<compile_context>
chip_gen: v7x
topology: tpu7x:2x2x1
jax: 0.10.0
libtpu: 0.0.40
codegen_flags: <defaults>
</compile_context>

<pallas_src>
import functools

import jax
import jax.numpy as jnp
from jax import lax
from jax.experimental import pallas as pl
from jax.experimental.pallas import tpu as pltpu

EPS = 1e-5
LANES = 128                 # lane width == channel-padding target
MM_DTYPE = jnp.bfloat16     # MXU operand dtype (accumulation stays f32)


def _mod(a, n):
    """a % n for a traced int array and a static positive Python int n."""
    if n & (n - 1) == 0:
        return jnp.bitwise_and(a, n - 1)
    return a % n  # TODO(synk): relies on constant-divisor strength reduction


def _floordiv(a, n):
    """a // n for a traced int array and a static positive Python int n."""
    if n & (n - 1) == 0:
        return jnp.right_shift(a, n.bit_length() - 1)
    return a // n


def basic_block_kernel(N, H, W, C, CP,
                       x_ref, w1_ref, w2_ref,
                       g1_ref, b1_ref, g2_ref, b2_ref,
                       o_ref, pad2_ref):
    """Fused conv3x3 -> BN -> ReLU -> conv3x3 -> BN -> +residual -> ReLU.

    x_ref   : (M, CP)  f32  packed conv1 im2col; lane = tap*C + cin, CENTER
                            tap first (lanes 0..C-1 == x == the residual)
    w1_ref  : (CP, CP) bf16 packed conv1 weight (rows match x_ref lanes)
    w2_ref  : (9*CP, CP) bf16 conv2 weight, one CP-row block per tap
    g*/b*   : (1, CP)  f32  BN affine params, zero-padded past C
    o_ref   : (M, CP)  f32  lane-dense output slab
    pad2_ref: (M + 2*(W+1), CP) f32 scratch: conv2 input with (W+1)-row halo
    """
    M = N * H * W
    PAD = W + 1
    inv_m = 1.0 / M

    x_f32 = x_ref[...]

    # ---- conv1: ONE K=CP bf16 MXU matmul (9*C real lanes packed) -----------
    acc1 = jnp.dot(x_f32.astype(MM_DTYPE), w1_ref[...],
                   preferred_element_type=jnp.float32)

    # ---- bn1 (batch stats, biased variance) + relu --------------------------
    mean1 = jnp.sum(acc1, axis=0, keepdims=True) * inv_m
    msq1 = jnp.sum(acc1 * acc1, axis=0, keepdims=True) * inv_m
    var1 = jnp.maximum(msq1 - mean1 * mean1, 0.0)
    out1 = (acc1 - mean1) * lax.rsqrt(var1 + EPS) * g1_ref[...] + b1_ref[...]
    out1 = jnp.maximum(out1, 0.0)

    # ---- stage out1 in a halo scratch (zero ONLY the halo rows) -------------
    zero_halo = jnp.zeros((PAD, CP), jnp.float32)
    pad2_ref[pl.ds(0, PAD), :] = zero_halo
    pad2_ref[pl.ds(PAD + M, PAD), :] = zero_halo
    pad2_ref[pl.ds(PAD, M), :] = out1

    # ---- in-kernel boundary masks (no (M,9) input; center tap unmasked) -----
    midx = lax.broadcasted_iota(jnp.int32, (M, 1), 0)
    xpos = _mod(midx, W)
    ypos = _mod(_floordiv(midx, W), H)
    y_ok = {-1: ypos >= 1, 0: None, 1: ypos <= H - 2}
    x_ok = {-1: xpos >= 1, 0: None, 1: xpos <= W - 2}

    # ---- conv2: 9-step per-tap bf16 accumulation into a f32 accumulator -----
    acc2 = jnp.zeros((M, CP), jnp.float32)
    t = 0
    for dy in (-1, 0, 1):
        for dx in (-1, 0, 1):
            blk = pad2_ref[pl.ds(PAD + dy * W + dx, M), :]
            conds = [c for c in (y_ok[dy], x_ok[dx]) if c is not None]
            if conds:
                valid = conds[0] if len(conds) == 1 else jnp.logical_and(*conds)
                blk = jnp.where(valid, blk, 0.0)
            acc2 = acc2 + jnp.dot(blk.astype(MM_DTYPE),
                                  w2_ref[pl.ds(t * CP, CP), :],
                                  preferred_element_type=jnp.float32)
            t += 1

    # ---- bn2 -----------------------------------------------------------------
    mean2 = jnp.sum(acc2, axis=0, keepdims=True) * inv_m
    msq2 = jnp.sum(acc2 * acc2, axis=0, keepdims=True) * inv_m
    var2 = jnp.maximum(msq2 - mean2 * mean2, 0.0)
    out2 = (acc2 - mean2) * lax.rsqrt(var2 + EPS) * g2_ref[...] + b2_ref[...]

    # ---- residual (f32 center-tap lanes of the packed im2col) + relu --------
    lane = lax.broadcasted_iota(jnp.int32, (1, CP), 1)
    residual = jnp.where(lane < C, x_f32, 0.0)
    o_ref[...] = jnp.maximum(out2 + residual, 0.0)


def basic_block_forward(x_nchw, params):
    """Pallas-backed BasicBlock forward. Input/output are NCHW like PyTorch."""
    w1, w2, g1, b1, g2, b2 = params      # w*: (3,3,Cin,Cout) HWIO, g/b: (C,)
    N, C, H, W = x_nchw.shape
    assert w1.shape[2] == C and w1.shape[3] == C, \
        "this BasicBlock instance assumes inplanes == planes, stride=1"
    CP = LANES
    assert 9 * C <= CP, "packed-K conv1 layout requires 9*C <= 128"
    M = N * H * W
    PAD = W + 1

    # Tap order for packed conv1: CENTER FIRST so lanes 0..C-1 of the packed
    # im2col are exactly x (reused as the residual inside the kernel).
    taps1 = [(0, 0)] + [(dy, dx) for dy in (-1, 0, 1) for dx in (-1, 0, 1)
                        if (dy, dx) != (0, 0)]

    # ---- packed conv1 im2col: (M, 9*C) real lanes, zero-padded to CP --------
    xn = jnp.transpose(x_nchw, (0, 2, 3, 1)).astype(jnp.float32)   # NHWC
    xp = jnp.pad(xn, ((0, 0), (1, 1), (1, 1), (0, 0)))
    cols = [xp[:, 1 + dy:1 + dy + H, 1 + dx:1 + dx + W, :] for dy, dx in taps1]
    im2col = jnp.concatenate(cols, axis=-1).reshape(M, 9 * C)
    im2col = jnp.pad(im2col, ((0, 0), (0, CP - 9 * C)))            # (M, CP)

    # ---- conv1 weight packed to match the im2col lanes: (CP, CP) bf16 -------
    w1_rows = jnp.concatenate(
        [w1.astype(jnp.float32)[dy + 1, dx + 1] for dy, dx in taps1], axis=0)
    w1p = jnp.pad(w1_rows, ((0, CP - 9 * C), (0, CP - C))).astype(MM_DTYPE)

    # ---- conv2 weight: one CP-row block per tap (row-major taps), bf16 ------
    w2p = jnp.pad(w2.astype(jnp.float32),
                  ((0, 0), (0, 0), (0, CP - C), (0, CP - C)))
    w2p = w2p.reshape(9 * CP, CP).astype(MM_DTYPE)

    def prep_bn(v):
        return jnp.pad(v.astype(jnp.float32).reshape(1, -1),
                       ((0, 0), (0, CP - v.shape[-1])))

    g1p, b1p, g2p, b2p = (prep_bn(v) for v in (g1, b1, g2, b2))

    kernel = functools.partial(basic_block_kernel, N, H, W, C, CP)

    o2d = pl.pallas_call(
        kernel,
        out_shape=jax.ShapeDtypeStruct((M, CP), jnp.float32),
        in_specs=[pl.BlockSpec(memory_space=pltpu.MemorySpace.VMEM)] * 7,
        out_specs=pl.BlockSpec(memory_space=pltpu.MemorySpace.VMEM),
        scratch_shapes=[pltpu.VMEM((M + 2 * PAD, CP), jnp.float32)],
        compiler_params=pltpu.CompilerParams(
            vmem_limit_bytes=48 * 1024 * 1024),
    )(im2col, w1p, w2p, g1p, b1p, g2p, b2p)

    out_nhwc = o2d[:, :C].reshape(N, H, W, C)
    return jnp.transpose(out_nhwc, (0, 3, 1, 2))                   # NCHW


def reference_forward(x_nchw, params):
    """Pure-JAX f32 reference (same math) for the correctness check."""
    w1, w2, g1, b1, g2, b2 = params
    x = jnp.transpose(x_nchw, (0, 2, 3, 1)).astype(jnp.float32)
    dn = ('NHWC', 'HWIO', 'NHWC')

    def bn(y, g, b, relu):
        mean = jnp.mean(y, axis=(0, 1, 2), keepdims=True)
        var = jnp.mean((y - mean) ** 2, axis=(0, 1, 2), keepdims=True)
        y = (y - mean) * lax.rsqrt(var + EPS) * g.reshape(1, 1, 1, -1) \
            + b.reshape(1, 1, 1, -1)
        return jnp.maximum(y, 0.0) if relu else y

    y = lax.conv_general_dilated(x, w1.astype(jnp.float32), (1, 1), 'SAME',
                                 dimension_numbers=dn)
    y = bn(y, g1, b1, True)
    y = lax.conv_general_dilated(y, w2.astype(jnp.float32), (1, 1), 'SAME',
                                 dimension_numbers=dn)
    y = bn(y, g2, b2, False)
    y = jnp.maximum(y + x, 0.0)
    return jnp.transpose(y, (0, 3, 1, 2))


if __name__ == "__main__":
    # BasicBlock(inplanes=4, planes=4, stride=1, downsample=None)
    N, C, H, W = 2, 4, 16, 16
    inplanes = planes = C

    key = jax.random.PRNGKey(0)
    kx, kw1, kw2 = jax.random.split(key, 3)

    x = jax.random.normal(kx, (N, C, H, W), dtype=jnp.float32)

    # conv weights (HWIO, no bias); BN affine = PyTorch default init
    w1 = jax.random.normal(kw1, (3, 3, inplanes, planes), jnp.float32) * 0.1
    w2 = jax.random.normal(kw2, (3, 3, planes, planes), jnp.float32) * 0.1
    g1 = jnp.ones((planes,), jnp.float32)
    b1 = jnp.zeros((planes,), jnp.float32)
    g2 = jnp.ones((planes,), jnp.float32)
    b2 = jnp.zeros((planes,), jnp.float32)
    params = (w1, w2, g1, b1, g2, b2)

    out = jax.block_until_ready(basic_block_forward(x, params))
    ref = jax.block_until_ready(reference_forward(x, params))

    assert out.shape == (N, C, H, W)
    assert bool(jnp.all(jnp.isfinite(out)))
    # Tolerance sized for bf16 MXU operands (perf-review request); accumulation,
    # BN statistics and the residual add remain f32.  Set MM_DTYPE = jnp.float32
    # to recover the 2e-3-tight f32 path.
    err = float(jnp.max(jnp.abs(out - ref)))
    assert err < 2e-2, f"mismatch vs pure-JAX reference: {err}"

    print("KERNEL_OK")
</pallas_src>

<mosaic_0001>
module attributes {stable_mosaic.version = 11 : i64} {
  func.func @basic_block_kernel(%arg0: memref<512x128xf32, #tpu.memory_space<vmem>>, %arg1: memref<128x128xbf16, #tpu.memory_space<vmem>>, %arg2: memref<1152x128xbf16, #tpu.memory_space<vmem>>, %arg3: memref<1x128xf32, #tpu.memory_space<vmem>>, %arg4: memref<1x128xf32, #tpu.memory_space<vmem>>, %arg5: memref<1x128xf32, #tpu.memory_space<vmem>>, %arg6: memref<1x128xf32, #tpu.memory_space<vmem>>, %arg7: memref<512x128xf32, #tpu.memory_space<vmem>>, %arg8: memref<546x128xf32, #tpu.memory_space<vmem>>) attributes {dimension_semantics = [], scalar_prefetch = 0 : i64, scratch_operands = 1 : i64, tpu.core_type = #tpu.core_type<tc>} {
    %c0 = arith.constant 0 : index
    %c0_0 = arith.constant 0 : index
    %0 = vector.load %arg0[%c0, %c0_0] : memref<512x128xf32, #tpu.memory_space<vmem>>, vector<512x128xf32>
    %1 = arith.truncf %0 : vector<512x128xf32> to vector<512x128xbf16>
    %c0_1 = arith.constant 0 : index
    %c0_2 = arith.constant 0 : index
    %2 = vector.load %arg1[%c0_1, %c0_2] : memref<128x128xbf16, #tpu.memory_space<vmem>>, vector<128x128xbf16>
    %cst = arith.constant dense<0.000000e+00> : vector<512x128xf32>
    %3 = tpu.matmul %1, %2, %cst {dimension_numbers = #tpu.dot_dimension_numbers<[1], [0], [0], [1], [0, 0, 1, 1], [], []>} : vector<512x128xbf16>, vector<128x128xbf16>, vector<512x128xf32> -> vector<512x128xf32>
    %cst_3 = arith.constant dense<0.000000e+00> : vector<128xf32>
    %4 = vector.multi_reduction <add>, %3, %cst_3 [0] : vector<512x128xf32> to vector<128xf32>
    %5 = vector.shape_cast %4 : vector<128xf32> to vector<1x128xf32>
    %cst_4 = arith.constant 0.001953125 : f32
    %6 = vector.broadcast %cst_4 : f32 to vector<1x128xf32>
    %7 = arith.mulf %5, %6 : vector<1x128xf32>
    %8 = arith.mulf %3, %3 : vector<512x128xf32>
    %cst_5 = arith.constant dense<0.000000e+00> : vector<128xf32>
    %9 = vector.multi_reduction <add>, %8, %cst_5 [0] : vector<512x128xf32> to vector<128xf32>
    %10 = vector.shape_cast %9 : vector<128xf32> to vector<1x128xf32>
    %cst_6 = arith.constant 0.001953125 : f32
    %11 = vector.broadcast %cst_6 : f32 to vector<1x128xf32>
    %12 = arith.mulf %10, %11 : vector<1x128xf32>
    %13 = arith.mulf %7, %7 : vector<1x128xf32>
    %14 = arith.subf %12, %13 : vector<1x128xf32>
    %cst_7 = arith.constant 0.000000e+00 : f32
    %15 = vector.broadcast %cst_7 : f32 to vector<1x128xf32>
    %16 = arith.maximumf %14, %15 : vector<1x128xf32>
    %17 = vector.broadcast %7 : vector<1x128xf32> to vector<512x128xf32>
    %18 = arith.subf %3, %17 : vector<512x128xf32>
    %cst_8 = arith.constant 9.99999974E-6 : f32
    %19 = vector.broadcast %cst_8 : f32 to vector<1x128xf32>
    %20 = arith.addf %16, %19 : vector<1x128xf32>
    %21 = math.rsqrt %20 : vector<1x128xf32>
    %22 = vector.broadcast %21 : vector<1x128xf32> to vector<512x128xf32>
    %23 = arith.mulf %18, %22 : vector<512x128xf32>
    %c0_9 = arith.constant 0 : index
    %c0_10 = arith.constant 0 : index
    %24 = vector.load %arg3[%c0_9, %c0_10] : memref<1x128xf32, #tpu.memory_space<vmem>>, vector<1x128xf32>
    %25 = vector.broadcast %24 : vector<1x128xf32> to vector<512x128xf32>
    %26 = arith.mulf %23, %25 : vector<512x128xf32>
    %c0_11 = arith.constant 0 : index
    %c0_12 = arith.constant 0 : index
    %27 = vector.load %arg4[%c0_11, %c0_12] : memref<1x128xf32, #tpu.memory_space<vmem>>, vector<1x128xf32>
    %28 = vector.broadcast %27 : vector<1x128xf32> to vector<512x128xf32>
    %29 = arith.addf %26, %28 : vector<512x128xf32>
    %cst_13 = arith.constant 0.000000e+00 : f32
    %30 = vector.broadcast %cst_13 : f32 to vector<512x128xf32>
    %31 = arith.maximumf %29, %30 : vector<512x128xf32>
    %cst_14 = arith.constant 0.000000e+00 : f32
    %32 = vector.broadcast %cst_14 : f32 to vector<17x128xf32>
    %c0_15 = arith.constant 0 : index
    %c0_16 = arith.constant 0 : index
    %33 = vector.load %arg8[%c0_15, %c0_16] : memref<546x128xf32, #tpu.memory_space<vmem>>, vector<17x128xf32>
    tpu.vector_store %arg8[%c0_15, %c0_16], %32 {strides = array<i32>} : memref<546x128xf32, #tpu.memory_space<vmem>>, vector<17x128xf32>,
    %c529 = arith.constant 529 : index
    %c0_17 = arith.constant 0 : index
    %34 = vector.load %arg8[%c529, %c0_17] : memref<546x128xf32, #tpu.memory_space<vmem>>, vector<17x128xf32>
    tpu.vector_store %arg8[%c529, %c0_17], %32 {strides = array<i32>} : memref<546x128xf32, #tpu.memory_space<vmem>>, vector<17x128xf32>,
    %c17 = arith.constant 17 : index
    %c0_18 = arith.constant 0 : index
    %35 = vector.load %arg8[%c17, %c0_18] : memref<546x128xf32, #tpu.memory_space<vmem>>, vector<512x128xf32>
    tpu.vector_store %arg8[%c17, %c0_18], %31 {strides = array<i32>} : memref<546x128xf32, #tpu.memory_space<vmem>>, vector<512x128xf32>,
    %36 = tpu.iota {dimensions = array<i32: 0>} : vector<512x1xi32>
    %c15_i32 = arith.constant 15 : i32
    %37 = vector.broadcast %c15_i32 : i32 to vector<512x1xi32>
    %38 = arith.andi %36, %37 : vector<512x1xi32>
    %c4_i32 = arith.constant 4 : i32
    %39 = vector.broadcast %c4_i32 : i32 to vector<512x1xi32>
    %40 = arith.shrsi %36, %39 : vector<512x1xi32>
    %c15_i32_19 = arith.constant 15 : i32
    %41 = vector.broadcast %c15_i32_19 : i32 to vector<512x1xi32>
    %42 = arith.andi %40, %41 : vector<512x1xi32>
    %c1_i32 = arith.constant 1 : i32
    %43 = vector.broadcast %c1_i32 : i32 to vector<512x1xi32>
    %44 = arith.cmpi sge, %42, %43 : vector<512x1xi32>
    %c14_i32 = arith.constant 14 : i32
    %45 = vector.broadcast %c14_i32 : i32 to vector<512x1xi32>
    %46 = arith.cmpi sle, %42, %45 : vector<512x1xi32>
    %c1_i32_20 = arith.constant 1 : i32
    %47 = vector.broadcast %c1_i32_20 : i32 to vector<512x1xi32>
    %48 = arith.cmpi sge, %38, %47 : vector<512x1xi32>
    %c14_i32_21 = arith.constant 14 : i32
    %49 = vector.broadcast %c14_i32_21 : i32 to vector<512x1xi32>
    %50 = arith.cmpi sle, %38, %49 : vector<512x1xi32>
    %cst_22 = arith.constant 0.000000e+00 : f32
    %51 = vector.broadcast %cst_22 : f32 to vector<512x128xf32>
    %c0_23 = arith.constant 0 : index
    %c0_24 = arith.constant 0 : index
    %52 = vector.load %arg8[%c0_23, %c0_24] : memref<546x128xf32, #tpu.memory_space<vmem>>, vector<512x128xf32>
    %53 = arith.andi %44, %48 : vector<512x1xi1>
    %cst_25 = arith.constant 0.000000e+00 : f32
    %54 = vector.shape_cast %53 : vector<512x1xi1> to vector<512x1xi1>
    %55 = vector.broadcast %54 : vector<512x1xi1> to vector<512x128xi1>
    %56 = vector.broadcast %cst_25 : f32 to vector<512x128xf32>
    %57 = arith.select %55, %52, %56 : vector<512x128xi1>, vector<512x128xf32>
    %58 = arith.truncf %57 : vector<512x128xf32> to vector<512x128xbf16>
    %c0_26 = arith.constant 0 : index
    %c0_27 = arith.constant 0 : index
    %59 = vector.load %arg2[%c0_26, %c0_27] : memref<1152x128xbf16, #tpu.memory_space<vmem>>, vector<128x128xbf16>
    %cst_28 = arith.constant dense<0.000000e+00> : vector<512x128xf32>
    %60 = tpu.matmul %58, %59, %cst_28 {dimension_numbers = #tpu.dot_dimension_numbers<[1], [0], [0], [1], [0, 0, 1, 1], [], []>} : vector<512x128xbf16>, vector<128x128xbf16>, vector<512x128xf32> -> vector<512x128xf32>
    %61 = arith.addf %51, %60 : vector<512x128xf32>
    %c1 = arith.constant 1 : index
    %c0_29 = arith.constant 0 : index
    %62 = vector.load %arg8[%c1, %c0_29] : memref<546x128xf32, #tpu.memory_space<vmem>>, vector<512x128xf32>
    %cst_30 = arith.constant 0.000000e+00 : f32
    %63 = vector.shape_cast %44 : vector<512x1xi1> to vector<512x1xi1>
    %64 = vector.broadcast %63 : vector<512x1xi1> to vector<512x128xi1>
    %65 = vector.broadcast %cst_30 : f32 to vector<512x128xf32>
    %66 = arith.select %64, %62, %65 : vector<512x128xi1>, vector<512x128xf32>
    %67 = arith.truncf %66 : vector<512x128xf32> to vector<512x128xbf16>
    %c128 = arith.constant 128 : index
    %c0_31 = arith.constant 0 : index
    %68 = vector.load %arg2[%c128, %c0_31] : memref<1152x128xbf16, #tpu.memory_space<vmem>>, vector<128x128xbf16>
    %cst_32 = arith.constant dense<0.000000e+00> : vector<512x128xf32>
    %69 = tpu.matmul %67, %68, %cst_32 {dimension_numbers = #tpu.dot_dimension_numbers<[1], [0], [0], [1], [0, 0, 1, 1], [], []>} : vector<512x128xbf16>, vector<128x128xbf16>, vector<512x128xf32> -> vector<512x128xf32>
    %70 = arith.addf %61, %69 : vector<512x128xf32>
    %c2 = arith.constant 2 : index
    %c0_33 = arith.constant 0 : index
    %71 = vector.load %arg8[%c2, %c0_33] : memref<546x128xf32, #tpu.memory_space<vmem>>, vector<512x128xf32>
    %72 = arith.andi %44, %50 : vector<512x1xi1>
    %cst_34 = arith.constant 0.000000e+00 : f32
    %73 = vector.shape_cast %72 : vector<512x1xi1> to vector<512x1xi1>
    %74 = vector.broadcast %73 : vector<512x1xi1> to vector<512x128xi1>
    %75 = vector.broadcast %cst_34 : f32 to vector<512x128xf32>
    %76 = arith.select %74, %71, %75 : vector<512x128xi1>, vector<512x128xf32>
    %77 = arith.truncf %76 : vector<512x128xf32> to vector<512x128xbf16>
    %c256 = arith.constant 256 : index
    %c0_35 = arith.constant 0 : index
    %78 = vector.load %arg2[%c256, %c0_35] : memref<1152x128xbf16, #tpu.memory_space<vmem>>, vector<128x128xbf16>
    %cst_36 = arith.constant dense<0.000000e+00> : vector<512x128xf32>
    %79 = tpu.matmul %77, %78, %cst_36 {dimension_numbers = #tpu.dot_dimension_numbers<[1], [0], [0], [1], [0, 0, 1, 1], [], []>} : vector<512x128xbf16>, vector<128x128xbf16>, vector<512x128xf32> -> vector<512x128xf32>
    %80 = arith.addf %70, %79 : vector<512x128xf32>
    %c16 = arith.constant 16 : index
    %c0_37 = arith.constant 0 : index
    %81 = vector.load %arg8[%c16, %c0_37] : memref<546x128xf32, #tpu.memory_space<vmem>>, vector<512x128xf32>
    %cst_38 = arith.constant 0.000000e+00 : f32
    %82 = vector.shape_cast %48 : vector<512x1xi1> to vector<512x1xi1>
    %83 = vector.broadcast %82 : vector<512x1xi1> to vector<512x128xi1>
    %84 = vector.broadcast %cst_38 : f32 to vector<512x128xf32>
    %85 = arith.select %83, %81, %84 : vector<512x128xi1>, vector<512x128xf32>
    %86 = arith.truncf %85 : vector<512x128xf32> to vector<512x128xbf16>
    %c384 = arith.constant 384 : index
    %c0_39 = arith.constant 0 : index
    %87 = vector.load %arg2[%c384, %c0_39] : memref<1152x128xbf16, #tpu.memory_space<vmem>>, vector<128x128xbf16>
    %cst_40 = arith.constant dense<0.000000e+00> : vector<512x128xf32>
    %88 = tpu.matmul %86, %87, %cst_40 {dimension_numbers = #tpu.dot_dimension_numbers<[1], [0], [0], [1], [0, 0, 1, 1], [], []>} : vector<512x128xbf16>, vector<128x128xbf16>, vector<512x128xf32> -> vector<512x128xf32>
    %89 = arith.addf %80, %88 : vector<512x128xf32>
    %c17_41 = arith.constant 17 : index
    %c0_42 = arith.constant 0 : index
    %90 = vector.load %arg8[%c17_41, %c0_42] : memref<546x128xf32, #tpu.memory_space<vmem>>, vector<512x128xf32>
    %91 = arith.truncf %90 : vector<512x128xf32> to vector<512x128xbf16>
    %c512 = arith.constant 512 : index
    %c0_43 = arith.constant 0 : index
    %92 = vector.load %arg2[%c512, %c0_43] : memref<1152x128xbf16, #tpu.memory_space<vmem>>, vector<128x128xbf16>
    %cst_44 = arith.constant dense<0.000000e+00> : vector<512x128xf32>
    %93 = tpu.matmul %91, %92, %cst_44 {dimension_numbers = #tpu.dot_dimension_numbers<[1], [0], [0], [1], [0, 0, 1, 1], [], []>} : vector<512x128xbf16>, vector<128x128xbf16>, vector<512x128xf32> -> vector<512x128xf32>
    %94 = arith.addf %89, %93 : vector<512x128xf32>
    %c18 = arith.constant 18 : index
    %c0_45 = arith.constant 0 : index
    %95 = vector.load %arg8[%c18, %c0_45] : memref<546x128xf32, #tpu.memory_space<vmem>>, vector<512x128xf32>
    %cst_46 = arith.constant 0.000000e+00 : f32
    %96 = vector.shape_cast %50 : vector<512x1xi1> to vector<512x1xi1>
    %97 = vector.broadcast %96 : vector<512x1xi1> to vector<512x128xi1>
    %98 = vector.broadcast %cst_46 : f32 to vector<512x128xf32>
    %99 = arith.select %97, %95, %98 : vector<512x128xi1>, vector<512x128xf32>
    %100 = arith.truncf %99 : vector<512x128xf32> to vector<512x128xbf16>
    %c640 = arith.constant 640 : index
    %c0_47 = arith.constant 0 : index
    %101 = vector.load %arg2[%c640, %c0_47] : memref<1152x128xbf16, #tpu.memory_space<vmem>>, vector<128x128xbf16>
    %cst_48 = arith.constant dense<0.000000e+00> : vector<512x128xf32>
    %102 = tpu.matmul %100, %101, %cst_48 {dimension_numbers = #tpu.dot_dimension_numbers<[1], [0], [0], [1], [0, 0, 1, 1], [], []>} : vector<512x128xbf16>, vector<128x128xbf16>, vector<512x128xf32> -> vector<512x128xf32>
    %103 = arith.addf %94, %102 : vector<512x128xf32>
    %c32 = arith.constant 32 : index
    %c0_49 = arith.constant 0 : index
    %104 = vector.load %arg8[%c32, %c0_49] : memref<546x128xf32, #tpu.memory_space<vmem>>, vector<512x128xf32>
    %105 = arith.andi %46, %48 : vector<512x1xi1>
    %cst_50 = arith.constant 0.000000e+00 : f32
    %106 = vector.shape_cast %105 : vector<512x1xi1> to vector<512x1xi1>
    %107 = vector.broadcast %106 : vector<512x1xi1> to vector<512x128xi1>
    %108 = vector.broadcast %cst_50 : f32 to vector<512x128xf32>
    %109 = arith.select %107, %104, %108 : vector<512x128xi1>, vector<512x128xf32>
    %110 = arith.truncf %109 : vector<512x128xf32> to vector<512x128xbf16>
    %c768 = arith.constant 768 : index
    %c0_51 = arith.constant 0 : index
    %111 = vector.load %arg2[%c768, %c0_51] : memref<1152x128xbf16, #tpu.memory_space<vmem>>, vector<128x128xbf16>
    %cst_52 = arith.constant dense<0.000000e+00> : vector<512x128xf32>
    %112 = tpu.matmul %110, %111, %cst_52 {dimension_numbers = #tpu.dot_dimension_numbers<[1], [0], [0], [1], [0, 0, 1, 1], [], []>} : vector<512x128xbf16>, vector<128x128xbf16>, vector<512x128xf32> -> vector<512x128xf32>
    %113 = arith.addf %103, %112 : vector<512x128xf32>
    %c33 = arith.constant 33 : index
    %c0_53 = arith.constant 0 : index
    %114 = vector.load %arg8[%c33, %c0_53] : memref<546x128xf32, #tpu.memory_space<vmem>>, vector<512x128xf32>
    %cst_54 = arith.constant 0.000000e+00 : f32
    %115 = vector.shape_cast %46 : vector<512x1xi1> to vector<512x1xi1>
    %116 = vector.broadcast %115 : vector<512x1xi1> to vector<512x128xi1>
    %117 = vector.broadcast %cst_54 : f32 to vector<512x128xf32>
    %118 = arith.select %116, %114, %117 : vector<512x128xi1>, vector<512x128xf32>
    %119 = arith.truncf %118 : vector<512x128xf32> to vector<512x128xbf16>
    %c896 = arith.constant 896 : index
    %c0_55 = arith.constant 0 : index
    %120 = vector.load %arg2[%c896, %c0_55] : memref<1152x128xbf16, #tpu.memory_space<vmem>>, vector<128x128xbf16>
    %cst_56 = arith.constant dense<0.000000e+00> : vector<512x128xf32>
    %121 = tpu.matmul %119, %120, %cst_56 {dimension_numbers = #tpu.dot_dimension_numbers<[1], [0], [0], [1], [0, 0, 1, 1], [], []>} : vector<512x128xbf16>, vector<128x128xbf16>, vector<512x128xf32> -> vector<512x128xf32>
    %122 = arith.addf %113, %121 : vector<512x128xf32>
    %c34 = arith.constant 34 : index
    %c0_57 = arith.constant 0 : index
    %123 = vector.load %arg8[%c34, %c0_57] : memref<546x128xf32, #tpu.memory_space<vmem>>, vector<512x128xf32>
    %124 = arith.andi %46, %50 : vector<512x1xi1>
    %cst_58 = arith.constant 0.000000e+00 : f32
    %125 = vector.shape_cast %124 : vector<512x1xi1> to vector<512x1xi1>
    %126 = vector.broadcast %125 : vector<512x1xi1> to vector<512x128xi1>
    %127 = vector.broadcast %cst_58 : f32 to vector<512x128xf32>
    %128 = arith.select %126, %123, %127 : vector<512x128xi1>, vector<512x128xf32>
    %129 = arith.truncf %128 : vector<512x128xf32> to vector<512x128xbf16>
    %c1024 = arith.constant 1024 : index
    %c0_59 = arith.constant 0 : index
    %130 = vector.load %arg2[%c1024, %c0_59] : memref<1152x128xbf16, #tpu.memory_space<vmem>>, vector<128x128xbf16>
    %cst_60 = arith.constant dense<0.000000e+00> : vector<512x128xf32>
    %131 = tpu.matmul %129, %130, %cst_60 {dimension_numbers = #tpu.dot_dimension_numbers<[1], [0], [0], [1], [0, 0, 1, 1], [], []>} : vector<512x128xbf16>, vector<128x128xbf16>, vector<512x128xf32> -> vector<512x128xf32>
    %132 = arith.addf %122, %131 : vector<512x128xf32>
    %cst_61 = arith.constant dense<0.000000e+00> : vector<128xf32>
    %133 = vector.multi_reduction <add>, %132, %cst_61 [0] : vector<512x128xf32> to vector<128xf32>
    %134 = vector.shape_cast %133 : vector<128xf32> to vector<1x128xf32>
    %cst_62 = arith.constant 0.001953125 : f32
    %135 = vector.broadcast %cst_62 : f32 to vector<1x128xf32>
    %136 = arith.mulf %134, %135 : vector<1x128xf32>
    %137 = arith.mulf %132, %132 : vector<512x128xf32>
    %cst_63 = arith.constant dense<0.000000e+00> : vector<128xf32>
    %138 = vector.multi_reduction <add>, %137, %cst_63 [0] : vector<512x128xf32> to vector<128xf32>
    %139 = vector.shape_cast %138 : vector<128xf32> to vector<1x128xf32>
    %cst_64 = arith.constant 0.001953125 : f32
    %140 = vector.broadcast %cst_64 : f32 to vector<1x128xf32>
    %141 = arith.mulf %139, %140 : vector<1x128xf32>
    %142 = arith.mulf %136, %136 : vector<1x128xf32>
    %143 = arith.subf %141, %142 : vector<1x128xf32>
    %cst_65 = arith.constant 0.000000e+00 : f32
    %144 = vector.broadcast %cst_65 : f32 to vector<1x128xf32>
    %145 = arith.maximumf %143, %144 : vector<1x128xf32>
    %146 = vector.broadcast %136 : vector<1x128xf32> to vector<512x128xf32>
    %147 = arith.subf %132, %146 : vector<512x128xf32>
    %cst_66 = arith.constant 9.99999974E-6 : f32
    %148 = vector.broadcast %cst_66 : f32 to vector<1x128xf32>
    %149 = arith.addf %145, %148 : vector<1x128xf32>
    %150 = math.rsqrt %149 : vector<1x128xf32>
    %151 = vector.broadcast %150 : vector<1x128xf32> to vector<512x128xf32>
    %152 = arith.mulf %147, %151 : vector<512x128xf32>
    %c0_67 = arith.constant 0 : index
    %c0_68 = arith.constant 0 : index
    %153 = vector.load %arg5[%c0_67, %c0_68] : memref<1x128xf32, #tpu.memory_space<vmem>>, vector<1x128xf32>
    %154 = vector.broadcast %153 : vector<1x128xf32> to vector<512x128xf32>
    %155 = arith.mulf %152, %154 : vector<512x128xf32>
    %c0_69 = arith.constant 0 : index
    %c0_70 = arith.constant 0 : index
    %156 = vector.load %arg6[%c0_69, %c0_70] : memref<1x128xf32, #tpu.memory_space<vmem>>, vector<1x128xf32>
    %157 = vector.broadcast %156 : vector<1x128xf32> to vector<512x128xf32>
    %158 = arith.addf %155, %157 : vector<512x128xf32>
    %159 = tpu.iota {dimensions = array<i32: 1>} : vector<1x128xi32>
    %c4_i32_71 = arith.constant 4 : i32
    %160 = vector.broadcast %c4_i32_71 : i32 to vector<1x128xi32>
    %161 = arith.cmpi slt, %159, %160 : vector<1x128xi32>
    %cst_72 = arith.constant 0.000000e+00 : f32
    %162 = vector.shape_cast %161 : vector<1x128xi1> to vector<1x128xi1>
    %163 = vector.broadcast %162 : vector<1x128xi1> to vector<512x128xi1>
    %164 = vector.broadcast %cst_72 : f32 to vector<512x128xf32>
    %165 = arith.select %163, %0, %164 : vector<512x128xi1>, vector<512x128xf32>
    %166 = arith.addf %158, %165 : vector<512x128xf32>
    %cst_73 = arith.constant 0.000000e+00 : f32
    %167 = vector.broadcast %cst_73 : f32 to vector<512x128xf32>
    %168 = arith.maximumf %166, %167 : vector<512x128xf32>
    %c0_74 = arith.constant 0 : index
    %c0_75 = arith.constant 0 : index
    %169 = vector.load %arg7[%c0_74, %c0_75] : memref<512x128xf32, #tpu.memory_space<vmem>>, vector<512x128xf32>
    tpu.vector_store %arg7[%c0_74, %c0_75], %168 {strides = array<i32>} : memref<512x128xf32, #tpu.memory_space<vmem>>, vector<512x128xf32>,
    return
  }
}

</mosaic_0001>

<bundles_post_ra>
// kernel: tpu_custom_call.1
= control target key start
LH: loop header
LB: loop body
LE: loop exit
PB: predicated region body
PF: predicated region fallthrough
CT: control target
= control target key end

     0   :  { %12 = vsyncpa [#allocation4], 0  ;;  %s18047_s0 = inlined_call_operand.hbm [shape: f32[512,128], index: 0, kind: input, shape index: {}]   ;;  %s18048_s1 = inlined_call_operand.hbm [shape: bf16[128,128], index: 1, kind: input, shape index: {}]   ;;  %s18049_s2 = inlined_call_operand.hbm [shape: bf16[1152,128], index: 2, kind: input, shape index: {}]   ;;  %s18050_s3 = inlined_call_operand.vmem [shape: f32[1,128], index: 3, kind: input, shape index: {}]   ;;  %s18051_s4 = inlined_call_operand.vmem [shape: f32[1,128], index: 4, kind: input, shape index: {}]   ;;  %s18052_s5 = inlined_call_operand.vmem [shape: f32[1,128], index: 5, kind: input, shape index: {}]   ;;  %s18053_s6 = inlined_call_operand.vmem [shape: f32[1,128], index: 6, kind: input, shape index: {}]   ;;  %s18054_s7 = inlined_call_operand.hbm [shape: f32[512,128], index: 7, kind: output, shape index: {}]  }
   0x1   :  { %13 = vsyncpa [#allocation7], 0 }
   0x2   :  { %14 = vsyncpa [#allocation5], 0  ;;  %s11470_s24 = smov [#allocation6]   ;;  %s11376_s28 = scalar_lea.hbm %s18048_s1, 1024 }
   0x3   :  { %s32_s25 = sshll.u32 %s11470_s24, 4  ;;  %p11377_p0 = scmp.ne.s32.totalorder %s18048_s1, %s11376_s28  ;;  %s33_s25 = int_to_ptr.vmem [resolvable:$true] %s32_s25 }
   0x4   :  { %p11380_p1 = scmp.lt.u32.totalorder %s11376_s28, %s18048_s1 }
   0x6   :  { %p11382_p2 = pnand %p11380_p1, %p11377_p0 }
   0x8   :  { %11385 = shalt.err (!%p11382_p2)
}
   0x9   :  { %s11386_s10 = scalar_lea.vmem %s33_s25, 1024  ;;  %p11391_p4 = scmp.lt.s32.totalorder %s33_s25, %s33_s25 }
   0xa   :  { %p11387_p3 = scmp.ne.s32.totalorder %s33_s25, %s11386_s10  ;;  %p11392_p5 = scmp.lt.s32.totalorder %s11386_s10, %s11386_s10 }
   0xc   :  { %p11393_p6 = por %p11392_p5, %p11391_p4 }
   0xe   :  { %p11394_p7 = pnand %p11393_p6, %p11387_p3 }
  0x10   :  { %11397 = shalt.err (!%p11394_p7)
}
  0x11   :  { %s11471_s11 = smov 64   ;;  %s11472_s12 = smov 4  }
  0x12   :  { %38 = dma.hbm_to_vmem [thread:$0]  %s18048_s1, 1024, %s33_s25, [#allocation7], %s11471_s11, %s11471_s11, %s11472_s12  }
  0x13   :  { %s11473_s15 = smov [#allocation3]   ;;  %s11398_s19 = scalar_lea.hbm %s18047_s0, 8192 }
  0x14   :  { %s20_s16 = sshll.u32 %s11473_s15, 4  ;;  %p11399_p8 = scmp.ne.s32.totalorder %s18047_s0, %s11398_s19  ;;  %s21_s16 = int_to_ptr.vmem [resolvable:$true] %s20_s16 }
  0x15   :  { %p11402_p9 = scmp.lt.u32.totalorder %s11398_s19, %s18047_s0 }
  0x17   :  { %p11404_p10 = pnand %p11402_p9, %p11399_p8 }
  0x19   :  { %11407 = shalt.err (!%p11404_p10)
}
  0x1a   :  { %s11408_s24 = scalar_lea.vmem %s21_s16, 8192  ;;  %p11413_p12 = scmp.lt.s32.totalorder %s21_s16, %s21_s16 }
  0x1b   :  { %p11409_p11 = scmp.ne.s32.totalorder %s21_s16, %s11408_s24  ;;  %p11414_p13 = scmp.lt.s32.totalorder %s11408_s24, %s11408_s24 }
  0x1d   :  { %p11415_p0 = por %p11414_p13, %p11413_p12 }
  0x1f   :  { %p11416_p1 = pnand %p11415_p0, %p11409_p11 }
  0x21   :  { %11419 = shalt.err (!%p11416_p1)
}
  0x22   :  { %s11474_s1 = smov 128   ;;  %s11475_s25 = smov 8  }
  0x23   :  { %26 = dma.hbm_to_vmem [thread:$0]  %s18047_s0, 8192, %s21_s16, [#allocation4], %s11474_s1, %s11474_s1, %s11475_s25  }
  0x24   :  { %s11476_s28 = smov [#allocation8]   ;;  %s11420_s9 = scalar_lea.hbm %s18049_s2, 9216 }
  0x25   :  { %s44_s29 = sshll.u32 %s11476_s28, 4  ;;  %p11421_p2 = scmp.ne.s32.totalorder %s18049_s2, %s11420_s9  ;;  %s45_s29 = int_to_ptr.vmem [resolvable:$true] %s44_s29 }
  0x26   :  { %p11424_p3 = scmp.lt.u32.totalorder %s11420_s9, %s18049_s2 }
  0x28   :  { %p11426_p4 = pnand %p11424_p3, %p11421_p2 }
  0x2a   :  { %11429 = shalt.err (!%p11426_p4)
}
  0x2b   :  { %s11430_s17 = scalar_lea.vmem %s45_s29, 9216  ;;  %p11435_p6 = scmp.lt.s32.totalorder %s45_s29, %s45_s29 }
  0x2c   :  { %p11431_p5 = scmp.ne.s32.totalorder %s45_s29, %s11430_s17  ;;  %p11436_p7 = scmp.lt.s32.totalorder %s11430_s17, %s11430_s17 }
  0x2e   :  { %p11437_p8 = por %p11436_p7, %p11435_p6 }
  0x30   :  { %p11438_p9 = pnand %p11437_p8, %p11431_p5 }
  0x32   :  { %11441 = shalt.err (!%p11438_p9)
}
  0x33   :  { %50 = dma.hbm_to_vmem [thread:$0]  %s18049_s2, 9216, %s45_s29, [#allocation7], %s11471_s11, %s11471_s11, %s11472_s12  }
  0x34   :  { %11464 = dma.done.wait [#allocation4], 8192  }
  0x35   :  { %11465 = vsyncadd [#allocation4], 4294959104 }
  0x36   :  { %11466 = dma.done.wait [#allocation7], 10240  }
  0x37   :  { %11467 = vsyncadd [#allocation7], 4294957056  ;;  %v11257_v0 = vld [vmem:[#allocation6] sm:$0xff]   ;;  %v11258_v1 = vld [vmem:[#allocation6 + $0x8] sm:$0xff]   ;;  %v18055_v7 = vlaneseq }
  0x38   :  { %9935 = vmatprep.subr.bf16.mxu0 %v11257_v0  ;;  %v11259_v2 = vld [vmem:[#allocation6 + $0x10] sm:$0xff]   ;;  %v11260_v3 = vld [vmem:[#allocation6 + $0x18] sm:$0xff]   ;;  %v69_v4 = vld [vmem:[#allocation3] sm:$0xff] }
  0x39   :  { %9936 = vmatpush3.bf16.msra.mxu0 %v11257_v0  ;;  %v70_v5 = vld [vmem:[#allocation3 + $0x8] sm:$0xff]  ;;  %v11261_v8 = vld [vmem:[#allocation6 + $0x20] sm:$0xff]   ;;  %v11566_v9 = vand.u32 127, %v18055_v7  ;;  %v11263_v11 = vld [vmem:[#allocation6 + $0x30] sm:$0xff]  }
  0x3a   :  { %9937 = vmatprep.subr.bf16.mxu0 %v11258_v1  ;;  %v133_v6 = vpack.c.bf16 %v70_v5, %v69_v4  ;;  %v11262_v10 = vld [vmem:[#allocation6 + $0x28] sm:$0xff]   ;;  %v11569_v12 = vld [vmem:[#allocation3 + $0xf8] sm:$0xff]  ;;  %v11571_v13 = vld [vmem:[#allocation3 + $0x100] sm:$0xff] }
  0x3b   :  { %18699 = vst [vmem:[#allocation13_spill] sm:$0xff] %v11566_v9  ;;  %vm18151_vm0 = vcmp.lt.s32.totalorder %v11566_v9, 4  ;;  %v11573_v14 = vld [vmem:[#allocation3 + $0x108] sm:$0xff]  ;;  %v11580_v16 = vld [vmem:[#allocation3 + $0x110] sm:$0xff]  ;;  %v11582_v17 = vld [vmem:[#allocation3 + $0x118] sm:$0xff] }
  0x3c   :  { %9951 = vmatprep.mubr.bf16.mxu0 %v133_v6  ;;  %v11578_v15 = vsel %vm18151_vm0, %v11569_v12, 0.0  ;;  %v11584_v18 = vld [vmem:[#allocation3 + $0x120] sm:$0xff]  ;;  %v11589_v19 = vsel %vm18151_vm0, %v11571_v13, 0.0  ;;  %v11594_v20 = vsel %vm18151_vm0, %v11573_v14, 0.0  ;;  %v11596_v21 = vld [vmem:[#allocation3 + $0x128] sm:$0xff]  ;;  %v11598_v22 = vld [vmem:[#allocation3 + $0x130] sm:$0xff] }
  0x3d   :  { %9938 = vmatpush3.bf16.msra.mxu0 %v11258_v1  ;;  %18700 = vst [vmem:[#allocation14_spill] sm:$0xff] %v11578_v15  ;;  %18701 = vst [vmem:[#allocation15_spill] sm:$0xff] %v11589_v19  ;;  %v11600_v23 = vld [vmem:[#allocation3 + $0x138] sm:$0xff]  ;;  %v11605_v25 = vsel %vm18151_vm0, %v11580_v16, 0.0  ;;  %v11610_v26 = vsel %vm18151_vm0, %v11582_v17, 0.0  ;;  %v11615_v27 = vsel %vm18151_vm0, %v11584_v18, 0.0 }
  0x3e   :  { %9939 = vmatprep.subr.bf16.mxu0 %v11259_v2  ;;  %18702 = vst [vmem:[#allocation16_spill] sm:$0xff] %v11594_v20  ;;  %v11264_v24 = vld [vmem:[#allocation6 + $0x38] sm:$0xff]   ;;  %18703 = vst [vmem:[#allocation17_spill] sm:$0xff] %v11605_v25  ;;  %v11617_v28 = vld [vmem:[#allocation3 + $0x140] sm:$0xff]  ;;  %v11626_v31 = vsel %vm18151_vm0, %v11596_v21, 0.0  ;;  %v11631_v32 = vsel %vm18151_vm0, %v11598_v22, 0.0 }
  0x3f   :  { %18704 = vst [vmem:[#allocation18_spill] sm:$0xff] %v11610_v26  ;;  %18705 = vst [vmem:[#allocation19_spill] sm:$0xff] %v11615_v27  ;;  %v11619_v29 = vld [vmem:[#allocation3 + $0x148] sm:$0xff]  ;;  %v11621_v30 = vld [vmem:[#allocation3 + $0x150] sm:$0xff]  ;;  %v11636_v33 = vsel %vm18151_vm0, %v11600_v23, 0.0  ;;  %v11647_v37 = vsel %vm18151_vm0, %v11617_v28, 0.0 }
  0x40   :  { %18706 = vst [vmem:[#allocation20_spill] sm:$0xff] %v11626_v31  ;;  %18707 = vst [vmem:[#allocation21_spill] sm:$0xff] %v11631_v32  ;;  %v11638_v34 = vld [vmem:[#allocation3 + $0x158] sm:$0xff]  ;;  %v11640_v35 = vld [vmem:[#allocation3 + $0x160] sm:$0xff]  ;;  %v11652_v38 = vsel %vm18151_vm0, %v11619_v29, 0.0  ;;  %v11663_v44 = vsel %vm18151_vm0, %v11621_v30, 0.0 }
  0x41   :  { %9940 = vmatpush3.bf16.msra.mxu0 %v11259_v2  ;;  %18708 = vst [vmem:[#allocation22_spill] sm:$0xff] %v11636_v33  ;;  %v11642_v36 = vld [vmem:[#allocation3 + $0x168] sm:$0xff]  ;;  %18709 = vst [vmem:[#allocation23_spill] sm:$0xff] %v11647_v37  ;;  %v11654_v39 = vld [vmem:[#allocation3 + $0x170] sm:$0xff]  ;;  %v11668_v45 = vsel %vm18151_vm0, %v11638_v34, 0.0  ;;  %v11673_v46 = vsel %vm18151_vm0, %v11640_v35, 0.0 }
  0x42   :  { %9941 = vmatprep.subr.bf16.mxu0 %v11260_v3  ;;  %18710 = vst [vmem:[#allocation24_spill] sm:$0xff] %v11652_v38  ;;  %v11656_v40 = vld [vmem:[#allocation3 + $0x178] sm:$0xff]  ;;  %v11658_v41 = vld [vmem:[#allocation3 + $0x180] sm:$0xff]  ;;  %v71_v42 = vld [vmem:[#allocation3 + $0x10] sm:$0xff]  ;;  %v11684_v52 = vsel %vm18151_vm0, %v11642_v36, 0.0  ;;  %v11689_v53 = vsel %vm18151_vm0, %v11654_v39, 0.0 }
  0x43   :  { %v72_v43 = vld [vmem:[#allocation3 + $0x18] sm:$0xff]  ;;  %18711 = vst [vmem:[#allocation25_spill] sm:$0xff] %v11663_v44  ;;  %18712 = vst [vmem:[#allocation26_spill] sm:$0xff] %v11668_v45  ;;  %v11675_v47 = vld [vmem:[#allocation3 + $0x188] sm:$0xff]  ;;  %v11694_v54 = vsel %vm18151_vm0, %v11656_v40, 0.0  ;;  %v11705_v58 = vsel %vm18151_vm0, %v11658_v41, 0.0 }
  0x44   :  { %18713 = vst [vmem:[#allocation27_spill] sm:$0xff] %v11673_v46  ;;  %v11677_v48 = vld [vmem:[#allocation3 + $0x190] sm:$0xff]  ;;  %v11679_v49 = vld [vmem:[#allocation3 + $0x198] sm:$0xff]  ;;  %v73_v50 = vld [vmem:[#allocation3 + $0x20] sm:$0xff]  ;;  %v11710_v59 = vsel %vm18151_vm0, %v11675_v47, 0.0 }
  0x45   :  { %9942 = vmatpush3.bf16.msra.mxu0 %v11260_v3  ;;  %v74_v51 = vld [vmem:[#allocation3 + $0x28] sm:$0xff]  ;;  %18714 = vst [vmem:[#allocation28_spill] sm:$0xff] %v11684_v52  ;;  %18715 = vst [vmem:[#allocation29_spill] sm:$0xff] %v11689_v53  ;;  %v11696_v55 = vld [vmem:[#allocation3 + $0x1a0] sm:$0xff]  ;;  %v11721_v63 = vsel %vm18151_vm0, %v11677_v48, 0.0  ;;  %v11726_v0 = vsel %vm18151_vm0, %v11679_v49, 0.0 }
  0x46   :  { %9943 = vmatprep.subr.bf16.mxu0 %v11261_v8  ;;  %18716 = vst [vmem:[#allocation30_spill] sm:$0xff] %v11694_v54  ;;  %v11698_v56 = vld [vmem:[#allocation3 + $0x1a8] sm:$0xff]  ;;  %v11700_v57 = vld [vmem:[#allocation3 + $0x1b0] sm:$0xff]  ;;  %18717 = vst [vmem:[#allocation31_spill] sm:$0xff] %v11705_v58  ;;  %v11731_v1 = vsel %vm18151_vm0, %v11696_v55, 0.0 }
  0x47   :  { %18718 = vst [vmem:[#allocation32_spill] sm:$0xff] %v11710_v59  ;;  %v11712_v60 = vld [vmem:[#allocation3 + $0x1b8] sm:$0xff]  ;;  %v11714_v61 = vld [vmem:[#allocation3 + $0x1c0] sm:$0xff]  ;;  %v11716_v62 = vld [vmem:[#allocation3 + $0x1c8] sm:$0xff]  ;;  %v11742_v5 = vsel %vm18151_vm0, %v11698_v56, 0.0  ;;  %v11747_v6 = vsel %vm18151_vm0, %v11700_v57, 0.0 }
  0x48   :  { %18719 = vst [vmem:[#allocation33_spill] sm:$0xff] %v11721_v63  ;;  %18720 = vst [vmem:[#allocation34_spill] sm:$0xff] %v11726_v0  ;;  %v11733_v2 = vld [vmem:[#allocation3 + $0x1d0] sm:$0xff]  ;;  %v11735_v3 = vld [vmem:[#allocation3 + $0x1d8] sm:$0xff]  ;;  %v11759_v7 = vsel %vm18151_vm0, %v11714_v61, 0.0 }
  0x49   :  { %9944 = vmatpush3.bf16.msra.mxu0 %v11261_v8  ;;  %18721 = vst [vmem:[#allocation35_spill] sm:$0xff] %v11731_v1  ;;  %v11737_v4 = vld [vmem:[#allocation3 + $0x1e0] sm:$0xff]  ;;  %18722 = vst [vmem:[#allocation36_spill] sm:$0xff] %v11742_v5  ;;  %v11752_v8 = vsel %vm18151_vm0, %v11712_v60, 0.0  ;;  %v11764_v5 = vsel %vm18151_vm0, %v11716_v62, 0.0  ;;  %v11769_v1 = vsel %vm18151_vm0, %v11733_v2, 0.0 }
  0x4a   :  { %9945 = vmatprep.subr.bf16.mxu0 %v11262_v10  ;;  %18723 = vst [vmem:[#allocation37_spill] sm:$0xff] %v11747_v6  ;;  %18724 = vst [vmem:[#allocation38_spill] sm:$0xff] %v11752_v8  ;;  %v135_v6 = vpack.c.bf16 %v74_v51, %v73_v50  ;;  %v75_v51 = vld [vmem:[#allocation3 + $0x30] sm:$0xff]  ;;  %v80_v63 = vld [vmem:[#allocation3 + $0x58] sm:$0xff] }
  0x4b   :  { %18725 = vst [vmem:[#allocation39_spill] sm:$0xff] %v11759_v7  ;;  %18726 = vst [vmem:[#allocation40_spill] sm:$0xff] %v11764_v5  ;;  %v11781_v7 = vld [vmem:[#allocation3 + $0x1f8] sm:$0xff]  ;;  %v78_v5 = vld [vmem:[#allocation3 + $0x48] sm:$0xff] }
  0x4c   :  { %18727 = vst [vmem:[#allocation41_spill] sm:$0xff] %v11769_v1  ;;  %v11791_v50 = vsel %vm18151_vm0, %v11781_v7, 0.0  ;;  %v76_v1 = vld [vmem:[#allocation3 + $0x38] sm:$0xff]  ;;  %v79_v0 = vld [vmem:[#allocation3 + $0x50] sm:$0xff]  ;;  %v81_v59 = vld [vmem:[#allocation3 + $0x60] sm:$0xff] }
  0x4d   :  { %9946 = vmatpush3.bf16.msra.mxu0 %v11262_v10  ;;  %v11754_v10 = vld [vmem:[#allocation3 + $0x1f0] sm:$0xff]  ;;  %18731 = vst [vmem:[#allocation45_spill] sm:$0xff] %v11791_v50  ;;  %v136_v8 = vpack.c.bf16 %v76_v1, %v75_v51  ;;  %v82_v58 = vld [vmem:[#allocation3 + $0x68] sm:$0xff]  ;;  %v84_v52 = vld [vmem:[#allocation3 + $0x78] sm:$0xff] }
  0x4e   :  { %9947 = vmatprep.subr.bf16.mxu0 %v11263_v11  ;;  %v139_v54 = vpack.c.bf16 %v82_v58, %v81_v59  ;;  %v83_v53 = vld [vmem:[#allocation3 + $0x70] sm:$0xff]  ;;  %v85_v50 = vld [vmem:[#allocation3 + $0x80] sm:$0xff]  ;;  %v86_v46 = vld [vmem:[#allocation3 + $0x88] sm:$0xff] }
  0x4f   :  { %v141_v45 = vpack.c.bf16 %v86_v46, %v85_v50  ;;  %v87_v44 = vld [vmem:[#allocation3 + $0x90] sm:$0xff]  ;;  %v89_v1 = vld [vmem:[#allocation3 + $0xa0] sm:$0xff]  ;;  %v94_v59 = vld [vmem:[#allocation3 + $0xc8] sm:$0xff] }
  0x50   :  { %v91_v51 = vld [vmem:[#allocation3 + $0xb0] sm:$0xff]  ;;  %v93_v58 = vld [vmem:[#allocation3 + $0xc0] sm:$0xff]  ;;  %v11272_v33 = vld [vmem:[#allocation8 + $0x118] sm:$0xff]  }
  0x51   :  { %9948 = vmatpush3.bf16.msra.mxu0 %v11263_v11  ;;  %v134_v11 = vpack.c.bf16 %v72_v43, %v71_v42  ;;  %v11774_v42 = vsel %vm18151_vm0, %v11735_v3, 0.0  ;;  %v11779_v43 = vsel %vm18151_vm0, %v11737_v4, 0.0  ;;  %v97_v46 = vld [vmem:[#allocation3 + $0xe0] sm:$0xff]  ;;  %v11276_v26 = vld [vmem:[#allocation8 + $0x128] sm:$0xff]   ;;  %v11278_v20 = vld [vmem:[#allocation8 + $0x130] sm:$0xff]  }
  0x52   :  { %9949 = vmatprep.subr.bf16.mxu0 %v11264_v24  ;;  %18728 = vst [vmem:[#allocation42_spill] sm:$0xff] %v11774_v42  ;;  %18729 = vst [vmem:[#allocation43_spill] sm:$0xff] %v11779_v43  ;;  %v77_v42 = vld [vmem:[#allocation3 + $0x40] sm:$0xff] }
  0x53   :  { %v137_v43 = vpack.c.bf16 %v78_v5, %v77_v42  ;;  %v90_v5 = vld [vmem:[#allocation3 + $0xa8] sm:$0xff] }
  0x54   :  { %v143_v42 = vpack.c.bf16 %v90_v5, %v89_v1  ;;  %v151_v1 = vpack.c.bf16 %v11596_v21, %v11584_v18  ;;  %v152_v5 = vpack.c.bf16 %v11600_v23, %v11598_v22  ;;  %v159_v18 = vpack.c.bf16 %v11698_v56, %v11696_v55  ;;  %v130_v23 = vld [vmem:[#allocation3 + $0x1e8] sm:$0xff] }
  0x55   :  { %9950 = vmatpush3.bf16.msra.mxu0 %v11264_v24  ;;  %v11786_v24 = vsel %vm18151_vm0, %v11754_v10, 0.0  ;;  %v160_v21 = vpack.c.bf16 %v11712_v60, %v11700_v57  ;;  %v161_v22 = vpack.c.bf16 %v11716_v62, %v11714_v61 }
  0x56   :  { %18730 = vst [vmem:[#allocation44_spill] sm:$0xff] %v11786_v24  ;;  %v138_v24 = vpack.c.bf16 %v80_v63, %v79_v0  ;;  %v145_v0 = vpack.c.bf16 %v94_v59, %v93_v58 }
  0x58   :  { %9952 = vmatmul.mubr.bf16.vlgmr.msra.gmra.mrb[0].mxu0 %v134_v11  ;;  %v140_v11 = vpack.c.bf16 %v84_v52, %v83_v53  ;;  %v98_v52 = vld [vmem:[#allocation3 + $0xe8] sm:$0xff] }
  0x59   :  { %9955 = vmatprep.mubr.bf16.mxu0 %v135_v6  ;;  %v88_v6 = vld [vmem:[#allocation3 + $0x98] sm:$0xff]  ;;  %v147_v50 = vpack.c.bf16 %v98_v52, %v97_v46 }
  0x60   :  { %9956 = vmatmul.mubr.bf16.gmra.mrb[4].mxu0 %v136_v8  ;;  %v142_v8 = vpack.c.bf16 %v88_v6, %v87_v44  ;;  %v99_v44 = vld [vmem:[#allocation3 + $0xf0] sm:$0xff]  ;;  %v150_v6 = vpack.c.bf16 %v11582_v17, %v11580_v16  ;;  %v157_v16 = vpack.c.bf16 %v11675_v47, %v11658_v41  ;;  %v158_v17 = vpack.c.bf16 %v11679_v49, %v11677_v48 }
  0x61   :  { %9959 = vmatprep.mubr.bf16.mxu0 %v137_v43  ;;  %v92_v43 = vld [vmem:[#allocation3 + $0xb8] sm:$0xff] }
  0x62   :  { %v144_v63 = vpack.c.bf16 %v92_v43, %v91_v51 }
  0x68   :  { %9960 = vmatmul.mubr.bf16.gmra.mrb[8].mxu0 %v138_v24  ;;  %v95_v24 = vld [vmem:[#allocation3 + $0xd0] sm:$0xff] }
  0x69   :  { %9963 = vmatprep.mubr.bf16.mxu0 %v139_v54  ;;  %v96_v54 = vld [vmem:[#allocation3 + $0xd8] sm:$0xff] }
  0x6a   :  { %v146_v53 = vpack.c.bf16 %v96_v54, %v95_v24 }
  0x70   :  { %9964 = vmatmul.mubr.bf16.gmra.mrb[12].mxu0 %v140_v11  ;;  %v149_v11 = vpack.c.bf16 %v11573_v14, %v11571_v13  ;;  %v155_v13 = vpack.c.bf16 %v11642_v36, %v11640_v35  ;;  %v156_v14 = vpack.c.bf16 %v11656_v40, %v11654_v39 }
  0x71   :  { %9967 = vmatprep.mubr.bf16.mxu0 %v141_v45  ;;  %v148_v45 = vpack.c.bf16 %v11569_v12, %v99_v44  ;;  %v154_v12 = vpack.c.bf16 %v11638_v34, %v11621_v30  ;;  %v164_v30 = vpack.c.bf16 %v11781_v7, %v11754_v10 }
  0x78   :  { %9968 = vmatmul.mubr.bf16.gmra.mrb[16].mxu0 %v142_v8  ;;  %v153_v8 = vpack.c.bf16 %v11619_v29, %v11617_v28  ;;  %v162_v28 = vpack.c.bf16 %v11735_v3, %v11733_v2  ;;  %v163_v29 = vpack.c.bf16 %v130_v23, %v11737_v4 }
  0x79   :  { %9971 = vmatprep.mubr.bf16.mxu0 %v143_v42 }
  0x80   :  { %9972 = vmatmul.mubr.bf16.gmra.mrb[20].mxu0 %v144_v63 }
  0x81   :  { %9975 = vmatprep.mubr.bf16.mxu0 %v145_v0 }
  0x88   :  { %9976 = vmatmul.mubr.bf16.gmra.mrb[24].mxu0 %v146_v53 }
  0x89   :  { %9979 = vmatprep.mubr.bf16.mxu0 %v147_v50 }
  0x90   :  { %9980 = vmatmul.mubr.bf16.gmra.mrb[28].mxu0 %v148_v45 }
  0x91   :  { %9983 = vmatprep.mubr.bf16.mxu0 %v149_v11 }
  0x98   :  { %9984 = vmatmul.mubr.bf16.gmra.mrb[32].mxu0 %v150_v6 }
  0x99   :  { %9987 = vmatprep.mubr.bf16.mxu0 %v151_v1 }
  0xa0   :  { %9988 = vmatmul.mubr.bf16.gmra.mrb[36].mxu0 %v152_v5 }
  0xa1   :  { %9991 = vmatprep.mubr.bf16.mxu0 %v153_v8 }
  0xa8   :  { %9992 = vmatmul.mubr.bf16.gmra.mrb[40].mxu0 %v154_v12 }
  0xa9   :  { %9995 = vmatprep.mubr.bf16.mxu0 %v155_v13 }
  0xb0   :  { %9996 = vmatmul.mubr.bf16.gmra.mrb[44].mxu0 %v156_v14 }
  0xb1   :  { %9999 = vmatprep.mubr.bf16.mxu0 %v157_v16 }
  0xb8   :  { %10000 = vmatmul.mubr.bf16.gmra.mrb[48].mxu0 %v158_v17 }
  0xb9   :  { %10003 = vmatprep.mubr.bf16.mxu0 %v159_v18 }
  0xc0   :  { %10004 = vmatmul.mubr.bf16.gmra.mrb[52].mxu0 %v160_v21 }
  0xc1   :  { %10007 = vmatprep.mubr.bf16.mxu0 %v161_v22 }
  0xc8   :  { %10008 = vmatmul.mubr.bf16.gmra.mrb[56].mxu0 %v162_v28 }
  0xc9   :  { %10011 = vmatprep.mubr.bf16.mxu0 %v163_v29 }
  0xd0   :  { %10012 = vmatmul.mubr.bf16.gmra.mrb[60].mxu0 %v164_v30 }
 0x12b   :  { %v11825_v34 = vpop.f32.mrb[0].mxu0 }
 0x12c   :  { %v11827_v35 = vpop.f32.mrb[1].mxu0  ;;  %v590_v7 = vmul.f32 %v11825_v34, %v11825_v34 }
 0x12d   :  { %v11829_v36 = vpop.f32.mrb[2].mxu0  ;;  %v588_v40 = vmul.f32 %v11827_v35, %v11827_v35 }
 0x12e   :  { %v11831_v39 = vpop.f32.mrb[3].mxu0  ;;  %v591_v55 = vmul.f32 %v11829_v36, %v11829_v36 }
 0x12f   :  { %v518_v41 = vadd.f32 %v11831_v39, %v11827_v35  ;;  %v589_v47 = vmul.f32 %v11831_v39, %v11831_v39 }
 0x131   :  { %v519_v48 = vadd.f32 %v11825_v34, %v518_v41  ;;  %v652_v49 = vadd.f32 %v589_v47, %v588_v40 }
 0x133   :  { %v653_v56 = vadd.f32 %v652_v49, %v590_v7  ;;  %v11844_v57 = vpop.f32.mrb[4].mxu0  ;;  %v520_v60 = vadd.f32 %v11829_v36, %v519_v48 }
 0x134   :  { %v11847_v61 = vpop.f32.mrb[5].mxu0  ;;  %v594_v58 = vmul.f32 %v11844_v57, %v11844_v57 }
 0x135   :  { %v521_v62 = vadd.f32 %v520_v60, %v11847_v61  ;;  %v592_v2 = vmul.f32 %v11847_v61, %v11847_v61  ;;  %v654_v3 = vadd.f32 %v653_v56, %v591_v55  ;;  %v11852_v4 = vpop.f32.mrb[6].mxu0 }
 0x136   :  { %v11854_v10 = vpop.f32.mrb[7].mxu0  ;;  %v595_v0 = vmul.f32 %v11852_v4, %v11852_v4 }
 0x137   :  { %v655_v42 = vadd.f32 %v654_v3, %v592_v2  ;;  %v522_v51 = vadd.f32 %v521_v62, %v11854_v10  ;;  %v593_v43 = vmul.f32 %v11854_v10, %v11854_v10 }
 0x139   :  { %v523_v59 = vadd.f32 %v11844_v57, %v522_v51  ;;  %v656_v63 = vadd.f32 %v655_v42, %v593_v43 }
 0x13b   :  { %v657_v24 = vadd.f32 %v656_v63, %v594_v58  ;;  %v11864_v54 = vpop.f32.mrb[8].mxu0  ;;  %v524_v46 = vadd.f32 %v11852_v4, %v523_v59 }
 0x13c   :  { %v11867_v52 = vpop.f32.mrb[9].mxu0  ;;  %v598_v8 = vmul.f32 %v11864_v54, %v11864_v54 }
 0x13d   :  { %v525_v53 = vadd.f32 %v524_v46, %v11867_v52  ;;  %v596_v50 = vmul.f32 %v11867_v52, %v11867_v52  ;;  %v658_v44 = vadd.f32 %v657_v24, %v595_v0  ;;  %v11872_v45 = vpop.f32.mrb[10].mxu0 }
 0x13e   :  { %v11874_v11 = vpop.f32.mrb[11].mxu0  ;;  %v599_v14 = vmul.f32 %v11872_v45, %v11872_v45 }
 0x13f   :  { %v659_v6 = vadd.f32 %v658_v44, %v596_v50  ;;  %v526_v1 = vadd.f32 %v525_v53, %v11874_v11  ;;  %v597_v5 = vmul.f32 %v11874_v11, %v11874_v11 }
 0x141   :  { %v527_v12 = vadd.f32 %v11864_v54, %v526_v1  ;;  %v660_v13 = vadd.f32 %v659_v6, %v597_v5 }
 0x143   :  { %v661_v16 = vadd.f32 %v660_v13, %v598_v8  ;;  %v11884_v17 = vpop.f32.mrb[12].mxu0  ;;  %v528_v18 = vadd.f32 %v11872_v45, %v527_v12 }
 0x144   :  { %v11887_v21 = vpop.f32.mrb[13].mxu0  ;;  %v602_v7 = vmul.f32 %v11884_v17, %v11884_v17 }
 0x145   :  { %v529_v22 = vadd.f32 %v528_v18, %v11887_v21  ;;  %v600_v23 = vmul.f32 %v11887_v21, %v11887_v21  ;;  %v662_v28 = vadd.f32 %v661_v16, %v599_v14  ;;  %v11892_v29 = vpop.f32.mrb[14].mxu0 }
 0x146   :  { %v11894_v30 = vpop.f32.mrb[15].mxu0  ;;  %v603_v55 = vmul.f32 %v11892_v29, %v11892_v29 }
 0x147   :  { %v663_v40 = vadd.f32 %v662_v28, %v600_v23  ;;  %v530_v41 = vadd.f32 %v529_v22, %v11894_v30  ;;  %v601_v47 = vmul.f32 %v11894_v30, %v11894_v30 }
 0x149   :  { %v531_v48 = vadd.f32 %v11884_v17, %v530_v41  ;;  %v664_v49 = vadd.f32 %v663_v40, %v601_v47 }
 0x14b   :  { %v665_v56 = vadd.f32 %v664_v49, %v602_v7  ;;  %v11904_v60 = vpop.f32.mrb[16].mxu0  ;;  %v532_v62 = vadd.f32 %v11892_v29, %v531_v48 }
 0x14c   :  { %v11907_v2 = vpop.f32.mrb[17].mxu0  ;;  %v606_v24 = vmul.f32 %v11904_v60, %v11904_v60 }
 0x14d   :  { %v533_v3 = vadd.f32 %v532_v62, %v11907_v2  ;;  %v604_v42 = vmul.f32 %v11907_v2, %v11907_v2  ;;  %v666_v51 = vadd.f32 %v665_v56, %v603_v55  ;;  %v11912_v43 = vpop.f32.mrb[18].mxu0 }
 0x14e   :  { %v11914_v58 = vpop.f32.mrb[19].mxu0  ;;  %v607_v50 = vmul.f32 %v11912_v43, %v11912_v43 }
 0x14f   :  { %v667_v59 = vadd.f32 %v666_v51, %v604_v42  ;;  %v534_v63 = vadd.f32 %v533_v3, %v11914_v58  ;;  %v605_v0 = vmul.f32 %v11914_v58, %v11914_v58 }
 0x151   :  { %v535_v46 = vadd.f32 %v11904_v60, %v534_v63  ;;  %v668_v53 = vadd.f32 %v667_v59, %v605_v0 }
 0x153   :  { %v669_v44 = vadd.f32 %v668_v53, %v606_v24  ;;  %v11924_v6 = vpop.f32.mrb[20].mxu0  ;;  %v536_v1 = vadd.f32 %v11912_v43, %v535_v46 }
 0x154   :  { %v11927_v5 = vpop.f32.mrb[21].mxu0  ;;  %v610_v28 = vmul.f32 %v11924_v6, %v11924_v6 }
 0x155   :  { %v537_v8 = vadd.f32 %v536_v1, %v11927_v5  ;;  %v608_v12 = vmul.f32 %v11927_v5, %v11927_v5  ;;  %v670_v13 = vadd.f32 %v669_v44, %v607_v50  ;;  %v11932_v14 = vpop.f32.mrb[22].mxu0 }
 0x156   :  { %v11934_v16 = vpop.f32.mrb[23].mxu0  ;;  %v611_v47 = vmul.f32 %v11932_v14, %v11932_v14 }
 0x157   :  { %v671_v18 = vadd.f32 %v670_v13, %v608_v12  ;;  %v538_v22 = vadd.f32 %v537_v8, %v11934_v16  ;;  %v609_v23 = vmul.f32 %v11934_v16, %v11934_v16 }
 0x159   :  { %v539_v40 = vadd.f32 %v11924_v6, %v538_v22  ;;  %v672_v41 = vadd.f32 %v671_v18, %v609_v23 }
 0x15b   :  { %v673_v7 = vadd.f32 %v672_v41, %v610_v28  ;;  %v11944_v48 = vpop.f32.mrb[24].mxu0  ;;  %v540_v49 = vadd.f32 %v11932_v14, %v539_v40 }
 0x15c   :  { %v11947_v55 = vpop.f32.mrb[25].mxu0  ;;  %v614_v24 = vmul.f32 %v11944_v48, %v11944_v48 }
 0x15d   :  { %v541_v56 = vadd.f32 %v540_v49, %v11947_v55  ;;  %v612_v62 = vmul.f32 %v11947_v55, %v11947_v55  ;;  %v674_v3 = vadd.f32 %v673_v7, %v611_v47  ;;  %v11952_v42 = vpop.f32.mrb[26].mxu0 }
 0x15e   :  { %v11954_v51 = vpop.f32.mrb[27].mxu0  ;;  %v615_v50 = vmul.f32 %v11952_v42, %v11952_v42 }
 0x15f   :  { %v675_v59 = vadd.f32 %v674_v3, %v612_v62  ;;  %v542_v63 = vadd.f32 %v541_v56, %v11954_v51  ;;  %v613_v0 = vmul.f32 %v11954_v51, %v11954_v51 }
 0x161   :  { %v543_v46 = vadd.f32 %v11944_v48, %v542_v63  ;;  %v676_v53 = vadd.f32 %v675_v59, %v613_v0 }
 0x163   :  { %v677_v44 = vadd.f32 %v676_v53, %v614_v24  ;;  %v11964_v1 = vpop.f32.mrb[28].mxu0  ;;  %v544_v8 = vadd.f32 %v11952_v42, %v543_v46 }
 0x164   :  { %v11967_v12 = vpop.f32.mrb[29].mxu0  ;;  %v618_v7 = vmul.f32 %v11964_v1, %v11964_v1 }
 0x165   :  { %v545_v13 = vadd.f32 %v544_v8, %v11967_v12  ;;  %v616_v18 = vmul.f32 %v11967_v12, %v11967_v12  ;;  %v678_v22 = vadd.f32 %v677_v44, %v615_v50  ;;  %v11972_v23 = vpop.f32.mrb[30].mxu0 }
 0x166   :  { %v11974_v28 = vpop.f32.mrb[31].mxu0  ;;  %v619_v62 = vmul.f32 %v11972_v23, %v11972_v23 }
 0x167   :  { %v679_v40 = vadd.f32 %v678_v22, %v616_v18  ;;  %v546_v41 = vadd.f32 %v545_v13, %v11974_v28  ;;  %v617_v47 = vmul.f32 %v11974_v28, %v11974_v28  ;;  %v11265_v22 = vld [vmem:[#allocation8 + $0x40] sm:$0xff]  }
 0x168   :  { %10015 = vmatprep.subr.bf16.mxu0 %v11265_v22 }
 0x169   :  { %v547_v49 = vadd.f32 %v11964_v1, %v546_v41  ;;  %v680_v56 = vadd.f32 %v679_v40, %v617_v47  ;;  %v11266_v40 = vld [vmem:[#allocation8 + $0x100] sm:$0xff]   ;;  %10016 = vmatpush3.bf16.msra.mxu0 %v11265_v22 }
 0x16a   :  { %10335 = vmatprep.subr.bf16.mxu1 %v11266_v40 }
 0x16b   :  { %v681_v3 = vadd.f32 %v680_v56, %v618_v7  ;;  %v11984_v59 = vpop.f32.mrb[32].mxu0  ;;  %v548_v63 = vadd.f32 %v11972_v23, %v547_v49  ;;  %10336 = vmatpush3.bf16.msra.mxu1 %v11266_v40 }
 0x16c   :  { %v11987_v0 = vpop.f32.mrb[33].mxu0  ;;  %v622_v41 = vmul.f32 %v11984_v59, %v11984_v59 }
 0x16d   :  { %v549_v24 = vadd.f32 %v548_v63, %v11987_v0  ;;  %v620_v46 = vmul.f32 %v11987_v0, %v11987_v0  ;;  %v682_v53 = vadd.f32 %v681_v3, %v619_v62  ;;  %v11992_v50 = vpop.f32.mrb[34].mxu0  ;;  %v11267_v63 = vld [vmem:[#allocation8 + $0x48] sm:$0xff]  }
 0x16e   :  { %v11994_v44 = vpop.f32.mrb[35].mxu0  ;;  %v623_v49 = vmul.f32 %v11992_v50, %v11992_v50  ;;  %10017 = vmatprep.subr.bf16.mxu0 %v11267_v63 }
 0x16f   :  { %v683_v8 = vadd.f32 %v682_v53, %v620_v46  ;;  %v550_v13 = vadd.f32 %v549_v24, %v11994_v44  ;;  %v621_v18 = vmul.f32 %v11994_v44, %v11994_v44  ;;  %v11268_v46 = vld [vmem:[#allocation8 + $0x108] sm:$0xff]   ;;  %10018 = vmatpush3.bf16.msra.mxu0 %v11267_v63 }
 0x170   :  { %10337 = vmatprep.subr.bf16.mxu1 %v11268_v46 }
 0x171   :  { %v551_v47 = vadd.f32 %v11984_v59, %v550_v13  ;;  %v684_v7 = vadd.f32 %v683_v8, %v621_v18  ;;  %10338 = vmatpush3.bf16.msra.mxu1 %v11268_v46  ;;  %v11271_v46 = vld [vmem:[#allocation8 + $0x58] sm:$0xff]  }
 0x173   :  { %v685_v56 = vadd.f32 %v684_v7, %v622_v41  ;;  %v12004_v62 = vpop.f32.mrb[36].mxu0  ;;  %v552_v3 = vadd.f32 %v11992_v50, %v551_v47  ;;  %v11269_v7 = vld [vmem:[#allocation8 + $0x50] sm:$0xff]  }
 0x174   :  { %v12007_v24 = vpop.f32.mrb[37].mxu0  ;;  %v626_v38 = vmul.f32 %v12004_v62, %v12004_v62  ;;  %10019 = vmatprep.subr.bf16.mxu0 %v11269_v7 }
 0x175   :  { %v553_v53 = vadd.f32 %v552_v3, %v12007_v24  ;;  %v624_v8 = vmul.f32 %v12007_v24, %v12007_v24  ;;  %v686_v13 = vadd.f32 %v685_v56, %v623_v49  ;;  %v12012_v18 = vpop.f32.mrb[38].mxu0  ;;  %v11270_v3 = vld [vmem:[#allocation8 + $0x110] sm:$0xff]   ;;  %10020 = vmatpush3.bf16.msra.mxu0 %v11269_v7 }
 0x176   :  { %v12014_v22 = vpop.f32.mrb[39].mxu0  ;;  %10339 = vmatprep.subr.bf16.mxu1 %v11270_v3  ;;  %v627_v63 = vmul.f32 %v12012_v18, %v12012_v18  ;;  %10021 = vmatprep.subr.bf16.mxu0 %v11271_v46 }
 0x177   :  { %v687_v41 = vadd.f32 %v686_v13, %v624_v8  ;;  %v554_v40 = vadd.f32 %v553_v53, %v12014_v22  ;;  %v625_v47 = vmul.f32 %v12014_v22, %v12014_v22  ;;  %10340 = vmatpush3.bf16.msra.mxu1 %v11270_v3 }
 0x178   :  { %10341 = vmatprep.subr.bf16.mxu1 %v11272_v33 }
 0x179   :  { %v555_v49 = vadd.f32 %v12004_v62, %v554_v40  ;;  %v688_v56 = vadd.f32 %v687_v41, %v625_v47  ;;  %10022 = vmatpush3.bf16.msra.mxu0 %v11271_v46 }
 0x17b   :  { %v689_v8 = vadd.f32 %v688_v56, %v626_v38  ;;  %v12024_v53 = vpop.f32.mrb[40].mxu0  ;;  %v556_v13 = vadd.f32 %v12012_v18, %v555_v49  ;;  %10342 = vmatpush3.bf16.msra.mxu1 %v11272_v33  ;;  %v11273_v56 = vld [vmem:[#allocation8 + $0x60] sm:$0xff]   ;;  %v11275_v33 = vld [vmem:[#allocation8 + $0x68] sm:$0xff]  }
 0x17c   :  { %18732 = vst [vmem:[#allocation46_spill] sm:$0xff] %v12024_v53  ;;  %v12027_v37 = vpop.f32.mrb[41].mxu0  ;;  %v630_v31 = vmul.f32 %v12024_v53, %v12024_v53  ;;  %10023 = vmatprep.subr.bf16.mxu0 %v11273_v56 }
 0x17d   :  { %v557_v32 = vadd.f32 %v556_v13, %v12027_v37  ;;  %v628_v41 = vmul.f32 %v12027_v37, %v12027_v37  ;;  %v690_v40 = vadd.f32 %v689_v8, %v627_v63  ;;  %v12032_v47 = vpop.f32.mrb[42].mxu0  ;;  %v11274_v13 = vld [vmem:[#allocation8 + $0x120] sm:$0xff]   ;;  %10024 = vmatpush3.bf16.msra.mxu0 %v11273_v56 }
 0x17e   :  { %18733 = vst [vmem:[#allocation47_spill] sm:$0xff] %v12032_v47  ;;  %v12034_v7 = vpop.f32.mrb[43].mxu0  ;;  %10343 = vmatprep.subr.bf16.mxu1 %v11274_v13  ;;  %v631_v46 = vmul.f32 %v12032_v47, %v12032_v47  ;;  %10025 = vmatprep.subr.bf16.mxu0 %v11275_v33 }
 0x17f   :  { %18734 = vst [vmem:[#allocation48_spill] sm:$0xff] %v12034_v7  ;;  %v691_v38 = vadd.f32 %v690_v40, %v628_v41  ;;  %v558_v3 = vadd.f32 %v557_v32, %v12034_v7  ;;  %v629_v49 = vmul.f32 %v12034_v7, %v12034_v7  ;;  %10344 = vmatpush3.bf16.msra.mxu1 %v11274_v13  ;;  %v18739_v13 = vlaneseq }
 0x180   :  { %10345 = vmatprep.subr.bf16.mxu1 %v11276_v26 }
 0x181   :  { %v559_v63 = vadd.f32 %v12024_v53, %v558_v3  ;;  %v692_v8 = vadd.f32 %v691_v38, %v629_v49  ;;  %10026 = vmatpush3.bf16.msra.mxu0 %v11275_v33 }
 0x183   :  { %v693_v41 = vadd.f32 %v692_v8, %v630_v31  ;;  %v12044_v32 = vpop.f32.mrb[44].mxu0  ;;  %v560_v40 = vadd.f32 %v12032_v47, %v559_v63  ;;  %v11477_v31 = vmov 0.0   ;;  %v12057_v63 = vshrl.u32 %v18739_v13, 7  ;;  %10346 = vmatpush3.bf16.msra.mxu1 %v11276_v26 }
 0x184   :  { %18735 = vst [vmem:[#allocation49_spill] sm:$0xff] %v12044_v32  ;;  %v12047_v27 = vpop.f32.mrb[45].mxu0  ;;  %1061 = vst [vmem:[#allocation2] sm:$0xff] %v11477_v31  ;;  %v634_v19 = vmul.f32 %v12044_v32, %v12044_v32  ;;  %10347 = vmatprep.subr.bf16.mxu1 %v11278_v20 }
 0x185   :  { %18736 = vst [vmem:[#allocation50_spill] sm:$0xff] %v12047_v27  ;;  %v561_v25 = vadd.f32 %v560_v40, %v12047_v27  ;;  %v632_v38 = vmul.f32 %v12047_v27, %v12047_v27  ;;  %v694_v3 = vadd.f32 %v693_v41, %v631_v46  ;;  %v12052_v49 = vpop.f32.mrb[46].mxu0  ;;  %1062 = vst [vmem:[#allocation2 + $0x8] sm:$0xff] %v11477_v31  ;;  %v11277_v40 = vld [vmem:[#allocation8 + $0x70] sm:$0xff]   ;;  %v12063_v33 = vadd.s32 8, %v12057_v63 }
 0x186   :  { %18737 = vst [vmem:[#allocation51_spill] sm:$0xff] %v12052_v49  ;;  %v12054_v56 = vpop.f32.mrb[47].mxu0  ;;  %1063 = vst [vmem:[#allocation2 + $0x10] sm:$0x1] %v11477_v31  ;;  %10027 = vmatprep.subr.bf16.mxu0 %v11277_v40  ;;  %v635_v26 = vmul.f32 %v12052_v49, %v12052_v49  ;;  %v12188_v53 = vadd.s32 64, %v12057_v63 }
 0x187   :  { %18738 = vst [vmem:[#allocation52_spill] sm:$0xff] %v12054_v56  ;;  %18740 = vst [vmem:[#allocation53_spill] sm:$0xff] %v12057_v63  ;;  %v695_v8 = vadd.f32 %v694_v3, %v632_v38  ;;  %v562_v46 = vadd.f32 %v561_v25, %v12054_v56  ;;  %v633_v41 = vmul.f32 %v12054_v56, %v12054_v56  ;;  %10028 = vmatpush3.bf16.msra.mxu0 %v11277_v40  ;;  %v11279_v56 = vld [vmem:[#allocation8 + $0x78] sm:$0xff]  }
 0x188   :  { %1064 = vst [vmem:[#allocation2 + $0x211] sm:$0xff] %v11477_v31  ;;  %1065 = vst [vmem:[#allocation2 + $0x219] sm:$0xff] %v11477_v31  ;;  %v1260_v25 = vshra.s32 %v12057_v63, 4  ;;  %v1261_v38 = vshra.s32 %v12063_v33, 4  ;;  %10348 = vmatpush3.bf16.msra.mxu1 %v11278_v20  ;;  %10029 = vmatprep.subr.bf16.mxu0 %v11279_v56 }
 0x189   :  { %1066 = vst [vmem:[#allocation2 + $0x221] sm:$0x1] %v11477_v31  ;;  %18741 = vst [vmem:[#allocation54_spill] sm:$0xff] %v12063_v33  ;;  %v563_v13 = vadd.f32 %v12044_v32, %v562_v46  ;;  %v696_v15 = vadd.f32 %v695_v8, %v633_v41  ;;  %v11280_v8 = vld [vmem:[#allocation8 + $0x138] sm:$0xff]  }
 0x18a   :  { %v12077_v46 = vand.u32 15, %v1260_v25  ;;  %v12079_v41 = vand.u32 15, %v1261_v38  ;;  %10349 = vmatprep.subr.bf16.mxu1 %v11280_v8  ;;  %18765 = vst [vmem:[#allocation78_spill] sm:$0xff] %v12188_v53 }
 0x18b   :  { %v697_v3 = vadd.f32 %v696_v15, %v634_v19  ;;  %v12072_v31 = vpop.f32.mrb[48].mxu0  ;;  %v564_v9 = vadd.f32 %v12052_v49, %v563_v13  ;;  %10030 = vmatpush3.bf16.msra.mxu0 %v11279_v56 }
 0x18c   :  { %18742 = vst [vmem:[#allocation55_spill] sm:$0xff] %v12072_v31  ;;  %v12075_v27 = vpop.f32.mrb[49].mxu0  ;;  %18744 = vst [vmem:[#allocation57_spill] sm:$0xff] %v12077_v46  ;;  %v2012_v19 = vld [vmem:[#allocation2 + $0x1] sm:$0xff]  ;;  %vm18305_vm1 = vcmp.ge.s32.totalorder %v12077_v46, 1  ;;  %vm18335_vm2 = vcmp.ge.s32.totalorder %v12079_v41, 1  ;;  %10350 = vmatpush3.bf16.msra.mxu1 %v11280_v8  ;;  %v638_v56 = vmul.f32 %v12072_v31, %v12072_v31 }
 0x18d   :  { %18743 = vst [vmem:[#allocation56_spill] sm:$0xff] %v12075_v27  ;;  %18745 = vst [vmem:[#allocation58_spill] sm:$0xff] %v12079_v41  ;;  %v565_v40 = vadd.f32 %v564_v9, %v12075_v27  ;;  %v636_v33 = vmul.f32 %v12075_v27, %v12075_v27  ;;  %v698_v32 = vadd.f32 %v697_v3, %v635_v26  ;;  %v12084_v15 = vpop.f32.mrb[50].mxu0  ;;  %v2013_v13 = vld [vmem:[#allocation2 + $0x9] sm:$0xff] }
 0x18e   :  { %18746 = vst [vmem:[#allocation59_spill] sm:$0xff] %v12084_v15  ;;  %v12086_v20 = vpop.f32.mrb[51].mxu0  ;;  %v8702_v25 = vpack.c.bf16 %v2013_v13, %v2012_v19  ;;  %vm8701_vm3 = vmpackc.low %vm18335_vm2, %vm18305_vm1  ;;  %v11281_v3 = vld [vmem:[#allocation8 + $0x140] sm:$0xff]  }
 0x18f   :  { %18747 = vst [vmem:[#allocation60_spill] sm:$0xff] %v12086_v20  ;;  %v699_v38 = vadd.f32 %v698_v32, %v636_v33  ;;  %v566_v9 = vadd.f32 %v565_v40, %v12086_v20  ;;  %v637_v26 = vmul.f32 %v12086_v20, %v12086_v20  ;;  %10415 = vmatprep.subr.bf16.mxu1 %v11281_v3 }
 0x190   :  { %10031 = vmatprep.mubr.msk.bf16.mxu0 %vm8701_vm3, %v8702_v25  ;;  %v639_v32 = vmul.f32 %v12084_v15, %v12084_v15 }
 0x191   :  { %v567_v27 = vadd.f32 %v12072_v31, %v566_v9  ;;  %v700_v19 = vadd.f32 %v699_v38, %v637_v26  ;;  %v12167_v31 = vadd.s32 24, %v12057_v63 }
 0x193   :  { %v701_v33 = vadd.f32 %v700_v19, %v638_v56  ;;  %v12102_v40 = vpop.f32.mrb[52].mxu0  ;;  %v568_v8 = vadd.f32 %v12084_v15, %v567_v27  ;;  %18760 = vst [vmem:[#allocation73_spill] sm:$0xff] %v12167_v31 }
 0x194   :  { %18748 = vst [vmem:[#allocation61_spill] sm:$0xff] %v12102_v40  ;;  %v12105_v13 = vpop.f32.mrb[53].mxu0  ;;  %v642_v27 = vmul.f32 %v12102_v40, %v12102_v40 }
 0x195   :  { %18749 = vst [vmem:[#allocation62_spill] sm:$0xff] %v12105_v13  ;;  %v569_v25 = vadd.f32 %v568_v8, %v12105_v13  ;;  %v640_v41 = vmul.f32 %v12105_v13, %v12105_v13  ;;  %v702_v46 = vadd.f32 %v701_v33, %v639_v32  ;;  %v12110_v20 = vpop.f32.mrb[54].mxu0 }
 0x196   :  { %18750 = vst [vmem:[#allocation63_spill] sm:$0xff] %v12110_v20  ;;  %v12112_v38 = vpop.f32.mrb[55].mxu0  ;;  %v643_v8 = vmul.f32 %v12110_v20, %v12110_v20 }
 0x197   :  { %18751 = vst [vmem:[#allocation64_spill] sm:$0xff] %v12112_v38  ;;  %v703_v9 = vadd.f32 %v702_v46, %v640_v41  ;;  %v570_v26 = vadd.f32 %v569_v25, %v12112_v38  ;;  %v641_v3 = vmul.f32 %v12112_v38, %v12112_v38 }
 0x199   :  { %v571_v56 = vadd.f32 %v12102_v40, %v570_v26  ;;  %v704_v19 = vadd.f32 %v703_v9, %v641_v3 }
 0x19b   :  { %v705_v32 = vadd.f32 %v704_v19, %v642_v27  ;;  %v12122_v33 = vpop.f32.mrb[56].mxu0  ;;  %v572_v13 = vadd.f32 %v12110_v20, %v571_v56 }
 0x19c   :  { %18752 = vst [vmem:[#allocation65_spill] sm:$0xff] %v12122_v33  ;;  %v12125_v46 = vpop.f32.mrb[57].mxu0  ;;  %v646_v56 = vmul.f32 %v12122_v33, %v12122_v33 }
 0x19d   :  { %18753 = vst [vmem:[#allocation66_spill] sm:$0xff] %v12125_v46  ;;  %v573_v41 = vadd.f32 %v572_v13, %v12125_v46  ;;  %v644_v25 = vmul.f32 %v12125_v46, %v12125_v46  ;;  %v706_v38 = vadd.f32 %v705_v32, %v643_v8  ;;  %v12130_v15 = vpop.f32.mrb[58].mxu0 }
 0x19e   :  { %18754 = vst [vmem:[#allocation67_spill] sm:$0xff] %v12130_v15  ;;  %v12132_v26 = vpop.f32.mrb[59].mxu0  ;;  %v647_v46 = vmul.f32 %v12130_v15, %v12130_v15 }
 0x19f   :  { %18755 = vst [vmem:[#allocation68_spill] sm:$0xff] %v12132_v26  ;;  %v707_v9 = vadd.f32 %v706_v38, %v644_v25  ;;  %v574_v3 = vadd.f32 %v573_v41, %v12132_v26  ;;  %v645_v27 = vmul.f32 %v12132_v26, %v12132_v26 }
 0x1a1   :  { %v575_v19 = vadd.f32 %v12122_v33, %v574_v3  ;;  %v708_v13 = vadd.f32 %v707_v9, %v645_v27 }
 0x1a3   :  { %v709_v8 = vadd.f32 %v708_v13, %v646_v56  ;;  %v12142_v32 = vpop.f32.mrb[60].mxu0  ;;  %v576_v20 = vadd.f32 %v12130_v15, %v575_v19 }
 0x1a4   :  { %18756 = vst [vmem:[#allocation69_spill] sm:$0xff] %v12142_v32  ;;  %v12145_v38 = vpop.f32.mrb[61].mxu0  ;;  %v650_v19 = vmul.f32 %v12142_v32, %v12142_v32 }
 0x1a5   :  { %18757 = vst [vmem:[#allocation70_spill] sm:$0xff] %v12145_v38  ;;  %v577_v41 = vadd.f32 %v576_v20, %v12145_v38  ;;  %v648_v25 = vmul.f32 %v12145_v38, %v12145_v38  ;;  %v710_v26 = vadd.f32 %v709_v8, %v647_v46  ;;  %v12150_v40 = vpop.f32.mrb[62].mxu0 }
 0x1a6   :  { %18758 = vst [vmem:[#allocation71_spill] sm:$0xff] %v12150_v40  ;;  %v12152_v3 = vpop.f32.mrb[63].mxu0  ;;  %v651_v38 = vmul.f32 %v12150_v40, %v12150_v40 }
 0x1a7   :  { %v711_v9 = vadd.f32 %v710_v26, %v648_v25  ;;  %v578_v27 = vadd.f32 %v577_v41, %v12152_v3  ;;  %v649_v56 = vmul.f32 %v12152_v3, %v12152_v3  ;;  %v12164_v41 = vadd.s32 16, %v12057_v63 }
 0x1a9   :  { %v579_v13 = vadd.f32 %v12142_v32, %v578_v27  ;;  %v712_v20 = vadd.f32 %v711_v9, %v649_v56  ;;  %18759 = vst [vmem:[#allocation72_spill] sm:$0xff] %v12164_v41  ;;  %v12170_v9 = vadd.s32 32, %v12057_v63  ;;  %v12173_v27 = vadd.s32 40, %v12057_v63 }
 0x1aa   :  { %v12176_v56 = vadd.s32 48, %v12057_v63 }
 0x1ab   :  { %v580_v46 = vadd.f32 %v12150_v40, %v579_v13  ;;  %v713_v8 = vadd.f32 %v712_v20, %v650_v19  ;;  %18761 = vst [vmem:[#allocation74_spill] sm:$0xff] %v12170_v9  ;;  %18762 = vst [vmem:[#allocation75_spill] sm:$0xff] %v12173_v27  ;;  %v1262_v13 = vshra.s32 %v12164_v41, 4  ;;  %v1263_v20 = vshra.s32 %v12167_v31, 4 }
 0x1ac   :  { %18763 = vst [vmem:[#allocation76_spill] sm:$0xff] %v12176_v56  ;;  %v1266_v40 = vshra.s32 %v12176_v56, 4 }
 0x1ad   :  { %v581_v15 = vrot.slane %v580_v46, 4  ;;  %v714_v33 = vadd.f32 %v713_v8, %v651_v38  ;;  %v1264_v8 = vshra.s32 %v12170_v9, 4  ;;  %v12193_v7 = vand.u32 15, %v1262_v13 }
 0x1ae   :  { %v12195_v31 = vand.u32 15, %v1263_v20 }
 0x1af   :  { %v582_v26 = vadd.f32 %v581_v15, %v580_v46  ;;  %v715_v25 = vrot.slane %v714_v33, 4  ;;  %v12179_v15 = vadd.s32 56, %v12057_v63  ;;  %18767 = vst [vmem:[#allocation80_spill] sm:$0xff] %v12193_v7  ;;  %v18791_v7 = vld [vmem:[#allocation67_spill] sm:$0xff] }
 0x1b0   :  { %18768 = vst [vmem:[#allocation81_spill] sm:$0xff] %v12195_v31  ;;  %v18790_v31 = vld [vmem:[#allocation65_spill] sm:$0xff] }
 0x1b1   :  { %v583_v49 = vrot.slane %v582_v26, 2  ;;  %v716_v47 = vadd.f32 %v715_v25, %v714_v33  ;;  %18764 = vst [vmem:[#allocation77_spill] sm:$0xff] %v12179_v15  ;;  %v1265_v25 = vshra.s32 %v12173_v27, 4  ;;  %v1267_v32 = vshra.s32 %v12179_v15, 4 }
 0x1b2   :  { %v12199_v27 = vand.u32 15, %v1264_v8  ;;  %v12203_v15 = vand.u32 15, %v1266_v40  ;;  %v18775_v40 = vld [vmem:[#allocation47_spill] sm:$0xff] }
 0x1b3   :  { %v584_v38 = vadd.f32 %v583_v49, %v582_v26  ;;  %v717_v19 = vrot.slane %v716_v47, 2  ;;  %v12191_v49 = vadd.s32 72, %v12057_v63  ;;  %v12201_v56 = vand.u32 15, %v1265_v25  ;;  %v12352_v63 = vld [vmem:[%s18050_s3] ss:$0 sm:$0xff] }
 0x1b4   :  { %18769 = vst [vmem:[#allocation82_spill] sm:$0xff] %v12199_v27  ;;  %18771 = vst [vmem:[#allocation84_spill] sm:$0xff] %v12203_v15  ;;  %v12205_v9 = vand.u32 15, %v1267_v32  ;;  %v18776_v32 = vld [vmem:[#allocation50_spill] sm:$0xff] }
 0x1b5   :  { %v585_v46 = vrot.slane %v584_v38, 1  ;;  %v718_v33 = vadd.f32 %v717_v19, %v716_v47  ;;  %18766 = vst [vmem:[#allocation79_spill] sm:$0xff] %v12191_v49  ;;  %18770 = vst [vmem:[#allocation83_spill] sm:$0xff] %v12201_v56  ;;  %v18797_v8 = vshra.s32 %v12191_v49, 4 }
 0x1b6   :  { %18772 = vst [vmem:[#allocation85_spill] sm:$0xff] %v12205_v9 }
 0x1b7   :  { %v586_v26 = vadd.f32 %v585_v46, %v584_v38  ;;  %v719_v41 = vrot.slane %v718_v33, 1  ;;  %v12345_v27 = vand.u32 15, %v18797_v8  ;;  %v18799_v38 = vld [vmem:[#allocation53_spill] sm:$0xff] }
 0x1b8   :  { %v12355_v9 = vadd.s32 80, %v18799_v38  ;;  %v12358_v15 = vadd.s32 88, %v18799_v38  ;;  %v12364_v49 = vadd.s32 104, %v18799_v38 }
 0x1b9   :  { %v12197_v47 = vmul.f32 0.001953125, %v586_v26  ;;  %v720_v19 = vadd.f32 %v719_v41, %v718_v33  ;;  %v18774_v41 = vld [vmem:[#allocation46_spill] sm:$0xff]  ;;  %v18777_v33 = vld [vmem:[#allocation52_spill] sm:$0xff]  ;;  %v18793_v26 = vld [vmem:[#allocation69_spill] sm:$0xff] }
 0x1ba   :  { %18798 = vst [vmem:[#allocation46_spill] sm:$0xff] %v12345_v27  ;;  %18800 = vst [vmem:[#allocation47_spill] sm:$0xff] %v12355_v9 }
 0x1bb   :  { %v721_v46 = vmul.f32 0.001953125, %v720_v19  ;;  %v722_v13 = vmul.f32 %v12197_v47, %v12197_v47  ;;  %v18773_v19 = vld [vmem:[#allocation48_spill] sm:$0xff]  ;;  %18801 = vst [vmem:[#allocation50_spill] sm:$0xff] %v12358_v15  ;;  %18803 = vst [vmem:[#allocation65_spill] sm:$0xff] %v12364_v49  ;;  %v18804_v8 = vsub.f32 %v12152_v3, %v12197_v47  ;;  %v18805_v27 = vsub.f32 %v11827_v35, %v12197_v47 }
 0x1bc   :  { %v18806_v15 = vsub.f32 %v11831_v39, %v12197_v47  ;;  %v12391_v3 = vld [vmem:[%s18051_s4] ss:$0 sm:$0xff]  ;;  %v18809_v35 = vsub.f32 %v11829_v36, %v12197_v47  ;;  %v18810_v39 = vsub.f32 %v11847_v61, %v12197_v47  ;;  %v18813_v61 = vsub.f32 %v11852_v4, %v12197_v47 }
 0x1bd   :  { %v723_v25 = vsub.f32 %v721_v46, %v722_v13  ;;  %18808 = vst [vmem:[#allocation67_spill] sm:$0xff] %v12391_v3 }
 0x1bf   :  { %v724_v13 = vmax.f32 %v723_v25, 0.0  ;;  %v18795_v25 = vshra.s32 %v12188_v53, 4 }
 0x1c1   :  { %v789_v46 = vadd.f32 1e-05, %v724_v13  ;;  %v18794_v13 = vld [vmem:[#allocation71_spill] sm:$0xff]  ;;  %v12341_v56 = vand.u32 15, %v18795_v25  ;;  %v12361_v25 = vadd.s32 96, %v18799_v38  ;;  %v18807_v38 = vsub.f32 %v11825_v34, %v12197_v47 }
 0x1c2   :  { %v18811_v34 = vsub.f32 %v11854_v10, %v12197_v47  ;;  %v18814_v10 = vsub.f32 %v11867_v52, %v12197_v47 }
 0x1c3   :  { %11337 = vrsqrt.f32 %v789_v46  ;;  %v18792_v46 = vld [vmem:[#allocation70_spill] sm:$0xff]  ;;  %18796 = vst [vmem:[#allocation48_spill] sm:$0xff] %v12341_v56  ;;  %18802 = vst [vmem:[#allocation52_spill] sm:$0xff] %v12361_v25  ;;  %v18827_v25 = vsub.f32 %v11934_v16, %v12197_v47 }
 0x1cd   :  { %v12347_v20 = vpop.eup %11337 }
 0x1ce   :  { %v852_v53 = vmul.f32 %v12347_v20, %v18804_v8  ;;  %v12374_v56 = vmul.f32 %v12347_v20, %v18805_v27  ;;  %v12380_v9 = vmul.f32 %v12347_v20, %v18806_v15  ;;  %v12386_v49 = vmul.f32 %v12347_v20, %v18807_v38 }
 0x1cf   :  { %v12397_v27 = vmul.f32 %v12347_v20, %v18809_v35  ;;  %v12403_v15 = vmul.f32 %v12347_v20, %v18810_v39  ;;  %v12409_v38 = vmul.f32 %v12347_v20, %v18811_v34  ;;  %v18812_v8 = vsub.f32 %v11844_v57, %v12197_v47 }
 0x1d0   :  { %v923_v35 = vmul.f32 %v12352_v63, %v852_v53  ;;  %v12422_v39 = vmul.f32 %v12347_v20, %v18813_v61  ;;  %v12428_v34 = vmul.f32 %v12347_v20, %v18814_v10  ;;  %v18815_v57 = vsub.f32 %v11874_v11, %v12197_v47 }
 0x1d1   :  { %v12415_v36 = vmul.f32 %v12347_v20, %v18812_v8  ;;  %v18816_v53 = vsub.f32 %v11864_v54, %v12197_v47  ;;  %v18817_v61 = vsub.f32 %v11872_v45, %v12197_v47  ;;  %v18818_v10 = vsub.f32 %v11887_v21, %v12197_v47 }
 0x1d2   :  { %v12434_v8 = vmul.f32 %v12347_v20, %v18815_v57  ;;  %v18819_v57 = vsub.f32 %v11894_v30, %v12197_v47  ;;  %v18820_v45 = vsub.f32 %v11884_v17, %v12197_v47  ;;  %v18821_v21 = vsub.f32 %v11892_v29, %v12197_v47 }
 0x1d3   :  { %v12440_v4 = vmul.f32 %v12347_v20, %v18816_v53  ;;  %v12446_v52 = vmul.f32 %v12347_v20, %v18817_v61  ;;  %v12452_v11 = vmul.f32 %v12347_v20, %v18818_v10  ;;  %v994_v53 = vadd.f32 %v12391_v3, %v923_v35 }
 0x1d4   :  { %v12458_v54 = vmul.f32 %v12347_v20, %v18819_v57  ;;  %v12465_v61 = vmul.f32 %v12347_v20, %v18820_v45  ;;  %v12471_v10 = vmul.f32 %v12347_v20, %v18821_v21  ;;  %v18822_v30 = vsub.f32 %v11907_v2, %v12197_v47 }
 0x1d5   :  { %v18823_v35 = vsub.f32 %v11914_v58, %v12197_v47  ;;  %v18824_v45 = vsub.f32 %v11904_v60, %v12197_v47  ;;  %v18825_v21 = vsub.f32 %v11912_v43, %v12197_v47  ;;  %v12507_v60 = vmul.f32 %v12347_v20, %v18827_v25 }
 0x1d6   :  { %v12477_v57 = vmul.f32 %v12347_v20, %v18822_v30  ;;  %v18826_v30 = vsub.f32 %v11927_v5, %v12197_v47  ;;  %v18831_v25 = vsub.f32 %v11954_v51, %v12197_v47 }
 0x1d7   :  { %v12483_v17 = vmul.f32 %v12347_v20, %v18823_v35  ;;  %v12489_v29 = vmul.f32 %v12347_v20, %v18824_v45  ;;  %v12495_v2 = vmul.f32 %v12347_v20, %v18825_v21  ;;  %v1058_v35 = vmax.f32 %v994_v53, 0.0 }
 0x1d8   :  { %v12501_v58 = vmul.f32 %v12347_v20, %v18826_v30  ;;  %v18828_v45 = vsub.f32 %v11924_v6, %v12197_v47  ;;  %v18829_v21 = vsub.f32 %v11932_v14, %v12197_v47  ;;  %v18830_v53 = vsub.f32 %v11947_v55, %v12197_v47 }
 0x1d9   :  { %v12531_v6 = vmul.f32 %v12347_v20, %v18831_v25  ;;  %v18832_v30 = vsub.f32 %v11944_v48, %v12197_v47  ;;  %1128 = vst [vmem:[#allocation2 + $0x1f9] sm:$0xff] %v1058_v35  ;;  %v18836_v25 = vsub.f32 %v11964_v1, %v12197_v47  ;;  %v18837_v35 = vsub.f32 %v11972_v23, %v12197_v47 }
 0x1da   :  { %v12513_v43 = vmul.f32 %v12347_v20, %v18828_v45  ;;  %v12519_v5 = vmul.f32 %v12347_v20, %v18829_v21  ;;  %v12525_v16 = vmul.f32 %v12347_v20, %v18830_v53  ;;  %v18833_v45 = vsub.f32 %v11952_v42, %v12197_v47 }
 0x1db   :  { %v12537_v14 = vmul.f32 %v12347_v20, %v18832_v30  ;;  %v18834_v21 = vsub.f32 %v11967_v12, %v12197_v47  ;;  %v18835_v53 = vsub.f32 %v11974_v28, %v12197_v47  ;;  %v12561_v42 = vmul.f32 %v12347_v20, %v18836_v25 }
 0x1dc   :  { %v12543_v55 = vmul.f32 %v12347_v20, %v18833_v45  ;;  %v12567_v12 = vmul.f32 %v12347_v20, %v18837_v35  ;;  %v18838_v30 = vsub.f32 %v11987_v0, %v12197_v47  ;;  %v18839_v45 = vsub.f32 %v11994_v44, %v12197_v47 }
 0x1dd   :  { %v12549_v51 = vmul.f32 %v12347_v20, %v18834_v21  ;;  %v12555_v48 = vmul.f32 %v12347_v20, %v18835_v53  ;;  %v18840_v21 = vsub.f32 %v11984_v59, %v12197_v47  ;;  %v18841_v53 = vsub.f32 %v11992_v50, %v12197_v47 }
 0x1de   :  { %v12573_v28 = vmul.f32 %v12347_v20, %v18838_v30  ;;  %v12579_v1 = vmul.f32 %v12347_v20, %v18839_v45  ;;  %v18842_v25 = vsub.f32 %v12007_v24, %v12197_v47  ;;  %v18843_v35 = vsub.f32 %v12014_v22, %v12197_v47 }
 0x1df   :  { %v12585_v23 = vmul.f32 %v12347_v20, %v18840_v21  ;;  %v12591_v0 = vmul.f32 %v12347_v20, %v18841_v53  ;;  %v18844_v30 = vsub.f32 %v12004_v62, %v12197_v47  ;;  %v18845_v45 = vsub.f32 %v12012_v18, %v12197_v47 }
 0x1e0   :  { %v12597_v44 = vmul.f32 %v12347_v20, %v18842_v25  ;;  %v12603_v59 = vmul.f32 %v12347_v20, %v18843_v35  ;;  %v18846_v21 = vsub.f32 %v12027_v37, %v12197_v47  ;;  %v18847_v53 = vsub.f32 %v18773_v19, %v12197_v47 }
 0x1e1   :  { %v12609_v50 = vmul.f32 %v12347_v20, %v18844_v30  ;;  %v12615_v24 = vmul.f32 %v12347_v20, %v18845_v45  ;;  %v18848_v25 = vsub.f32 %v18774_v41, %v12197_v47  ;;  %v18849_v35 = vsub.f32 %v18775_v40, %v12197_v47 }
 0x1e2   :  { %v12621_v22 = vmul.f32 %v12347_v20, %v18846_v21  ;;  %v12627_v62 = vmul.f32 %v12347_v20, %v18847_v53  ;;  %v18850_v30 = vsub.f32 %v18776_v32, %v12197_v47  ;;  %v18851_v45 = vsub.f32 %v18777_v33, %v12197_v47  ;;  %v18853_v21 = vld [vmem:[#allocation49_spill] sm:$0xff] }
 0x1e3   :  { %v12633_v18 = vmul.f32 %v12347_v20, %v18848_v25  ;;  %v12639_v37 = vmul.f32 %v12347_v20, %v18849_v35  ;;  %v18854_v53 = vsub.f32 %v18853_v21, %v12197_v47  ;;  %v18856_v25 = vld [vmem:[#allocation51_spill] sm:$0xff] }
 0x1e4   :  { %v12645_v19 = vmul.f32 %v12347_v20, %v18850_v30  ;;  %v12651_v41 = vmul.f32 %v12347_v20, %v18851_v45  ;;  %v18857_v35 = vsub.f32 %v18856_v25, %v12197_v47  ;;  %v18859_v30 = vld [vmem:[#allocation56_spill] sm:$0xff] }
 0x1e5   :  { %v12657_v40 = vmul.f32 %v12347_v20, %v18854_v53  ;;  %v18860_v3 = vsub.f32 %v18859_v30, %v12197_v47  ;;  %v18862_v45 = vld [vmem:[#allocation60_spill] sm:$0xff]  ;;  %v18865_v53 = vld [vmem:[#allocation55_spill] sm:$0xff] }
 0x1e6   :  { %18852 = vst [vmem:[#allocation70_spill] sm:$0xff] %v12651_v41  ;;  %v12663_v32 = vmul.f32 %v12347_v20, %v18857_v35  ;;  %v18863_v41 = vsub.f32 %v18862_v45, %v12197_v47  ;;  %v18868_v35 = vld [vmem:[#allocation59_spill] sm:$0xff] }
 0x1e7   :  { %18855 = vst [vmem:[#allocation69_spill] sm:$0xff] %v12657_v40  ;;  %v12669_v33 = vmul.f32 %v12347_v20, %v18860_v3  ;;  %v18866_v40 = vsub.f32 %v18865_v53, %v12197_v47  ;;  %v18871_v3 = vld [vmem:[#allocation62_spill] sm:$0xff] }
 0x1e8   :  { %18858 = vst [vmem:[#allocation71_spill] sm:$0xff] %v12663_v32  ;;  %v12675_v21 = vmul.f32 %v12347_v20, %v18863_v41  ;;  %v18869_v32 = vsub.f32 %v18868_v35, %v12197_v47  ;;  %v18874_v41 = vld [vmem:[#allocation64_spill] sm:$0xff] }
 0x1e9   :  { %18861 = vst [vmem:[#allocation49_spill] sm:$0xff] %v12669_v33  ;;  %v12681_v25 = vmul.f32 %v12347_v20, %v18866_v40  ;;  %v18872_v33 = vsub.f32 %v18871_v3, %v12197_v47  ;;  %v18877_v40 = vld [vmem:[#allocation61_spill] sm:$0xff] }
 0x1ea   :  { %18864 = vst [vmem:[#allocation51_spill] sm:$0xff] %v12675_v21  ;;  %v12687_v30 = vmul.f32 %v12347_v20, %v18869_v32  ;;  %v18875_v21 = vsub.f32 %v18874_v41, %v12197_v47  ;;  %v18879_v32 = vld [vmem:[#allocation63_spill] sm:$0xff] }
 0x1eb   :  { %18867 = vst [vmem:[#allocation56_spill] sm:$0xff] %v12681_v25  ;;  %v12693_v45 = vmul.f32 %v12347_v20, %v18872_v33  ;;  %v18878_v25 = vsub.f32 %v18877_v40, %v12197_v47  ;;  %v18881_v33 = vld [vmem:[#allocation66_spill] sm:$0xff] }
 0x1ec   :  { %18870 = vst [vmem:[#allocation60_spill] sm:$0xff] %v12687_v30  ;;  %v12699_v53 = vmul.f32 %v12347_v20, %v18875_v21  ;;  %v18880_v30 = vsub.f32 %v18879_v32, %v12197_v47  ;;  %v18883_v21 = vld [vmem:[#allocation68_spill] sm:$0xff] }
 0x1ed   :  { %18873 = vst [vmem:[#allocation55_spill] sm:$0xff] %v12693_v45  ;;  %v12705_v35 = vmul.f32 %v12347_v20, %v18878_v25  ;;  %v18882_v45 = vsub.f32 %v18881_v33, %v12197_v47  ;;  %v18885_v25 = vsub.f32 %v18790_v31, %v12197_v47 }
 0x1ee   :  { %18876 = vst [vmem:[#allocation59_spill] sm:$0xff] %v12699_v53  ;;  %v12711_v3 = vmul.f32 %v12347_v20, %v18880_v30  ;;  %v18884_v53 = vsub.f32 %v18883_v21, %v12197_v47  ;;  %v18886_v30 = vsub.f32 %v18791_v7, %v12197_v47 }
 0x1ef   :  { %v12717_v41 = vmul.f32 %v12347_v20, %v18882_v45  ;;  %v12729_v32 = vmul.f32 %v12347_v20, %v18885_v25  ;;  %v18887_v45 = vsub.f32 %v18792_v46, %v12197_v47  ;;  %v18889_v25 = vsub.f32 %v18794_v13, %v12197_v47 }
 0x1f0   :  { %v12723_v40 = vmul.f32 %v12347_v20, %v18884_v53  ;;  %v12735_v33 = vmul.f32 %v12347_v20, %v18886_v30  ;;  %v18888_v53 = vsub.f32 %v18793_v26, %v12197_v47  ;;  %v12757_v30 = vmul.f32 %v12352_v63, %v12374_v56 }
 0x1f1   :  { %v12741_v21 = vmul.f32 %v12347_v20, %v18887_v45  ;;  %v12753_v7 = vmul.f32 %v12347_v20, %v18889_v25  ;;  %v12761_v46 = vmul.f32 %v12352_v63, %v12380_v9  ;;  %v12765_v26 = vmul.f32 %v12352_v63, %v12386_v49  ;;  %v18898_v25 = vld [vmem:[#allocation49_spill] sm:$0xff] }
 0x1f2   :  { %v12747_v31 = vmul.f32 %v12347_v20, %v18888_v53  ;;  %v12769_v45 = vmul.f32 %v12352_v63, %v12397_v27  ;;  %v12773_v47 = vmul.f32 %v12352_v63, %v12403_v15  ;;  %v12777_v56 = vmul.f32 %v12352_v63, %v12409_v38  ;;  %v18896_v53 = vld [vmem:[#allocation71_spill] sm:$0xff] }
 0x1f3   :  { %v12781_v9 = vmul.f32 %v12352_v63, %v12415_v36  ;;  %v12785_v49 = vmul.f32 %v12352_v63, %v12422_v39  ;;  %v12789_v20 = vmul.f32 %v12352_v63, %v12428_v34  ;;  %v12793_v13 = vmul.f32 %v12352_v63, %v12434_v8 }
 0x1f4   :  { %v12797_v27 = vmul.f32 %v12352_v63, %v12440_v4  ;;  %v12801_v15 = vmul.f32 %v12352_v63, %v12446_v52  ;;  %v12805_v38 = vmul.f32 %v12352_v63, %v12452_v11  ;;  %v12809_v36 = vmul.f32 %v12352_v63, %v12458_v54 }
 0x1f5   :  { %v12813_v39 = vmul.f32 %v12352_v63, %v12465_v61  ;;  %v12817_v34 = vmul.f32 %v12352_v63, %v12471_v10  ;;  %v12821_v8 = vmul.f32 %v12352_v63, %v12477_v57  ;;  %v12825_v4 = vmul.f32 %v12352_v63, %v12483_v17 }
 0x1f6   :  { %v12829_v52 = vmul.f32 %v12352_v63, %v12489_v29  ;;  %v12833_v11 = vmul.f32 %v12352_v63, %v12495_v2  ;;  %v12837_v54 = vmul.f32 %v12352_v63, %v12501_v58  ;;  %v12841_v61 = vmul.f32 %v12352_v63, %v12507_v60 }
 0x1f7   :  { %v12845_v10 = vmul.f32 %v12352_v63, %v12513_v43  ;;  %v12849_v57 = vmul.f32 %v12352_v63, %v12519_v5  ;;  %v12853_v17 = vmul.f32 %v12352_v63, %v12525_v16  ;;  %v12857_v29 = vmul.f32 %v12352_v63, %v12531_v6 }
 0x1f8   :  { %v12861_v2 = vmul.f32 %v12352_v63, %v12537_v14  ;;  %v12865_v58 = vmul.f32 %v12352_v63, %v12543_v55  ;;  %v12869_v60 = vmul.f32 %v12352_v63, %v12549_v51  ;;  %v12873_v43 = vmul.f32 %v12352_v63, %v12555_v48 }
 0x1f9   :  { %v12877_v5 = vmul.f32 %v12352_v63, %v12561_v42  ;;  %v12881_v16 = vmul.f32 %v12352_v63, %v12567_v12  ;;  %v12885_v6 = vmul.f32 %v12352_v63, %v12573_v28  ;;  %v12889_v14 = vmul.f32 %v12352_v63, %v12579_v1 }
 0x1fa   :  { %v12893_v55 = vmul.f32 %v12352_v63, %v12585_v23  ;;  %v12897_v51 = vmul.f32 %v12352_v63, %v12591_v0  ;;  %v12901_v48 = vmul.f32 %v12352_v63, %v12597_v44  ;;  %v12905_v42 = vmul.f32 %v12352_v63, %v12603_v59 }
 0x1fb   :  { %v12909_v12 = vmul.f32 %v12352_v63, %v12609_v50  ;;  %v12913_v28 = vmul.f32 %v12352_v63, %v12615_v24  ;;  %v12917_v1 = vmul.f32 %v12352_v63, %v12621_v22  ;;  %v12921_v23 = vmul.f32 %v12352_v63, %v12627_v62  ;;  %v18892_v50 = vld [vmem:[#allocation70_spill] sm:$0xff]  ;;  %v18894_v22 = vld [vmem:[#allocation69_spill] sm:$0xff] }
 0x1fc   :  { %v12925_v0 = vmul.f32 %v12352_v63, %v12633_v18  ;;  %v12929_v44 = vmul.f32 %v12352_v63, %v12639_v37  ;;  %v12933_v59 = vmul.f32 %v12352_v63, %v12645_v19  ;;  %v12937_v24 = vmul.f32 %v12352_v63, %v18892_v50 }
 0x1fd   :  { %v12941_v62 = vmul.f32 %v12352_v63, %v18894_v22  ;;  %v12945_v18 = vmul.f32 %v12352_v63, %v18896_v53  ;;  %v12949_v37 = vmul.f32 %v12352_v63, %v18898_v25 }
 0x1fe   :  { %18890 = vst [vmem:[#allocation62_spill] sm:$0xff] %v12929_v44  ;;  %18891 = vst [vmem:[#allocation64_spill] sm:$0xff] %v12933_v59  ;;  %v18899_v44 = vld [vmem:[#allocation51_spill] sm:$0xff]  ;;  %v18900_v59 = vld [vmem:[#allocation56_spill] sm:$0xff] }
 0x1ff   :  { %18893 = vst [vmem:[#allocation61_spill] sm:$0xff] %v12937_v24  ;;  %18895 = vst [vmem:[#allocation63_spill] sm:$0xff] %v12941_v62  ;;  %v12953_v19 = vmul.f32 %v12352_v63, %v18899_v44  ;;  %v12957_v50 = vmul.f32 %v12352_v63, %v18900_v59  ;;  %v18901_v24 = vld [vmem:[#allocation60_spill] sm:$0xff]  ;;  %v18902_v62 = vld [vmem:[#allocation55_spill] sm:$0xff]  ;;  %v12973_v44 = vmul.f32 %v12352_v63, %v12705_v35 }
 0x200   :  { %18897 = vst [vmem:[#allocation66_spill] sm:$0xff] %v12945_v18  ;;  %v12961_v22 = vmul.f32 %v12352_v63, %v18901_v24  ;;  %v12965_v53 = vmul.f32 %v12352_v63, %v18902_v62  ;;  %v18903_v18 = vld [vmem:[#allocation59_spill] sm:$0xff]  ;;  %v12977_v59 = vmul.f32 %v12352_v63, %v12711_v3  ;;  %v12981_v24 = vmul.f32 %v12352_v63, %v12717_v41 }
 0x201   :  { %v12969_v25 = vmul.f32 %v12352_v63, %v18903_v18  ;;  %v12985_v62 = vmul.f32 %v12352_v63, %v12723_v40  ;;  %v12989_v18 = vmul.f32 %v12352_v63, %v12729_v32  ;;  %v12993_v35 = vmul.f32 %v12352_v63, %v12735_v33 }
 0x202   :  { %v12997_v3 = vmul.f32 %v12352_v63, %v12741_v21  ;;  %v13001_v41 = vmul.f32 %v12352_v63, %v12747_v31  ;;  %v13005_v40 = vmul.f32 %v12352_v63, %v12753_v7 }
 0x203   :  { %18904 = vst [vmem:[#allocation68_spill] sm:$0xff] %v12985_v62  ;;  %v18905_v62 = vld [vmem:[#allocation67_spill] sm:$0xff] }
 0x204   :  { %v13009_v32 = vadd.f32 %v18905_v62, %v12757_v30  ;;  %v13013_v33 = vadd.f32 %v18905_v62, %v12761_v46  ;;  %v13017_v21 = vadd.f32 %v18905_v62, %v12765_v26  ;;  %v13021_v31 = vadd.f32 %v18905_v62, %v12769_v45 }
 0x205   :  { %v13025_v63 = vadd.f32 %v18905_v62, %v12773_v47  ;;  %v13029_v7 = vadd.f32 %v18905_v62, %v12777_v56  ;;  %v13033_v30 = vadd.f32 %v18905_v62, %v12781_v9  ;;  %v13037_v46 = vadd.f32 %v18905_v62, %v12785_v49  ;;  %v13047_v47 = vld [vmem:[#allocation8] sm:$0xff]  }
 0x206   :  { %v13041_v26 = vadd.f32 %v18905_v62, %v12789_v20  ;;  %v13045_v45 = vadd.f32 %v18905_v62, %v12793_v13  ;;  %18906 = vst [vmem:[#allocation70_spill] sm:$0xff] %v13047_v47  ;;  %v13051_v56 = vadd.f32 %v18905_v62, %v12797_v27  ;;  %v13055_v9 = vadd.f32 %v18905_v62, %v12801_v15 }
 0x207   :  { %v13059_v49 = vadd.f32 %v18905_v62, %v12805_v38  ;;  %v13063_v20 = vadd.f32 %v18905_v62, %v12809_v36  ;;  %v13067_v13 = vadd.f32 %v18905_v62, %v12813_v39  ;;  %v13071_v27 = vadd.f32 %v18905_v62, %v12817_v34  ;;  %10095 = vmatprep.subr.bf16.mxu0 %v13047_v47  ;;  %v18917_v47 = vld [vmem:[#allocation62_spill] sm:$0xff] }
 0x208   :  { %v13075_v15 = vadd.f32 %v18905_v62, %v12821_v8  ;;  %v13079_v38 = vadd.f32 %v18905_v62, %v12825_v4  ;;  %v13084_v36 = vadd.f32 %v18905_v62, %v12829_v52  ;;  %v13088_v39 = vadd.f32 %v18905_v62, %v12833_v11 }
 0x209   :  { %18907 = vst [vmem:[#allocation69_spill] sm:$0xff] %v13067_v13  ;;  %18908 = vst [vmem:[#allocation71_spill] sm:$0xff] %v13071_v27  ;;  %v13092_v34 = vadd.f32 %v18905_v62, %v12837_v54  ;;  %v13096_v8 = vadd.f32 %v18905_v62, %v12841_v61  ;;  %v13100_v4 = vadd.f32 %v18905_v62, %v12845_v10 }
 0x20a   :  { %v13104_v52 = vadd.f32 %v18905_v62, %v12849_v57  ;;  %v13108_v11 = vadd.f32 %v18905_v62, %v12853_v17  ;;  %v13112_v54 = vadd.f32 %v18905_v62, %v12857_v29  ;;  %v13116_v61 = vadd.f32 %v18905_v62, %v12861_v2 }
 0x20b   :  { %v13120_v10 = vadd.f32 %v18905_v62, %v12865_v58  ;;  %v13124_v57 = vadd.f32 %v18905_v62, %v12869_v60  ;;  %v13128_v17 = vadd.f32 %v18905_v62, %v12873_v43  ;;  %v13132_v29 = vadd.f32 %v18905_v62, %v12877_v5 }
 0x20c   :  { %18909 = vst [vmem:[#allocation49_spill] sm:$0xff] %v13104_v52  ;;  %18910 = vst [vmem:[#allocation51_spill] sm:$0xff] %v13112_v54  ;;  %v13136_v2 = vadd.f32 %v18905_v62, %v12881_v16  ;;  %v13140_v58 = vadd.f32 %v18905_v62, %v12885_v6  ;;  %v13144_v60 = vadd.f32 %v18905_v62, %v12889_v14 }
 0x20d   :  { %18911 = vst [vmem:[#allocation56_spill] sm:$0xff] %v13116_v61  ;;  %18912 = vst [vmem:[#allocation60_spill] sm:$0xff] %v13120_v10  ;;  %v13148_v43 = vadd.f32 %v18905_v62, %v12893_v55  ;;  %v13152_v5 = vadd.f32 %v18905_v62, %v12897_v51  ;;  %v13156_v16 = vadd.f32 %v18905_v62, %v12901_v48 }
 0x20e   :  { %v13160_v6 = vadd.f32 %v18905_v62, %v12905_v42  ;;  %v13164_v14 = vadd.f32 %v18905_v62, %v12909_v12  ;;  %v13168_v55 = vadd.f32 %v18905_v62, %v12913_v28  ;;  %v13172_v51 = vadd.f32 %v18905_v62, %v12917_v1 }
 0x20f   :  { %v13176_v48 = vadd.f32 %v18905_v62, %v12921_v23  ;;  %v13180_v42 = vadd.f32 %v18905_v62, %v12925_v0  ;;  %v13184_v12 = vadd.f32 %v18905_v62, %v18917_v47  ;;  %v13204_v47 = vadd.f32 %v18905_v62, %v12949_v37 }
 0x210   :  { %18913 = vst [vmem:[#allocation55_spill] sm:$0xff] %v13164_v14  ;;  %18914 = vst [vmem:[#allocation59_spill] sm:$0xff] %v13168_v55  ;;  %v18918_v14 = vld [vmem:[#allocation64_spill] sm:$0xff]  ;;  %v18919_v55 = vld [vmem:[#allocation61_spill] sm:$0xff]  ;;  %v13224_v37 = vadd.f32 %v18905_v62, %v12969_v25  ;;  %v13244_v25 = vadd.f32 %v18905_v62, %v12989_v18  ;;  %v18138_v18 = vmax.f32 %v13013_v33, 0.0 }
 0x211   :  { %18915 = vst [vmem:[#allocation67_spill] sm:$0xff] %v13172_v51  ;;  %18916 = vst [vmem:[#allocation86_spill] sm:$0xff] %v13176_v48  ;;  %v13188_v28 = vadd.f32 %v18905_v62, %v18918_v14  ;;  %v13192_v1 = vadd.f32 %v18905_v62, %v18919_v55  ;;  %v18920_v51 = vld [vmem:[#allocation63_spill] sm:$0xff]  ;;  %v18921_v48 = vld [vmem:[#allocation66_spill] sm:$0xff]  ;;  %v13208_v14 = vadd.f32 %v18905_v62, %v12953_v19 }
 0x212   :  { %v13196_v23 = vadd.f32 %v18905_v62, %v18920_v51  ;;  %v13200_v0 = vadd.f32 %v18905_v62, %v18921_v48  ;;  %v13212_v55 = vadd.f32 %v18905_v62, %v12957_v50  ;;  %v13216_v51 = vadd.f32 %v18905_v62, %v12961_v22  ;;  %18925 = vst [vmem:[#allocation61_spill] sm:$0xff] %v13244_v25 }
 0x213   :  { %v13220_v48 = vadd.f32 %v18905_v62, %v12965_v53  ;;  %v13228_v19 = vadd.f32 %v18905_v62, %v12973_v44  ;;  %v13232_v50 = vadd.f32 %v18905_v62, %v12977_v59  ;;  %v13236_v22 = vadd.f32 %v18905_v62, %v12981_v24  ;;  %1068 = vst [vmem:[#allocation2 + $0x19] sm:$0xff] %v18138_v18 }
 0x214   :  { %18922 = vst [vmem:[#allocation62_spill] sm:$0xff] %v13216_v51  ;;  %v18923_v51 = vld [vmem:[#allocation68_spill] sm:$0xff]  ;;  %v13248_v44 = vadd.f32 %v18905_v62, %v12993_v35  ;;  %v13252_v59 = vadd.f32 %v18905_v62, %v12997_v3  ;;  %v13256_v24 = vadd.f32 %v18905_v62, %v13001_v41  ;;  %v18139_v25 = vmax.f32 %v13017_v21, 0.0 }
 0x215   :  { %v13240_v53 = vadd.f32 %v18905_v62, %v18923_v51  ;;  %v13260_v51 = vadd.f32 %v18905_v62, %v13005_v40  ;;  %v18140_v35 = vmax.f32 %v13021_v31, 0.0  ;;  %v18142_v62 = vmax.f32 %v13045_v45, 0.0 }
 0x216   :  { %18926 = vst [vmem:[#allocation63_spill] sm:$0xff] %v13248_v44  ;;  %18927 = vst [vmem:[#allocation66_spill] sm:$0xff] %v13252_v59  ;;  %v18141_v44 = vmax.f32 %v13025_v63, 0.0  ;;  %v18143_v40 = vmax.f32 %v13051_v56, 0.0  ;;  %v18930_v18 = vmax.f32 %v13033_v30, 0.0  ;;  %v18931_v3 = vmax.f32 %v13037_v46, 0.0 }
 0x217   :  { %18924 = vst [vmem:[#allocation64_spill] sm:$0xff] %v13240_v53  ;;  %18928 = vst [vmem:[#allocation68_spill] sm:$0xff] %v13256_v24  ;;  %v18137_v53 = vmax.f32 %v13009_v32, 0.0  ;;  %v18938_v59 = vmax.f32 %v13067_v13, 0.0  ;;  %v18944_v13 = vmax.f32 %v13084_v36, 0.0  ;;  %v18949_v41 = vmax.f32 %v13104_v52, 0.0 }
 0x218   :  { %1069 = vst [vmem:[#allocation2 + $0x21] sm:$0xff] %v18139_v25  ;;  %1070 = vst [vmem:[#allocation2 + $0x29] sm:$0xff] %v18140_v35  ;;  %v18932_v35 = vmax.f32 %v13041_v26, 0.0  ;;  %v18939_v25 = vld [vmem:[#allocation82_spill] sm:$0xff]  ;;  %v18954_v52 = vmax.f32 %v13120_v10, 0.0  ;;  %v18961_v10 = vmax.f32 %v13136_v2, 0.0 }
 0x219   :  { %1067 = vst [vmem:[#allocation2 + $0x11] sm:$0xff] %v18137_v53  ;;  %1071 = vst [vmem:[#allocation2 + $0x31] sm:$0xff] %v18141_v44  ;;  %v18929_v53 = vmax.f32 %v13029_v7, 0.0  ;;  %vm18319_vm6 = vcmp.ge.s32.totalorder %v18939_v25, 1  ;;  %v18940_v44 = vld [vmem:[#allocation83_spill] sm:$0xff]  ;;  %v1042_v24 = vmax.f32 %v13192_v1, 0.0 }
 0x21a   :  { %1073 = vst [vmem:[#allocation2 + $0x41] sm:$0xff] %v18930_v18  ;;  %1074 = vst [vmem:[#allocation2 + $0x49] sm:$0xff] %v18931_v3  ;;  %v18934_v18 = vld [vmem:[#allocation81_spill] sm:$0xff]  ;;  %vm18325_vm7 = vcmp.ge.s32.totalorder %v18940_v44, 1  ;;  %v1041_v3 = vmax.f32 %v13188_v28, 0.0  ;;  %v1045_v28 = vmax.f32 %v13204_v47, 0.0 }
 0x21b   :  { %1072 = vst [vmem:[#allocation2 + $0x39] sm:$0xff] %v18929_v53  ;;  %1075 = vst [vmem:[#allocation2 + $0x51] sm:$0xff] %v18932_v35  ;;  %v18933_v53 = vld [vmem:[#allocation80_spill] sm:$0xff]  ;;  %vm18334_vm5 = vcmp.ge.s32.totalorder %v18934_v18, 1  ;;  %v18935_v35 = vmax.f32 %v13055_v9, 0.0  ;;  %v1046_v1 = vmax.f32 %v13208_v14, 0.0 }
 0x21c   :  { %1076 = vst [vmem:[#allocation2 + $0x59] sm:$0xff] %v18142_v62  ;;  %1077 = vst [vmem:[#allocation2 + $0x61] sm:$0xff] %v18143_v40  ;;  %vm18322_vm4 = vcmp.ge.s32.totalorder %v18933_v53, 1  ;;  %v18936_v62 = vmax.f32 %v13059_v49, 0.0  ;;  %v18937_v40 = vmax.f32 %v13063_v20, 0.0  ;;  %v1050_v47 = vmax.f32 %v13224_v37, 0.0 }
 0x21d   :  { %1078 = vst [vmem:[#allocation2 + $0x69] sm:$0xff] %v18935_v35  ;;  %1081 = vst [vmem:[#allocation2 + $0x81] sm:$0xff] %v18938_v59  ;;  %v18943_v59 = vmax.f32 %v13079_v38, 0.0  ;;  %v1039_v35 = vmax.f32 %v13180_v42, 0.0  ;;  %v1043_v42 = vmax.f32 %v13196_v23, 0.0  ;;  %v1047_v23 = vmax.f32 %v13212_v55, 0.0 }
 0x21e   :  { %1079 = vst [vmem:[#allocation2 + $0x71] sm:$0xff] %v18936_v62  ;;  %1080 = vst [vmem:[#allocation2 + $0x79] sm:$0xff] %v18937_v40  ;;  %v18941_v62 = vmax.f32 %v13071_v27, 0.0  ;;  %v18942_v40 = vmax.f32 %v13075_v15, 0.0  ;;  %v18945_v27 = vmax.f32 %v13088_v39, 0.0  ;;  %v1051_v14 = vmax.f32 %v13228_v19, 0.0 }
 0x21f   :  { %1084 = vst [vmem:[#allocation2 + $0x99] sm:$0xff] %v18943_v59  ;;  %1085 = vst [vmem:[#allocation2 + $0xa1] sm:$0xff] %v18944_v13  ;;  %v18948_v59 = vmax.f32 %v13100_v4, 0.0  ;;  %v18953_v13 = vld [vmem:[#allocation55_spill] sm:$0xff]  ;;  %v1052_v55 = vmax.f32 %v13232_v50, 0.0  ;;  %v19155_v25 = vmov 0 }
 0x220   :  { %1082 = vst [vmem:[#allocation2 + $0x89] sm:$0xff] %v18941_v62  ;;  %1083 = vst [vmem:[#allocation2 + $0x91] sm:$0xff] %v18942_v40  ;;  %v18946_v62 = vmax.f32 %v13092_v34, 0.0  ;;  %v18947_v40 = vmax.f32 %v13096_v8, 0.0  ;;  %v19157_v44 = vmov 0  ;;  %v19160_v18 = vld [vmem:[#allocation77_spill] sm:$0xff] }
 0x221   :  { %1086 = vst [vmem:[#allocation2 + $0xa9] sm:$0xff] %v18945_v27  ;;  %1089 = vst [vmem:[#allocation2 + $0xc1] sm:$0xff] %v18948_v59  ;;  %v18950_v27 = vmax.f32 %v13108_v11, 0.0  ;;  %v18965_v59 = vmax.f32 %v13152_v5, 0.0 }
 0x222   :  { %1087 = vst [vmem:[#allocation2 + $0xb1] sm:$0xff] %v18946_v62  ;;  %1088 = vst [vmem:[#allocation2 + $0xb9] sm:$0xff] %v18947_v40  ;;  %v18951_v62 = vmax.f32 %v13112_v54, 0.0  ;;  %v18952_v40 = vmax.f32 %v13116_v61, 0.0  ;;  %v18959_v61 = vld [vmem:[#allocation67_spill] sm:$0xff]  ;;  %v18960_v54 = vld [vmem:[#allocation86_spill] sm:$0xff] }
 0x223   :  { %1090 = vst [vmem:[#allocation2 + $0xc9] sm:$0xff] %v18949_v41  ;;  %1091 = vst [vmem:[#allocation2 + $0xd1] sm:$0xff] %v18950_v27  ;;  %v18955_v41 = vmax.f32 %v13124_v57, 0.0  ;;  %v18956_v27 = vmax.f32 %v13128_v17, 0.0 }
 0x224   :  { %1092 = vst [vmem:[#allocation2 + $0xd9] sm:$0xff] %v18951_v62  ;;  %1093 = vst [vmem:[#allocation2 + $0xe1] sm:$0xff] %v18952_v40  ;;  %v18957_v62 = vmax.f32 %v13132_v29, 0.0  ;;  %v18958_v40 = vld [vmem:[#allocation59_spill] sm:$0xff] }
 0x225   :  { %1094 = vst [vmem:[#allocation2 + $0xe9] sm:$0xff] %v18954_v52  ;;  %1095 = vst [vmem:[#allocation2 + $0xf1] sm:$0xff] %v18955_v41  ;;  %v18962_v52 = vmax.f32 %v13140_v58, 0.0  ;;  %v18963_v41 = vmax.f32 %v13144_v60, 0.0 }
 0x226   :  { %1096 = vst [vmem:[#allocation2 + $0xf9] sm:$0xff] %v18956_v27  ;;  %1097 = vst [vmem:[#allocation2 + $0x101] sm:$0xff] %v18957_v62  ;;  %v18964_v27 = vmax.f32 %v13148_v43, 0.0  ;;  %v1040_v62 = vmax.f32 %v13184_v12, 0.0  ;;  %v1044_v12 = vmax.f32 %v13200_v0, 0.0  ;;  %v1049_v0 = vmax.f32 %v13220_v48, 0.0 }
 0x227   :  { %1098 = vst [vmem:[#allocation2 + $0x109] sm:$0xff] %v18961_v10  ;;  %1099 = vst [vmem:[#allocation2 + $0x111] sm:$0xff] %v18962_v52  ;;  %v18966_v10 = vmax.f32 %v13156_v16, 0.0  ;;  %v18967_v52 = vmax.f32 %v13160_v6, 0.0  ;;  %v18975_v48 = vld [vmem:[#allocation63_spill] sm:$0xff] }
 0x228   :  { %1100 = vst [vmem:[#allocation2 + $0x119] sm:$0xff] %v18963_v41  ;;  %1101 = vst [vmem:[#allocation2 + $0x121] sm:$0xff] %v18964_v27  ;;  %v18968_v41 = vmax.f32 %v18953_v13, 0.0  ;;  %v18969_v27 = vmax.f32 %v18958_v40, 0.0  ;;  %v1056_v37 = vmax.f32 %v18975_v48, 0.0 }
 0x229   :  { %1102 = vst [vmem:[#allocation2 + $0x129] sm:$0xff] %v18965_v59  ;;  %1103 = vst [vmem:[#allocation2 + $0x131] sm:$0xff] %v18966_v10  ;;  %v18970_v59 = vmax.f32 %v18959_v61, 0.0  ;;  %v18971_v10 = vmax.f32 %v18960_v54, 0.0 }
 0x22a   :  { %1104 = vst [vmem:[#allocation2 + $0x139] sm:$0xff] %v18967_v52  ;;  %1105 = vst [vmem:[#allocation2 + $0x141] sm:$0xff] %v18968_v41  ;;  %v18972_v52 = vld [vmem:[#allocation62_spill] sm:$0xff] }
 0x22b   :  { %1106 = vst [vmem:[#allocation2 + $0x149] sm:$0xff] %v18969_v27  ;;  %1107 = vst [vmem:[#allocation2 + $0x151] sm:$0xff] %v18970_v59  ;;  %v1048_v41 = vmax.f32 %v18972_v52, 0.0  ;;  %v1053_v27 = vmax.f32 %v13236_v22, 0.0  ;;  %v18973_v59 = vld [vmem:[#allocation64_spill] sm:$0xff]  ;;  %v18976_v52 = vld [vmem:[#allocation66_spill] sm:$0xff] }
 0x22c   :  { %1108 = vst [vmem:[#allocation2 + $0x159] sm:$0xff] %v18971_v10  ;;  %1109 = vst [vmem:[#allocation2 + $0x161] sm:$0xff] %v1039_v35  ;;  %v1054_v54 = vmax.f32 %v18973_v59, 0.0  ;;  %v18974_v10 = vld [vmem:[#allocation61_spill] sm:$0xff]  ;;  %v1057_v19 = vmax.f32 %v18976_v52, 0.0  ;;  %v18980_v22 = vmax.f32 %v13009_v32, 0.0 }
 0x22d   :  { %1110 = vst [vmem:[#allocation2 + $0x169] sm:$0xff] %v1040_v62  ;;  %1111 = vst [vmem:[#allocation2 + $0x171] sm:$0xff] %v1041_v3  ;;  %v1055_v35 = vmax.f32 %v18974_v10, 0.0  ;;  %v18977_v62 = vld [vmem:[#allocation68_spill] sm:$0xff]  ;;  %v18987_v32 = vmax.f32 %v13029_v7, 0.0  ;;  %v18993_v7 = vmax.f32 %v13055_v9, 0.0 }
 0x22e   :  { %1112 = vst [vmem:[#allocation2 + $0x179] sm:$0xff] %v1042_v24  ;;  %1113 = vst [vmem:[#allocation2 + $0x181] sm:$0xff] %v1043_v42  ;;  %v1059_v3 = vmax.f32 %v18977_v62, 0.0  ;;  %v1060_v24 = vmax.f32 %v13260_v51, 0.0  ;;  %v18981_v51 = vmax.f32 %v13013_v33, 0.0  ;;  %v18988_v33 = vmax.f32 %v13033_v30, 0.0 }
 0x22f   :  { %1114 = vst [vmem:[#allocation2 + $0x189] sm:$0xff] %v1044_v12  ;;  %1115 = vst [vmem:[#allocation2 + $0x191] sm:$0xff] %v1045_v28  ;;  %v18984_v28 = vmax.f32 %v13017_v21, 0.0  ;;  %v18991_v21 = vmax.f32 %v13045_v45, 0.0  ;;  %v18994_v30 = vmax.f32 %v13059_v49, 0.0  ;;  %v18996_v10 = vld [vmem:[#allocation69_spill] sm:$0xff] }
 0x230   :  { %1116 = vst [vmem:[#allocation2 + $0x199] sm:$0xff] %v1046_v1  ;;  %1117 = vst [vmem:[#allocation2 + $0x1a1] sm:$0xff] %v1047_v23  ;;  %v8705_v42 = vpack.c.bf16 %v18981_v51, %v18980_v22  ;;  %v18985_v1 = vmax.f32 %v13021_v31, 0.0  ;;  %v19001_v9 = vmax.f32 %v13079_v38, 0.0  ;;  %v19002_v49 = vmax.f32 %v13084_v36, 0.0  ;;  %v19007_v38 = vld [vmem:[#allocation85_spill] sm:$0xff] }
 0x231   :  { %1118 = vst [vmem:[#allocation2 + $0x1a9] sm:$0xff] %v1048_v41  ;;  %1119 = vst [vmem:[#allocation2 + $0x1b1] sm:$0xff] %v1049_v0  ;;  %v18989_v0 = vmax.f32 %v13037_v46, 0.0  ;;  %v18995_v46 = vmax.f32 %v13063_v20, 0.0  ;;  %v19003_v20 = vmax.f32 %v13088_v39, 0.0  ;;  %v19005_v62 = vmax.f32 %v13096_v8, 0.0 }
 0x232   :  { %1120 = vst [vmem:[#allocation2 + $0x1b9] sm:$0xff] %v1050_v47  ;;  %1121 = vst [vmem:[#allocation2 + $0x1c1] sm:$0xff] %v1051_v14  ;;  %v8708_v23 = vpack.c.bf16 %v18985_v1, %v18984_v28  ;;  %v18990_v14 = vmax.f32 %v13041_v26, 0.0  ;;  %v18998_v26 = vld [vmem:[#allocation71_spill] sm:$0xff]  ;;  %10351 = vmatprep.mubr.bf16.mxu1 %v8705_v42  ;;  %vm18307_vm11 = vcmp.ge.s32.totalorder %v19007_v38, 1  ;;  %v19008_v36 = vmax.f32 %v13100_v4, 0.0 }
 0x233   :  { %vm13417_vm8 = vmpackc.low %vm18334_vm5, %vm18322_vm4  ;;  %1122 = vst [vmem:[#allocation2 + $0x1c9] sm:$0xff] %v1052_v55  ;;  %v8714_v47 = vpack.c.bf16 %v18989_v0, %v18988_v33  ;;  %v11282_v55 = vld [vmem:[#allocation8 + $0x148] sm:$0xff]   ;;  %v13461_v59 = vpack.c.bf16 %v18995_v46, %v18994_v30  ;;  %v18999_v48 = vmax.f32 %v18998_v26, 0.0  ;;  %v13481_v52 = vpack.c.bf16 %v19003_v20, %v19002_v49  ;;  %v19009_v39 = vld [vmem:[#allocation49_spill] sm:$0xff] }
 0x234   :  { %1123 = vst [vmem:[#allocation2 + $0x1d1] sm:$0xff] %v1053_v27  ;;  %1124 = vst [vmem:[#allocation2 + $0x1d9] sm:$0xff] %v1054_v54  ;;  %v18986_v54 = vmax.f32 %v13025_v63, 0.0  ;;  %v13449_v31 = vpack.c.bf16 %v18991_v21, %v18990_v14  ;;  %v18992_v63 = vmax.f32 %v13051_v56, 0.0  ;;  %10032 = vmatmul.mubr.msk.bf16.vlgmr.msra.gmra.mrb[64].mxu0 %vm13417_vm8, %v8705_v42  ;;  %v19000_v56 = vmax.f32 %v13075_v15, 0.0  ;;  %10352 = vmatmul.mubr.bf16.vlgmr.msra.gmra.mrb[0].mxu1 %v8708_v23  ;;  %v19006_v15 = vld [vmem:[#allocation84_spill] sm:$0xff] }
 0x235   :  { %1125 = vst [vmem:[#allocation2 + $0x1e1] sm:$0xff] %v1055_v35  ;;  %vm13429_vm9 = vmpackc.low %vm18325_vm7, %vm18319_vm6  ;;  %v18997_v35 = vmax.f32 %v18996_v10, 0.0  ;;  %vm18309_vm10 = vcmp.ge.s32.totalorder %v19006_v15, 1  ;;  %v19010_v50 = vmax.f32 %v19009_v39, 0.0  ;;  %v19012_v8 = vld [vmem:[#allocation51_spill] sm:$0xff]  ;;  %v11341_v28 = vld [vmem:[#allocation8 + $0x140] sm:$0xff]  }
 0x236   :  { %v4530_v41 = vpack.c.bf16 %v18987_v32, %v18986_v54  ;;  %1126 = vst [vmem:[#allocation2 + $0x1e9] sm:$0xff] %v1056_v37  ;;  %1127 = vst [vmem:[#allocation2 + $0x1f1] sm:$0xff] %v1057_v19  ;;  %v13455_v27 = vpack.c.bf16 %v18993_v7, %v18992_v63  ;;  %v13475_v37 = vpack.c.bf16 %v19001_v9, %v19000_v56  ;;  %v19004_v19 = vmax.f32 %v13092_v34, 0.0  ;;  %v19014_v12 = vld [vmem:[#allocation47_spill] sm:$0xff]  ;;  %v19016_v32 = vld [vmem:[#allocation56_spill] sm:$0xff] }
 0x237   :  { %1129 = vst [vmem:[#allocation2 + $0x201] sm:$0xff] %v1059_v3  ;;  %1130 = vst [vmem:[#allocation2 + $0x209] sm:$0xff] %v1060_v24  ;;  %v13467_v45 = vpack.c.bf16 %v18999_v48, %v18997_v35  ;;  %v11289_v24 = vld [vmem:[#allocation8 + $0x8] sm:$0xff]   ;;  %10035 = vmatprep.mubr.msk.bf16.mxu0 %vm13429_vm9, %v8708_v23  ;;  %v13497_v22 = vpack.c.bf16 %v19010_v50, %v19008_v36  ;;  %v19011_v34 = vmax.f32 %v13108_v11, 0.0  ;;  %v19013_v51 = vmax.f32 %v19012_v8, 0.0  ;;  %v19018_v4 = vld [vmem:[#allocation60_spill] sm:$0xff] }
 0x238   :  { %v13487_v3 = vpack.c.bf16 %v19005_v62, %v19004_v19  ;;  %10416 = vmatpush3.bf16.msra.mxu1 %v11341_v28  ;;  %10355 = vmatprep.mubr.bf16.mxu1 %v4530_v41  ;;  %v1270_v1 = vshra.s32 %v19014_v12, 4  ;;  %v19015_v23 = vld [vmem:[#allocation50_spill] sm:$0xff]  ;;  %v19017_v33 = vmax.f32 %v19016_v32, 0.0  ;;  %v19019_v0 = vmax.f32 %v19018_v4, 0.0  ;;  %v19022_v7 = vld [vmem:[#allocation48_spill] sm:$0xff]  ;;  %v19025_v35 = vld [vmem:[#allocation65_spill] sm:$0xff] }
 0x239   :  { %v13503_v42 = vpack.c.bf16 %v19013_v51, %v19011_v34  ;;  %v1271_v54 = vshra.s32 %v19015_v23, 4  ;;  %v19020_v21 = vmax.f32 %v13124_v57, 0.0  ;;  %v19021_v11 = vmax.f32 %v13128_v17, 0.0  ;;  %v19023_v30 = vld [vmem:[#allocation46_spill] sm:$0xff]  ;;  %10417 = vmatprep.subr.bf16.mxu1 %v11282_v55  ;;  %v19024_v46 = vld [vmem:[#allocation52_spill] sm:$0xff]  ;;  %v11283_v48 = vld [vmem:[#allocation8 + $0x150] sm:$0xff]  }
 0x23a   :  { %v13511_v14 = vpack.c.bf16 %v19019_v0, %v19017_v33  ;;  %vm18308_vm12 = vcmp.ge.s32.totalorder %v19022_v7, 1  ;;  %vm18295_vm13 = vcmp.ge.s32.totalorder %v19023_v30, 1  ;;  %v1272_v10 = vshra.s32 %v19024_v46, 4  ;;  %v19026_v56 = vld [vmem:[#allocation70_spill] sm:$0xff]  ;;  %v11290_v17 = vld [vmem:[#allocation8 + $0x10] sm:$0xff]   ;;  %vm8710_vm14 = vmpackc.low %vm18307_vm11, %vm18309_vm10 }
 0x23b   :  { %v13517_v63 = vpack.c.bf16 %v19021_v11, %v19020_v21  ;;  %v1273_v26 = vshra.s32 %v19025_v35, 4  ;;  %10096 = vmatpush3.bf16.msra.mxu0 %v19026_v56  ;;  %v19027_v9 = vmax.f32 %v13132_v29, 0.0  ;;  %v19028_v57 = vmax.f32 %v13136_v2, 0.0  ;;  %v19029_v20 = vld [vmem:[#allocation53_spill] sm:$0xff]  ;;  %vm8713_vm15 = vmpackc.low %vm18295_vm13, %vm18308_vm12  ;;  %v11284_v51 = vld [vmem:[#allocation8 + $0x158] sm:$0xff]  }
 0x23c   :  { %10097 = vmatprep.subr.bf16.mxu0 %v11289_v24  ;;  %v13535_v19 = vadd.s32 112, %v19029_v20  ;;  %v13538_v62 = vadd.s32 120, %v19029_v20  ;;  %v19030_v36 = vmax.f32 %v13140_v58, 0.0  ;;  %v19031_v29 = vmax.f32 %v13144_v60, 0.0  ;;  %10418 = vmatpush3.bf16.msra.mxu1 %v11282_v55  ;;  %v11291_v28 = vld [vmem:[#allocation8 + $0x18] sm:$0xff]  }
 0x23d   :  { %v13528_v49 = vpack.c.bf16 %v19028_v57, %v19027_v9  ;;  %v13550_v39 = vand.u32 15, %v1270_v1  ;;  %v13552_v50 = vand.u32 15, %v1271_v54  ;;  %v13555_v34 = vadd.s32 128, %v19029_v20  ;;  %10419 = vmatprep.subr.bf16.mxu1 %v11283_v48  ;;  %10036 = vmatmul.mubr.msk.bf16.gmra.mrb[68].mxu0 %vm8710_vm14, %v4530_v41 }
 0x23e   :  { %v13544_v2 = vpack.c.bf16 %v19031_v29, %v19030_v36  ;;  %v13557_v8 = vand.u32 15, %v1272_v10  ;;  %v13559_v58 = vand.u32 15, %v1273_v26  ;;  %v13562_v60 = vadd.s32 136, %v19029_v20  ;;  %10039 = vmatprep.mubr.msk.bf16.mxu0 %vm8713_vm15, %v8714_v47  ;;  %10356 = vmatmul.mubr.bf16.gmra.mrb[4].mxu1 %v8714_v47 }
 0x23f   :  { %10098 = vmatpush3.bf16.msra.mxu0 %v11289_v24  ;;  %v1274_v55 = vshra.s32 %v13535_v19, 4  ;;  %v1275_v1 = vshra.s32 %v13538_v62, 4  ;;  %v19032_v54 = vmax.f32 %v13148_v43, 0.0  ;;  %v19033_v32 = vmax.f32 %v13152_v5, 0.0  ;;  %10359 = vmatprep.mubr.bf16.mxu1 %v13449_v31  ;;  %v11285_v5 = vld [vmem:[#allocation8 + $0x160] sm:$0xff]  }
 0x240   :  { %10099 = vmatprep.subr.bf16.mxu0 %v11290_v17  ;;  %v19034_v4 = vmax.f32 %v13156_v16, 0.0  ;;  %v19035_v0 = vmax.f32 %v13160_v6, 0.0  ;;  %vm18155_vm3 = vcmp.ge.s32.totalorder %v13550_v39, 1  ;;  %vm18153_vm8 = vcmp.ge.s32.totalorder %v13552_v50, 1  ;;  %10420 = vmatpush3.bf16.msra.mxu1 %v11283_v48  ;;  %v11292_v16 = vld [vmem:[#allocation8 + $0x20] sm:$0xff]  }
 0x241   :  { %v13570_v33 = vpack.c.bf16 %v19033_v32, %v19032_v54  ;;  %v1276_v41 = vshra.s32 %v13555_v34, 4  ;;  %vm18154_vm9 = vcmp.ge.s32.totalorder %v13557_v8, 1  ;;  %vm18152_vm14 = vcmp.ge.s32.totalorder %v13559_v58, 1  ;;  %10421 = vmatprep.subr.bf16.mxu1 %v11284_v51  ;;  %vm13589_vm15 = vmpackc.low %vm18153_vm8, %vm18155_vm3 }
 0x242   :  { %v13576_v24 = vpack.c.bf16 %v19035_v0, %v19034_v4  ;;  %v1277_v43 = vshra.s32 %v13562_v60, 4  ;;  %v13593_v47 = vand.u32 15, %v1274_v55  ;;  %v13595_v21 = vand.u32 15, %v1275_v1  ;;  %vm13601_vm0 = vmpackc.low %vm18152_vm14, %vm18154_vm9  ;;  %v19043_v1 = vld [vmem:[#allocation86_spill] sm:$0xff]  ;;  %v11295_v4 = vld [vmem:[#allocation8 + $0x30] sm:$0xff]  }
 0x243   :  { %10100 = vmatpush3.bf16.msra.mxu0 %v11290_v17  ;;  %v13605_v10 = vand.u32 15, %v1276_v41  ;;  %v13608_v26 = vadd.s32 144, %v19029_v20  ;;  %v13611_v48 = vadd.s32 152, %v19029_v20  ;;  %v19040_v56 = vmax.f32 %v18953_v13, 0.0  ;;  %v11286_v13 = vld [vmem:[#allocation8 + $0x168] sm:$0xff]  }
 0x244   :  { %10101 = vmatprep.subr.bf16.mxu0 %v11291_v28  ;;  %10422 = vmatpush3.bf16.msra.mxu1 %v11284_v51  ;;  %v19041_v9 = vmax.f32 %v18958_v40, 0.0  ;;  %v13619_v17 = vand.u32 15, %v1277_v43  ;;  %v13622_v36 = vadd.s32 160, %v19029_v20  ;;  %v13625_v29 = vadd.s32 168, %v19029_v20  ;;  %v11294_v40 = vld [vmem:[#allocation8 + $0x28] sm:$0xff]  }
 0x245   :  { %10423 = vmatprep.subr.bf16.mxu1 %v11285_v5  ;;  %v19042_v55 = vmax.f32 %v18959_v61, 0.0  ;;  %v19044_v54 = vmax.f32 %v19043_v1, 0.0  ;;  %10040 = vmatmul.mubr.msk.bf16.gmra.mrb[72].mxu0 %vm13589_vm15, %v13449_v31  ;;  %vm18159_vm14 = vcmp.ge.s32.totalorder %v13593_v47, 1  ;;  %vm18157_vm8 = vcmp.ge.s32.totalorder %v13595_v21, 1  ;;  %v11296_v1 = vld [vmem:[#allocation8 + $0x38] sm:$0xff]  }
 0x246   :  { %v13617_v57 = vpack.c.bf16 %v19041_v9, %v19040_v56  ;;  %10043 = vmatprep.mubr.msk.bf16.mxu0 %vm13601_vm0, %v13455_v27  ;;  %10360 = vmatmul.mubr.bf16.gmra.mrb[8].mxu1 %v13455_v27  ;;  %v1278_v61 = vshra.s32 %v13608_v26, 4  ;;  %vm18158_vm15 = vcmp.ge.s32.totalorder %v13605_v10, 1  ;;  %vm18156_vm9 = vcmp.ge.s32.totalorder %v13619_v17, 1  ;;  %v11288_v27 = vld [vmem:[#allocation8 + $0x170] sm:$0xff]   ;;  %vm8722_vm0 = vmpackc.low %vm18157_vm8, %vm18159_vm14 }
 0x247   :  { %v13631_v51 = vpack.c.bf16 %v19044_v54, %v19042_v55  ;;  %10102 = vmatpush3.bf16.msra.mxu0 %v11291_v28  ;;  %10363 = vmatprep.mubr.bf16.mxu1 %v13461_v59  ;;  %v1279_v28 = vshra.s32 %v13611_v48, 4  ;;  %v1280_v31 = vshra.s32 %v13622_v36, 4  ;;  %v1281_v32 = vshra.s32 %v13625_v29, 4  ;;  %vm13657_vm3 = vmpackc.low %vm18156_vm9, %vm18158_vm15  ;;  %v11293_v55 = vld [vmem:[#allocation8 + $0x178] sm:$0xff]  }
 0x248   :  { %10103 = vmatprep.subr.bf16.mxu0 %v11292_v16  ;;  %10424 = vmatpush3.bf16.msra.mxu1 %v11285_v5  ;;  %v13661_v41 = vand.u32 15, %v1278_v61  ;;  %v13666_v5 = vadd.s32 176, %v19029_v20  ;;  %v13676_v56 = vadd.s32 192, %v19029_v20  ;;  %v13679_v9 = vadd.s32 200, %v19029_v20 }
 0x249   :  { %10425 = vmatprep.subr.bf16.mxu1 %v11286_v13  ;;  %v13663_v43 = vand.u32 15, %v1279_v28  ;;  %v13671_v6 = vand.u32 15, %v1280_v31  ;;  %v13673_v11 = vand.u32 15, %v1281_v32  ;;  %v13710_v31 = vadd.s32 208, %v19029_v20 }
 0x24a   :  { %19047 = vst [vmem:[#allocation55_spill] sm:$0xff] %v13679_v9  ;;  %vm18164_vm9 = vcmp.ge.s32.totalorder %v13661_v41, 1  ;;  %v1282_v54 = vshra.s32 %v13666_v5, 4  ;;  %v13713_v32 = vadd.s32 216, %v19029_v20  ;;  %v13720_v0 = vadd.s32 224, %v19029_v20 }
 0x24b   :  { %10104 = vmatpush3.bf16.msra.mxu0 %v11292_v16  ;;  %v13669_v16 = vadd.s32 184, %v19029_v20  ;;  %vm18162_vm8 = vcmp.ge.s32.totalorder %v13663_v43, 1  ;;  %vm18161_vm15 = vcmp.ge.s32.totalorder %v13673_v11, 1  ;;  %vm18337_vm11 = vmmov 1  }
 0x24c   :  { %10105 = vmatprep.subr.bf16.mxu0 %v11294_v40  ;;  %10426 = vmatpush3.bf16.msra.mxu1 %v11286_v13  ;;  %v13705_v61 = vand.u32 15, %v1282_v54  ;;  %19049 = vst [vmem:[#allocation67_spill] sm:$0xff] %v13713_v32  ;;  %v1287_v54 = vshra.s32 %v13713_v32, 4 }
 0x24d   :  { %10427 = vmatprep.subr.bf16.mxu1 %v11288_v27  ;;  %10044 = vmatmul.mubr.msk.bf16.gmra.mrb[76].mxu0 %vm8722_vm0, %v13461_v59  ;;  %v1283_v13 = vshra.s32 %v13669_v16, 4  ;;  %vm18163_vm0 = vcmp.ge.s32.totalorder %v13671_v6, 1  ;;  %v1284_v59 = vshra.s32 %v13676_v56, 4 }
 0x24e   :  { %10047 = vmatprep.mubr.msk.bf16.mxu0 %vm13657_vm3, %v13467_v45  ;;  %10364 = vmatmul.mubr.bf16.gmra.mrb[12].mxu1 %v13467_v45  ;;  %v13695_v45 = vld [vmem:[#allocation8 + $0x180] sm:$0xff]   ;;  %vm8728_vm3 = vmpackc.low %vm18162_vm8, %vm18164_vm9 }
 0x24f   :  { %10106 = vmatpush3.bf16.msra.mxu0 %v11294_v40  ;;  %10367 = vmatprep.mubr.bf16.mxu1 %v13475_v37  ;;  %v1285_v40 = vshra.s32 %v13679_v9, 4  ;;  %vm8731_vm14 = vmpackc.low %vm18161_vm15, %vm18163_vm0  ;;  %v13707_v28 = vand.u32 15, %v1283_v13  ;;  %v13723_v9 = vadd.s32 232, %v19029_v20  ;;  %vm18174_vm15 = vcmp.ge.s32.totalorder %v13705_v61, 1 }
 0x250   :  { %10107 = vmatprep.subr.bf16.mxu0 %v11295_v4  ;;  %10428 = vmatpush3.bf16.msra.mxu1 %v11288_v27  ;;  %v13715_v27 = vand.u32 15, %v1284_v59  ;;  %v13748_v13 = vand.u32 15, %v1287_v54  ;;  %v13751_v59 = vadd.s32 240, %v19029_v20 }
 0x251   :  { %10429 = vmatprep.subr.bf16.mxu1 %v11293_v55  ;;  %19048 = vst [vmem:[#allocation59_spill] sm:$0xff] %v13707_v28  ;;  %19051 = vst [vmem:[#allocation64_spill] sm:$0xff] %v13723_v9  ;;  %vm18172_vm8 = vcmp.ge.s32.totalorder %v13707_v28, 1  ;;  %v13761_v28 = vadd.s32 256, %v19029_v20 }
 0x252   :  { %vm18173_vm0 = vcmp.ge.s32.totalorder %v13715_v27, 1  ;;  %19053 = vst [vmem:[#allocation63_spill] sm:$0xff] %v13748_v13  ;;  %19054 = vst [vmem:[#allocation66_spill] sm:$0xff] %v13751_v59 }
 0x253   :  { %10108 = vmatpush3.bf16.msra.mxu0 %v11295_v4  ;;  %v13717_v4 = vand.u32 15, %v1285_v40  ;;  %v13754_v40 = vadd.s32 248, %v19029_v20  ;;  %19058 = vst [vmem:[#allocation84_spill] sm:$0xff] %v13761_v28 }
 0x254   :  { %10109 = vmatprep.subr.bf16.mxu0 %v11296_v1  ;;  %10430 = vmatpush3.bf16.msra.mxu1 %v11293_v55  ;;  %v1286_v55 = vshra.s32 %v13710_v31, 4 }
 0x255   :  { %19050 = vst [vmem:[#allocation62_spill] sm:$0xff] %v13717_v4  ;;  %10495 = vmatprep.subr.bf16.mxu1 %v13695_v45  ;;  %10048 = vmatmul.mubr.msk.bf16.gmra.mrb[80].mxu0 %vm8728_vm3, %v13475_v37  ;;  %vm18171_vm9 = vcmp.ge.s32.totalorder %v13717_v4, 1  ;;  %v1288_v37 = vshra.s32 %v13720_v0, 4  ;;  %19055 = vst [vmem:[#allocation68_spill] sm:$0xff] %v13754_v40  ;;  %v13764_v4 = vadd.s32 264, %v19029_v20  ;;  %v1291_v54 = vshra.s32 %v13754_v40, 4 }
 0x256   :  { %10051 = vmatprep.mubr.msk.bf16.mxu0 %vm8731_vm14, %v13481_v52  ;;  %10368 = vmatmul.mubr.bf16.gmra.mrb[16].mxu1 %v13481_v52  ;;  %vm8734_vm14 = vmpackc.low %vm18172_vm8, %vm18174_vm15  ;;  %v13746_v52 = vand.u32 15, %v1286_v55  ;;  %vm18184_vm8 = vcmp.ge.s32.totalorder %v13748_v13, 1  ;;  %v1290_v55 = vshra.s32 %v13751_v59, 4  ;;  %v13791_v40 = vadd.s32 272, %v19029_v20 }
 0x257   :  { %10110 = vmatpush3.bf16.msra.mxu0 %v11296_v1  ;;  %10371 = vmatprep.mubr.bf16.mxu1 %v13487_v3  ;;  %v1289_v1 = vshra.s32 %v13723_v9, 4  ;;  %vm8737_vm3 = vmpackc.low %vm18171_vm9, %vm18173_vm0  ;;  %v13756_v9 = vand.u32 15, %v1288_v37  ;;  %19059 = vst [vmem:[#allocation49_spill] sm:$0xff] %v13764_v4  ;;  %v1293_v37 = vshra.s32 %v13764_v4, 4  ;;  %v13801_v13 = vadd.s32 288, %v19029_v20 }
 0x258   :  { %19052 = vst [vmem:[#allocation61_spill] sm:$0xff] %v13746_v52  ;;  %vm18186_vm9 = vcmp.ge.s32.totalorder %v13746_v52, 1  ;;  %19062 = vst [vmem:[#allocation50_spill] sm:$0xff] %v13791_v40 }
 0x259   :  { %19056 = vst [vmem:[#allocation69_spill] sm:$0xff] %v13756_v9  ;;  %v13758_v32 = vand.u32 15, %v1289_v1  ;;  %vm18185_vm0 = vcmp.ge.s32.totalorder %v13756_v9, 1  ;;  %v13788_v1 = vand.u32 15, %v1291_v54  ;;  %v13798_v59 = vand.u32 15, %v1293_v37  ;;  %19066 = vst [vmem:[#allocation52_spill] sm:$0xff] %v13801_v13 }
 0x25b   :  { %19057 = vst [vmem:[#allocation71_spill] sm:$0xff] %v13758_v32  ;;  %vm18183_vm15 = vcmp.ge.s32.totalorder %v13758_v32, 1  ;;  %19061 = vst [vmem:[#allocation47_spill] sm:$0xff] %v13788_v1  ;;  %v13804_v32 = vadd.s32 296, %v19029_v20 }
 0x25c   :  { %19065 = vst [vmem:[#allocation46_spill] sm:$0xff] %v13798_v59 }
 0x25d   :  { %10052 = vmatmul.mubr.msk.bf16.gmra.mrb[84].mxu0 %vm8734_vm14, %v13487_v3  ;;  %v1292_v3 = vshra.s32 %v13761_v28, 4  ;;  %vm8740_vm14 = vmpackc.low %vm18184_vm8, %vm18186_vm9  ;;  %v13794_v28 = vadd.s32 280, %v19029_v20  ;;  %19067 = vst [vmem:[#allocation65_spill] sm:$0xff] %v13804_v32  ;;  %vm18196_vm8 = vcmp.ge.s32.totalorder %v13788_v1, 1  ;;  %vm18195_vm9 = vcmp.ge.s32.totalorder %v13798_v59, 1 }
 0x25e   :  { %10055 = vmatprep.mubr.msk.bf16.mxu0 %vm8737_vm3, %v13497_v22  ;;  %10372 = vmatmul.mubr.bf16.gmra.mrb[20].mxu1 %v13497_v22  ;;  %vm8743_vm3 = vmpackc.low %vm18183_vm15, %vm18185_vm0  ;;  %v13786_v22 = vand.u32 15, %v1290_v55  ;;  %v1294_v55 = vshra.s32 %v13791_v40, 4  ;;  %v13841_v1 = vadd.s32 320, %v19029_v20  ;;  %v13844_v59 = vadd.s32 328, %v19029_v20 }
 0x25f   :  { %10375 = vmatprep.mubr.bf16.mxu1 %v13503_v42  ;;  %19063 = vst [vmem:[#allocation56_spill] sm:$0xff] %v13794_v28  ;;  %v13796_v4 = vand.u32 15, %v1292_v3  ;;  %v1295_v54 = vshra.s32 %v13794_v28, 4  ;;  %v1297_v3 = vshra.s32 %v13804_v32, 4  ;;  %v13831_v28 = vadd.s32 304, %v19029_v20 }
 0x260   :  { %19060 = vst [vmem:[#allocation51_spill] sm:$0xff] %v13786_v22  ;;  %vm18198_vm15 = vcmp.ge.s32.totalorder %v13786_v22, 1  ;;  %19074 = vst [vmem:[#allocation90_spill] sm:$0xff] %v13841_v1 }
 0x261   :  { %19064 = vst [vmem:[#allocation60_spill] sm:$0xff] %v13796_v4  ;;  %vm18197_vm0 = vcmp.ge.s32.totalorder %v13796_v4, 1  ;;  %v13828_v37 = vand.u32 15, %v1295_v54  ;;  %19070 = vst [vmem:[#allocation86_spill] sm:$0xff] %v13831_v28  ;;  %v13838_v40 = vand.u32 15, %v1297_v3 }
 0x262   :  { %19075 = vst [vmem:[#allocation91_spill] sm:$0xff] %v13844_v59 }
 0x263   :  { %19069 = vst [vmem:[#allocation53_spill] sm:$0xff] %v13828_v37  ;;  %19073 = vst [vmem:[#allocation89_spill] sm:$0xff] %v13838_v40 }
 0x265   :  { %10056 = vmatmul.mubr.msk.bf16.gmra.mrb[88].mxu0 %vm8740_vm14, %v13503_v42  ;;  %v1296_v42 = vshra.s32 %v13801_v13, 4  ;;  %vm8746_vm14 = vmpackc.low %vm18196_vm8, %vm18198_vm15  ;;  %v13834_v13 = vadd.s32 312, %v19029_v20  ;;  %vm18208_vm8 = vcmp.ge.s32.totalorder %v13828_v37, 1  ;;  %vm18207_vm15 = vcmp.ge.s32.totalorder %v13838_v40, 1 }
 0x266   :  { %10059 = vmatprep.mubr.msk.bf16.mxu0 %vm8743_vm3, %v13511_v14  ;;  %10376 = vmatmul.mubr.bf16.gmra.mrb[24].mxu1 %v13511_v14  ;;  %vm8749_vm3 = vmpackc.low %vm18195_vm9, %vm18197_vm0  ;;  %v13826_v14 = vand.u32 15, %v1294_v55  ;;  %v1298_v55 = vshra.s32 %v13831_v28, 4  ;;  %v13881_v37 = vadd.s32 352, %v19029_v20  ;;  %v13884_v40 = vadd.s32 360, %v19029_v20 }
 0x267   :  { %10379 = vmatprep.mubr.bf16.mxu1 %v13517_v63  ;;  %19071 = vst [vmem:[#allocation87_spill] sm:$0xff] %v13834_v13  ;;  %v13836_v32 = vand.u32 15, %v1296_v42  ;;  %v1299_v54 = vshra.s32 %v13834_v13, 4  ;;  %v1301_v42 = vshra.s32 %v13844_v59, 4  ;;  %v13871_v13 = vadd.s32 336, %v19029_v20 }
 0x268   :  { %19068 = vst [vmem:[#allocation70_spill] sm:$0xff] %v13826_v14  ;;  %vm18210_vm9 = vcmp.ge.s32.totalorder %v13826_v14, 1  ;;  %19082 = vst [vmem:[#allocation98_spill] sm:$0xff] %v13881_v37 }
 0x269   :  { %19072 = vst [vmem:[#allocation88_spill] sm:$0xff] %v13836_v32  ;;  %vm18209_vm0 = vcmp.ge.s32.totalorder %v13836_v32, 1  ;;  %v13868_v3 = vand.u32 15, %v1299_v54  ;;  %19078 = vst [vmem:[#allocation94_spill] sm:$0xff] %v13871_v13  ;;  %v13878_v28 = vand.u32 15, %v1301_v42  ;;  %v4509_v32 = vld [vmem:[#allocation2 + $0x179] sm:$0xff] }
 0x26a   :  { %19083 = vst [vmem:[#allocation99_spill] sm:$0xff] %v13884_v40 }
 0x26b   :  { %19077 = vst [vmem:[#allocation93_spill] sm:$0xff] %v13868_v3  ;;  %19081 = vst [vmem:[#allocation97_spill] sm:$0xff] %v13878_v28 }
 0x26d   :  { %10060 = vmatmul.mubr.msk.bf16.gmra.mrb[92].mxu0 %vm8746_vm14, %v13517_v63  ;;  %v1300_v63 = vshra.s32 %v13841_v1, 4  ;;  %vm8752_vm14 = vmpackc.low %vm18208_vm8, %vm18210_vm9  ;;  %v13874_v1 = vadd.s32 344, %v19029_v20  ;;  %vm18220_vm8 = vcmp.ge.s32.totalorder %v13868_v3, 1  ;;  %vm18219_vm9 = vcmp.ge.s32.totalorder %v13878_v28, 1 }
 0x26e   :  { %10063 = vmatprep.mubr.msk.bf16.mxu0 %vm8749_vm3, %v13528_v49  ;;  %10380 = vmatmul.mubr.bf16.gmra.mrb[28].mxu1 %v13528_v49  ;;  %vm8755_vm3 = vmpackc.low %vm18207_vm15, %vm18209_vm0  ;;  %v13866_v49 = vand.u32 15, %v1298_v55  ;;  %v1302_v55 = vshra.s32 %v13871_v13, 4  ;;  %v13921_v3 = vadd.s32 384, %v19029_v20  ;;  %v13924_v28 = vadd.s32 392, %v19029_v20 }
 0x26f   :  { %10383 = vmatprep.mubr.bf16.mxu1 %v13544_v2  ;;  %19079 = vst [vmem:[#allocation95_spill] sm:$0xff] %v13874_v1  ;;  %v13876_v59 = vand.u32 15, %v1300_v63  ;;  %v1303_v54 = vshra.s32 %v13874_v1, 4  ;;  %v1305_v63 = vshra.s32 %v13884_v40, 4  ;;  %v13911_v1 = vadd.s32 368, %v19029_v20 }
 0x270   :  { %19076 = vst [vmem:[#allocation92_spill] sm:$0xff] %v13866_v49  ;;  %vm18228_vm15 = vcmp.ge.s32.totalorder %v13866_v49, 1  ;;  %19090 = vst [vmem:[#allocation106_spill] sm:$0xff] %v13921_v3  ;;  %v4508_v49 = vld [vmem:[#allocation2 + $0x171] sm:$0xff] }
 0x271   :  { %19080 = vst [vmem:[#allocation96_spill] sm:$0xff] %v13876_v59  ;;  %vm18221_vm0 = vcmp.ge.s32.totalorder %v13876_v59, 1  ;;  %v13908_v42 = vand.u32 15, %v1303_v54  ;;  %19086 = vst [vmem:[#allocation102_spill] sm:$0xff] %v13911_v1  ;;  %v13918_v13 = vand.u32 15, %v1305_v63  ;;  %v2057_v54 = vld [vmem:[#allocation2 + $0x169] sm:$0xff] }
 0x272   :  { %19091 = vst [vmem:[#allocation107_spill] sm:$0xff] %v13924_v28 }
 0x273   :  { %19085 = vst [vmem:[#allocation101_spill] sm:$0xff] %v13908_v42  ;;  %19089 = vst [vmem:[#allocation105_spill] sm:$0xff] %v13918_v13 }
 0x275   :  { %10064 = vmatmul.mubr.msk.bf16.gmra.mrb[96].mxu0 %vm8752_vm14, %v13544_v2  ;;  %v1304_v2 = vshra.s32 %v13881_v37, 4  ;;  %vm8758_vm14 = vmpackc.low %vm18220_vm8, %vm18228_vm15  ;;  %v13914_v37 = vadd.s32 376, %v19029_v20  ;;  %vm18238_vm8 = vcmp.ge.s32.totalorder %v13908_v42, 1 }
 0x276   :  { %10067 = vmatprep.mubr.msk.bf16.mxu0 %vm8755_vm3, %v13570_v33  ;;  %10384 = vmatmul.mubr.bf16.gmra.mrb[32].mxu1 %v13570_v33  ;;  %vm8761_vm3 = vmpackc.low %vm18219_vm9, %vm18221_vm0  ;;  %v13906_v33 = vand.u32 15, %v1302_v55  ;;  %v2056_v55 = vld [vmem:[#allocation2 + $0x161] sm:$0xff] }
 0x277   :  { %10387 = vmatprep.mubr.bf16.mxu1 %v13576_v24  ;;  %19087 = vst [vmem:[#allocation103_spill] sm:$0xff] %v13914_v37  ;;  %v13916_v40 = vand.u32 15, %v1304_v2  ;;  %v1306_v2 = vshra.s32 %v13911_v1, 4  ;;  %v1307_v63 = vshra.s32 %v13914_v37, 4  ;;  %v8768_v59 = vpack.c.bf16 %v2057_v54, %v2056_v55 }
 0x278   :  { %19084 = vst [vmem:[#allocation100_spill] sm:$0xff] %v13906_v33  ;;  %vm18242_vm9 = vcmp.ge.s32.totalorder %v13906_v33, 1  ;;  %v13961_v54 = vadd.s32 416, %v19029_v20  ;;  %v4513_v33 = vld [vmem:[#allocation2 + $0x199] sm:$0xff] }
 0x279   :  { %19088 = vst [vmem:[#allocation104_spill] sm:$0xff] %v13916_v40  ;;  %vm18241_vm0 = vcmp.ge.s32.totalorder %v13916_v40, 1  ;;  %v13946_v37 = vand.u32 15, %v1306_v2  ;;  %v13948_v1 = vand.u32 15, %v1307_v63  ;;  %v4550_v2 = vpack.c.bf16 %v4509_v32, %v4508_v49  ;;  %v2060_v63 = vld [vmem:[#allocation2 + $0x181] sm:$0xff]  ;;  %v4512_v49 = vld [vmem:[#allocation2 + $0x191] sm:$0xff] }
 0x27a   :  { %19098 = vst [vmem:[#allocation114_spill] sm:$0xff] %v13961_v54 }
 0x27b   :  { %19092 = vst [vmem:[#allocation108_spill] sm:$0xff] %v13946_v37  ;;  %19093 = vst [vmem:[#allocation109_spill] sm:$0xff] %v13948_v1 }
 0x27d   :  { %10068 = vmatmul.mubr.msk.bf16.gmra.mrb[100].mxu0 %vm8758_vm14, %v13576_v24  ;;  %vm18237_vm14 = vcmp.ge.s32.totalorder %v13918_v13, 1  ;;  %v1308_v24 = vshra.s32 %v13921_v3, 4  ;;  %v13951_v3 = vadd.s32 400, %v19029_v20  ;;  %v13964_v13 = vadd.s32 424, %v19029_v20 }
 0x27e   :  { %10071 = vmatprep.mubr.msk.bf16.mxu0 %vm8761_vm3, %v13617_v57  ;;  %10388 = vmatmul.mubr.bf16.gmra.mrb[36].mxu1 %v13617_v57  ;;  %v1309_v57 = vshra.s32 %v13924_v28, 4  ;;  %vm8764_vm3 = vmpackc.low %vm18238_vm8, %vm18242_vm9  ;;  %v13954_v28 = vadd.s32 408, %v19029_v20  ;;  %vm18254_vm8 = vcmp.ge.s32.totalorder %v13948_v1, 1 }
 0x27f   :  { %10391 = vmatprep.mubr.bf16.mxu1 %v13631_v51  ;;  %vm8767_vm15 = vmpackc.low %vm18237_vm14, %vm18241_vm0  ;;  %19094 = vst [vmem:[#allocation110_spill] sm:$0xff] %v13951_v3  ;;  %v13956_v42 = vand.u32 15, %v1308_v24  ;;  %vm18258_vm14 = vcmp.ge.s32.totalorder %v13946_v37, 1  ;;  %v2061_v24 = vld [vmem:[#allocation2 + $0x189] sm:$0xff]  ;;  %v1313_v32 = vshra.s32 %v13964_v13, 4  ;;  %v4517_v37 = vld [vmem:[#allocation2 + $0x1b9] sm:$0xff] }
 0x280   :  { %19095 = vst [vmem:[#allocation111_spill] sm:$0xff] %v13954_v28  ;;  %v13958_v55 = vand.u32 15, %v1309_v57  ;;  %19099 = vst [vmem:[#allocation115_spill] sm:$0xff] %v13964_v13  ;;  %v1310_v57 = vshra.s32 %v13951_v3, 4  ;;  %v1311_v40 = vshra.s32 %v13954_v28, 4  ;;  %v13991_v13 = vadd.s32 440, %v19029_v20 }
 0x281   :  { %19096 = vst [vmem:[#allocation112_spill] sm:$0xff] %v13956_v42  ;;  %vm18257_vm0 = vcmp.ge.s32.totalorder %v13956_v42, 1 }
 0x282   :  { %19097 = vst [vmem:[#allocation113_spill] sm:$0xff] %v13958_v55  ;;  %vm18253_vm9 = vcmp.ge.s32.totalorder %v13958_v55, 1  ;;  %v13983_v28 = vand.u32 15, %v1310_v57  ;;  %v13985_v3 = vand.u32 15, %v1311_v40  ;;  %19103 = vst [vmem:[#allocation119_spill] sm:$0xff] %v13991_v13  ;;  %v14001_v55 = vadd.s32 456, %v19029_v20 }
 0x283   :  { %v4552_v57 = vpack.c.bf16 %v4513_v33, %v4512_v49  ;;  %v2064_v40 = vld [vmem:[#allocation2 + $0x1a1] sm:$0xff]  ;;  %v1315_v42 = vshra.s32 %v13991_v13, 4  ;;  %v4516_v49 = vld [vmem:[#allocation2 + $0x1b1] sm:$0xff] }
 0x284   :  { %19100 = vst [vmem:[#allocation116_spill] sm:$0xff] %v13983_v28  ;;  %19101 = vst [vmem:[#allocation117_spill] sm:$0xff] %v13985_v3  ;;  %v1317_v33 = vshra.s32 %v14001_v55, 4 }
 0x285   :  { %10072 = vmatmul.mubr.msk.bf16.gmra.mrb[104].mxu0 %vm8764_vm3, %v13631_v51  ;;  %v1312_v51 = vshra.s32 %v13961_v54, 4  ;;  %vm8773_vm3 = vmpackc.low %vm18253_vm9, %vm18257_vm0  ;;  %v13988_v54 = vadd.s32 432, %v19029_v20  ;;  %19107 = vst [vmem:[#allocation123_spill] sm:$0xff] %v14001_v55  ;;  %vm18275_vm9 = vcmp.ge.s32.totalorder %v13983_v28, 1  ;;  %v14027_v55 = vadd.s32 472, %v19029_v20 }
 0x286   :  { %10075 = vmatprep.mubr.msk.bf16.mxu0 %vm8767_vm15, %v8768_v59  ;;  %10392 = vmatmul.mubr.bf16.gmra.mrb[40].mxu1 %v8768_v59  ;;  %vm8770_vm15 = vmpackc.low %vm18254_vm8, %vm18258_vm14  ;;  %v8774_v59 = vpack.c.bf16 %v2061_v24, %v2060_v63  ;;  %v13995_v63 = vand.u32 15, %v1313_v32  ;;  %v13998_v24 = vadd.s32 448, %v19029_v20  ;;  %vm18270_vm8 = vcmp.ge.s32.totalorder %v13985_v3, 1 }
 0x287   :  { %10395 = vmatprep.mubr.bf16.mxu1 %v4550_v2  ;;  %19102 = vst [vmem:[#allocation118_spill] sm:$0xff] %v13988_v54  ;;  %v13993_v1 = vand.u32 15, %v1312_v51  ;;  %v2065_v51 = vld [vmem:[#allocation2 + $0x1a9] sm:$0xff]  ;;  %v1314_v32 = vshra.s32 %v13988_v54, 4  ;;  %v14021_v54 = vand.u32 15, %v1315_v42  ;;  %19111 = vst [vmem:[#allocation127_spill] sm:$0xff] %v14027_v55 }
 0x288   :  { %19105 = vst [vmem:[#allocation121_spill] sm:$0xff] %v13995_v63  ;;  %19106 = vst [vmem:[#allocation122_spill] sm:$0xff] %v13998_v24  ;;  %vm18269_vm14 = vcmp.ge.s32.totalorder %v13995_v63, 1  ;;  %v14037_v63 = vadd.s32 488, %v19029_v20  ;;  %v14039_v42 = vld [vmem:[#allocation8 + $0x80] sm:$0xff]  }
 0x289   :  { %19104 = vst [vmem:[#allocation120_spill] sm:$0xff] %v13993_v1  ;;  %vm18271_vm0 = vcmp.ge.s32.totalorder %v13993_v1, 1  ;;  %v14019_v13 = vand.u32 15, %v1314_v32  ;;  %19109 = vst [vmem:[#allocation125_spill] sm:$0xff] %v14021_v54  ;;  %v4554_v32 = vpack.c.bf16 %v4517_v37, %v4516_v49  ;;  %10175 = vmatprep.subr.bf16.mxu0 %v14039_v42  ;;  %v2069_v49 = vld [vmem:[#allocation2 + $0x1c9] sm:$0xff]  ;;  %v4521_v1 = vld [vmem:[#allocation2 + $0x1d9] sm:$0xff] }
 0x28a   :  { %19115 = vst [vmem:[#allocation131_spill] sm:$0xff] %v14037_v63 }
 0x28b   :  { %19108 = vst [vmem:[#allocation124_spill] sm:$0xff] %v14019_v13 }
 0x28d   :  { %10076 = vmatmul.mubr.msk.bf16.gmra.mrb[108].mxu0 %vm8770_vm15, %v4550_v2  ;;  %v1316_v2 = vshra.s32 %v13998_v24, 4  ;;  %vm8776_vm15 = vmpackc.low %vm18270_vm8, %vm18275_vm9  ;;  %v14024_v24 = vadd.s32 464, %v19029_v20  ;;  %vm18290_vm8 = vcmp.ge.s32.totalorder %v14021_v54, 1 }
 0x28e   :  { %10079 = vmatprep.mubr.msk.bf16.mxu0 %vm8773_vm3, %v8774_v59  ;;  %10396 = vmatmul.mubr.bf16.gmra.mrb[44].mxu1 %v8774_v59  ;;  %v8780_v59 = vpack.c.bf16 %v2065_v51, %v2064_v40  ;;  %vm8779_vm3 = vmpackc.low %vm18269_vm14, %vm18271_vm0  ;;  %v14031_v40 = vand.u32 15, %v1317_v33  ;;  %v14034_v51 = vadd.s32 480, %v19029_v20  ;;  %vm18292_vm14 = vcmp.ge.s32.totalorder %v14019_v13, 1 }
 0x28f   :  { %10399 = vmatprep.mubr.bf16.mxu1 %v4552_v57  ;;  %19110 = vst [vmem:[#allocation126_spill] sm:$0xff] %v14024_v24  ;;  %v14029_v3 = vand.u32 15, %v1316_v2  ;;  %v1318_v2 = vshra.s32 %v14024_v24, 4  ;;  %v1319_v33 = vshra.s32 %v14027_v55, 4  ;;  %v4520_v24 = vld [vmem:[#allocation2 + $0x1d1] sm:$0xff] }
 0x290   :  { %19113 = vst [vmem:[#allocation129_spill] sm:$0xff] %v14031_v40  ;;  %19114 = vst [vmem:[#allocation130_spill] sm:$0xff] %v14034_v51  ;;  %v1320_v37 = vshra.s32 %v14034_v51, 4  ;;  %v14066_v51 = vadd.s32 504, %v19029_v20 }
 0x291   :  { %19112 = vst [vmem:[#allocation128_spill] sm:$0xff] %v14029_v3  ;;  %vm18291_vm0 = vcmp.ge.s32.totalorder %v14029_v3, 1  ;;  %v14058_v55 = vand.u32 15, %v1318_v2  ;;  %v14060_v28 = vand.u32 15, %v1319_v33  ;;  %v4556_v3 = vpack.c.bf16 %v4521_v1, %v4520_v24  ;;  %v4525_v1 = vld [vmem:[#allocation2 + $0x1f9] sm:$0xff] }
 0x292   :  { %19119 = vst [vmem:[#allocation135_spill] sm:$0xff] %v14066_v51  ;;  %v14068_v54 = vand.u32 15, %v1320_v37  ;;  %v1323_v33 = vshra.s32 %v14066_v51, 4  ;;  %v2072_v37 = vld [vmem:[#allocation2 + $0x1e1] sm:$0xff] }
 0x293   :  { %19116 = vst [vmem:[#allocation132_spill] sm:$0xff] %v14058_v55  ;;  %19117 = vst [vmem:[#allocation133_spill] sm:$0xff] %v14060_v28 }
 0x294   :  { %19120 = vst [vmem:[#allocation136_spill] sm:$0xff] %v14068_v54 }
 0x295   :  { %10080 = vmatmul.mubr.msk.bf16.gmra.mrb[112].mxu0 %vm8776_vm15, %v4552_v57  ;;  %vm18289_vm15 = vcmp.ge.s32.totalorder %v14031_v40, 1  ;;  %v1321_v57 = vshra.s32 %v14037_v63, 4  ;;  %v14063_v63 = vadd.s32 496, %v19029_v20 }
 0x296   :  { %10083 = vmatprep.mubr.msk.bf16.mxu0 %vm8779_vm3, %v8780_v59  ;;  %10400 = vmatmul.mubr.bf16.gmra.mrb[48].mxu1 %v8780_v59  ;;  %v2068_v59 = vld [vmem:[#allocation2 + $0x1c1] sm:$0xff]  ;;  %vm8782_vm3 = vmpackc.low %vm18290_vm8, %vm18292_vm14  ;;  %vm18298_vm8 = vcmp.ge.s32.totalorder %v14060_v28, 1 }
 0x297   :  { %10403 = vmatprep.mubr.bf16.mxu1 %v4554_v32  ;;  %vm8785_vm9 = vmpackc.low %vm18289_vm15, %vm18291_vm0  ;;  %19118 = vst [vmem:[#allocation134_spill] sm:$0xff] %v14063_v63  ;;  %v8786_v13 = vpack.c.bf16 %v2069_v49, %v2068_v59  ;;  %v14070_v14 = vand.u32 15, %v1321_v57  ;;  %vm18306_vm15 = vcmp.ge.s32.totalorder %v14058_v55, 1  ;;  %v1322_v2 = vshra.s32 %v14063_v63, 4  ;;  %v2073_v57 = vld [vmem:[#allocation2 + $0x1e9] sm:$0xff] }
 0x298   :  { %vm18302_vm0 = vcmp.ge.s32.totalorder %v14068_v54, 1  ;;  %v14089_v59 = vand.u32 15, %v1323_v33  ;;  %v8792_v49 = vpack.c.bf16 %v2073_v57, %v2072_v37  ;;  %v19125_v55 = vmov 0  ;;  %v4526_v57 = vld [vmem:[#allocation2 + $0x201] sm:$0xff]  ;;  %v11305_v54 = vld [vmem:[#allocation8 + $0x88] sm:$0xff]  }
 0x299   :  { %19121 = vst [vmem:[#allocation137_spill] sm:$0xff] %v14070_v14  ;;  %vm18299_vm14 = vcmp.ge.s32.totalorder %v14070_v14, 1  ;;  %v14087_v24 = vand.u32 15, %v1322_v2  ;;  %v19128_v2 = vld [vmem:[#allocation72_spill] sm:$0xff]  ;;  %v19141_v33 = vld [vmem:[#allocation73_spill] sm:$0xff] }
 0x29a   :  { %19123 = vst [vmem:[#allocation139_spill] sm:$0xff] %v14089_v59  ;;  %v1198_v14 = vand.u32 15, %v19128_v2 }
 0x29b   :  { %19122 = vst [vmem:[#allocation138_spill] sm:$0xff] %v14087_v24 }
 0x29d   :  { %10084 = vmatmul.mubr.msk.bf16.gmra.mrb[116].mxu0 %vm8782_vm3, %v4554_v32  ;;  %v1196_v32 = vand.u32 15, %v19029_v20  ;;  %vm8791_vm3 = vmpackc.low %vm18299_vm14, %vm18302_vm0  ;;  %v19124_v20 = vld [vmem:[#allocation54_spill] sm:$0xff]  ;;  %vm18316_vm14 = vcmp.ge.s32.totalorder %v14089_v59, 1  ;;  %v19138_v59 = vmov 0 }
 0x29e   :  { %10087 = vmatprep.mubr.msk.bf16.mxu0 %vm8785_vm9, %v8786_v13  ;;  %10404 = vmatmul.mubr.bf16.gmra.mrb[52].mxu1 %v8786_v13  ;;  %vm8788_vm9 = vmpackc.low %vm18298_vm8, %vm18306_vm15  ;;  %v4524_v13 = vld [vmem:[#allocation2 + $0x1f1] sm:$0xff]  ;;  %v1197_v63 = vand.u32 15, %v19124_v20  ;;  %vm18336_vm8 = vcmp.ge.s32.totalorder %v14087_v24, 1  ;;  %v11342_v20 = vld [vmem:[#allocation2] sm:$0xff]  ;;  %vm14114_vm15 = vcmp.ge.s32.totalorder %v1198_v14, 1  ;;  %v1199_v24 = vand.u32 15, %v19141_v33 }
 0x29f   :  { %10407 = vmatprep.mubr.bf16.mxu1 %v4556_v3  ;;  %v4558_v51 = vpack.c.bf16 %v4525_v1, %v4524_v13  ;;  %vm14092_vm13 = vcmp.ge.s32.totalorder %v1196_v32, 1  ;;  %v4527_v32 = vld [vmem:[#allocation2 + $0x209] sm:$0xff]  ;;  %v19131_v13 = vmov 0  ;;  %v4977_v1 = vld [vmem:[#allocation2 + $0x12] sm:$0xff]  ;;  %v8806_v2 = vpack.c.bf16 %v11342_v20, %v11342_v20 }
 0x2a0   :  { %v19126_v55 = vsel %vm14092_vm13, 4294967295, %v19125_v55  ;;  %vm14104_vm0 = vcmp.le.s32.totalorder %v1197_v63, 14  ;;  %v4559_v63 = vpack.c.bf16 %v4527_v32, %v4526_v57  ;;  %v1646_v14 = vld [vmem:[#allocation2 + $0x10] sm:$0xff]  ;;  %v1648_v57 = vld [vmem:[#allocation2 + $0x20] sm:$0xff]  ;;  %v1649_v32 = vld [vmem:[#allocation2 + $0x28] sm:$0xff] }
 0x2a1   :  { %19127 = vst [vmem:[#allocation54_spill] sm:$0xff] %v19126_v55  ;;  %v19132_v13 = vsel %vm14104_vm0, 4294967295, %v19131_v13  ;;  %vm9125_vm12 = vmpackc.low %vm14104_vm0, %vm18337_vm11  ;;  %v19142_v55 = vld [vmem:[#allocation75_spill] sm:$0xff] }
 0x2a2   :  { %19133 = vst [vmem:[#allocation72_spill] sm:$0xff] %v19132_v13  ;;  %v1201_v28 = vand.u32 15, %v19142_v55  ;;  %v19144_v55 = vmov 0 }
 0x2a5   :  { %10088 = vmatmul.mubr.msk.bf16.gmra.mrb[120].mxu0 %vm8788_vm9, %v4556_v3  ;;  %vm1708_vm9 = vmand %vm18305_vm1, %vm14092_vm13  ;;  %v19130_v3 = vld [vmem:[#allocation74_spill] sm:$0xff] }
 0x2a6   :  { %10091 = vmatprep.mubr.msk.bf16.mxu0 %vm8791_vm3, %v8792_v49  ;;  %10408 = vmatmul.mubr.bf16.gmra.mrb[56].mxu1 %v8792_v49  ;;  %v1200_v37 = vand.u32 15, %v19130_v3  ;;  %vm8794_vm3 = vmpackc.low %vm18316_vm14, %vm18336_vm8  ;;  %v4978_v49 = vld [vmem:[#allocation2 + $0x1a] sm:$0xff]  ;;  %v19135_v3 = vmov 0 }
 0x2a7   :  { %10411 = vmatprep.mubr.bf16.mxu1 %v4558_v51  ;;  %vm8805_vm1 = vmpackc.low %vm18335_vm2, %vm1708_vm9  ;;  %v19136_v3 = vsel %vm14114_vm15, 4294967295, %v19135_v3  ;;  %v9126_v20 = vpack.c.bf16 %v4978_v49, %v4977_v1  ;;  %v19147_v1 = vld [vmem:[#allocation78_spill] sm:$0xff] }
 0x2a8   :  { %19137 = vst [vmem:[#allocation74_spill] sm:$0xff] %v19136_v3  ;;  %vm14121_vm10 = vcmp.ge.s32.totalorder %v1200_v37, 1  ;;  %vm1710_vm9 = vmand %vm18322_vm4, %vm14114_vm15  ;;  %v19143_v37 = vld [vmem:[#allocation76_spill] sm:$0xff]  ;;  %v1204_v49 = vand.u32 15, %v19147_v1 }
 0x2a9   :  { %v19139_v59 = vsel %vm14121_vm10, 4294967295, %v19138_v59  ;;  %vm1712_vm14 = vmand %vm18319_vm6, %vm14121_vm10  ;;  %v1202_v33 = vand.u32 15, %v19143_v37  ;;  %v4981_v37 = vld [vmem:[#allocation2 + $0x32] sm:$0xff]  ;;  %v4982_v1 = vld [vmem:[#allocation2 + $0x3a] sm:$0xff] }
 0x2aa   :  { %19140 = vst [vmem:[#allocation140_spill] sm:$0xff] %v19139_v59  ;;  %v19150_v59 = vmov 0  ;;  %vm14153_vm6 = vmpackc.low %vm18325_vm7, %vm1712_vm14  ;;  %vm14167_vm7 = vcmp.ge.s32.totalorder %v1204_v49, 1  ;;  %v4983_v49 = vld [vmem:[#allocation2 + $0x42] sm:$0xff] }
 0x2ab   :  { %vm14160_vm4 = vcmp.ge.s32.totalorder %v1202_v33, 1  ;;  %v19158_v44 = vsel %vm14167_vm7, 4294967295, %v19157_v44  ;;  %v9132_v33 = vpack.c.bf16 %v4982_v1, %v4981_v37  ;;  %v4986_v37 = vld [vmem:[#allocation2 + $0x5a] sm:$0xff] }
 0x2ac   :  { %v19156_v25 = vsel %vm14160_vm4, 4294967295, %v19155_v25  ;;  %19159 = vst [vmem:[#allocation76_spill] sm:$0xff] %v19158_v44  ;;  %v4987_v44 = vld [vmem:[#allocation2 + $0x62] sm:$0xff] }
 0x2ad   :  { %10092 = vmatmul.mubr.msk.bf16.gmra.mrb[124].mxu0 %vm8794_vm3, %v4558_v51  ;;  %v1647_v51 = vld [vmem:[#allocation2 + $0x18] sm:$0xff]  ;;  %vm14136_vm3 = vcmp.le.s32.totalorder %v1199_v24, 14 }
 0x2ae   :  { %10412 = vmatmul.mubr.bf16.gmra.mrb[60].mxu1 %v4559_v63  ;;  %10111 = vmatprep.mubr.msk.bf16.mxu0 %vm8805_vm1, %v8806_v2  ;;  %v19145_v55 = vsel %vm14136_vm3, 4294967295, %v19144_v55  ;;  %vm14143_vm1 = vmpackc.low %vm18334_vm5, %vm1710_vm9  ;;  %v4979_v63 = vld [vmem:[#allocation2 + $0x22] sm:$0xff]  ;;  %v8809_v3 = vpack.c.bf16 %v1647_v51, %v1646_v14  ;;  %v1203_v14 = vand.u32 15, %v19160_v18  ;;  %v11298_v51 = vld [vmem:[#allocation8 + $0x188] sm:$0xff]   ;;  %vm19162_vm5 = vcmp.ge.s32.totalorder %v19006_v15, 1 }
 0x2af   :  { %10431 = vmatprep.mubr.msk.bf16.mxu1 %vm9125_vm12, %v9126_v20  ;;  %19146 = vst [vmem:[#allocation73_spill] sm:$0xff] %v19145_v55  ;;  %v4980_v20 = vld [vmem:[#allocation2 + $0x2a] sm:$0xff]  ;;  %vm14147_vm12 = vcmp.le.s32.totalorder %v1201_v28, 14  ;;  %vm9128_vm9 = vmpackc.low %vm14136_vm3, %vm18337_vm11  ;;  %v8812_v28 = vpack.c.bf16 %v1649_v32, %v1648_v57  ;;  %v19161_v55 = vld [vmem:[#allocation79_spill] sm:$0xff]  ;;  %v1208_v2 = vand.u32 15, %v19024_v46  ;;  %v1212_v46 = vand.u32 15, %v13555_v34 }
 0x2b0   :  { %v19151_v59 = vsel %vm14147_vm12, 4294967295, %v19150_v59  ;;  %v9129_v53 = vpack.c.bf16 %v4980_v20, %v4979_v63  ;;  %vm9131_vm14 = vmpackc.low %vm14147_vm12, %vm18337_vm11  ;;  %v1205_v13 = vand.u32 15, %v19161_v55  ;;  %v1650_v57 = vld [vmem:[#allocation2 + $0x30] sm:$0xff]  ;;  %v1651_v18 = vld [vmem:[#allocation2 + $0x38] sm:$0xff] }
 0x2b1   :  { %19152 = vst [vmem:[#allocation75_spill] sm:$0xff] %v19151_v59  ;;  %vm1714_vm2 = vmand %vm19162_vm5, %vm14160_vm4  ;;  %v1652_v32 = vld [vmem:[#allocation2 + $0x40] sm:$0xff]  ;;  %v1653_v55 = vld [vmem:[#allocation2 + $0x48] sm:$0xff]  ;;  %vm19167_vm5 = vcmp.ge.s32.totalorder %v19007_v38, 1  ;;  %v8815_v1 = vpack.c.bf16 %v1651_v18, %v1650_v57  ;;  %v19183_v57 = vmov 0  ;;  %v1207_v18 = vand.u32 15, %v19015_v23 }
 0x2b2   :  { %v4984_v20 = vld [vmem:[#allocation2 + $0x4a] sm:$0xff]  ;;  %v11306_v24 = vld [vmem:[#allocation8 + $0x90] sm:$0xff]   ;;  %vm19185_vm4 = vcmp.ge.s32.totalorder %v13550_v39, 1  ;;  %v4991_v34 = vld [vmem:[#allocation2 + $0x82] sm:$0xff] }
 0x2b3   :  { %v1655_v23 = vld [vmem:[#allocation2 + $0x58] sm:$0xff]  ;;  %v1657_v63 = vld [vmem:[#allocation2 + $0x68] sm:$0xff] }
 0x2b4   :  { %v5687_v59 = vld [vmem:[#allocation2 + $0x48] sm:$0xff] }
 0x2b5   :  { %10112 = vmatmul.mubr.msk.bf16.vlgmr.msra.gmra.mrb[64].mxu0 %vm14143_vm1, %v8809_v3  ;;  %vm19163_vm1 = vcmp.ge.s32.totalorder %v19022_v7, 1  ;;  %v1206_v3 = vand.u32 15, %v19014_v12  ;;  %v19170_v12 = vmov 0 }
 0x2b6   :  { %10115 = vmatprep.mubr.msk.bf16.mxu0 %vm14153_vm6, %v8812_v28  ;;  %10432 = vmatmul.mubr.msk.bf16.vlgmr.msra.gmra.mrb[0].mxu1 %vm9128_vm9, %v9129_v53  ;;  %vm1716_vm8 = vmand %vm19163_vm1, %vm14167_vm7  ;;  %vm14187_vm6 = vcmp.le.s32.totalorder %v1203_v14, 14  ;;  %v19164_v53 = vmov 0  ;;  %vm19173_vm1 = vcmp.ge.s32.totalorder %v19023_v30, 1  ;;  %v8818_v14 = vpack.c.bf16 %v1653_v55, %v1652_v32  ;;  %v11307_v55 = vld [vmem:[#allocation8 + $0x98] sm:$0xff]  }
 0x2b7   :  { %10496 = vmatpush3.bf16.msra.mxu1 %v13695_v45  ;;  %10435 = vmatprep.mubr.msk.bf16.mxu1 %vm9131_vm14, %v9132_v33  ;;  %v19165_v53 = vsel %vm14187_vm6, 4294967295, %v19164_v53  ;;  %v11299_v45 = vld [vmem:[#allocation8 + $0x190] sm:$0xff]   ;;  %vm14195_vm9 = vmpackc.low %vm19167_vm5, %vm1714_vm2  ;;  %vm14199_vm14 = vcmp.le.s32.totalorder %v1205_v13, 14  ;;  %vm19176_vm2 = vmmov 1   ;;  %vm14216_vm7 = vcmp.ge.s32.totalorder %v1206_v3, 1  ;;  %v11300_v3 = vld [vmem:[#allocation8 + $0x198] sm:$0xff]  }
 0x2b8   :  { %19166 = vst [vmem:[#allocation78_spill] sm:$0xff] %v19165_v53  ;;  %10497 = vmatprep.subr.bf16.mxu1 %v11298_v51  ;;  %10176 = vmatpush3.bf16.msra.mxu0 %v14039_v42  ;;  %v19171_v12 = vsel %vm14199_vm14, 4294967295, %v19170_v12  ;;  %vm14205_vm11 = vmpackc.low %vm19173_vm1, %vm1716_vm8  ;;  %v4985_v42 = vld [vmem:[#allocation2 + $0x52] sm:$0xff]  ;;  %v19179_v13 = vmov 0  ;;  %v9135_v33 = vpack.c.bf16 %v4984_v20, %v4983_v49  ;;  %vm14227_vm1 = vcmp.ge.s32.totalorder %v1208_v2, 1  ;;  %v4990_v28 = vld [vmem:[#allocation2 + $0x7a] sm:$0xff] }
 0x2b9   :  { %19172 = vst [vmem:[#allocation77_spill] sm:$0xff] %v19171_v12  ;;  %10177 = vmatprep.subr.bf16.mxu0 %v11305_v54  ;;  %vm14212_vm5 = vmpackc.low %vm14187_vm6, %vm19176_vm2  ;;  %v19180_v13 = vsel %vm14216_vm7, 4294967295, %v19179_v13  ;;  %v19184_v57 = vsel %vm14227_vm1, 4294967295, %v19183_v57  ;;  %v1209_v32 = vand.u32 15, %v19025_v35  ;;  %v1654_v49 = vld [vmem:[#allocation2 + $0x50] sm:$0xff]  ;;  %v1210_v2 = vand.u32 15, %v13535_v19 }
 0x2ba   :  { %vm14223_vm8 = vmpackc.low %vm14199_vm14, %vm19176_vm2  ;;  %v19189_v20 = vmov 0  ;;  %v19195_v19 = vmov 0 }
 0x2bb   :  { %10498 = vmatpush3.bf16.msra.mxu1 %v11298_v51  ;;  %v9138_v51 = vpack.c.bf16 %v4986_v37, %v4985_v42  ;;  %vm1718_vm14 = vmand %vm19185_vm4, %vm14216_vm7  ;;  %v11301_v42 = vld [vmem:[#allocation8 + $0x1a0] sm:$0xff]   ;;  %vm19192_vm4 = vcmp.ge.s32.totalorder %v13552_v50, 1  ;;  %vm19209_vm7 = vcmp.ge.s32.totalorder %v13593_v47, 1 }
 0x2bc   :  { %10499 = vmatprep.subr.bf16.mxu1 %v11299_v45  ;;  %10178 = vmatpush3.bf16.msra.mxu0 %v11305_v54  ;;  %v1656_v54 = vld [vmem:[#allocation2 + $0x60] sm:$0xff]  ;;  %v1661_v37 = vld [vmem:[#allocation2 + $0x88] sm:$0xff] }
 0x2bd   :  { %10116 = vmatmul.mubr.msk.bf16.gmra.mrb[68].mxu0 %vm14195_vm9, %v8815_v1  ;;  %10179 = vmatprep.subr.bf16.mxu0 %v11306_v24  ;;  %vm19186_vm9 = vcmp.ge.s32.totalorder %v13557_v8, 1  ;;  %v4988_v1 = vld [vmem:[#allocation2 + $0x6a] sm:$0xff] }
 0x2be   :  { %10119 = vmatprep.mubr.msk.bf16.mxu0 %vm14205_vm11, %v8818_v14  ;;  %10436 = vmatmul.mubr.msk.bf16.gmra.mrb[4].mxu1 %vm14212_vm5, %v9135_v33  ;;  %vm14249_vm6 = vmand %vm19186_vm9, %vm14227_vm1  ;;  %vm14254_vm11 = vcmp.le.s32.totalorder %v1207_v18, 14  ;;  %vm19198_vm9 = vcmp.ge.s32.totalorder %v13559_v58, 1  ;;  %v8821_v14 = vpack.c.bf16 %v1655_v23, %v1654_v49  ;;  %v19203_v18 = vmov 0  ;;  %v4992_v33 = vld [vmem:[#allocation2 + $0x8a] sm:$0xff] }
 0x2bf   :  { %10439 = vmatprep.mubr.msk.bf16.mxu1 %vm14223_vm8, %v9138_v51  ;;  %10500 = vmatpush3.bf16.msra.mxu1 %v11299_v45  ;;  %v19190_v20 = vsel %vm14254_vm11, 4294967295, %v19189_v20  ;;  %vm14261_vm5 = vmpackc.low %vm19192_vm4, %vm1718_vm14  ;;  %vm14265_vm8 = vcmp.le.s32.totalorder %v1209_v32, 14  ;;  %v11308_v45 = vld [vmem:[#allocation8 + $0xa0] sm:$0xff]   ;;  %vm14284_vm4 = vcmp.ge.s32.totalorder %v1210_v2, 1  ;;  %v8824_v51 = vpack.c.bf16 %v1657_v63, %v1656_v54  ;;  %v11302_v2 = vld [vmem:[#allocation8 + $0x1a8] sm:$0xff]  }
 0x2c0   :  { %19191 = vst [vmem:[#allocation79_spill] sm:$0xff] %v19190_v20  ;;  %10501 = vmatprep.subr.bf16.mxu1 %v11300_v3  ;;  %10180 = vmatpush3.bf16.msra.mxu0 %v11306_v24  ;;  %v19196_v19 = vsel %vm14265_vm8, 4294967295, %v19195_v19  ;;  %vm14273_vm1 = vmpackc.low %vm19198_vm9, %vm14249_vm6  ;;  %v4989_v24 = vld [vmem:[#allocation2 + $0x72] sm:$0xff]  ;;  %v19204_v18 = vsel %vm14284_vm4, 4294967295, %v19203_v18  ;;  %v9141_v32 = vpack.c.bf16 %v4988_v1, %v4987_v44  ;;  %vm14295_vm9 = vcmp.ge.s32.totalorder %v1212_v46, 1 }
 0x2c1   :  { %19197 = vst [vmem:[#allocation141_spill] sm:$0xff] %v19196_v19  ;;  %10181 = vmatprep.subr.bf16.mxu0 %v11307_v55  ;;  %vm14280_vm14 = vmpackc.low %vm14254_vm11, %vm19176_vm2  ;;  %v19207_v49 = vmov 0  ;;  %v1211_v23 = vand.u32 15, %v13538_v62  ;;  %v1213_v54 = vand.u32 15, %v13562_v60  ;;  %v11310_v63 = vld [vmem:[#allocation8 + $0xa8] sm:$0xff]   ;;  %v1659_v62 = vld [vmem:[#allocation2 + $0x78] sm:$0xff] }
 0x2c2   :  { %vm14291_vm6 = vmpackc.low %vm14265_vm8, %vm19176_vm2  ;;  %v19208_v49 = vsel %vm14295_vm9, 4294967295, %v19207_v49  ;;  %v1658_v44 = vld [vmem:[#allocation2 + $0x70] sm:$0xff]  ;;  %v1214_v46 = vand.u32 15, %v13608_v26  ;;  %v19213_v1 = vmov 0  ;;  %v19219_v26 = vmov 0  ;;  %v11309_v60 = vld [vmem:[#allocation8 + $0x1b8] sm:$0xff]  }
 0x2c3   :  { %10502 = vmatpush3.bf16.msra.mxu1 %v11300_v3  ;;  %v9144_v3 = vpack.c.bf16 %v4990_v28, %v4989_v24  ;;  %vm1722_vm8 = vmand %vm19209_vm7, %vm14284_vm4  ;;  %v1216_v24 = vand.u32 15, %v13622_v36  ;;  %v11304_v28 = vld [vmem:[#allocation8 + $0x1b0] sm:$0xff]   ;;  %vm19216_vm7 = vcmp.ge.s32.totalorder %v13595_v21, 1  ;;  %vm19231_vm4 = vcmp.ge.s32.totalorder %v13661_v41, 1  ;;  %v14389_v36 = vld [vmem:[#allocation8 + $0x1c0] sm:$0xff]  }
 0x2c4   :  { %10503 = vmatprep.subr.bf16.mxu1 %v11301_v42  ;;  %10182 = vmatpush3.bf16.msra.mxu0 %v11307_v55  ;;  %v1660_v55 = vld [vmem:[#allocation2 + $0x80] sm:$0xff] }
 0x2c5   :  { %10120 = vmatmul.mubr.msk.bf16.gmra.mrb[72].mxu0 %vm14261_vm5, %v8821_v14  ;;  %10183 = vmatprep.subr.bf16.mxu0 %v11308_v45  ;;  %vm19210_vm5 = vcmp.ge.s32.totalorder %v13605_v10, 1  ;;  %v19235_v14 = vmov 0 }
 0x2c6   :  { %10123 = vmatprep.mubr.msk.bf16.mxu0 %vm14273_vm1, %v8824_v51  ;;  %10440 = vmatmul.mubr.msk.bf16.gmra.mrb[8].mxu1 %vm14280_vm14, %v9141_v32  ;;  %vm14317_vm11 = vmand %vm19210_vm5, %vm14295_vm9  ;;  %vm14322_vm1 = vcmp.le.s32.totalorder %v1211_v23, 14  ;;  %vm19222_vm5 = vcmp.ge.s32.totalorder %v13619_v17, 1  ;;  %v4994_v51 = vld [vmem:[#allocation2 + $0x9a] sm:$0xff]  ;;  %v8827_v32 = vpack.c.bf16 %v1659_v62, %v1658_v44  ;;  %v19227_v23 = vmov 0 }
 0x2c7   :  { %10443 = vmatprep.mubr.msk.bf16.mxu1 %vm14291_vm6, %v9144_v3  ;;  %10504 = vmatpush3.bf16.msra.mxu1 %v11301_v42  ;;  %v19214_v1 = vsel %vm14322_vm1, 4294967295, %v19213_v1  ;;  %vm14329_vm14 = vmpackc.low %vm19216_vm7, %vm1722_vm8  ;;  %vm14333_vm6 = vcmp.le.s32.totalorder %v1213_v54, 14  ;;  %v11311_v42 = vld [vmem:[#allocation8 + $0xb0] sm:$0xff]   ;;  %vm14352_vm7 = vcmp.ge.s32.totalorder %v1214_v46, 1  ;;  %v8830_v3 = vpack.c.bf16 %v1661_v37, %v1660_v55  ;;  %v11312_v55 = vld [vmem:[#allocation8 + $0xb8] sm:$0xff]  }
 0x2c8   :  { %19215 = vst [vmem:[#allocation142_spill] sm:$0xff] %v19214_v1  ;;  %10505 = vmatprep.subr.bf16.mxu1 %v11302_v2  ;;  %10184 = vmatpush3.bf16.msra.mxu0 %v11308_v45  ;;  %v19220_v26 = vsel %vm14333_vm6, 4294967295, %v19219_v26  ;;  %vm14341_vm9 = vmpackc.low %vm19222_vm5, %vm14317_vm11  ;;  %v4993_v45 = vld [vmem:[#allocation2 + $0x92] sm:$0xff]  ;;  %v19228_v23 = vsel %vm14352_vm7, 4294967295, %v19227_v23  ;;  %v9147_v54 = vpack.c.bf16 %v4992_v33, %v4991_v34  ;;  %vm14359_vm5 = vcmp.ge.s32.totalorder %v1216_v24, 1  ;;  %v1664_v34 = vld [vmem:[#allocation2 + $0xa0] sm:$0xff] }
 0x2c9   :  { %19221 = vst [vmem:[#allocation143_spill] sm:$0xff] %v19220_v26  ;;  %10185 = vmatprep.subr.bf16.mxu0 %v11310_v63  ;;  %vm14348_vm8 = vmpackc.low %vm14322_vm1, %vm19176_vm2  ;;  %v19229_v44 = vmov 0  ;;  %v1215_v62 = vand.u32 15, %v13611_v48  ;;  %v9150_v46 = vpack.c.bf16 %v4994_v51, %v4993_v45  ;;  %v1662_v48 = vld [vmem:[#allocation2 + $0x90] sm:$0xff]  ;;  %v1218_v37 = vand.u32 15, %v13666_v5  ;;  %v1665_v24 = vld [vmem:[#allocation2 + $0xa8] sm:$0xff] }
 0x2ca   :  { %vm9149_vm11 = vmpackc.low %vm14333_vm6, %vm19176_vm2  ;;  %v19230_v44 = vsel %vm14359_vm5, 4294967295, %v19229_v44  ;;  %v1220_v33 = vand.u32 15, %v13676_v56  ;;  %v4995_v5 = vld [vmem:[#allocation2 + $0xa2] sm:$0xff]  ;;  %v19241_v51 = vmov 0  ;;  %v19257_v45 = vld [vmem:[#allocation59_spill] sm:$0xff]  ;;  %v19259_v56 = vmov 0 }
 0x2cb   :  { %10506 = vmatpush3.bf16.msra.mxu1 %v11302_v2  ;;  %v1217_v2 = vand.u32 15, %v13625_v29  ;;  %vm1726_vm6 = vmand %vm19231_vm4, %vm14352_vm7  ;;  %vm19238_vm4 = vcmp.ge.s32.totalorder %v13663_v43, 1  ;;  %vm19252_vm7 = vcmp.ge.s32.totalorder %v13705_v61, 1  ;;  %v1667_v29 = vld [vmem:[#allocation2 + $0xb8] sm:$0xff] }
 0x2cc   :  { %10507 = vmatprep.subr.bf16.mxu1 %v11304_v28  ;;  %10186 = vmatpush3.bf16.msra.mxu0 %v11310_v63  ;;  %v1663_v63 = vld [vmem:[#allocation2 + $0x98] sm:$0xff] }
 0x2cd   :  { %10124 = vmatmul.mubr.msk.bf16.gmra.mrb[76].mxu0 %vm14329_vm14, %v8827_v32  ;;  %10187 = vmatprep.subr.bf16.mxu0 %v11311_v42  ;;  %vm19232_vm14 = vcmp.ge.s32.totalorder %v13671_v6, 1  ;;  %v4998_v32 = vld [vmem:[#allocation2 + $0xba] sm:$0xff]  ;;  %v8833_v35 = vpack.c.bf16 %v1663_v63, %v1662_v48 }
 0x2ce   :  { %10127 = vmatprep.mubr.msk.bf16.mxu0 %vm14341_vm9, %v8830_v3  ;;  %10444 = vmatmul.mubr.msk.bf16.gmra.mrb[12].mxu1 %vm14348_vm8, %v9147_v54  ;;  %vm14379_vm1 = vmand %vm19232_vm14, %vm14359_vm5  ;;  %vm14384_vm9 = vcmp.le.s32.totalorder %v1215_v62, 14  ;;  %vm19244_vm14 = vcmp.ge.s32.totalorder %v13673_v11, 1  ;;  %v19247_v3 = vmov 0  ;;  %v8836_v54 = vpack.c.bf16 %v1665_v24, %v1664_v34  ;;  %v1669_v34 = vld [vmem:[#allocation2 + $0xc8] sm:$0xff] }
 0x2cf   :  { %10447 = vmatprep.mubr.msk.bf16.mxu1 %vm9149_vm11, %v9150_v46  ;;  %10508 = vmatpush3.bf16.msra.mxu1 %v11304_v28  ;;  %v19236_v14 = vsel %vm14384_vm9, 4294967295, %v19235_v14  ;;  %vm14393_vm8 = vmpackc.low %vm19238_vm4, %vm1726_vm6  ;;  %v4996_v28 = vld [vmem:[#allocation2 + $0xaa] sm:$0xff]  ;;  %vm14397_vm11 = vcmp.le.s32.totalorder %v1217_v2, 14  ;;  %vm14412_vm4 = vcmp.ge.s32.totalorder %v1218_v37, 1  ;;  %v19249_v46 = vmov 0  ;;  %v1668_v37 = vld [vmem:[#allocation2 + $0xc0] sm:$0xff] }
 0x2d0   :  { %19237 = vst [vmem:[#allocation144_spill] sm:$0xff] %v19236_v14  ;;  %10509 = vmatprep.subr.bf16.mxu1 %v11309_v60  ;;  %10188 = vmatpush3.bf16.msra.mxu0 %v11311_v42  ;;  %v19242_v51 = vsel %vm14397_vm11, 4294967295, %v19241_v51  ;;  %vm14405_vm5 = vmpackc.low %vm19244_vm14, %vm14379_vm1  ;;  %v4997_v42 = vld [vmem:[#allocation2 + $0xb2] sm:$0xff]  ;;  %v19248_v3 = vsel %vm14412_vm4, 4294967295, %v19247_v3  ;;  %v9153_v62 = vpack.c.bf16 %v4996_v28, %v4995_v5  ;;  %vm14419_vm14 = vcmp.ge.s32.totalorder %v1220_v33, 1  ;;  %v4999_v5 = vld [vmem:[#allocation2 + $0xc2] sm:$0xff] }
 0x2d1   :  { %19243 = vst [vmem:[#allocation145_spill] sm:$0xff] %v19242_v51  ;;  %10189 = vmatprep.subr.bf16.mxu0 %v11312_v55  ;;  %vm9152_vm6 = vmpackc.low %vm14384_vm9, %vm19176_vm2  ;;  %v19250_v46 = vsel %vm14419_vm14, 4294967295, %v19249_v46  ;;  %v1219_v2 = vand.u32 15, %v13669_v16  ;;  %v9156_v48 = vpack.c.bf16 %v4998_v32, %v4997_v42  ;;  %v1666_v16 = vld [vmem:[#allocation2 + $0xb0] sm:$0xff]  ;;  %vm19253_vm9 = vcmp.ge.s32.totalorder %v13715_v27, 1  ;;  %v5002_v32 = vld [vmem:[#allocation2 + $0xda] sm:$0xff] }
 0x2d2   :  { %vm9155_vm1 = vmpackc.low %vm14397_vm11, %vm19176_vm2  ;;  %v19254_v24 = vmov 0  ;;  %v1224_v33 = vand.u32 15, %v13720_v0  ;;  %v5000_v28 = vld [vmem:[#allocation2 + $0xca] sm:$0xff]  ;;  %v19264_v0 = vmov 0 }
 0x2d3   :  { %10510 = vmatpush3.bf16.msra.mxu1 %v11309_v60  ;;  %v19251_v60 = vld [vmem:[#allocation55_spill] sm:$0xff]  ;;  %vm1730_vm11 = vmand %vm19252_vm7, %vm14412_vm4  ;;  %vm19258_vm7 = vcmp.ge.s32.totalorder %v19257_v45, 1  ;;  %v19262_v42 = vld [vmem:[#allocation62_spill] sm:$0xff] }
 0x2d4   :  { %10190 = vmatpush3.bf16.msra.mxu0 %v11312_v55  ;;  %10575 = vmatprep.subr.bf16.mxu1 %v14389_v36  ;;  %v1221_v63 = vand.u32 15, %v19251_v60  ;;  %vm1732_vm10 = vmand %vm19253_vm9, %vm14419_vm14  ;;  %v1222_v55 = vand.u32 15, %v13710_v31  ;;  %vm19263_vm9 = vcmp.ge.s32.totalorder %v19262_v42, 1  ;;  %v5001_v31 = vld [vmem:[#allocation2 + $0xd2] sm:$0xff] }
 0x2d5   :  { %10128 = vmatmul.mubr.msk.bf16.gmra.mrb[80].mxu0 %vm14393_vm8, %v8833_v35  ;;  %vm14439_vm8 = vcmp.le.s32.totalorder %v1219_v2, 14  ;;  %v8839_v35 = vpack.c.bf16 %v1667_v29, %v1666_v16  ;;  %v19267_v2 = vmov 0  ;;  %v19271_v16 = vld [vmem:[#allocation64_spill] sm:$0xff] }
 0x2d6   :  { %10131 = vmatprep.mubr.msk.bf16.mxu0 %vm14405_vm5, %v8836_v54  ;;  %10448 = vmatmul.mubr.msk.bf16.gmra.mrb[16].mxu1 %vm9152_vm6, %v9153_v62  ;;  %v19255_v24 = vsel %vm14439_vm8, 4294967295, %v19254_v24  ;;  %vm8838_vm5 = vmpackc.low %vm19258_vm7, %vm1730_vm11  ;;  %vm14446_vm6 = vcmp.le.s32.totalorder %v1221_v63, 14  ;;  %vm14455_vm4 = vcmp.ge.s32.totalorder %v1222_v55, 1  ;;  %v8842_v54 = vpack.c.bf16 %v1669_v34, %v1668_v37  ;;  %v1670_v55 = vld [vmem:[#allocation2 + $0xd0] sm:$0xff] }
 0x2d7   :  { %10451 = vmatprep.mubr.msk.bf16.mxu1 %vm9155_vm1, %v9156_v48  ;;  %19256 = vst [vmem:[#allocation55_spill] sm:$0xff] %v19255_v24  ;;  %v19260_v56 = vsel %vm14446_vm6, 4294967295, %v19259_v56  ;;  %vm8841_vm1 = vmpackc.low %vm19263_vm9, %vm1732_vm10  ;;  %v19265_v0 = vsel %vm14455_vm4, 4294967295, %v19264_v0  ;;  %v9159_v62 = vpack.c.bf16 %v5000_v28, %v4999_v5  ;;  %vm14462_vm7 = vcmp.ge.s32.totalorder %v1224_v33, 1  ;;  %v19270_v48 = vld [vmem:[#allocation67_spill] sm:$0xff]  ;;  %v19274_v37 = vld [vmem:[#allocation66_spill] sm:$0xff] }
 0x2d8   :  { %19261 = vst [vmem:[#allocation59_spill] sm:$0xff] %v19260_v56  ;;  %vm9158_vm14 = vmpackc.low %vm14439_vm8, %vm19176_vm2  ;;  %v19268_v2 = vsel %vm14462_vm7, 4294967295, %v19267_v2  ;;  %v1223_v60 = vand.u32 15, %v19270_v48  ;;  %v9162_v63 = vpack.c.bf16 %v5002_v32, %v5001_v31  ;;  %v1225_v29 = vand.u32 15, %v19271_v16  ;;  %v1671_v33 = vld [vmem:[#allocation2 + $0xd8] sm:$0xff]  ;;  %v1672_v5 = vld [vmem:[#allocation2 + $0xe0] sm:$0xff] }
 0x2d9   :  { %19266 = vst [vmem:[#allocation62_spill] sm:$0xff] %v19265_v0  ;;  %vm9161_vm11 = vmpackc.low %vm14446_vm6, %vm19176_vm2  ;;  %vm19272_vm10 = vcmp.ge.s32.totalorder %v13746_v52, 1  ;;  %vm19273_vm6 = vcmp.ge.s32.totalorder %v13756_v9, 1  ;;  %v1226_v34 = vand.u32 15, %v19274_v37  ;;  %v1673_v28 = vld [vmem:[#allocation2 + $0xe8] sm:$0xff]  ;;  %v19275_v31 = vmov 0 }
 0x2da   :  { %19269 = vst [vmem:[#allocation146_spill] sm:$0xff] %v19268_v2  ;;  %vm1734_vm9 = vmand %vm19272_vm10, %vm14455_vm4  ;;  %v19278_v32 = vld [vmem:[#allocation84_spill] sm:$0xff]  ;;  %v5004_v48 = vld [vmem:[#allocation2 + $0xea] sm:$0xff]  ;;  %v8848_v0 = vpack.c.bf16 %v1673_v28, %v1672_v5 }
 0x2db   :  { %vm1736_vm8 = vmand %vm19273_vm6, %vm14462_vm7  ;;  %v19284_v16 = vld [vmem:[#allocation71_spill] sm:$0xff]  ;;  %vm14493_vm4 = vcmp.ge.s32.totalorder %v1226_v34, 1  ;;  %v19293_v52 = vld [vmem:[#allocation49_spill] sm:$0xff] }
 0x2dc   :  { %vm19285_vm6 = vcmp.ge.s32.totalorder %v19284_v16, 1  ;;  %v5005_v37 = vld [vmem:[#allocation2 + $0xf2] sm:$0xff]  ;;  %v5006_v2 = vld [vmem:[#allocation2 + $0xfa] sm:$0xff] }
 0x2dd   :  { %10132 = vmatmul.mubr.msk.bf16.gmra.mrb[84].mxu0 %vm8838_vm5, %v8839_v35  ;;  %vm14477_vm5 = vcmp.le.s32.totalorder %v1223_v60, 14  ;;  %v1228_v35 = vand.u32 15, %v19278_v32  ;;  %vm8847_vm10 = vmpackc.low %vm19285_vm6, %vm1736_vm8  ;;  %v8845_v60 = vpack.c.bf16 %v1671_v33, %v1670_v55  ;;  %v19286_v32 = vmov 0  ;;  %v19292_v16 = vld [vmem:[#allocation68_spill] sm:$0xff]  ;;  %v1674_v34 = vld [vmem:[#allocation2 + $0xf0] sm:$0xff] }
 0x2de   :  { %10135 = vmatprep.mubr.msk.bf16.mxu0 %vm8841_vm1, %v8842_v54  ;;  %10452 = vmatmul.mubr.msk.bf16.gmra.mrb[20].mxu1 %vm9158_vm14, %v9159_v62  ;;  %v19276_v31 = vsel %vm14477_vm5, 4294967295, %v19275_v31  ;;  %v19279_v54 = vld [vmem:[#allocation63_spill] sm:$0xff]  ;;  %v5003_v62 = vld [vmem:[#allocation2 + $0xe2] sm:$0xff]  ;;  %vm9164_vm7 = vmpackc.low %vm14477_vm5, %vm19176_vm2  ;;  %v19287_v32 = vsel %vm14493_vm4, 4294967295, %v19286_v32  ;;  %v1227_v55 = vand.u32 15, %v19292_v16  ;;  %v9168_v33 = vpack.c.bf16 %v5006_v2, %v5005_v37 }
 0x2df   :  { %10455 = vmatprep.mubr.msk.bf16.mxu1 %vm9161_vm11, %v9162_v63  ;;  %19277 = vst [vmem:[#allocation67_spill] sm:$0xff] %v19276_v31  ;;  %vm19280_vm14 = vcmp.ge.s32.totalorder %v19279_v54, 1  ;;  %vm14484_vm11 = vcmp.le.s32.totalorder %v1225_v29, 14  ;;  %v19281_v63 = vmov 0  ;;  %19288 = vst [vmem:[#allocation66_spill] sm:$0xff] %v19287_v32  ;;  %v9165_v9 = vpack.c.bf16 %v5004_v48, %v5003_v62  ;;  %v19296_v5 = vld [vmem:[#allocation50_spill] sm:$0xff] }
 0x2e0   :  { %vm8844_vm1 = vmpackc.low %vm19280_vm14, %vm1734_vm9  ;;  %v19282_v63 = vsel %vm14484_vm11, 4294967295, %v19281_v63  ;;  %vm14500_vm14 = vcmp.ge.s32.totalorder %v1228_v35, 1  ;;  %v19289_v29 = vmov 0  ;;  %v1229_v54 = vand.u32 15, %v19293_v52  ;;  %v1675_v35 = vld [vmem:[#allocation2 + $0xf8] sm:$0xff]  ;;  %v1676_v2 = vld [vmem:[#allocation2 + $0x100] sm:$0xff] }
 0x2e1   :  { %19283 = vst [vmem:[#allocation64_spill] sm:$0xff] %v19282_v63  ;;  %vm9167_vm9 = vmpackc.low %vm14484_vm11, %vm19176_vm2  ;;  %v19290_v29 = vsel %vm14500_vm14, 4294967295, %v19289_v29  ;;  %vm19294_vm8 = vcmp.ge.s32.totalorder %v13786_v22, 1  ;;  %vm19295_vm11 = vcmp.ge.s32.totalorder %v13796_v4, 1  ;;  %v1230_v28 = vand.u32 15, %v19296_v5  ;;  %v1677_v62 = vld [vmem:[#allocation2 + $0x108] sm:$0xff] }
 0x2e2   :  { %19291 = vst [vmem:[#allocation84_spill] sm:$0xff] %v19290_v29  ;;  %vm1738_vm6 = vmand %vm19294_vm8, %vm14493_vm4  ;;  %v19297_v52 = vmov 0  ;;  %v19301_v48 = vld [vmem:[#allocation47_spill] sm:$0xff]  ;;  %v5007_v16 = vld [vmem:[#allocation2 + $0x102] sm:$0xff]  ;;  %v8854_v32 = vpack.c.bf16 %v1677_v62, %v1676_v2 }
 0x2e3   :  { %vm1740_vm5 = vmand %vm19295_vm11, %vm14500_vm14  ;;  %v5008_v37 = vld [vmem:[#allocation2 + $0x10a] sm:$0xff]  ;;  %v5009_v5 = vld [vmem:[#allocation2 + $0x112] sm:$0xff]  ;;  %vm14531_vm4 = vcmp.ge.s32.totalorder %v1230_v28, 1 }
 0x2e4   :  { %v5010_v29 = vld [vmem:[#allocation2 + $0x11a] sm:$0xff]  ;;  %v9171_v4 = vpack.c.bf16 %v5008_v37, %v5007_v16  ;;  %v19315_v22 = vld [vmem:[#allocation65_spill] sm:$0xff]  ;;  %v19316_v28 = vld [vmem:[#allocation70_spill] sm:$0xff] }
 0x2e5   :  { %10136 = vmatmul.mubr.msk.bf16.gmra.mrb[88].mxu0 %vm8844_vm1, %v8845_v60  ;;  %vm14515_vm1 = vcmp.le.s32.totalorder %v1227_v55, 14  ;;  %v19303_v60 = vmov 0  ;;  %v8851_v55 = vpack.c.bf16 %v1675_v35, %v1674_v34  ;;  %v9174_v35 = vpack.c.bf16 %v5010_v29, %v5009_v5  ;;  %v1678_v2 = vld [vmem:[#allocation2 + $0x110] sm:$0xff]  ;;  %v19318_v62 = vld [vmem:[#allocation88_spill] sm:$0xff]  ;;  %v1679_v37 = vld [vmem:[#allocation2 + $0x118] sm:$0xff] }
 0x2e6   :  { %10139 = vmatprep.mubr.msk.bf16.mxu0 %vm8847_vm10, %v8848_v0  ;;  %10456 = vmatmul.mubr.msk.bf16.gmra.mrb[24].mxu1 %vm9164_vm7, %v9165_v9  ;;  %v19298_v52 = vsel %vm14515_vm1, 4294967295, %v19297_v52  ;;  %v19300_v9 = vld [vmem:[#allocation52_spill] sm:$0xff]  ;;  %vm19302_vm7 = vcmp.ge.s32.totalorder %v19301_v48, 1  ;;  %vm9170_vm14 = vmpackc.low %vm14515_vm1, %vm19176_vm2  ;;  %v1233_v48 = vand.u32 15, %v19315_v22  ;;  %v19321_v22 = vmov 0  ;;  %v19325_v5 = vld [vmem:[#allocation53_spill] sm:$0xff] }
 0x2e7   :  { %10459 = vmatprep.mubr.msk.bf16.mxu1 %vm9167_vm9, %v9168_v33  ;;  %19299 = vst [vmem:[#allocation68_spill] sm:$0xff] %v19298_v52  ;;  %v1232_v0 = vand.u32 15, %v19300_v9  ;;  %vm8850_vm10 = vmpackc.low %vm19302_vm7, %vm1738_vm6  ;;  %vm14522_vm9 = vcmp.le.s32.totalorder %v1229_v54, 14  ;;  %v19306_v33 = vld [vmem:[#allocation46_spill] sm:$0xff]  ;;  %v19308_v9 = vmov 0  ;;  %v19311_v54 = vmov 0 }
 0x2e8   :  { %v19304_v60 = vsel %vm14522_vm9, 4294967295, %v19303_v60  ;;  %vm19307_vm11 = vcmp.ge.s32.totalorder %v19306_v33, 1  ;;  %v19309_v9 = vsel %vm14531_vm4, 4294967295, %v19308_v9  ;;  %vm9173_vm6 = vmpackc.low %vm14522_vm9, %vm19176_vm2  ;;  %v19314_v33 = vld [vmem:[#allocation56_spill] sm:$0xff]  ;;  %vm19319_vm9 = vcmp.ge.s32.totalorder %v19318_v62, 1 }
 0x2e9   :  { %19305 = vst [vmem:[#allocation49_spill] sm:$0xff] %v19304_v60  ;;  %vm8853_vm8 = vmpackc.low %vm19307_vm11, %vm1740_vm5  ;;  %vm14538_vm7 = vcmp.ge.s32.totalorder %v1232_v0, 1  ;;  %v1231_v34 = vand.u32 15, %v19314_v33  ;;  %vm19317_vm5 = vcmp.ge.s32.totalorder %v19316_v28, 1  ;;  %v19320_v0 = vld [vmem:[#allocation86_spill] sm:$0xff]  ;;  %v1680_v29 = vld [vmem:[#allocation2 + $0x120] sm:$0xff] }
 0x2ea   :  { %19310 = vst [vmem:[#allocation50_spill] sm:$0xff] %v19309_v9  ;;  %v19312_v54 = vsel %vm14538_vm7, 4294967295, %v19311_v54  ;;  %vm1742_vm11 = vmand %vm19317_vm5, %vm14531_vm4  ;;  %v1234_v16 = vand.u32 15, %v19320_v0  ;;  %v1681_v33 = vld [vmem:[#allocation2 + $0x128] sm:$0xff]  ;;  %v5013_v0 = vld [vmem:[#allocation2 + $0x132] sm:$0xff] }
 0x2eb   :  { %19313 = vst [vmem:[#allocation52_spill] sm:$0xff] %v19312_v54  ;;  %vm1744_vm1 = vmand %vm19319_vm9, %vm14538_vm7  ;;  %v19327_v54 = vmov 0  ;;  %v19330_v9 = vld [vmem:[#allocation89_spill] sm:$0xff]  ;;  %v5014_v62 = vld [vmem:[#allocation2 + $0x13a] sm:$0xff]  ;;  %v8860_v28 = vpack.c.bf16 %v1681_v33, %v1680_v29 }
 0x2ec   :  { %vm19331_vm9 = vcmp.ge.s32.totalorder %v19330_v9, 1  ;;  %vm14569_vm4 = vcmp.ge.s32.totalorder %v1234_v16, 1  ;;  %v19338_v9 = vld [vmem:[#allocation87_spill] sm:$0xff]  ;;  %v19340_v16 = vld [vmem:[#allocation92_spill] sm:$0xff]  ;;  %v1682_v29 = vld [vmem:[#allocation2 + $0x130] sm:$0xff] }
 0x2ed   :  { %10140 = vmatmul.mubr.msk.bf16.gmra.mrb[92].mxu0 %vm8850_vm10, %v8851_v55  ;;  %vm14553_vm10 = vcmp.le.s32.totalorder %v1231_v34, 14  ;;  %v5011_v55 = vld [vmem:[#allocation2 + $0x122] sm:$0xff]  ;;  %vm8859_vm5 = vmpackc.low %vm19331_vm9, %vm1744_vm1  ;;  %v8857_v34 = vpack.c.bf16 %v1679_v37, %v1678_v2  ;;  %v1235_v2 = vand.u32 15, %v19338_v9  ;;  %v9180_v37 = vpack.c.bf16 %v5014_v62, %v5013_v0 }
 0x2ee   :  { %10143 = vmatprep.mubr.msk.bf16.mxu0 %vm8853_vm8, %v8854_v32  ;;  %10460 = vmatmul.mubr.msk.bf16.gmra.mrb[28].mxu1 %vm9170_vm14, %v9171_v4  ;;  %v19322_v22 = vsel %vm14553_vm10, 4294967295, %v19321_v22  ;;  %v19324_v4 = vld [vmem:[#allocation90_spill] sm:$0xff]  ;;  %vm19326_vm14 = vcmp.ge.s32.totalorder %v19325_v5, 1  ;;  %vm9176_vm7 = vmpackc.low %vm14553_vm10, %vm19176_vm2  ;;  %vm19341_vm1 = vcmp.ge.s32.totalorder %v19340_v16, 1  ;;  %v19342_v33 = vld [vmem:[#allocation96_spill] sm:$0xff] }
 0x2ef   :  { %10463 = vmatprep.mubr.msk.bf16.mxu1 %vm9173_vm6, %v9174_v35  ;;  %19323 = vst [vmem:[#allocation56_spill] sm:$0xff] %v19322_v22  ;;  %v1236_v32 = vand.u32 15, %v19324_v4  ;;  %vm8856_vm8 = vmpackc.low %vm19326_vm14, %vm1742_vm11  ;;  %v5012_v35 = vld [vmem:[#allocation2 + $0x12a] sm:$0xff]  ;;  %vm14560_vm6 = vcmp.le.s32.totalorder %v1233_v48, 14  ;;  %v19332_v4 = vmov 0  ;;  %v19335_v48 = vmov 0 }
 0x2f0   :  { %v19328_v54 = vsel %vm14560_vm6, 4294967295, %v19327_v54  ;;  %v19333_v4 = vsel %vm14569_vm4, 4294967295, %v19332_v4  ;;  %v9177_v5 = vpack.c.bf16 %v5012_v35, %v5011_v55  ;;  %vm9179_vm11 = vmpackc.low %vm14560_vm6, %vm19176_vm2  ;;  %v19339_v22 = vld [vmem:[#allocation91_spill] sm:$0xff]  ;;  %vm19343_vm6 = vcmp.ge.s32.totalorder %v19342_v33, 1  ;;  %v1684_v62 = vld [vmem:[#allocation2 + $0x140] sm:$0xff] }
 0x2f1   :  { %19329 = vst [vmem:[#allocation65_spill] sm:$0xff] %v19328_v54  ;;  %19334 = vst [vmem:[#allocation86_spill] sm:$0xff] %v19333_v4  ;;  %vm14576_vm14 = vcmp.ge.s32.totalorder %v1236_v32, 1  ;;  %v1237_v60 = vand.u32 15, %v19339_v22  ;;  %v19344_v32 = vld [vmem:[#allocation94_spill] sm:$0xff]  ;;  %v1683_v55 = vld [vmem:[#allocation2 + $0x138] sm:$0xff] }
 0x2f2   :  { %v19336_v48 = vsel %vm14576_vm14, 4294967295, %v19335_v48  ;;  %vm1746_vm9 = vmand %vm19341_vm1, %vm14569_vm4  ;;  %v1238_v9 = vand.u32 15, %v19344_v32  ;;  %v1685_v35 = vld [vmem:[#allocation2 + $0x148] sm:$0xff]  ;;  %v19348_v22 = vld [vmem:[#allocation98_spill] sm:$0xff] }
 0x2f3   :  { %19337 = vst [vmem:[#allocation90_spill] sm:$0xff] %v19336_v48  ;;  %vm1748_vm10 = vmand %vm19343_vm6, %vm14576_vm14  ;;  %v19349_v0 = vld [vmem:[#allocation93_spill] sm:$0xff]  ;;  %v19351_v48 = vmov 0  ;;  %v5017_v32 = vld [vmem:[#allocation2 + $0x152] sm:$0xff]  ;;  %v8866_v16 = vpack.c.bf16 %v1685_v35, %v1684_v62 }
 0x2f4   :  { %v19354_v4 = vld [vmem:[#allocation97_spill] sm:$0xff]  ;;  %v5018_v33 = vld [vmem:[#allocation2 + $0x15a] sm:$0xff]  ;;  %vm14607_vm4 = vcmp.ge.s32.totalorder %v1238_v9, 1  ;;  %v1686_v62 = vld [vmem:[#allocation2 + $0x150] sm:$0xff] }
 0x2f5   :  { %10144 = vmatmul.mubr.msk.bf16.gmra.mrb[96].mxu0 %vm8856_vm8, %v8857_v34  ;;  %vm14591_vm8 = vcmp.le.s32.totalorder %v1235_v2, 14  ;;  %v5015_v34 = vld [vmem:[#allocation2 + $0x142] sm:$0xff]  ;;  %vm19355_vm6 = vcmp.ge.s32.totalorder %v19354_v4, 1  ;;  %v8863_v2 = vpack.c.bf16 %v1683_v55, %v1682_v29  ;;  %v19362_v4 = vld [vmem:[#allocation95_spill] sm:$0xff]  ;;  %v9186_v55 = vpack.c.bf16 %v5018_v33, %v5017_v32 }
 0x2f6   :  { %10147 = vmatprep.mubr.msk.bf16.mxu0 %vm8859_vm5, %v8860_v28  ;;  %10464 = vmatmul.mubr.msk.bf16.gmra.mrb[32].mxu1 %vm9176_vm7, %v9177_v5  ;;  %v19345_v28 = vmov 0  ;;  %v1240_v5 = vand.u32 15, %v19348_v22  ;;  %vm19350_vm7 = vcmp.ge.s32.totalorder %v19349_v0, 1  ;;  %vm8865_vm1 = vmpackc.low %vm19355_vm6, %vm1748_vm10  ;;  %v19356_v22 = vmov 0  ;;  %v19364_v9 = vld [vmem:[#allocation100_spill] sm:$0xff]  ;;  %v19373_v32 = vld [vmem:[#allocation101_spill] sm:$0xff] }
 0x2f7   :  { %10467 = vmatprep.mubr.msk.bf16.mxu1 %vm9179_vm11, %v9180_v37  ;;  %v19346_v28 = vsel %vm14591_vm8, 4294967295, %v19345_v28  ;;  %vm8862_vm5 = vmpackc.low %vm19350_vm7, %vm1746_vm9  ;;  %v5016_v37 = vld [vmem:[#allocation2 + $0x14a] sm:$0xff]  ;;  %vm14598_vm11 = vcmp.le.s32.totalorder %v1237_v60, 14  ;;  %v19357_v22 = vsel %vm14607_vm4, 4294967295, %v19356_v22  ;;  %v19359_v60 = vmov 0  ;;  %v19366_v35 = vld [vmem:[#allocation104_spill] sm:$0xff] }
 0x2f8   :  { %19347 = vst [vmem:[#allocation87_spill] sm:$0xff] %v19346_v28  ;;  %v19352_v48 = vsel %vm14598_vm11, 4294967295, %v19351_v48  ;;  %vm9182_vm14 = vmpackc.low %vm14591_vm8, %vm19176_vm2  ;;  %v9183_v0 = vpack.c.bf16 %v5016_v37, %v5015_v34  ;;  %vm14614_vm7 = vcmp.ge.s32.totalorder %v1240_v5, 1  ;;  %v1239_v29 = vand.u32 15, %v19362_v4  ;;  %v19363_v28 = vld [vmem:[#allocation99_spill] sm:$0xff]  ;;  %v19368_v5 = vld [vmem:[#allocation102_spill] sm:$0xff] }
 0x2f9   :  { %19353 = vst [vmem:[#allocation91_spill] sm:$0xff] %v19352_v48  ;;  %19358 = vst [vmem:[#allocation94_spill] sm:$0xff] %v19357_v22  ;;  %v19360_v60 = vsel %vm14614_vm7, 4294967295, %v19359_v60  ;;  %v1241_v54 = vand.u32 15, %v19363_v28  ;;  %vm19365_vm10 = vcmp.ge.s32.totalorder %v19364_v9, 1  ;;  %v1242_v4 = vand.u32 15, %v19368_v5 }
 0x2fa   :  { %vm9185_vm9 = vmpackc.low %vm14598_vm11, %vm19176_vm2  ;;  %19361 = vst [vmem:[#allocation98_spill] sm:$0xff] %v19360_v60  ;;  %vm19367_vm11 = vcmp.ge.s32.totalorder %v19366_v35, 1  ;;  %v1687_v34 = vld [vmem:[#allocation2 + $0x158] sm:$0xff]  ;;  %v1688_v33 = vld [vmem:[#allocation2 + $0x160] sm:$0xff]  ;;  %v19375_v60 = vmov 0 }
 0x2fb   :  { %vm1750_vm6 = vmand %vm19365_vm10, %vm14607_vm4  ;;  %v1689_v37 = vld [vmem:[#allocation2 + $0x168] sm:$0xff]  ;;  %v19372_v28 = vld [vmem:[#allocation106_spill] sm:$0xff]  ;;  %vm14645_vm4 = vcmp.ge.s32.totalorder %v1242_v4, 1 }
 0x2fc   :  { %vm1752_vm8 = vmand %vm19367_vm11, %vm14614_vm7  ;;  %v19378_v22 = vld [vmem:[#allocation105_spill] sm:$0xff]  ;;  %v5021_v5 = vld [vmem:[#allocation2 + $0x172] sm:$0xff]  ;;  %v8872_v9 = vpack.c.bf16 %v1689_v37, %v1688_v33 }
 0x2fd   :  { %10148 = vmatmul.mubr.msk.bf16.gmra.mrb[100].mxu0 %vm8862_vm5, %v8863_v2  ;;  %vm14629_vm5 = vcmp.le.s32.totalorder %v1239_v29, 14  ;;  %v5019_v2 = vld [vmem:[#allocation2 + $0x162] sm:$0xff]  ;;  %vm19379_vm11 = vcmp.ge.s32.totalorder %v19378_v22, 1  ;;  %v5022_v35 = vld [vmem:[#allocation2 + $0x17a] sm:$0xff]  ;;  %v8869_v29 = vpack.c.bf16 %v1687_v34, %v1686_v62  ;;  %v1690_v33 = vld [vmem:[#allocation2 + $0x170] sm:$0xff] }
 0x2fe   :  { %10151 = vmatprep.mubr.msk.bf16.mxu0 %vm8865_vm1, %v8866_v16  ;;  %10468 = vmatmul.mubr.msk.bf16.gmra.mrb[36].mxu1 %vm9182_vm14, %v9183_v0  ;;  %v19369_v16 = vmov 0  ;;  %v1244_v0 = vand.u32 15, %v19372_v28  ;;  %vm19374_vm14 = vcmp.ge.s32.totalorder %v19373_v32, 1  ;;  %vm8871_vm10 = vmpackc.low %vm19379_vm11, %vm1752_vm8  ;;  %v19380_v28 = vmov 0  ;;  %v19386_v22 = vld [vmem:[#allocation103_spill] sm:$0xff]  ;;  %v19388_v4 = vld [vmem:[#allocation108_spill] sm:$0xff] }
 0x2ff   :  { %10471 = vmatprep.mubr.msk.bf16.mxu1 %vm9185_vm9, %v9186_v55  ;;  %v19370_v16 = vsel %vm14629_vm5, 4294967295, %v19369_v16  ;;  %vm8868_vm1 = vmpackc.low %vm19374_vm14, %vm1750_vm6  ;;  %v5020_v55 = vld [vmem:[#allocation2 + $0x16a] sm:$0xff]  ;;  %vm14636_vm9 = vcmp.le.s32.totalorder %v1241_v54, 14  ;;  %v19381_v28 = vsel %vm14645_vm4, 4294967295, %v19380_v28  ;;  %v19383_v54 = vmov 0  ;;  %v19390_v37 = vld [vmem:[#allocation112_spill] sm:$0xff] }
 0x300   :  { %19371 = vst [vmem:[#allocation95_spill] sm:$0xff] %v19370_v16  ;;  %v19376_v60 = vsel %vm14636_vm9, 4294967295, %v19375_v60  ;;  %vm9188_vm7 = vmpackc.low %vm14629_vm5, %vm19176_vm2  ;;  %v9189_v32 = vpack.c.bf16 %v5020_v55, %v5019_v2  ;;  %vm14652_vm14 = vcmp.ge.s32.totalorder %v1244_v0, 1  ;;  %v1243_v62 = vand.u32 15, %v19386_v22  ;;  %v19387_v16 = vld [vmem:[#allocation107_spill] sm:$0xff]  ;;  %v19392_v0 = vld [vmem:[#allocation110_spill] sm:$0xff] }
 0x301   :  { %19377 = vst [vmem:[#allocation99_spill] sm:$0xff] %v19376_v60  ;;  %19382 = vst [vmem:[#allocation102_spill] sm:$0xff] %v19381_v28  ;;  %v19384_v54 = vsel %vm14652_vm14, 4294967295, %v19383_v54  ;;  %v9192_v34 = vpack.c.bf16 %v5022_v35, %v5021_v5  ;;  %v1245_v48 = vand.u32 15, %v19387_v16  ;;  %vm19389_vm8 = vcmp.ge.s32.totalorder %v19388_v4, 1  ;;  %v1691_v2 = vld [vmem:[#allocation2 + $0x178] sm:$0xff] }
 0x302   :  { %vm9191_vm6 = vmpackc.low %vm14636_vm9, %vm19176_vm2  ;;  %19385 = vst [vmem:[#allocation106_spill] sm:$0xff] %v19384_v54  ;;  %vm19391_vm9 = vcmp.ge.s32.totalorder %v19390_v37, 1  ;;  %v1246_v22 = vand.u32 15, %v19392_v0  ;;  %v1692_v35 = vld [vmem:[#allocation2 + $0x180] sm:$0xff]  ;;  %v1693_v55 = vld [vmem:[#allocation2 + $0x188] sm:$0xff]  ;;  %v19399_v54 = vmov 0 }
 0x303   :  { %vm1754_vm11 = vmand %vm19389_vm8, %vm14645_vm4  ;;  %v19396_v16 = vld [vmem:[#allocation114_spill] sm:$0xff]  ;;  %v19397_v5 = vld [vmem:[#allocation109_spill] sm:$0xff]  ;;  %v8878_v4 = vpack.c.bf16 %v1693_v55, %v1692_v35 }
 0x304   :  { %vm1756_vm5 = vmand %vm19391_vm9, %vm14652_vm14  ;;  %v19402_v28 = vld [vmem:[#allocation113_spill] sm:$0xff]  ;;  %v5025_v0 = vld [vmem:[#allocation2 + $0x192] sm:$0xff]  ;;  %vm14683_vm4 = vcmp.ge.s32.totalorder %v1246_v22, 1 }
 0x305   :  { %10152 = vmatmul.mubr.msk.bf16.gmra.mrb[104].mxu0 %vm8868_vm1, %v8869_v29  ;;  %vm14667_vm1 = vcmp.le.s32.totalorder %v1243_v62, 14  ;;  %v5023_v29 = vld [vmem:[#allocation2 + $0x182] sm:$0xff]  ;;  %vm19403_vm9 = vcmp.ge.s32.totalorder %v19402_v28, 1  ;;  %v5026_v37 = vld [vmem:[#allocation2 + $0x19a] sm:$0xff]  ;;  %v8875_v62 = vpack.c.bf16 %v1691_v2, %v1690_v33  ;;  %v1694_v35 = vld [vmem:[#allocation2 + $0x190] sm:$0xff] }
 0x306   :  { %10155 = vmatprep.mubr.msk.bf16.mxu0 %vm8871_vm10, %v8872_v9  ;;  %10472 = vmatmul.mubr.msk.bf16.gmra.mrb[40].mxu1 %vm9188_vm7, %v9189_v32  ;;  %v19393_v9 = vmov 0  ;;  %v1248_v32 = vand.u32 15, %v19396_v16  ;;  %vm19398_vm7 = vcmp.ge.s32.totalorder %v19397_v5, 1  ;;  %vm8877_vm8 = vmpackc.low %vm19403_vm9, %vm1756_vm5  ;;  %v19404_v16 = vmov 0  ;;  %v19410_v28 = vld [vmem:[#allocation111_spill] sm:$0xff]  ;;  %v19412_v22 = vld [vmem:[#allocation116_spill] sm:$0xff] }
 0x307   :  { %10475 = vmatprep.mubr.msk.bf16.mxu1 %vm9191_vm6, %v9192_v34  ;;  %v19394_v9 = vsel %vm14667_vm1, 4294967295, %v19393_v9  ;;  %vm8874_vm10 = vmpackc.low %vm19398_vm7, %vm1754_vm11  ;;  %v5024_v34 = vld [vmem:[#allocation2 + $0x18a] sm:$0xff]  ;;  %vm14674_vm6 = vcmp.le.s32.totalorder %v1245_v48, 14  ;;  %v19405_v16 = vsel %vm14683_vm4, 4294967295, %v19404_v16  ;;  %v19407_v48 = vmov 0  ;;  %v19414_v55 = vld [vmem:[#allocation120_spill] sm:$0xff] }
 0x308   :  { %19395 = vst [vmem:[#allocation103_spill] sm:$0xff] %v19394_v9  ;;  %v19400_v54 = vsel %vm14674_vm6, 4294967295, %v19399_v54  ;;  %vm9194_vm14 = vmpackc.low %vm14667_vm1, %vm19176_vm2  ;;  %v9195_v5 = vpack.c.bf16 %v5024_v34, %v5023_v29  ;;  %vm14690_vm7 = vcmp.ge.s32.totalorder %v1248_v32, 1  ;;  %v1247_v33 = vand.u32 15, %v19410_v28  ;;  %v19411_v9 = vld [vmem:[#allocation115_spill] sm:$0xff]  ;;  %v19416_v32 = vld [vmem:[#allocation118_spill] sm:$0xff] }
 0x309   :  { %19401 = vst [vmem:[#allocation107_spill] sm:$0xff] %v19400_v54  ;;  %19406 = vst [vmem:[#allocation110_spill] sm:$0xff] %v19405_v16  ;;  %v19408_v48 = vsel %vm14690_vm7, 4294967295, %v19407_v48  ;;  %v9198_v2 = vpack.c.bf16 %v5026_v37, %v5025_v0  ;;  %v1249_v60 = vand.u32 15, %v19411_v9  ;;  %vm19413_vm5 = vcmp.ge.s32.totalorder %v19412_v22, 1  ;;  %v1695_v29 = vld [vmem:[#allocation2 + $0x198] sm:$0xff] }
 0x30a   :  { %vm9197_vm11 = vmpackc.low %vm14674_vm6, %vm19176_vm2  ;;  %19409 = vst [vmem:[#allocation114_spill] sm:$0xff] %v19408_v48  ;;  %vm19415_vm6 = vcmp.ge.s32.totalorder %v19414_v55, 1  ;;  %v1250_v28 = vand.u32 15, %v19416_v32  ;;  %v1696_v37 = vld [vmem:[#allocation2 + $0x1a0] sm:$0xff]  ;;  %v1697_v34 = vld [vmem:[#allocation2 + $0x1a8] sm:$0xff]  ;;  %v19423_v48 = vmov 0 }
 0x30b   :  { %vm1758_vm9 = vmand %vm19413_vm5, %vm14683_vm4  ;;  %v19420_v9 = vld [vmem:[#allocation122_spill] sm:$0xff]  ;;  %v19421_v0 = vld [vmem:[#allocation117_spill] sm:$0xff]  ;;  %v14725_v22 = vpack.c.bf16 %v1697_v34, %v1696_v37 }
 0x30c   :  { %vm1760_vm1 = vmand %vm19415_vm6, %vm14690_vm7  ;;  %v19426_v16 = vld [vmem:[#allocation121_spill] sm:$0xff]  ;;  %v5029_v32 = vld [vmem:[#allocation2 + $0x1b2] sm:$0xff]  ;;  %vm14721_vm4 = vcmp.ge.s32.totalorder %v1250_v28, 1 }
 0x30d   :  { %10156 = vmatmul.mubr.msk.bf16.gmra.mrb[108].mxu0 %vm8874_vm10, %v8875_v62  ;;  %vm14705_vm10 = vcmp.le.s32.totalorder %v1247_v33, 14  ;;  %v5027_v62 = vld [vmem:[#allocation2 + $0x1a2] sm:$0xff]  ;;  %vm19427_vm6 = vcmp.ge.s32.totalorder %v19426_v16, 1  ;;  %v5030_v55 = vld [vmem:[#allocation2 + $0x1ba] sm:$0xff]  ;;  %v8881_v33 = vpack.c.bf16 %v1695_v29, %v1694_v35  ;;  %19431 = vst [vmem:[#allocation122_spill] sm:$0xff] %v14725_v22  ;;  %v19432_v16 = vmov 0 }
 0x30e   :  { %10159 = vmatprep.mubr.msk.bf16.mxu0 %vm8877_vm8, %v8878_v4  ;;  %10476 = vmatmul.mubr.msk.bf16.gmra.mrb[44].mxu1 %vm9194_vm14, %v9195_v5  ;;  %v19417_v4 = vmov 0  ;;  %v1252_v5 = vand.u32 15, %v19420_v9  ;;  %vm19422_vm14 = vcmp.ge.s32.totalorder %v19421_v0, 1  ;;  %vm8883_vm5 = vmpackc.low %vm19427_vm6, %vm1760_vm1  ;;  %v19428_v9 = vmov 0  ;;  %v19435_v35 = vld [vmem:[#allocation119_spill] sm:$0xff]  ;;  %v14736_v54 = vld [vmem:[#allocation8 + $0xc0] sm:$0xff]  }
 0x30f   :  { %10479 = vmatprep.mubr.msk.bf16.mxu1 %vm9197_vm11, %v9198_v2  ;;  %v19418_v4 = vsel %vm14705_vm10, 4294967295, %v19417_v4  ;;  %vm8880_vm8 = vmpackc.low %vm19422_vm14, %vm1758_vm9  ;;  %v5028_v2 = vld [vmem:[#allocation2 + $0x1aa] sm:$0xff]  ;;  %vm14712_vm11 = vcmp.le.s32.totalorder %v1249_v60, 14  ;;  %v19429_v9 = vsel %vm14721_vm4, 4294967295, %v19428_v9  ;;  %v1251_v29 = vand.u32 15, %v19435_v35  ;;  %v19437_v37 = vld [vmem:[#allocation124_spill] sm:$0xff]  ;;  %10255 = vmatprep.subr.bf16.mxu0 %v14736_v54 }
 0x310   :  { %19419 = vst [vmem:[#allocation111_spill] sm:$0xff] %v19418_v4  ;;  %v19424_v48 = vsel %vm14712_vm11, 4294967295, %v19423_v48  ;;  %vm9200_vm7 = vmpackc.low %vm14705_vm10, %vm19176_vm2  ;;  %v9201_v60 = vpack.c.bf16 %v5028_v2, %v5027_v62  ;;  %vm14730_vm14 = vcmp.ge.s32.totalorder %v1252_v5, 1  ;;  %v9204_v0 = vpack.c.bf16 %v5030_v55, %v5029_v32  ;;  %v19436_v4 = vld [vmem:[#allocation123_spill] sm:$0xff]  ;;  %v19439_v34 = vld [vmem:[#allocation126_spill] sm:$0xff] }
 0x311   :  { %19425 = vst [vmem:[#allocation115_spill] sm:$0xff] %v19424_v48  ;;  %19430 = vst [vmem:[#allocation118_spill] sm:$0xff] %v19429_v9  ;;  %v19433_v16 = vsel %vm14730_vm14, 4294967295, %v19432_v16  ;;  %v1253_v28 = vand.u32 15, %v19436_v4  ;;  %vm19438_vm1 = vcmp.ge.s32.totalorder %v19437_v37, 1  ;;  %v1254_v5 = vand.u32 15, %v19439_v34 }
 0x312   :  { %vm9203_vm9 = vmpackc.low %vm14712_vm11, %vm19176_vm2  ;;  %19434 = vst [vmem:[#allocation147_spill] sm:$0xff] %v19433_v16  ;;  %v1698_v62 = vld [vmem:[#allocation2 + $0x1b0] sm:$0xff]  ;;  %v19440_v2 = vld [vmem:[#allocation128_spill] sm:$0xff]  ;;  %v19443_v35 = vmov 0 }
 0x313   :  { %vm1762_vm6 = vmand %vm19438_vm1, %vm14721_vm4  ;;  %v19442_v55 = vld [vmem:[#allocation130_spill] sm:$0xff]  ;;  %v1699_v32 = vld [vmem:[#allocation2 + $0x1b8] sm:$0xff]  ;;  %vm14760_vm1 = vcmp.le.s32.totalorder %v1253_v28, 14  ;;  %vm14770_vm4 = vcmp.ge.s32.totalorder %v1254_v5, 1  ;;  %v19460_v28 = vmov 0 }
 0x314   :  { %v1256_v4 = vand.u32 15, %v19442_v55  ;;  %v19446_v9 = vld [vmem:[#allocation125_spill] sm:$0xff]  ;;  %v5034_v37 = vld [vmem:[#allocation2 + $0x1da] sm:$0xff] }
 0x315   :  { %10160 = vmatmul.mubr.msk.bf16.gmra.mrb[112].mxu0 %vm8880_vm8, %v8881_v33  ;;  %vm19441_vm8 = vcmp.ge.s32.totalorder %v19440_v2, 1  ;;  %v1700_v33 = vld [vmem:[#allocation2 + $0x1c0] sm:$0xff]  ;;  %v5032_v16 = vld [vmem:[#allocation2 + $0x1ca] sm:$0xff]  ;;  %v19450_v2 = vmov 0  ;;  %v19465_v5 = vld [vmem:[#allocation131_spill] sm:$0xff] }
 0x316   :  { %10163 = vmatprep.mubr.msk.bf16.mxu0 %vm8883_vm5, %v14725_v22  ;;  %10480 = vmatmul.mubr.msk.bf16.gmra.mrb[48].mxu1 %vm9200_vm7, %v9201_v60  ;;  %vm1764_vm11 = vmand %vm19441_vm8, %vm14730_vm14  ;;  %v1701_v60 = vld [vmem:[#allocation2 + $0x1c8] sm:$0xff]  ;;  %vm14750_vm7 = vcmp.le.s32.totalorder %v1251_v29, 14  ;;  %vm19447_vm5 = vcmp.ge.s32.totalorder %v19446_v9, 1  ;;  %v19451_v2 = vsel %vm14760_vm1, 4294967295, %v19450_v2  ;;  %vm19453_vm8 = vcmp.ge.s32.totalorder %v14031_v40, 1  ;;  %v5033_v29 = vld [vmem:[#allocation2 + $0x1d2] sm:$0xff] }
 0x317   :  { %10483 = vmatprep.mubr.msk.bf16.mxu1 %vm9203_vm9, %v9204_v0  ;;  %v19444_v35 = vsel %vm14750_vm7, 4294967295, %v19443_v35  ;;  %vm14756_vm9 = vmpackc.low %vm19447_vm5, %vm1762_vm6  ;;  %v5031_v34 = vld [vmem:[#allocation2 + $0x1c2] sm:$0xff]  ;;  %19452 = vst [vmem:[#allocation123_spill] sm:$0xff] %v19451_v2  ;;  %v19456_v9 = vmov 0  ;;  %v14774_v22 = vpack.c.bf16 %v1699_v32, %v1698_v62  ;;  %vm14779_vm5 = vcmp.ge.s32.totalorder %v1256_v4, 1  ;;  %v19463_v40 = vld [vmem:[#allocation127_spill] sm:$0xff] }
 0x318   :  { %19445 = vst [vmem:[#allocation119_spill] sm:$0xff] %v19444_v35  ;;  %vm14766_vm14 = vmpackc.low %vm19453_vm8, %vm1764_vm11  ;;  %v19457_v9 = vsel %vm14770_vm4, 4294967295, %v19456_v9  ;;  %v19461_v28 = vsel %vm14779_vm5, 4294967295, %v19460_v28  ;;  %v1255_v48 = vand.u32 15, %v19463_v40  ;;  %v14784_v52 = vpack.c.bf16 %v1701_v60, %v1700_v33  ;;  %v19466_v4 = vld [vmem:[#allocation132_spill] sm:$0xff]  ;;  %v19468_v40 = vld [vmem:[#allocation134_spill] sm:$0xff] }
 0x319   :  { %19458 = vst [vmem:[#allocation126_spill] sm:$0xff] %v19457_v9  ;;  %19459 = vst [vmem:[#allocation130_spill] sm:$0xff] %v14774_v22  ;;  %v9207_v63 = vpack.c.bf16 %v5032_v16, %v5031_v34  ;;  %v1257_v62 = vand.u32 15, %v19465_v5  ;;  %v9210_v32 = vpack.c.bf16 %v5034_v37, %v5033_v29  ;;  %vm19467_vm8 = vcmp.ge.s32.totalorder %v19466_v4, 1  ;;  %v19469_v16 = vld [vmem:[#allocation136_spill] sm:$0xff]  ;;  %v1702_v60 = vld [vmem:[#allocation2 + $0x1d0] sm:$0xff] }
 0x31a   :  { %vm9206_vm6 = vmpackc.low %vm14750_vm7, %vm19176_vm2  ;;  %19462 = vst [vmem:[#allocation148_spill] sm:$0xff] %v19461_v28  ;;  %v1258_v33 = vand.u32 15, %v19468_v40  ;;  %v1703_v37 = vld [vmem:[#allocation2 + $0x1d8] sm:$0xff]  ;;  %v19471_v0 = vmov 0  ;;  %v19474_v34 = vld [vmem:[#allocation133_spill] sm:$0xff]  ;;  %v19478_v5 = vmov 0 }
 0x31b   :  { %19464 = vst [vmem:[#allocation127_spill] sm:$0xff] %v14784_v52  ;;  %vm9209_vm11 = vmpackc.low %vm14760_vm1, %vm19176_vm2  ;;  %vm19470_vm1 = vcmp.ge.s32.totalorder %v19469_v16, 1  ;;  %v1704_v55 = vld [vmem:[#allocation2 + $0x1e0] sm:$0xff]  ;;  %v19481_v40 = vld [vmem:[#allocation137_spill] sm:$0xff]  ;;  %v19485_v9 = vmov 0  ;;  %v14832_v4 = vpack.c.bf16 %v1703_v37, %v1702_v60 }
 0x31c   :  { %vm1766_vm7 = vmand %vm19467_vm8, %vm14770_vm4  ;;  %vm19475_vm8 = vcmp.ge.s32.totalorder %v19474_v34, 1  ;;  %v5036_v28 = vld [vmem:[#allocation2 + $0x1ea] sm:$0xff]  ;;  %v5038_v16 = vld [vmem:[#allocation2 + $0x1fa] sm:$0xff] }
 0x31d   :  { %10164 = vmatmul.mubr.msk.bf16.gmra.mrb[116].mxu0 %vm14756_vm9, %v14774_v22  ;;  %vm1768_vm10 = vmand %vm19470_vm1, %vm14779_vm5  ;;  %vm14805_vm9 = vcmp.le.s32.totalorder %v1255_v48, 14  ;;  %vm19482_vm1 = vcmp.ge.s32.totalorder %v19481_v40, 1  ;;  %v5035_v48 = vld [vmem:[#allocation2 + $0x1e2] sm:$0xff]  ;;  %19488 = vst [vmem:[#allocation150_spill] sm:$0xff] %v14832_v4  ;;  %v19489_v40 = vld [vmem:[#allocation135_spill] sm:$0xff] }
 0x31e   :  { %10167 = vmatprep.mubr.msk.bf16.mxu0 %vm14766_vm14, %v14784_v52  ;;  %10484 = vmatmul.mubr.msk.bf16.gmra.mrb[52].mxu1 %vm9206_vm6, %v9207_v63  ;;  %v19472_v0 = vsel %vm14805_vm9, 4294967295, %v19471_v0  ;;  %vm14811_vm4 = vmpackc.low %vm19475_vm8, %vm1766_vm7  ;;  %v1705_v63 = vld [vmem:[#allocation2 + $0x1e8] sm:$0xff]  ;;  %vm14815_vm14 = vcmp.le.s32.totalorder %v1257_v62, 14  ;;  %v5037_v62 = vld [vmem:[#allocation2 + $0x1f2] sm:$0xff]  ;;  %v1259_v34 = vand.u32 15, %v19489_v40  ;;  %v19501_v40 = vmov 0 }
 0x31f   :  { %10487 = vmatprep.mubr.msk.bf16.mxu1 %vm9209_vm11, %v9210_v32  ;;  %19473 = vst [vmem:[#allocation131_spill] sm:$0xff] %v19472_v0  ;;  %v19479_v5 = vsel %vm14815_vm14, 4294967295, %v19478_v5  ;;  %vm14821_vm6 = vmpackc.low %vm19482_vm1, %vm1768_vm10  ;;  %vm14825_vm11 = vcmp.ge.s32.totalorder %v1258_v33, 1  ;;  %v14838_v52 = vpack.c.bf16 %v1705_v63, %v1704_v55  ;;  %v9213_v33 = vpack.c.bf16 %v5036_v28, %v5035_v48  ;;  %v19491_v22 = vld [vmem:[#allocation138_spill] sm:$0xff]  ;;  %v19496_v28 = vld [vmem:[#allocation57_spill] sm:$0xff] }
 0x320   :  { %19480 = vst [vmem:[#allocation134_spill] sm:$0xff] %v19479_v5  ;;  %v19486_v9 = vsel %vm14825_vm11, 4294967295, %v19485_v9  ;;  %vm9212_vm7 = vmpackc.low %vm14805_vm9, %vm19176_vm2  ;;  %vm19492_vm8 = vcmp.ge.s32.totalorder %v19491_v22, 1  ;;  %v9216_v60 = vpack.c.bf16 %v5038_v16, %v5037_v62  ;;  %v19494_v0 = vld [vmem:[#allocation58_spill] sm:$0xff]  ;;  %vm18541_vm9 = vcmp.le.s32.totalorder %v19496_v28, 14  ;;  %v19497_v63 = vld [vmem:[#allocation139_spill] sm:$0xff] }
 0x321   :  { %19487 = vst [vmem:[#allocation149_spill] sm:$0xff] %v19486_v9  ;;  %vm9215_vm10 = vmpackc.low %vm14815_vm14, %vm19176_vm2  ;;  %vm19495_vm5 = vcmp.ge.s32.totalorder %v19494_v0, 1  ;;  %v1706_v55 = vld [vmem:[#allocation2 + $0x1f0] sm:$0xff]  ;;  %v2990_v16 = vld [vmem:[#allocation2 + $0x2] sm:$0xff] }
 0x322   :  { %19490 = vst [vmem:[#allocation135_spill] sm:$0xff] %v14838_v52  ;;  %vm1770_vm1 = vmand %vm19492_vm8, %vm14825_vm11  ;;  %vm19498_vm8 = vcmp.ge.s32.totalorder %v19497_v63, 1  ;;  %v1707_v48 = vld [vmem:[#allocation2 + $0x1f8] sm:$0xff]  ;;  %v2991_v62 = vld [vmem:[#allocation2 + $0xa] sm:$0xff] }
 0x323   :  { %vm3055_vm14 = vmand %vm19495_vm5, %vm14104_vm0  ;;  %vm19504_vm5 = vcmp.ge.s32.totalorder %v19496_v28, 1  ;;  %v5683_v9 = vld [vmem:[#allocation2 + $0x28] sm:$0xff]  ;;  %v14879_v63 = vpack.c.bf16 %v1707_v48, %v1706_v55  ;;  %v19511_v28 = vld [vmem:[#allocation80_spill] sm:$0xff] }
 0x324   :  { %vm14857_vm11 = vmpackc.low %vm19498_vm8, %vm1770_vm1  ;;  %v19509_v5 = vld [vmem:[#allocation81_spill] sm:$0xff]  ;;  %v19512_v55 = vld [vmem:[#allocation83_spill] sm:$0xff] }
 0x325   :  { %10168 = vmatmul.mubr.msk.bf16.gmra.mrb[120].mxu0 %vm14811_vm4, %v14832_v4  ;;  %vm14861_vm4 = vcmp.le.s32.totalorder %v1259_v34, 14  ;;  %v5682_v34 = vld [vmem:[#allocation2 + $0x20] sm:$0xff]  ;;  %vm19513_vm0 = vcmp.ge.s32.totalorder %v19512_v55, 1  ;;  %v19517_v48 = vld [vmem:[#allocation82_spill] sm:$0xff]  ;;  %v11322_v32 = vld [vmem:[#allocation8 + $0xd0] sm:$0xff]  }
 0x326   :  { %10171 = vmatprep.mubr.msk.bf16.mxu0 %vm14821_vm6, %v14838_v52  ;;  %10488 = vmatmul.mubr.msk.bf16.gmra.mrb[56].mxu1 %vm9212_vm7, %v9213_v33  ;;  %v19502_v40 = vsel %vm14861_vm4, 4294967295, %v19501_v40  ;;  %vm14867_vm6 = vmpackc.low %vm3055_vm14, %vm19504_vm5  ;;  %v5039_v33 = vld [vmem:[#allocation2 + $0x202] sm:$0xff]  ;;  %vm18547_vm7 = vcmp.le.s32.totalorder %v19494_v0, 14  ;;  %vm19510_vm14 = vcmp.ge.s32.totalorder %v19509_v5, 1  ;;  %v8910_v52 = vpack.c.bf16 %v2991_v62, %v2990_v16  ;;  %v2992_v29 = vld [vmem:[#allocation2 + $0x12] sm:$0xff] }
 0x327   :  { %10491 = vmatprep.mubr.msk.bf16.mxu1 %vm9215_vm10, %v9216_v60  ;;  %19503 = vst [vmem:[#allocation58_spill] sm:$0xff] %v19502_v40  ;;  %v5040_v60 = vld [vmem:[#allocation2 + $0x20a] sm:$0xff]  ;;  %vm5746_vm10 = vmand %vm18541_vm9, %vm14092_vm13  ;;  %vm18545_vm9 = vcmp.le.s32.totalorder %v19511_v28, 14  ;;  %v9230_v37 = vpack.c.bf16 %v5683_v9, %v5682_v34  ;;  %v2993_v9 = vld [vmem:[#allocation2 + $0x1a] sm:$0xff] }
 0x328   :  { %vm9218_vm1 = vmpackc.low %vm14861_vm4, %vm19176_vm2  ;;  %v9219_v4 = vpack.c.bf16 %v5040_v60, %v5039_v33  ;;  %v5684_v33 = vld [vmem:[#allocation2 + $0x30] sm:$0xff]  ;;  %v5685_v60 = vld [vmem:[#allocation2 + $0x38] sm:$0xff]  ;;  %v8913_v22 = vpack.c.bf16 %v2993_v9, %v2992_v29 }
 0x329   :  { %vm3057_vm8 = vmand %vm19510_vm14, %vm14136_vm3  ;;  %vm19514_vm14 = vcmp.ge.s32.totalorder %v19511_v28, 1  ;;  %v5686_v34 = vld [vmem:[#allocation2 + $0x40] sm:$0xff]  ;;  %v9233_v62 = vpack.c.bf16 %v5685_v60, %v5684_v33  ;;  %v11321_v29 = vld [vmem:[#allocation8 + $0xc8] sm:$0xff]  }
 0x32a   :  { %vm9229_vm5 = vmpackc.low %vm18547_vm7, %vm5746_vm10  ;;  %vm18553_vm10 = vcmp.le.s32.totalorder %v19517_v48, 14  ;;  %v2996_v9 = vld [vmem:[#allocation2 + $0x32] sm:$0xff]  ;;  %v5690_v60 = vld [vmem:[#allocation2 + $0x60] sm:$0xff] }
 0x32b   :  { %vm3059_vm2 = vmand %vm19513_vm0, %vm14147_vm12  ;;  %v5688_v16 = vld [vmem:[#allocation2 + $0x50] sm:$0xff]  ;;  %v11320_v33 = vld [vmem:[#allocation8 + $0x1f0] sm:$0xff]  }
 0x32c   :  { %vm14899_vm3 = vmpackc.low %vm3057_vm8, %vm19514_vm14  ;;  %vm18555_vm8 = vcmp.le.s32.totalorder %v19512_v55, 14 }
 0x32d   :  { %10172 = vmatmul.mubr.msk.bf16.gmra.mrb[124].mxu0 %vm14857_vm11, %v14879_v63  ;;  %vm18554_vm11 = vcmp.le.s32.totalorder %v19509_v5, 14  ;;  %vm5748_vm0 = vmand %vm18545_vm9, %vm14114_vm15  ;;  %vm18557_vm15 = vcmp.le.s32.totalorder %v19006_v15, 14  ;;  %v9236_v5 = vpack.c.bf16 %v5687_v59, %v5686_v34  ;;  %v2998_v59 = vld [vmem:[#allocation2 + $0x42] sm:$0xff] }
 0x32e   :  { %10191 = vmatprep.mubr.msk.bf16.mxu0 %vm14867_vm6, %v8910_v52  ;;  %10492 = vmatmul.mubr.msk.bf16.gmra.mrb[60].mxu1 %vm9218_vm1, %v9219_v4  ;;  %v2994_v52 = vld [vmem:[#allocation2 + $0x22] sm:$0xff]  ;;  %v2995_v4 = vld [vmem:[#allocation2 + $0x2a] sm:$0xff]  ;;  %vm19519_vm6 = vcmp.ge.s32.totalorder %v19517_v48, 1  ;;  %vm9232_vm9 = vmpackc.low %vm18554_vm11, %vm5748_vm0  ;;  %vm19526_vm0 = vnez %v19171_v12 }
 0x32f   :  { %10511 = vmatprep.mubr.msk.bf16.mxu1 %vm9229_vm5, %v9230_v37  ;;  %vm14911_vm1 = vmpackc.low %vm3059_vm2, %vm19519_vm6  ;;  %v19522_v37 = vld [vmem:[#allocation140_spill] sm:$0xff]  ;;  %vm19524_vm2 = vnez %v19165_v53  ;;  %vm19525_vm6 = vcmp.ge.s32.totalorder %v19007_v38, 1  ;;  %v8916_v28 = vpack.c.bf16 %v2995_v4, %v2994_v52  ;;  %v11314_v48 = vld [vmem:[#allocation8 + $0x1c8] sm:$0xff]  }
 0x330   :  { %vm19523_vm5 = vnez %v19522_v37  ;;  %vm3061_vm7 = vmand %vm19525_vm6, %vm19524_vm2  ;;  %v2997_v52 = vld [vmem:[#allocation2 + $0x3a] sm:$0xff]  ;;  %v5691_v34 = vld [vmem:[#allocation2 + $0x68] sm:$0xff] }
 0x331   :  { %vm5750_vm14 = vmand %vm18553_vm10, %vm19523_vm5  ;;  %vm19527_vm10 = vcmp.ge.s32.totalorder %v19023_v30, 1  ;;  %v8919_v12 = vpack.c.bf16 %v2997_v52, %v2996_v9  ;;  %v11316_v9 = vld [vmem:[#allocation8 + $0x1d8] sm:$0xff]   ;;  %v9242_v52 = vpack.c.bf16 %v5691_v34, %v5690_v60  ;;  %v5695_v34 = vld [vmem:[#allocation2 + $0x88] sm:$0xff] }
 0x332   :  { %vm9235_vm12 = vmpackc.low %vm18555_vm8, %vm5750_vm14  ;;  %vm19528_vm14 = vcmp.ge.s32.totalorder %v19006_v15, 1  ;;  %vm19532_vm8 = vcmp.ge.s32.totalorder %v19022_v7, 1  ;;  %v5694_v60 = vld [vmem:[#allocation2 + $0x80] sm:$0xff] }
 0x333   :  { %vm3063_vm11 = vmand %vm19527_vm10, %vm19526_vm0  ;;  %v3005_v4 = vld [vmem:[#allocation2 + $0x7a] sm:$0xff] }
 0x334   :  { %vm14939_vm6 = vmpackc.low %vm3061_vm7, %vm19528_vm14 }
 0x335   :  { %10192 = vmatmul.mubr.msk.bf16.vlgmr.msra.gmra.mrb[64].mxu0 %vm14899_vm3, %v8913_v22  ;;  %vm18561_vm3 = vcmp.le.s32.totalorder %v19022_v7, 14  ;;  %v2999_v22 = vld [vmem:[#allocation2 + $0x4a] sm:$0xff]  ;;  %vm14952_vm7 = vmpackc.low %vm3063_vm11, %vm19532_vm8  ;;  %vm19537_vm11 = vcmp.le.s32.totalorder %v19007_v38, 14 }
 0x336   :  { %10195 = vmatprep.mubr.msk.bf16.mxu0 %vm14911_vm1, %v8916_v28  ;;  %10512 = vmatmul.mubr.msk.bf16.vlgmr.msra.gmra.mrb[0].mxu1 %vm9232_vm9, %v9233_v62  ;;  %vm19531_vm1 = vnez %v19156_v25  ;;  %v11315_v62 = vld [vmem:[#allocation8 + $0x1d0] sm:$0xff]   ;;  %v8922_v53 = vpack.c.bf16 %v2999_v22, %v2998_v59  ;;  %v11323_v59 = vld [vmem:[#allocation8 + $0xd8] sm:$0xff]   ;;  %v3003_v22 = vld [vmem:[#allocation2 + $0x6a] sm:$0xff] }
 0x337   :  { %10576 = vmatpush3.bf16.msra.mxu1 %v14389_v36  ;;  %10515 = vmatprep.mubr.msk.bf16.mxu1 %vm9235_vm12, %v9236_v5  ;;  %vm5752_vm9 = vmand %vm18557_vm15, %vm19531_vm1  ;;  %v5689_v36 = vld [vmem:[#allocation2 + $0x58] sm:$0xff]  ;;  %v19535_v5 = vld [vmem:[#allocation76_spill] sm:$0xff]  ;;  %vm19540_vm15 = vnez %v19190_v20  ;;  %vm19541_vm12 = vcmp.ge.s32.totalorder %v13552_v50, 1 }
 0x338   :  { %10577 = vmatprep.subr.bf16.mxu1 %v11314_v48  ;;  %10256 = vmatpush3.bf16.msra.mxu0 %v14736_v54  ;;  %vm19536_vm14 = vnez %v19535_v5  ;;  %vm14964_vm8 = vmpackc.low %vm19537_vm11, %vm5752_vm9  ;;  %v14976_v7 = vpack.c.bf16 %v5689_v36, %v5688_v16  ;;  %vm19544_vm9 = vcmp.le.s32.totalorder %v19023_v30, 14  ;;  %v5692_v38 = vld [vmem:[#allocation2 + $0x70] sm:$0xff]  ;;  %v11317_v16 = vld [vmem:[#allocation8 + $0x1e0] sm:$0xff]  }
 0x339   :  { %vm5754_vm10 = vmand %vm18561_vm3, %vm19536_vm14  ;;  %10257 = vmatprep.subr.bf16.mxu0 %v11321_v29  ;;  %vm18562_vm3 = vcmp.le.s32.totalorder %v13550_v39, 14  ;;  %v5693_v36 = vld [vmem:[#allocation2 + $0x78] sm:$0xff]  ;;  %v3006_v28 = vld [vmem:[#allocation2 + $0x82] sm:$0xff]  ;;  %vm19617_vm14 = vcmp.le.s32.totalorder %v19257_v45, 14 }
 0x33a   :  { %vm14972_vm0 = vmand %vm19541_vm12, %vm19540_vm15  ;;  %vm19547_vm12 = vnez %v19196_v19  ;;  %vm19548_vm15 = vcmp.ge.s32.totalorder %v13559_v58, 1  ;;  %v5696_v19 = vld [vmem:[#allocation2 + $0x90] sm:$0xff]  ;;  %v19641_v20 = vld [vmem:[#allocation47_spill] sm:$0xff] }
 0x33b   :  { %10578 = vmatpush3.bf16.msra.mxu1 %v11314_v48  ;;  %vm14980_vm11 = vmpackc.low %vm19544_vm9, %vm5754_vm10  ;;  %v15043_v48 = vpack.c.bf16 %v5693_v36, %v5692_v38  ;;  %v3007_v38 = vld [vmem:[#allocation2 + $0x8a] sm:$0xff] }
 0x33c   :  { %10579 = vmatprep.subr.bf16.mxu1 %v11315_v62  ;;  %10258 = vmatpush3.bf16.msra.mxu0 %v11321_v29  ;;  %vm14991_vm2 = vmand %vm19548_vm15, %vm19547_vm12  ;;  %v3000_v29 = vld [vmem:[#allocation2 + $0x52] sm:$0xff]  ;;  %vm18564_vm15 = vcmp.le.s32.totalorder %v13557_v8, 14  ;;  %vm19559_vm12 = vcmp.le.s32.totalorder %v13552_v50, 14  ;;  %v3011_v36 = vld [vmem:[#allocation2 + $0xaa] sm:$0xff] }
 0x33d   :  { %10196 = vmatmul.mubr.msk.bf16.gmra.mrb[68].mxu0 %vm14939_vm6, %v8919_v12  ;;  %10259 = vmatprep.subr.bf16.mxu0 %v11322_v32  ;;  %v3001_v12 = vld [vmem:[#allocation2 + $0x5a] sm:$0xff]  ;;  %vm19551_vm6 = vcmp.ge.s32.totalorder %v13550_v39, 1 }
 0x33e   :  { %10199 = vmatprep.mubr.msk.bf16.mxu0 %vm14952_vm7, %v8922_v53  ;;  %10516 = vmatmul.mubr.msk.bf16.gmra.mrb[4].mxu1 %vm14964_vm8, %v14976_v7  ;;  %vm15004_vm10 = vmpackc.low %vm14972_vm0, %vm19551_vm6  ;;  %v3002_v53 = vld [vmem:[#allocation2 + $0x62] sm:$0xff]  ;;  %vm19554_vm8 = vnez %v19180_v13  ;;  %vm19555_vm0 = vcmp.ge.s32.totalorder %v13557_v8, 1  ;;  %vm19558_vm7 = vnez %v19184_v57  ;;  %v8925_v54 = vpack.c.bf16 %v3001_v12, %v3000_v29  ;;  %v11318_v29 = vld [vmem:[#allocation8 + $0x1e8] sm:$0xff]  }
 0x33f   :  { %10519 = vmatprep.mubr.msk.bf16.mxu1 %vm14980_vm11, %v9242_v52  ;;  %vm5756_vm9 = vmand %vm18562_vm3, %vm19554_vm8  ;;  %10580 = vmatpush3.bf16.msra.mxu1 %v11315_v62  ;;  %v11324_v62 = vld [vmem:[#allocation8 + $0xe0] sm:$0xff]   ;;  %vm19563_vm11 = vcmp.ge.s32.totalorder %v13595_v21, 1  ;;  %v8928_v52 = vpack.c.bf16 %v3003_v22, %v3002_v53  ;;  %v15054_v12 = vpack.c.bf16 %v5695_v34, %v5694_v60  ;;  %v11326_v53 = vld [vmem:[#allocation8 + $0xe8] sm:$0xff]  }
 0x340   :  { %vm15020_vm6 = vmpackc.low %vm14991_vm2, %vm19555_vm0  ;;  %10581 = vmatprep.subr.bf16.mxu1 %v11316_v9  ;;  %10260 = vmatpush3.bf16.msra.mxu0 %v11322_v32  ;;  %vm19562_vm0 = vnez %v19214_v1  ;;  %v5697_v60 = vld [vmem:[#allocation2 + $0x98] sm:$0xff]  ;;  %v5699_v32 = vld [vmem:[#allocation2 + $0xa8] sm:$0xff] }
 0x341   :  { %vm5758_vm3 = vmand %vm18564_vm15, %vm19558_vm7  ;;  %10261 = vmatprep.subr.bf16.mxu0 %v11323_v59  ;;  %vm18565_vm15 = vcmp.le.s32.totalorder %v13593_v47, 14  ;;  %v11325_v1 = vld [vmem:[#allocation8 + $0x1f8] sm:$0xff]   ;;  %v5700_v34 = vld [vmem:[#allocation2 + $0xb0] sm:$0xff] }
 0x342   :  { %vm15031_vm2 = vmpackc.low %vm19559_vm12, %vm5756_vm9  ;;  %vm19566_vm12 = vcmp.le.s32.totalorder %v13559_v58, 14  ;;  %v3014_v22 = vld [vmem:[#allocation2 + $0xc2] sm:$0xff] }
 0x343   :  { %vm15039_vm8 = vmand %vm19563_vm11, %vm19562_vm0  ;;  %10582 = vmatpush3.bf16.msra.mxu1 %v11316_v9  ;;  %vm19569_vm11 = vnez %v19220_v26  ;;  %vm19570_vm0 = vcmp.ge.s32.totalorder %v13619_v17, 1  ;;  %v8934_v9 = vpack.c.bf16 %v3007_v38, %v3006_v28  ;;  %v15113_v26 = vpack.c.bf16 %v5697_v60, %v5696_v19  ;;  %v3009_v28 = vld [vmem:[#allocation2 + $0x9a] sm:$0xff]  ;;  %v3010_v38 = vld [vmem:[#allocation2 + $0xa2] sm:$0xff] }
 0x344   :  { %vm15047_vm9 = vmpackc.low %vm19566_vm12, %vm5758_vm3  ;;  %10583 = vmatprep.subr.bf16.mxu1 %v11317_v16  ;;  %10262 = vmatpush3.bf16.msra.mxu0 %v11323_v59  ;;  %v3004_v59 = vld [vmem:[#allocation2 + $0x72] sm:$0xff]  ;;  %vm19573_vm3 = vcmp.ge.s32.totalorder %v13593_v47, 1  ;;  %v15158_v60 = vld [vmem:[#allocation8 + $0x200] sm:$0xff]  }
 0x345   :  { %10200 = vmatmul.mubr.msk.bf16.gmra.mrb[72].mxu0 %vm15004_vm10, %v8925_v54  ;;  %vm15060_vm7 = vmand %vm19570_vm0, %vm19569_vm11  ;;  %10263 = vmatprep.subr.bf16.mxu0 %v11324_v62  ;;  %vm18567_vm0 = vcmp.le.s32.totalorder %v13605_v10, 14  ;;  %vm19581_vm11 = vcmp.le.s32.totalorder %v13595_v21, 14  ;;  %v5698_v54 = vld [vmem:[#allocation2 + $0xa0] sm:$0xff]  ;;  %v5705_v19 = vld [vmem:[#allocation2 + $0xd8] sm:$0xff] }
 0x346   :  { %10203 = vmatprep.mubr.msk.bf16.mxu0 %vm15020_vm6, %v8928_v52  ;;  %10520 = vmatmul.mubr.msk.bf16.gmra.mrb[8].mxu1 %vm15031_vm2, %v15043_v48  ;;  %vm15073_vm10 = vmpackc.low %vm15039_vm8, %vm19573_vm3  ;;  %vm19576_vm2 = vnez %v19204_v18  ;;  %vm19577_vm8 = vcmp.ge.s32.totalorder %v13605_v10, 1  ;;  %vm19580_vm6 = vnez %v19208_v49  ;;  %v8931_v52 = vpack.c.bf16 %v3005_v4, %v3004_v59  ;;  %v11328_v4 = vld [vmem:[#allocation8 + $0xf8] sm:$0xff]  }
 0x347   :  { %10523 = vmatprep.mubr.msk.bf16.mxu1 %vm15047_vm9, %v15054_v12  ;;  %vm5760_vm12 = vmand %vm18565_vm15, %vm19576_vm2  ;;  %10584 = vmatpush3.bf16.msra.mxu1 %v11317_v16  ;;  %v11327_v16 = vld [vmem:[#allocation8 + $0xf0] sm:$0xff]   ;;  %vm19585_vm9 = vcmp.ge.s32.totalorder %v13663_v43, 1  ;;  %v15120_v59 = vpack.c.bf16 %v5699_v32, %v5698_v54  ;;  %v5702_v32 = vld [vmem:[#allocation2 + $0xc0] sm:$0xff] }
 0x348   :  { %vm15090_vm3 = vmpackc.low %vm15060_vm7, %vm19577_vm8  ;;  %10585 = vmatprep.subr.bf16.mxu1 %v11318_v29  ;;  %10264 = vmatpush3.bf16.msra.mxu0 %v11324_v62  ;;  %vm19584_vm8 = vnez %v19236_v14  ;;  %v5701_v54 = vld [vmem:[#allocation2 + $0xb8] sm:$0xff]  ;;  %v8940_v62 = vpack.c.bf16 %v3011_v36, %v3010_v38  ;;  %v5704_v36 = vld [vmem:[#allocation2 + $0xd0] sm:$0xff] }
 0x349   :  { %vm5762_vm15 = vmand %vm18567_vm0, %vm19580_vm6  ;;  %10265 = vmatprep.subr.bf16.mxu0 %v11326_v53  ;;  %vm18569_vm0 = vcmp.le.s32.totalorder %v13661_v41, 14  ;;  %v3018_v38 = vld [vmem:[#allocation2 + $0xe2] sm:$0xff] }
 0x34a   :  { %vm15101_vm7 = vmpackc.low %vm19581_vm11, %vm5760_vm12  ;;  %vm19588_vm11 = vcmp.le.s32.totalorder %v13619_v17, 14  ;;  %v19639_v14 = vld [vmem:[#allocation68_spill] sm:$0xff] }
 0x34b   :  { %vm15109_vm2 = vmand %vm19585_vm9, %vm19584_vm8  ;;  %10586 = vmatpush3.bf16.msra.mxu1 %v11318_v29  ;;  %vm19589_vm9 = vnez %v19242_v51  ;;  %vm19590_vm8 = vcmp.ge.s32.totalorder %v13673_v11, 1 }
 0x34c   :  { %vm9253_vm12 = vmpackc.low %vm19588_vm11, %vm5762_vm15  ;;  %10587 = vmatprep.subr.bf16.mxu1 %v11320_v33  ;;  %10266 = vmatpush3.bf16.msra.mxu0 %v11326_v53  ;;  %v3008_v53 = vld [vmem:[#allocation2 + $0x92] sm:$0xff]  ;;  %vm19593_vm15 = vcmp.ge.s32.totalorder %v13661_v41, 1  ;;  %vm19596_vm11 = vnez %v19228_v23 }
 0x34d   :  { %10204 = vmatmul.mubr.msk.bf16.gmra.mrb[76].mxu0 %vm15073_vm10, %v8931_v52  ;;  %vm15126_vm6 = vmand %vm19590_vm8, %vm19589_vm9  ;;  %10267 = vmatprep.subr.bf16.mxu0 %v11327_v16  ;;  %vm18570_vm8 = vcmp.le.s32.totalorder %v13671_v6, 14  ;;  %vm19601_vm9 = vcmp.le.s32.totalorder %v13663_v43, 14  ;;  %v8937_v52 = vpack.c.bf16 %v3009_v28, %v3008_v53  ;;  %v3013_v53 = vld [vmem:[#allocation2 + $0xba] sm:$0xff]  ;;  %v3015_v28 = vld [vmem:[#allocation2 + $0xca] sm:$0xff] }
 0x34e   :  { %10207 = vmatprep.mubr.msk.bf16.mxu0 %vm15090_vm3, %v8934_v9  ;;  %10524 = vmatmul.mubr.msk.bf16.gmra.mrb[12].mxu1 %vm15101_vm7, %v15113_v26  ;;  %vm15139_vm10 = vmpackc.low %vm15109_vm2, %vm19593_vm15  ;;  %vm19597_vm2 = vcmp.ge.s32.totalorder %v13671_v6, 1  ;;  %v15175_v9 = vpack.c.bf16 %v5701_v54, %v5700_v34  ;;  %v5706_v34 = vld [vmem:[#allocation2 + $0xe0] sm:$0xff]  ;;  %v5707_v54 = vld [vmem:[#allocation2 + $0xe8] sm:$0xff] }
 0x34f   :  { %10527 = vmatprep.mubr.msk.bf16.mxu1 %vm9253_vm12, %v15120_v59  ;;  %vm5764_vm7 = vmand %vm18569_vm0, %vm19596_vm11  ;;  %10588 = vmatpush3.bf16.msra.mxu1 %v11320_v33  ;;  %vm19600_vm0 = vnez %v19230_v44  ;;  %vm19605_vm11 = vcmp.ge.s32.totalorder %v19257_v45, 1 }
 0x350   :  { %vm15154_vm15 = vmpackc.low %vm15126_vm6, %vm19597_vm2  ;;  %10589 = vmatprep.subr.bf16.mxu1 %v11325_v1  ;;  %10268 = vmatpush3.bf16.msra.mxu0 %v11327_v16  ;;  %v5703_v16 = vld [vmem:[#allocation2 + $0xc8] sm:$0xff]  ;;  %vm19604_vm2 = vnez %v19255_v24  ;;  %v19623_v24 = vld [vmem:[#allocation64_spill] sm:$0xff] }
 0x351   :  { %vm5766_vm3 = vmand %vm18570_vm8, %vm19600_vm0  ;;  %10269 = vmatprep.subr.bf16.mxu0 %v11328_v4  ;;  %vm19606_vm8 = vcmp.le.s32.totalorder %v13673_v11, 14  ;;  %v15183_v29 = vpack.c.bf16 %v5703_v16, %v5702_v32  ;;  %v19619_v32 = vld [vmem:[#allocation63_spill] sm:$0xff]  ;;  %v8946_v16 = vpack.c.bf16 %v3015_v28, %v3014_v22 }
 0x352   :  { %vm15167_vm6 = vmpackc.low %vm19601_vm9, %vm5764_vm7  ;;  %vm18571_vm9 = vcmp.le.s32.totalorder %v13705_v61, 14  ;;  %vm19607_vm7 = vnez %v19260_v56  ;;  %v15231_v56 = vpack.c.bf16 %v5707_v54, %v5706_v34  ;;  %v3016_v22 = vld [vmem:[#allocation2 + $0xd2] sm:$0xff]  ;;  %v3017_v28 = vld [vmem:[#allocation2 + $0xda] sm:$0xff] }
 0x353   :  { %vm3077_vm12 = vmand %vm19605_vm11, %vm19604_vm2  ;;  %10590 = vmatpush3.bf16.msra.mxu1 %v11325_v1  ;;  %vm19608_vm11 = vcmp.ge.s32.totalorder %v19262_v42, 1  ;;  %v19630_v1 = vld [vmem:[#allocation69_spill] sm:$0xff]  ;;  %v5708_v54 = vld [vmem:[#allocation2 + $0xf0] sm:$0xff]  ;;  %v8949_v51 = vpack.c.bf16 %v3017_v28, %v3016_v22 }
 0x354   :  { %vm9259_vm0 = vmpackc.low %vm19606_vm8, %vm5766_vm3  ;;  %10270 = vmatpush3.bf16.msra.mxu0 %v11328_v4  ;;  %10655 = vmatprep.subr.bf16.mxu1 %v15158_v60  ;;  %vm19609_vm8 = vcmp.ge.s32.totalorder %v13705_v61, 1  ;;  %v3012_v4 = vld [vmem:[#allocation2 + $0xb2] sm:$0xff]  ;;  %19622 = vst [vmem:[#allocation83_spill] sm:$0xff] %v15231_v56  ;;  %v19676_v28 = vld [vmem:[#allocation88_spill] sm:$0xff] }
 0x355   :  { %10208 = vmatmul.mubr.msk.bf16.gmra.mrb[80].mxu0 %vm15139_vm10, %v8937_v52  ;;  %vm3079_vm2 = vmand %vm19608_vm11, %vm19607_vm7  ;;  %vm18574_vm10 = vcmp.le.s32.totalorder %v13715_v27, 14  ;;  %v8943_v33 = vpack.c.bf16 %v3013_v53, %v3012_v4  ;;  %v15224_v52 = vpack.c.bf16 %v5705_v19, %v5704_v36  ;;  %v19625_v4 = vld [vmem:[#allocation71_spill] sm:$0xff]  ;;  %v19631_v36 = vld [vmem:[#allocation62_spill] sm:$0xff] }
 0x356   :  { %10211 = vmatprep.mubr.msk.bf16.mxu0 %vm15154_vm15, %v8940_v62  ;;  %10528 = vmatmul.mubr.msk.bf16.gmra.mrb[16].mxu1 %vm15167_vm6, %v15175_v9  ;;  %vm15196_vm3 = vmpackc.low %vm3077_vm12, %vm19609_vm8  ;;  %vm19612_vm15 = vnez %v19248_v3  ;;  %vm19613_vm12 = vcmp.ge.s32.totalorder %v13715_v27, 1  ;;  %vm19616_vm8 = vnez %v19250_v46  ;;  %v19621_v62 = vld [vmem:[#allocation61_spill] sm:$0xff]  ;;  %v19648_v22 = vld [vmem:[#allocation46_spill] sm:$0xff] }
 0x357   :  { %10531 = vmatprep.mubr.msk.bf16.mxu1 %vm9259_vm0, %v15183_v29  ;;  %vm5768_vm7 = vmand %vm18571_vm9, %vm19612_vm15  ;;  %vm18575_vm0 = vcmp.le.s32.totalorder %v19262_v42, 14  ;;  %vm18576_vm5 = vcmp.le.s32.totalorder %v19621_v62, 14  ;;  %v3019_v19 = vld [vmem:[#allocation2 + $0xea] sm:$0xff]  ;;  %v19653_v53 = vld [vmem:[#allocation60_spill] sm:$0xff] }
 0x358   :  { %vm15209_vm6 = vmpackc.low %vm3079_vm2, %vm19613_vm12  ;;  %vm19618_vm2 = vnez %v19276_v31  ;;  %vm19620_vm12 = vcmp.ge.s32.totalorder %v19619_v32, 1  ;;  %v5711_v31 = vld [vmem:[#allocation2 + $0x108] sm:$0xff]  ;;  %v5712_v34 = vld [vmem:[#allocation2 + $0x110] sm:$0xff] }
 0x359   :  { %vm5770_vm11 = vmand %vm18574_vm10, %vm19616_vm8 }
 0x35a   :  { %vm9262_vm9 = vmpackc.low %vm19617_vm14, %vm5768_vm7  ;;  %vm19624_vm14 = vnez %v19623_v24  ;;  %vm19626_vm7 = vcmp.ge.s32.totalorder %v19625_v4, 1  ;;  %v5710_v24 = vld [vmem:[#allocation2 + $0x100] sm:$0xff] }
 0x35b   :  { %vm3081_vm15 = vmand %vm19620_vm12, %vm19618_vm2  ;;  %vm19627_vm12 = vcmp.ge.s32.totalorder %v19621_v62, 1 }
 0x35c   :  { %vm9265_vm1 = vmpackc.low %vm18575_vm0, %vm5770_vm11 }
 0x35d   :  { %10212 = vmatmul.mubr.msk.bf16.gmra.mrb[84].mxu0 %vm15196_vm3, %v8943_v33  ;;  %vm3083_vm10 = vmand %vm19626_vm7, %vm19624_vm14  ;;  %vm18585_vm3 = vcmp.le.s32.totalorder %v19630_v1, 14  ;;  %vm19632_vm7 = vnez %v19631_v36  ;;  %v5709_v33 = vld [vmem:[#allocation2 + $0xf8] sm:$0xff]  ;;  %vm19638_vm14 = vcmp.le.s32.totalorder %v19619_v32, 14  ;;  %v19646_v32 = vld [vmem:[#allocation49_spill] sm:$0xff] }
 0x35e   :  { %10215 = vmatprep.mubr.msk.bf16.mxu0 %vm15209_vm6, %v8946_v16  ;;  %10532 = vmatmul.mubr.msk.bf16.gmra.mrb[20].mxu1 %vm9262_vm9, %v15224_v52  ;;  %vm15242_vm11 = vmpackc.low %vm3081_vm15, %vm19627_vm12  ;;  %vm19633_vm9 = vcmp.ge.s32.totalorder %v19630_v1, 1  ;;  %v19636_v16 = vld [vmem:[#allocation146_spill] sm:$0xff]  ;;  %v15270_v62 = vpack.c.bf16 %v5709_v33, %v5708_v54  ;;  %v15277_v1 = vpack.c.bf16 %v5711_v31, %v5710_v24  ;;  %v3021_v24 = vld [vmem:[#allocation2 + $0xfa] sm:$0xff] }
 0x35f   :  { %10535 = vmatprep.mubr.msk.bf16.mxu1 %vm9265_vm1, %v15231_v56  ;;  %vm5772_vm6 = vmand %vm18576_vm5, %vm19632_vm7  ;;  %vm18586_vm1 = vcmp.le.s32.totalorder %v19625_v4, 14  ;;  %vm19637_vm12 = vnez %v19636_v16  ;;  %v8952_v56 = vpack.c.bf16 %v3019_v19, %v3018_v38  ;;  %v19644_v16 = vld [vmem:[#allocation51_spill] sm:$0xff]  ;;  %v19654_v31 = vld [vmem:[#allocation66_spill] sm:$0xff] }
 0x360   :  { %vm15255_vm15 = vmpackc.low %vm3083_vm10, %vm19633_vm9  ;;  %vm19640_vm10 = vnez %v19639_v14  ;;  %vm19642_vm9 = vcmp.ge.s32.totalorder %v19641_v20, 1  ;;  %19643 = vst [vmem:[#allocation140_spill] sm:$0xff] %v15270_v62  ;;  %vm18587_vm8 = vcmp.le.s32.totalorder %v19644_v16, 14  ;;  %v3023_v38 = vld [vmem:[#allocation2 + $0x10a] sm:$0xff]  ;;  %v5713_v54 = vld [vmem:[#allocation2 + $0x118] sm:$0xff] }
 0x361   :  { %vm5774_vm0 = vmand %vm18585_vm3, %vm19637_vm12  ;;  %19645 = vst [vmem:[#allocation76_spill] sm:$0xff] %v15277_v1  ;;  %v19659_v33 = vld [vmem:[#allocation84_spill] sm:$0xff]  ;;  %v5715_v14 = vld [vmem:[#allocation2 + $0x128] sm:$0xff]  ;;  %v15316_v4 = vpack.c.bf16 %v5713_v54, %v5712_v34 }
 0x362   :  { %vm9268_vm5 = vmpackc.low %vm19638_vm14, %vm5772_vm6  ;;  %vm19647_vm14 = vnez %v19646_v32  ;;  %vm19649_vm6 = vcmp.ge.s32.totalorder %v19648_v22, 1  ;;  %v5714_v32 = vld [vmem:[#allocation2 + $0x120] sm:$0xff]  ;;  %v5716_v19 = vld [vmem:[#allocation2 + $0x130] sm:$0xff] }
 0x363   :  { %vm3085_vm2 = vmand %vm19642_vm9, %vm19640_vm10  ;;  %vm19650_vm9 = vcmp.ge.s32.totalorder %v19644_v16, 1  ;;  %v19662_v16 = vld [vmem:[#allocation56_spill] sm:$0xff]  ;;  %19666 = vst [vmem:[#allocation62_spill] sm:$0xff] %v15316_v4  ;;  %v5717_v34 = vld [vmem:[#allocation2 + $0x138] sm:$0xff] }
 0x364   :  { %vm9271_vm7 = vmpackc.low %vm18586_vm1, %vm5774_vm0  ;;  %v19682_v54 = vld [vmem:[#allocation52_spill] sm:$0xff] }
 0x365   :  { %10216 = vmatmul.mubr.msk.bf16.gmra.mrb[88].mxu0 %vm15242_vm11, %v8949_v51  ;;  %vm3087_vm3 = vmand %vm19649_vm6, %vm19647_vm14  ;;  %vm18594_vm11 = vcmp.le.s32.totalorder %v19653_v53, 14  ;;  %v3020_v51 = vld [vmem:[#allocation2 + $0xf2] sm:$0xff]  ;;  %vm19655_vm6 = vnez %v19654_v31  ;;  %vm19661_vm14 = vcmp.le.s32.totalorder %v19641_v20, 14  ;;  %v19664_v31 = vld [vmem:[#allocation53_spill] sm:$0xff] }
 0x366   :  { %10219 = vmatprep.mubr.msk.bf16.mxu0 %vm15255_vm15, %v8952_v56  ;;  %10536 = vmatmul.mubr.msk.bf16.gmra.mrb[24].mxu1 %vm9268_vm5, %v15270_v62  ;;  %vm15288_vm0 = vmpackc.low %vm3085_vm2, %vm19650_vm9  ;;  %v3022_v56 = vld [vmem:[#allocation2 + $0x102] sm:$0xff]  ;;  %vm19656_vm5 = vcmp.ge.s32.totalorder %v19653_v53, 1  ;;  %vm19660_vm9 = vnez %v19659_v33  ;;  %v19667_v33 = vld [vmem:[#allocation70_spill] sm:$0xff]  ;;  %v15323_v53 = vpack.c.bf16 %v5715_v14, %v5714_v32 }
 0x367   :  { %10539 = vmatprep.mubr.msk.bf16.mxu1 %vm9271_vm7, %v15277_v1  ;;  %vm5776_vm15 = vmand %vm18587_vm8, %vm19655_vm6  ;;  %vm18595_vm7 = vcmp.le.s32.totalorder %v19648_v22, 14  ;;  %v8955_v1 = vpack.c.bf16 %v3021_v24, %v3020_v51  ;;  %v8958_v62 = vpack.c.bf16 %v3023_v38, %v3022_v56  ;;  %vm18596_vm12 = vcmp.le.s32.totalorder %v19667_v33, 14  ;;  %v19669_v20 = vld [vmem:[#allocation65_spill] sm:$0xff]  ;;  %v3024_v14 = vld [vmem:[#allocation2 + $0x112] sm:$0xff] }
 0x368   :  { %vm15301_vm2 = vmpackc.low %vm3087_vm3, %vm19656_vm5  ;;  %vm19663_vm3 = vnez %v19662_v16  ;;  %vm19665_vm5 = vcmp.ge.s32.totalorder %v19664_v31, 1  ;;  %19668 = vst [vmem:[#allocation151_spill] sm:$0xff] %v15323_v53  ;;  %v19671_v51 = vld [vmem:[#allocation89_spill] sm:$0xff]  ;;  %v3025_v32 = vld [vmem:[#allocation2 + $0x11a] sm:$0xff]  ;;  %v15362_v22 = vpack.c.bf16 %v5717_v34, %v5716_v19 }
 0x369   :  { %vm5778_vm1 = vmand %vm18594_vm11, %vm19660_vm9  ;;  %v3027_v56 = vld [vmem:[#allocation2 + $0x12a] sm:$0xff]  ;;  %v19699_v24 = vld [vmem:[#allocation96_spill] sm:$0xff] }
 0x36a   :  { %vm9274_vm8 = vmpackc.low %vm19661_vm14, %vm5776_vm15  ;;  %vm19670_vm14 = vnez %v19669_v20  ;;  %vm19672_vm15 = vcmp.ge.s32.totalorder %v19671_v51, 1  ;;  %v5718_v20 = vld [vmem:[#allocation2 + $0x140] sm:$0xff]  ;;  %v5719_v16 = vld [vmem:[#allocation2 + $0x148] sm:$0xff]  ;;  %19689 = vst [vmem:[#allocation152_spill] sm:$0xff] %v15362_v22 }
 0x36b   :  { %vm3089_vm10 = vmand %vm19665_vm5, %vm19663_vm3  ;;  %vm19673_vm5 = vcmp.ge.s32.totalorder %v19667_v33, 1  ;;  %v19685_v33 = vld [vmem:[#allocation87_spill] sm:$0xff]  ;;  %v5720_v38 = vld [vmem:[#allocation2 + $0x150] sm:$0xff] }
 0x36c   :  { %vm9277_vm6 = vmpackc.low %vm18595_vm7, %vm5778_vm1  ;;  %v5721_v19 = vld [vmem:[#allocation2 + $0x158] sm:$0xff]  ;;  %v19705_v34 = vld [vmem:[#allocation90_spill] sm:$0xff] }
 0x36d   :  { %10220 = vmatmul.mubr.msk.bf16.gmra.mrb[92].mxu0 %vm15288_vm0, %v8955_v1  ;;  %vm3091_vm11 = vmand %vm19672_vm15, %vm19670_vm14  ;;  %vm18603_vm0 = vcmp.le.s32.totalorder %v19676_v28, 14  ;;  %v19677_v1 = vld [vmem:[#allocation50_spill] sm:$0xff]  ;;  %vm19684_vm14 = vcmp.le.s32.totalorder %v19664_v31, 14  ;;  %v19692_v31 = vld [vmem:[#allocation91_spill] sm:$0xff] }
 0x36e   :  { %10223 = vmatprep.mubr.msk.bf16.mxu0 %vm15301_vm2, %v8958_v62  ;;  %10540 = vmatmul.mubr.msk.bf16.gmra.mrb[28].mxu1 %vm9274_vm8, %v15316_v4  ;;  %vm15334_vm1 = vmpackc.low %vm3089_vm10, %vm19673_vm5  ;;  %vm19678_vm15 = vnez %v19677_v1  ;;  %v3026_v62 = vld [vmem:[#allocation2 + $0x122] sm:$0xff]  ;;  %vm19679_vm8 = vcmp.ge.s32.totalorder %v19676_v28, 1  ;;  %vm19683_vm5 = vnez %v19682_v54  ;;  %v15369_v28 = vpack.c.bf16 %v5719_v16, %v5718_v20  ;;  %v3028_v20 = vld [vmem:[#allocation2 + $0x132] sm:$0xff] }
 0x36f   :  { %10543 = vmatprep.mubr.msk.bf16.mxu1 %vm9277_vm6, %v15323_v53  ;;  %vm5780_vm2 = vmand %vm18596_vm12, %vm19678_vm15  ;;  %vm18604_vm6 = vcmp.le.s32.totalorder %v19671_v51, 14  ;;  %v8961_v53 = vpack.c.bf16 %v3025_v32, %v3024_v14  ;;  %v19687_v1 = vld [vmem:[#allocation93_spill] sm:$0xff]  ;;  %v8964_v4 = vpack.c.bf16 %v3027_v56, %v3026_v62  ;;  %v19690_v54 = vld [vmem:[#allocation92_spill] sm:$0xff]  ;;  %v15408_v51 = vpack.c.bf16 %v5721_v19, %v5720_v38 }
 0x370   :  { %vm15347_vm10 = vmpackc.low %vm3091_vm11, %vm19679_vm8  ;;  %vm19686_vm11 = vnez %v19685_v33  ;;  %vm19688_vm8 = vcmp.ge.s32.totalorder %v19687_v1, 1  ;;  %vm18605_vm9 = vcmp.le.s32.totalorder %v19690_v54, 14  ;;  %19691 = vst [vmem:[#allocation153_spill] sm:$0xff] %v15369_v28  ;;  %v19694_v14 = vld [vmem:[#allocation97_spill] sm:$0xff]  ;;  %v3029_v16 = vld [vmem:[#allocation2 + $0x13a] sm:$0xff] }
 0x371   :  { %vm5782_vm7 = vmand %vm18603_vm0, %vm19683_vm5  ;;  %v3031_v62 = vld [vmem:[#allocation2 + $0x14a] sm:$0xff]  ;;  %19712 = vst [vmem:[#allocation154_spill] sm:$0xff] %v15408_v51  ;;  %v19722_v32 = vld [vmem:[#allocation104_spill] sm:$0xff] }
 0x372   :  { %vm9280_vm12 = vmpackc.low %vm19684_vm14, %vm5780_vm2  ;;  %vm19693_vm14 = vnez %v19692_v31  ;;  %vm19695_vm2 = vcmp.ge.s32.totalorder %v19694_v14, 1  ;;  %v5722_v31 = vld [vmem:[#allocation2 + $0x160] sm:$0xff]  ;;  %v5723_v33 = vld [vmem:[#allocation2 + $0x168] sm:$0xff] }
 0x373   :  { %vm3093_vm3 = vmand %vm19688_vm8, %vm19686_vm11  ;;  %vm19696_vm8 = vcmp.ge.s32.totalorder %v19690_v54, 1  ;;  %v19708_v54 = vld [vmem:[#allocation95_spill] sm:$0xff]  ;;  %v5724_v56 = vld [vmem:[#allocation2 + $0x170] sm:$0xff] }
 0x374   :  { %vm9283_vm15 = vmpackc.low %vm18604_vm6, %vm5782_vm7  ;;  %v5725_v38 = vld [vmem:[#allocation2 + $0x178] sm:$0xff]  ;;  %v19728_v19 = vld [vmem:[#allocation98_spill] sm:$0xff] }
 0x375   :  { %10224 = vmatmul.mubr.msk.bf16.gmra.mrb[96].mxu0 %vm15334_vm1, %v8961_v53  ;;  %vm3095_vm0 = vmand %vm19695_vm2, %vm19693_vm14  ;;  %vm18612_vm1 = vcmp.le.s32.totalorder %v19699_v24, 14  ;;  %v19700_v53 = vld [vmem:[#allocation86_spill] sm:$0xff]  ;;  %vm19707_vm14 = vcmp.le.s32.totalorder %v19687_v1, 14  ;;  %v19715_v1 = vld [vmem:[#allocation99_spill] sm:$0xff] }
 0x376   :  { %10227 = vmatprep.mubr.msk.bf16.mxu0 %vm15347_vm10, %v8964_v4  ;;  %10544 = vmatmul.mubr.msk.bf16.gmra.mrb[32].mxu1 %vm9280_vm12, %v15362_v22  ;;  %vm15380_vm7 = vmpackc.low %vm3093_vm3, %vm19696_vm8  ;;  %vm19701_vm2 = vnez %v19700_v53  ;;  %v3030_v4 = vld [vmem:[#allocation2 + $0x142] sm:$0xff]  ;;  %vm19702_vm12 = vcmp.ge.s32.totalorder %v19699_v24, 1  ;;  %vm19706_vm8 = vnez %v19705_v34  ;;  %v15415_v24 = vpack.c.bf16 %v5723_v33, %v5722_v31  ;;  %v3032_v31 = vld [vmem:[#allocation2 + $0x152] sm:$0xff] }
 0x377   :  { %10547 = vmatprep.mubr.msk.bf16.mxu1 %vm9283_vm15, %v15369_v28  ;;  %vm5784_vm10 = vmand %vm18605_vm9, %vm19701_vm2  ;;  %vm18613_vm15 = vcmp.le.s32.totalorder %v19694_v14, 14  ;;  %v8967_v28 = vpack.c.bf16 %v3029_v16, %v3028_v20  ;;  %v19710_v53 = vld [vmem:[#allocation101_spill] sm:$0xff]  ;;  %v8970_v22 = vpack.c.bf16 %v3031_v62, %v3030_v4  ;;  %v19713_v34 = vld [vmem:[#allocation100_spill] sm:$0xff]  ;;  %v15454_v14 = vpack.c.bf16 %v5725_v38, %v5724_v56 }
 0x378   :  { %vm15393_vm3 = vmpackc.low %vm3095_vm0, %vm19702_vm12  ;;  %vm19709_vm0 = vnez %v19708_v54  ;;  %vm19711_vm12 = vcmp.ge.s32.totalorder %v19710_v53, 1  ;;  %vm18614_vm5 = vcmp.le.s32.totalorder %v19713_v34, 14  ;;  %19714 = vst [vmem:[#allocation155_spill] sm:$0xff] %v15415_v24  ;;  %v19717_v20 = vld [vmem:[#allocation105_spill] sm:$0xff]  ;;  %v3033_v33 = vld [vmem:[#allocation2 + $0x15a] sm:$0xff] }
 0x379   :  { %vm5786_vm6 = vmand %vm18612_vm1, %vm19706_vm8  ;;  %v3035_v4 = vld [vmem:[#allocation2 + $0x16a] sm:$0xff]  ;;  %v19744_v16 = vld [vmem:[#allocation112_spill] sm:$0xff] }
 0x37a   :  { %vm9286_vm9 = vmpackc.low %vm19707_vm14, %vm5784_vm10  ;;  %vm19716_vm14 = vnez %v19715_v1  ;;  %vm19718_vm10 = vcmp.ge.s32.totalorder %v19717_v20, 1  ;;  %v5726_v1 = vld [vmem:[#allocation2 + $0x180] sm:$0xff]  ;;  %v5727_v54 = vld [vmem:[#allocation2 + $0x188] sm:$0xff] }
 0x37b   :  { %vm3097_vm11 = vmand %vm19711_vm12, %vm19709_vm0  ;;  %vm19719_vm12 = vcmp.ge.s32.totalorder %v19713_v34, 1  ;;  %v19731_v34 = vld [vmem:[#allocation103_spill] sm:$0xff]  ;;  %v19748_v56 = vld [vmem:[#allocation106_spill] sm:$0xff] }
 0x37c   :  { %vm9289_vm2 = vmpackc.low %vm18613_vm15, %vm5786_vm6  ;;  %v5729_v62 = vld [vmem:[#allocation2 + $0x198] sm:$0xff] }
 0x37d   :  { %10228 = vmatmul.mubr.msk.bf16.gmra.mrb[100].mxu0 %vm15380_vm7, %v8967_v28  ;;  %vm3099_vm1 = vmand %vm19718_vm10, %vm19716_vm14  ;;  %vm18621_vm7 = vcmp.le.s32.totalorder %v19722_v32, 14  ;;  %v19723_v28 = vld [vmem:[#allocation94_spill] sm:$0xff]  ;;  %vm19730_vm14 = vcmp.le.s32.totalorder %v19710_v53, 14  ;;  %v19737_v53 = vld [vmem:[#allocation107_spill] sm:$0xff] }
 0x37e   :  { %10231 = vmatprep.mubr.msk.bf16.mxu0 %vm15393_vm3, %v8970_v22  ;;  %10548 = vmatmul.mubr.msk.bf16.gmra.mrb[36].mxu1 %vm9286_vm9, %v15408_v51  ;;  %vm15426_vm6 = vmpackc.low %vm3097_vm11, %vm19719_vm12  ;;  %vm19724_vm10 = vnez %v19723_v28  ;;  %v3034_v22 = vld [vmem:[#allocation2 + $0x162] sm:$0xff]  ;;  %vm19725_vm9 = vcmp.ge.s32.totalorder %v19722_v32, 1  ;;  %vm19729_vm12 = vnez %v19728_v19  ;;  %v15461_v32 = vpack.c.bf16 %v5727_v54, %v5726_v1  ;;  %v3036_v1 = vld [vmem:[#allocation2 + $0x172] sm:$0xff] }
 0x37f   :  { %10551 = vmatprep.mubr.msk.bf16.mxu1 %vm9289_vm2, %v15415_v24  ;;  %vm5788_vm3 = vmand %vm18614_vm5, %vm19724_vm10  ;;  %vm18622_vm2 = vcmp.le.s32.totalorder %v19717_v20, 14  ;;  %v8973_v24 = vpack.c.bf16 %v3033_v33, %v3032_v31  ;;  %v19733_v28 = vld [vmem:[#allocation109_spill] sm:$0xff]  ;;  %v8976_v51 = vpack.c.bf16 %v3035_v4, %v3034_v22  ;;  %v19735_v19 = vld [vmem:[#allocation108_spill] sm:$0xff] }
 0x380   :  { %vm15439_vm11 = vmpackc.low %vm3099_vm1, %vm19725_vm9  ;;  %vm19732_vm1 = vnez %v19731_v34  ;;  %vm19734_vm9 = vcmp.ge.s32.totalorder %v19733_v28, 1  ;;  %vm18623_vm8 = vcmp.le.s32.totalorder %v19735_v19, 14  ;;  %19736 = vst [vmem:[#allocation105_spill] sm:$0xff] %v15461_v32  ;;  %v19739_v31 = vld [vmem:[#allocation113_spill] sm:$0xff]  ;;  %v3037_v54 = vld [vmem:[#allocation2 + $0x17a] sm:$0xff] }
 0x381   :  { %vm5790_vm15 = vmand %vm18621_vm7, %vm19729_vm12  ;;  %v3039_v22 = vld [vmem:[#allocation2 + $0x18a] sm:$0xff]  ;;  %v8979_v38 = vpack.c.bf16 %v3037_v54, %v3036_v1  ;;  %v19762_v54 = vld [vmem:[#allocation120_spill] sm:$0xff] }
 0x382   :  { %vm9292_vm5 = vmpackc.low %vm19730_vm14, %vm5788_vm3  ;;  %vm19738_vm14 = vnez %v19737_v53  ;;  %vm19740_vm3 = vcmp.ge.s32.totalorder %v19739_v31, 1  ;;  %v5728_v4 = vld [vmem:[#allocation2 + $0x190] sm:$0xff]  ;;  %v19750_v53 = vld [vmem:[#allocation111_spill] sm:$0xff] }
 0x383   :  { %vm3101_vm0 = vmand %vm19734_vm9, %vm19732_vm1  ;;  %vm19741_vm9 = vcmp.ge.s32.totalorder %v19735_v19, 1  ;;  %v19752_v34 = vld [vmem:[#allocation117_spill] sm:$0xff]  ;;  %v15496_v19 = vpack.c.bf16 %v5729_v62, %v5728_v4  ;;  %v19764_v33 = vld [vmem:[#allocation110_spill] sm:$0xff] }
 0x384   :  { %vm9295_vm10 = vmpackc.low %vm18622_vm2, %vm5790_vm15  ;;  %vm18629_vm2 = vcmp.le.s32.totalorder %v19733_v28, 14  ;;  %v19757_v28 = vld [vmem:[#allocation121_spill] sm:$0xff]  ;;  %v19782_v1 = vld [vmem:[#allocation118_spill] sm:$0xff] }
 0x385   :  { %10232 = vmatmul.mubr.msk.bf16.gmra.mrb[104].mxu0 %vm15426_vm6, %v8973_v24  ;;  %vm3103_vm7 = vmand %vm19740_vm3, %vm19738_vm14  ;;  %vm18627_vm6 = vcmp.le.s32.totalorder %v19744_v16, 14  ;;  %v19745_v24 = vld [vmem:[#allocation102_spill] sm:$0xff]  ;;  %v3042_v4 = vld [vmem:[#allocation2 + $0x1a2] sm:$0xff] }
 0x386   :  { %10235 = vmatprep.mubr.msk.bf16.mxu0 %vm15439_vm11, %v8976_v51  ;;  %10552 = vmatmul.mubr.msk.bf16.gmra.mrb[40].mxu1 %vm9292_vm5, %v15454_v14  ;;  %vm15472_vm15 = vmpackc.low %vm3101_vm0, %vm19741_vm9  ;;  %vm19746_vm3 = vnez %v19745_v24  ;;  %v3038_v51 = vld [vmem:[#allocation2 + $0x182] sm:$0xff]  ;;  %vm19747_vm5 = vcmp.ge.s32.totalorder %v19744_v16, 1  ;;  %vm18630_vm9 = vcmp.le.s32.totalorder %v19739_v31, 14  ;;  %v19755_v16 = vld [vmem:[#allocation115_spill] sm:$0xff] }
 0x387   :  { %10555 = vmatprep.mubr.msk.bf16.mxu1 %vm9295_vm10, %v15461_v32  ;;  %vm5792_vm11 = vmand %vm18623_vm8, %vm19746_vm3  ;;  %vm19749_vm10 = vnez %v19748_v56  ;;  %vm19751_vm8 = vnez %v19750_v53  ;;  %vm19753_vm3 = vcmp.ge.s32.totalorder %v19752_v34, 1  ;;  %v8982_v32 = vpack.c.bf16 %v3039_v22, %v3038_v51  ;;  %v19754_v24 = vld [vmem:[#allocation116_spill] sm:$0xff]  ;;  %v19763_v51 = vld [vmem:[#allocation122_spill] sm:$0xff] }
 0x388   :  { %vm8981_vm0 = vmpackc.low %vm3103_vm7, %vm19747_vm5  ;;  %vm18631_vm5 = vcmp.le.s32.totalorder %v19754_v24, 14  ;;  %v3041_v22 = vld [vmem:[#allocation2 + $0x19a] sm:$0xff]  ;;  %v3043_v62 = vld [vmem:[#allocation2 + $0x1aa] sm:$0xff] }
 0x389   :  { %vm5794_vm14 = vmand %vm18627_vm6, %vm19749_vm10  ;;  %vm19756_vm6 = vnez %v19755_v16  ;;  %v19770_v16 = vld [vmem:[#allocation125_spill] sm:$0xff]  ;;  %v8988_v53 = vpack.c.bf16 %v3043_v62, %v3042_v4  ;;  %v19780_v4 = vld [vmem:[#allocation128_spill] sm:$0xff] }
 0x38a   :  { %vm9298_vm1 = vmpackc.low %vm18629_vm2, %vm5792_vm11  ;;  %vm19758_vm11 = vcmp.ge.s32.totalorder %v19757_v28, 1  ;;  %v19781_v62 = vld [vmem:[#allocation127_spill] sm:$0xff] }
 0x38b   :  { %vm3105_vm12 = vmand %vm19753_vm3, %vm19751_vm8  ;;  %vm19759_vm3 = vcmp.ge.s32.totalorder %v19754_v24, 1  ;;  %v19772_v24 = vld [vmem:[#allocation124_spill] sm:$0xff] }
 0x38c   :  { %vm9301_vm7 = vmpackc.low %vm18630_vm9, %vm5794_vm14  ;;  %vm18633_vm14 = vcmp.le.s32.totalorder %v19762_v54, 14  ;;  %vm19765_vm9 = vnez %v19764_v33  ;;  %v3764_v33 = vld [vmem:[#allocation2 + $0x38] sm:$0xff] }
 0x38d   :  { %10236 = vmatmul.mubr.msk.bf16.gmra.mrb[108].mxu0 %vm15472_vm15, %v8979_v38  ;;  %vm3107_vm2 = vmand %vm19758_vm11, %vm19756_vm6  ;;  %vm18635_vm15 = vcmp.le.s32.totalorder %v19752_v34, 14  ;;  %v19767_v38 = vld [vmem:[#allocation114_spill] sm:$0xff] }
 0x38e   :  { %10239 = vmatprep.mubr.msk.bf16.mxu0 %vm8981_vm0, %v8982_v32  ;;  %10556 = vmatmul.mubr.msk.bf16.gmra.mrb[44].mxu1 %vm9298_vm1, %v15496_v19  ;;  %vm15510_vm8 = vmpackc.low %vm3105_vm12, %vm19759_vm3  ;;  %v3040_v32 = vld [vmem:[#allocation2 + $0x192] sm:$0xff]  ;;  %vm19766_vm1 = vcmp.ge.s32.totalorder %v19762_v54, 1  ;;  %vm18636_vm12 = vcmp.le.s32.totalorder %v19757_v28, 14  ;;  %vm19768_vm3 = vnez %v19767_v38  ;;  %v19774_v54 = vld [vmem:[#allocation129_spill] sm:$0xff] }
 0x38f   :  { %10559 = vmatprep.mubr.msk.bf16.mxu1 %vm9301_vm7, %v19763_v51  ;;  %vm5796_vm11 = vmand %vm18631_vm5, %vm19765_vm9  ;;  %v8985_v51 = vpack.c.bf16 %v3041_v22, %v3040_v32  ;;  %vm19769_vm5 = vnez %v19444_v35  ;;  %vm19771_vm9 = vcmp.ge.s32.totalorder %v19770_v16, 1  ;;  %v19776_v32 = vld [vmem:[#allocation130_spill] sm:$0xff]  ;;  %v19785_v35 = vld [vmem:[#allocation147_spill] sm:$0xff] }
 0x390   :  { %vm8987_vm0 = vmpackc.low %vm3107_vm2, %vm19766_vm1  ;;  %vm18640_vm1 = vcmp.le.s32.totalorder %v19772_v24, 14  ;;  %v3048_v22 = vld [vmem:[#allocation2 + $0x1d2] sm:$0xff] }
 0x391   :  { %vm5798_vm7 = vmand %vm18633_vm14, %vm19768_vm3  ;;  %vm19773_vm14 = vnez %v19451_v2  ;;  %vm19775_vm3 = vcmp.ge.s32.totalorder %v19774_v54, 1  ;;  %v3047_v2 = vld [vmem:[#allocation2 + $0x1ca] sm:$0xff] }
 0x392   :  { %vm9304_vm6 = vmpackc.low %vm18635_vm15, %vm5796_vm11  ;;  %vm19777_vm15 = vcmp.ge.s32.totalorder %v19772_v24, 1  ;;  %v19787_v24 = vld [vmem:[#allocation131_spill] sm:$0xff]  ;;  %v3763_v38 = vld [vmem:[#allocation2 + $0x30] sm:$0xff] }
 0x393   :  { %vm3109_vm10 = vmand %vm19771_vm9, %vm19769_vm5 }
 0x394   :  { %vm9307_vm2 = vmpackc.low %vm18636_vm12, %vm5798_vm7  ;;  %vm18643_vm7 = vcmp.le.s32.totalorder %v19780_v4, 14  ;;  %vm19783_vm12 = vnez %v19782_v1  ;;  %v19789_v1 = vld [vmem:[#allocation133_spill] sm:$0xff] }
 0x395   :  { %10240 = vmatmul.mubr.msk.bf16.gmra.mrb[112].mxu0 %vm15510_vm8, %v8985_v51  ;;  %vm3111_vm11 = vmand %vm19775_vm3, %vm19773_vm14  ;;  %vm18647_vm8 = vcmp.le.s32.totalorder %v19770_v16, 14  ;;  %v3045_v51 = vld [vmem:[#allocation2 + $0x1ba] sm:$0xff]  ;;  %vm19790_vm5 = vcmp.ge.s32.totalorder %v19789_v1, 1 }
 0x396   :  { %10243 = vmatprep.mubr.msk.bf16.mxu0 %vm8987_vm0, %v8988_v53  ;;  %10560 = vmatmul.mubr.msk.bf16.gmra.mrb[48].mxu1 %vm9304_vm6, %v19776_v32  ;;  %vm15546_vm9 = vmpackc.low %vm3109_vm10, %vm19777_vm15  ;;  %v3044_v53 = vld [vmem:[#allocation2 + $0x1b2] sm:$0xff]  ;;  %vm19784_vm6 = vcmp.ge.s32.totalorder %v19780_v4, 1  ;;  %v3046_v32 = vld [vmem:[#allocation2 + $0x1c2] sm:$0xff]  ;;  %vm18644_vm10 = vcmp.le.s32.totalorder %v19774_v54, 14  ;;  %vm19786_vm15 = vnez %v19785_v35 }
 0x397   :  { %10563 = vmatprep.mubr.msk.bf16.mxu1 %vm9307_vm2, %v19781_v62  ;;  %vm5800_vm3 = vmand %vm18640_vm1, %vm19783_vm12  ;;  %v8991_v62 = vpack.c.bf16 %v3045_v51, %v3044_v53  ;;  %vm19788_vm1 = vnez %v19787_v24  ;;  %v8994_v28 = vpack.c.bf16 %v3047_v2, %v3046_v32  ;;  %v19791_v35 = vld [vmem:[#allocation132_spill] sm:$0xff]  ;;  %v19792_v4 = vld [vmem:[#allocation150_spill] sm:$0xff] }
 0x398   :  { %vm8993_vm0 = vmpackc.low %vm3111_vm11, %vm19784_vm6  ;;  %vm18650_vm6 = vcmp.le.s32.totalorder %v19791_v35, 14  ;;  %v19796_v51 = vld [vmem:[#allocation136_spill] sm:$0xff]  ;;  %v19797_v2 = vld [vmem:[#allocation135_spill] sm:$0xff] }
 0x399   :  { %vm5802_vm2 = vmand %vm18643_vm7, %vm19786_vm15  ;;  %v19798_v32 = vld [vmem:[#allocation134_spill] sm:$0xff]  ;;  %v19800_v24 = vld [vmem:[#allocation137_spill] sm:$0xff] }
 0x39a   :  { %vm9310_vm14 = vmpackc.low %vm18647_vm8, %vm5800_vm3  ;;  %vm19793_vm3 = vcmp.ge.s32.totalorder %v19791_v35, 1  ;;  %v3051_v54 = vld [vmem:[#allocation2 + $0x1ea] sm:$0xff]  ;;  %v19804_v16 = vld [vmem:[#allocation148_spill] sm:$0xff] }
 0x39b   :  { %vm3113_vm12 = vmand %vm19790_vm5, %vm19788_vm1  ;;  %vm18651_vm5 = vcmp.le.s32.totalorder %v19796_v51, 14  ;;  %v3761_v53 = vld [vmem:[#allocation2 + $0x20] sm:$0xff] }
 0x39c   :  { %vm9313_vm11 = vmpackc.low %vm18644_vm10, %vm5802_vm2  ;;  %vm19799_vm2 = vnez %v19798_v32  ;;  %vm19801_vm10 = vcmp.ge.s32.totalorder %v19800_v24, 1  ;;  %v5743_v32 = vld [vmem:[#allocation2 + $0x208] sm:$0xff] }
 0x39d   :  { %10244 = vmatmul.mubr.msk.bf16.gmra.mrb[116].mxu0 %vm15546_vm9, %v8991_v62  ;;  %vm15578_vm7 = vmpackc.low %vm3113_vm12, %vm19793_vm3  ;;  %v3049_v62 = vld [vmem:[#allocation2 + $0x1da] sm:$0xff]  ;;  %vm18654_vm3 = vcmp.le.s32.totalorder %v19800_v24, 14 }
 0x39e   :  { %10247 = vmatprep.mubr.msk.bf16.mxu0 %vm8993_vm0, %v8994_v28  ;;  %10564 = vmatmul.mubr.msk.bf16.gmra.mrb[52].mxu1 %vm9310_vm14, %v19792_v4  ;;  %vm3115_vm9 = vmand %vm19801_vm10, %vm19799_vm2  ;;  %vm18657_vm0 = vcmp.le.s32.totalorder %v19789_v1, 14  ;;  %v19802_v28 = vld [vmem:[#allocation126_spill] sm:$0xff]  ;;  %v3050_v4 = vld [vmem:[#allocation2 + $0x1e2] sm:$0xff]  ;;  %vm19806_vm10 = vcmp.ge.s32.totalorder %v19796_v51, 1  ;;  %v8997_v34 = vpack.c.bf16 %v3049_v62, %v3048_v22 }
 0x39f   :  { %10567 = vmatprep.mubr.msk.bf16.mxu1 %vm9313_vm11, %v19797_v2  ;;  %vm19803_vm14 = vnez %v19802_v28  ;;  %vm19805_vm11 = vnez %v19804_v16  ;;  %vm8999_vm2 = vmpackc.low %vm3115_vm9, %vm19806_vm10  ;;  %v5742_v2 = vld [vmem:[#allocation2 + $0x200] sm:$0xff]  ;;  %v9000_v35 = vpack.c.bf16 %v3051_v54, %v3050_v4  ;;  %v19808_v28 = vld [vmem:[#allocation138_spill] sm:$0xff] }
 0x3a0   :  { %vm5804_vm12 = vmand %vm18650_vm6, %vm19803_vm14  ;;  %v15606_v16 = vpack.c.bf16 %v5743_v32, %v5742_v2  ;;  %v19809_v22 = vld [vmem:[#allocation139_spill] sm:$0xff]  ;;  %v3759_v4 = vld [vmem:[#allocation2 + $0x10] sm:$0xff] }
 0x3a1   :  { %vm5806_vm8 = vmand %vm18651_vm5, %vm19805_vm11  ;;  %vm18658_vm5 = vcmp.le.s32.totalorder %v19808_v28, 14  ;;  %vm19810_vm9 = vcmp.ge.s32.totalorder %v19809_v22, 1  ;;  %v3052_v54 = vld [vmem:[#allocation2 + $0x1f2] sm:$0xff]  ;;  %v3053_v62 = vld [vmem:[#allocation2 + $0x1fa] sm:$0xff] }
 0x3a2   :  { %vm9316_vm1 = vmpackc.low %vm18657_vm0, %vm5804_vm12  ;;  %19807 = vst [vmem:[#allocation106_spill] sm:$0xff] %v15606_v16  ;;  %v3760_v24 = vld [vmem:[#allocation2 + $0x18] sm:$0xff]  ;;  %v6451_v32 = vld [vmem:[#allocation2 + $0x21] sm:$0xff]  ;;  %v9003_v40 = vpack.c.bf16 %v3053_v62, %v3052_v54 }
 0x3a3   :  { %vm9319_vm6 = vmpackc.low %vm18654_vm3, %vm5806_vm8  ;;  %v6452_v2 = vld [vmem:[#allocation2 + $0x29] sm:$0xff]  ;;  %v6454_v62 = vld [vmem:[#allocation2 + $0x39] sm:$0xff] }
 0x3a4   :  { %vm3117_vm10 = vmand %vm19810_vm9, %vm14861_vm4  ;;  %vm19815_vm9 = vmmov 1   ;;  %v19816_v51 = vld [vmem:[#allocation57_spill] sm:$0xff]  ;;  %v19819_v54 = vld [vmem:[#allocation74_spill] sm:$0xff] }
 0x3a5   :  { %10248 = vmatmul.mubr.msk.bf16.gmra.mrb[120].mxu0 %vm15578_vm7, %v8997_v34  ;;  %vm1515_vm7 = vcmp.le.s32.totalorder %v19809_v22, 14  ;;  %v19811_v34 = vld [vmem:[#allocation149_spill] sm:$0xff]  ;;  %vm19817_vm0 = vcmp.le.s32.totalorder %v19816_v51, 14 }
 0x3a6   :  { %10251 = vmatprep.mubr.msk.bf16.mxu0 %vm8999_vm2, %v9000_v35  ;;  %10568 = vmatmul.mubr.msk.bf16.gmra.mrb[56].mxu1 %vm9316_vm1, %v14879_v63  ;;  %vm19812_vm8 = vnez %v19811_v34  ;;  %vm19813_vm1 = vcmp.ge.s32.totalorder %v19808_v28, 1  ;;  %v5744_v35 = vld [vmem:[#allocation2 + $0x210] sm:$0xff]  ;;  %v5745_v63 = vld [vmem:[#allocation2 + $0x218] sm:$0xff]  ;;  %v9334_v28 = vpack.c.bf16 %v6452_v2, %v6451_v32  ;;  %v3762_v1 = vld [vmem:[#allocation2 + $0x28] sm:$0xff] }
 0x3a7   :  { %10571 = vmatprep.mubr.msk.bf16.mxu1 %vm9319_vm6, %v15606_v16  ;;  %vm5808_vm2 = vmand %vm18658_vm5, %vm19812_vm8  ;;  %v9014_v16 = vpack.c.bf16 %v3760_v24, %v3759_v4  ;;  %v9323_v34 = vpack.c.bf16 %v5745_v63, %v5744_v35  ;;  %vm19818_vm5 = vcmp.le.s32.totalorder %v19494_v0, 14  ;;  %v6453_v24 = vld [vmem:[#allocation2 + $0x31] sm:$0xff]  ;;  %v6455_v4 = vld [vmem:[#allocation2 + $0x41] sm:$0xff]  ;;  %v9017_v35 = vpack.c.bf16 %v3762_v1, %v3761_v53 }
 0x3a8   :  { %vm9002_vm12 = vmpackc.low %vm3117_vm10, %vm19813_vm1  ;;  %v9337_v63 = vpack.c.bf16 %v6454_v62, %v6453_v24  ;;  %v19826_v32 = vld [vmem:[#allocation82_spill] sm:$0xff]  ;;  %v3765_v1 = vld [vmem:[#allocation2 + $0x40] sm:$0xff] }
 0x3a9   :  { %vm9013_vm6 = vmpackc.low %vm19815_vm9, %vm14092_vm13  ;;  %vm19820_vm13 = vnez %v19819_v54  ;;  %v11330_v2 = vld [vmem:[#allocation8 + $0x208] sm:$0xff]   ;;  %v3766_v53 = vld [vmem:[#allocation2 + $0x48] sm:$0xff] }
 0x3aa   :  { %vm9322_vm3 = vmpackc.low %vm1515_vm7, %vm5808_vm2  ;;  %vm19821_vm2 = vnez %v19522_v37  ;;  %v11331_v54 = vld [vmem:[#allocation8 + $0x210] sm:$0xff]   ;;  %v6459_v24 = vld [vmem:[#allocation2 + $0x61] sm:$0xff] }
 0x3ab   :  { %vm9333_vm4 = vmpackc.low %vm19818_vm5, %vm19817_vm0  ;;  %v6460_v62 = vld [vmem:[#allocation2 + $0x69] sm:$0xff] }
 0x3ac   :  { %vm9016_vm10 = vmpackc.low %vm19815_vm9, %vm19820_vm13  ;;  %vm19829_vm13 = vnez %v19156_v25  ;;  %v11332_v25 = vld [vmem:[#allocation8 + $0x218] sm:$0xff]  }
 0x3ad   :  { %10252 = vmatmul.mubr.msk.bf16.gmra.mrb[124].mxu0 %vm9002_vm12, %v9003_v40  ;;  %vm9019_vm1 = vmpackc.low %vm19815_vm9, %vm19821_vm2  ;;  %v6456_v40 = vld [vmem:[#allocation2 + $0x49] sm:$0xff]  ;;  %vm19828_vm12 = vcmp.le.s32.totalorder %v19512_v55, 14 }
 0x3ae   :  { %10271 = vmatprep.mubr.msk.bf16.mxu0 %vm9013_vm6, %v9014_v16  ;;  %10572 = vmatmul.mubr.msk.bf16.gmra.mrb[60].mxu1 %vm9322_vm3, %v9323_v34  ;;  %v19822_v16 = vld [vmem:[#allocation80_spill] sm:$0xff]  ;;  %v9020_v34 = vpack.c.bf16 %v3764_v33, %v3763_v38  ;;  %vm19827_vm3 = vcmp.le.s32.totalorder %v19826_v32, 14  ;;  %v9340_v37 = vpack.c.bf16 %v6456_v40, %v6455_v4  ;;  %vm9022_vm2 = vmpackc.low %vm19815_vm9, %vm19829_vm13  ;;  %v6457_v33 = vld [vmem:[#allocation2 + $0x51] sm:$0xff]  ;;  %v9023_v4 = vpack.c.bf16 %v3766_v53, %v3765_v1 }
 0x3af   :  { %10591 = vmatprep.mubr.msk.bf16.mxu1 %vm9333_vm4, %v9334_v28  ;;  %vm19823_vm5 = vcmp.le.s32.totalorder %v19822_v16, 14  ;;  %v19824_v28 = vld [vmem:[#allocation81_spill] sm:$0xff]  ;;  %vm9339_vm6 = vmpackc.low %vm19828_vm12, %vm19827_vm3  ;;  %v6458_v38 = vld [vmem:[#allocation2 + $0x59] sm:$0xff]  ;;  %vm19836_vm12 = vcmp.le.s32.totalorder %v19023_v30, 14  ;;  %vm19837_vm13 = vnez %v19180_v13 }
 0x3b0   :  { %vm19825_vm4 = vcmp.le.s32.totalorder %v19824_v28, 14  ;;  %v9343_v40 = vpack.c.bf16 %v6458_v38, %v6457_v33  ;;  %v6462_v1 = vld [vmem:[#allocation2 + $0x79] sm:$0xff]  ;;  %v6463_v53 = vld [vmem:[#allocation2 + $0x81] sm:$0xff]  ;;  %v6464_v33 = vld [vmem:[#allocation2 + $0x89] sm:$0xff] }
 0x3b1   :  { %vm9336_vm0 = vmpackc.low %vm19825_vm4, %vm19823_vm5  ;;  %vm19830_vm5 = vnez %v19535_v5  ;;  %v9346_v5 = vpack.c.bf16 %v6460_v62, %v6459_v24  ;;  %v11334_v13 = vld [vmem:[#allocation8 + $0x228] sm:$0xff]   ;;  %v11335_v38 = vld [vmem:[#allocation8 + $0x230] sm:$0xff]  }
 0x3b2   :  { %v6465_v24 = vld [vmem:[#allocation2 + $0x91] sm:$0xff]  ;;  %v6466_v62 = vld [vmem:[#allocation2 + $0x99] sm:$0xff] }
 0x3b5   :  { %10272 = vmatmul.mubr.msk.bf16.vlgmr.msra.gmra.mrb[64].mxu0 %vm9016_vm10, %v9017_v35  ;;  %vm9025_vm10 = vmpackc.low %vm19815_vm9, %vm19830_vm5  ;;  %v19834_v35 = vld [vmem:[#allocation48_spill] sm:$0xff] }
 0x3b6   :  { %10275 = vmatprep.mubr.msk.bf16.mxu0 %vm9019_vm1, %v9020_v34  ;;  %10592 = vmatmul.mubr.msk.bf16.vlgmr.msra.gmra.mrb[0].mxu1 %vm9336_vm0, %v9337_v63  ;;  %vm19831_vm1 = vcmp.le.s32.totalorder %v19006_v15, 14  ;;  %vm19835_vm3 = vcmp.le.s32.totalorder %v19834_v35, 14  ;;  %v3769_v34 = vld [vmem:[#allocation2 + $0x60] sm:$0xff]  ;;  %v3770_v63 = vld [vmem:[#allocation2 + $0x68] sm:$0xff]  ;;  %vm9028_vm5 = vmpackc.low %vm19815_vm9, %vm19837_vm13  ;;  %vm19843_vm13 = vnez %v19204_v18 }
 0x3b7   :  { %10656 = vmatpush3.bf16.msra.mxu1 %v15158_v60  ;;  %10595 = vmatprep.mubr.msk.bf16.mxu1 %vm9339_vm6, %v9340_v37  ;;  %v19832_v60 = vld [vmem:[#allocation85_spill] sm:$0xff]  ;;  %vm9345_vm6 = vmpackc.low %vm19836_vm12, %vm19835_vm3  ;;  %vm19841_vm3 = vcmp.le.s32.totalorder %v13557_v8, 14  ;;  %vm19842_vm12 = vcmp.le.s32.totalorder %v13559_v58, 14  ;;  %v11336_v18 = vld [vmem:[#allocation8 + $0x238] sm:$0xff]  }
 0x3b8   :  { %10657 = vmatprep.subr.bf16.mxu1 %v11330_v2  ;;  %vm19833_vm4 = vcmp.le.s32.totalorder %v19832_v60, 14  ;;  %v11333_v37 = vld [vmem:[#allocation8 + $0x220] sm:$0xff]  }
 0x3b9   :  { %vm9342_vm0 = vmpackc.low %vm19833_vm4, %vm19831_vm1  ;;  %vm19838_vm1 = vnez %v19184_v57  ;;  %vm19840_vm4 = vcmp.le.s32.totalorder %v13552_v50, 14  ;;  %v9352_v57 = vpack.c.bf16 %v6464_v33, %v6463_v53  ;;  %v6479_v53 = vld [vmem:[#allocation2 + $0x101] sm:$0xff]  ;;  %v6480_v33 = vld [vmem:[#allocation2 + $0x109] sm:$0xff] }
 0x3bb   :  { %10658 = vmatpush3.bf16.msra.mxu1 %v11330_v2  ;;  %v6461_v2 = vld [vmem:[#allocation2 + $0x71] sm:$0xff] }
 0x3bc   :  { %10659 = vmatprep.subr.bf16.mxu1 %v11331_v54 }
 0x3bd   :  { %10276 = vmatmul.mubr.msk.bf16.gmra.mrb[68].mxu0 %vm9022_vm2, %v9023_v4  ;;  %vm9031_vm2 = vmpackc.low %vm19815_vm9, %vm19838_vm1  ;;  %v6467_v4 = vld [vmem:[#allocation2 + $0xa1] sm:$0xff] }
 0x3be   :  { %10279 = vmatprep.mubr.msk.bf16.mxu0 %vm9025_vm10, %v14976_v7  ;;  %10596 = vmatmul.mubr.msk.bf16.gmra.mrb[4].mxu1 %vm9342_vm0, %v9343_v40  ;;  %v9029_v7 = vpack.c.bf16 %v3770_v63, %v3769_v34  ;;  %vm19839_vm10 = vcmp.le.s32.totalorder %v13550_v39, 14  ;;  %vm9034_vm1 = vmpackc.low %vm19815_vm9, %vm19843_vm13  ;;  %v6468_v40 = vld [vmem:[#allocation2 + $0xa9] sm:$0xff]  ;;  %vm19849_vm13 = vnez %v19228_v23  ;;  %v6471_v34 = vld [vmem:[#allocation2 + $0xc1] sm:$0xff] }
 0x3bf   :  { %10599 = vmatprep.mubr.msk.bf16.mxu1 %vm9345_vm6, %v9346_v5  ;;  %10660 = vmatpush3.bf16.msra.mxu1 %v11331_v54  ;;  %vm9348_vm0 = vmpackc.low %vm19840_vm4, %vm19839_vm10  ;;  %v9349_v54 = vpack.c.bf16 %v6462_v1, %v6461_v2  ;;  %vm19844_vm10 = vnez %v19208_v49  ;;  %v9358_v49 = vpack.c.bf16 %v6468_v40, %v6467_v4  ;;  %v6470_v5 = vld [vmem:[#allocation2 + $0xb9] sm:$0xff]  ;;  %v6472_v63 = vld [vmem:[#allocation2 + $0xc9] sm:$0xff] }
 0x3c0   :  { %10661 = vmatprep.subr.bf16.mxu1 %v11332_v25  ;;  %vm9351_vm6 = vmpackc.low %vm19842_vm12, %vm19841_vm3  ;;  %vm19847_vm3 = vcmp.le.s32.totalorder %v13605_v10, 14  ;;  %vm19848_vm12 = vcmp.le.s32.totalorder %v13619_v17, 14  ;;  %v9364_v23 = vpack.c.bf16 %v6472_v63, %v6471_v34  ;;  %v6476_v2 = vld [vmem:[#allocation2 + $0xe9] sm:$0xff]  ;;  %v6482_v4 = vld [vmem:[#allocation2 + $0x119] sm:$0xff] }
 0x3c1   :  { %vm9037_vm4 = vmpackc.low %vm19815_vm9, %vm19844_vm10  ;;  %v19862_v1 = vld [vmem:[#allocation146_spill] sm:$0xff]  ;;  %v19876_v40 = vld [vmem:[#allocation84_spill] sm:$0xff] }
 0x3c2   :  { %vm9040_vm10 = vmpackc.low %vm19815_vm9, %vm19849_vm13  ;;  %vm19855_vm13 = vnez %v19248_v3  ;;  %v19882_v34 = vld [vmem:[#allocation60_spill] sm:$0xff]  ;;  %v19884_v63 = vld [vmem:[#allocation46_spill] sm:$0xff] }
 0x3c3   :  { %10662 = vmatpush3.bf16.msra.mxu1 %v11332_v25  ;;  %v6469_v25 = vld [vmem:[#allocation2 + $0xb1] sm:$0xff] }
 0x3c4   :  { %10663 = vmatprep.subr.bf16.mxu1 %v11333_v37 }
 0x3c5   :  { %10280 = vmatmul.mubr.msk.bf16.gmra.mrb[72].mxu0 %vm9028_vm5, %v9029_v7  ;;  %vm19845_vm5 = vcmp.le.s32.totalorder %v13593_v47, 14  ;;  %v19864_v7 = vld [vmem:[#allocation61_spill] sm:$0xff] }
 0x3c6   :  { %10283 = vmatprep.mubr.msk.bf16.mxu0 %vm9031_vm2, %v15043_v48  ;;  %10600 = vmatmul.mubr.msk.bf16.gmra.mrb[8].mxu1 %vm9348_vm0, %v9349_v54  ;;  %vm19846_vm2 = vcmp.le.s32.totalorder %v13595_v21, 14  ;;  %v9355_v48 = vpack.c.bf16 %v6466_v62, %v6465_v24  ;;  %v19868_v54 = vld [vmem:[#allocation69_spill] sm:$0xff]  ;;  %v19874_v24 = vld [vmem:[#allocation66_spill] sm:$0xff] }
 0x3c7   :  { %10603 = vmatprep.mubr.msk.bf16.mxu1 %vm9351_vm6, %v9352_v57  ;;  %10664 = vmatpush3.bf16.msra.mxu1 %v11333_v37  ;;  %vm9354_vm0 = vmpackc.low %vm19846_vm2, %vm19845_vm5  ;;  %vm19850_vm5 = vnez %v19230_v44  ;;  %v6473_v44 = vld [vmem:[#allocation2 + $0xd1] sm:$0xff]  ;;  %v6475_v37 = vld [vmem:[#allocation2 + $0xe1] sm:$0xff]  ;;  %v9376_v57 = vpack.c.bf16 %v6480_v33, %v6479_v53 }
 0x3c8   :  { %10665 = vmatprep.subr.bf16.mxu1 %v11334_v13  ;;  %vm9357_vm6 = vmpackc.low %vm19848_vm12, %vm19847_vm3  ;;  %vm19853_vm3 = vcmp.le.s32.totalorder %v13671_v6, 14  ;;  %vm19854_vm12 = vcmp.le.s32.totalorder %v13673_v11, 14  ;;  %v9370_v3 = vpack.c.bf16 %v6476_v2, %v6475_v37  ;;  %v6481_v62 = vld [vmem:[#allocation2 + $0x111] sm:$0xff]  ;;  %v6486_v2 = vld [vmem:[#allocation2 + $0x139] sm:$0xff] }
 0x3c9   :  { %vm9043_vm2 = vmpackc.low %vm19815_vm9, %vm19850_vm5  ;;  %v6485_v37 = vld [vmem:[#allocation2 + $0x131] sm:$0xff]  ;;  %v19896_v33 = vld [vmem:[#allocation88_spill] sm:$0xff] }
 0x3ca   :  { %vm9046_vm5 = vmpackc.low %vm19815_vm9, %vm19855_vm13  ;;  %vm19861_vm13 = vnez %v19631_v36  ;;  %v19872_v36 = vld [vmem:[#allocation83_spill] sm:$0xff]  ;;  %v9385_v53 = vpack.c.bf16 %v6486_v2, %v6485_v37  ;;  %v19914_v37 = vld [vmem:[#allocation153_spill] sm:$0xff] }
 0x3cb   :  { %10666 = vmatpush3.bf16.msra.mxu1 %v11334_v13  ;;  %v19870_v13 = vld [vmem:[#allocation71_spill] sm:$0xff] }
 0x3cc   :  { %10667 = vmatprep.subr.bf16.mxu1 %v11335_v38 }
 0x3cd   :  { %10284 = vmatmul.mubr.msk.bf16.gmra.mrb[76].mxu0 %vm9034_vm1, %v15054_v12  ;;  %vm19851_vm1 = vcmp.le.s32.totalorder %v13661_v41, 14  ;;  %v6474_v12 = vld [vmem:[#allocation2 + $0xd9] sm:$0xff] }
 0x3ce   :  { %10287 = vmatprep.mubr.msk.bf16.mxu0 %vm9037_vm4, %v15113_v26  ;;  %10604 = vmatmul.mubr.msk.bf16.gmra.mrb[12].mxu1 %vm9354_vm0, %v9355_v48  ;;  %vm19852_vm4 = vcmp.le.s32.totalorder %v13663_v43, 14  ;;  %v9361_v26 = vpack.c.bf16 %v6470_v5, %v6469_v25  ;;  %v6483_v48 = vld [vmem:[#allocation2 + $0x121] sm:$0xff]  ;;  %v19880_v25 = vld [vmem:[#allocation47_spill] sm:$0xff]  ;;  %v9379_v5 = vpack.c.bf16 %v6482_v4, %v6481_v62 }
 0x3cf   :  { %10607 = vmatprep.mubr.msk.bf16.mxu1 %vm9357_vm6, %v9358_v49  ;;  %10668 = vmatpush3.bf16.msra.mxu1 %v11335_v38  ;;  %vm9360_vm0 = vmpackc.low %vm19852_vm4, %vm19851_vm1  ;;  %vm19856_vm1 = vnez %v19250_v46  ;;  %v6477_v46 = vld [vmem:[#allocation2 + $0xf1] sm:$0xff]  ;;  %v19873_v38 = vld [vmem:[#allocation140_spill] sm:$0xff] }
 0x3d0   :  { %10669 = vmatprep.subr.bf16.mxu1 %v11336_v18  ;;  %vm9363_vm6 = vmpackc.low %vm19854_vm12, %vm19853_vm3  ;;  %vm19857_vm3 = vcmp.le.s32.totalorder %v13705_v61, 14  ;;  %v19878_v49 = vld [vmem:[#allocation51_spill] sm:$0xff] }
 0x3d1   :  { %vm9049_vm4 = vmpackc.low %vm19815_vm9, %vm19856_vm1  ;;  %v6489_v62 = vld [vmem:[#allocation2 + $0x151] sm:$0xff]  ;;  %v6490_v4 = vld [vmem:[#allocation2 + $0x159] sm:$0xff] }
 0x3d2   :  { %vm9052_vm1 = vmpackc.low %vm19815_vm9, %vm19861_vm13  ;;  %vm19875_vm13 = vnez %v19874_v24  ;;  %v19902_v24 = vld [vmem:[#allocation86_spill] sm:$0xff] }
 0x3d3   :  { %10670 = vmatpush3.bf16.msra.mxu1 %v11336_v18  ;;  %v6484_v18 = vld [vmem:[#allocation2 + $0x129] sm:$0xff] }
 0x3d5   :  { %10288 = vmatmul.mubr.msk.bf16.gmra.mrb[80].mxu0 %vm9040_vm10, %v15120_v59  ;;  %vm19858_vm10 = vcmp.le.s32.totalorder %v19257_v45, 14  ;;  %v9367_v59 = vpack.c.bf16 %v6474_v12, %v6473_v44  ;;  %v19887_v44 = vld [vmem:[#allocation62_spill] sm:$0xff] }
 0x3d6   :  { %10291 = vmatprep.mubr.msk.bf16.mxu0 %vm9043_vm2, %v15175_v9  ;;  %10608 = vmatmul.mubr.msk.bf16.gmra.mrb[16].mxu1 %vm9360_vm0, %v9361_v26  ;;  %vm9366_vm12 = vmpackc.low %vm19858_vm10, %vm19857_vm3  ;;  %vm19859_vm2 = vcmp.le.s32.totalorder %v13715_v27, 14  ;;  %vm19860_vm0 = vcmp.le.s32.totalorder %v19262_v42, 14  ;;  %v6478_v9 = vld [vmem:[#allocation2 + $0xf9] sm:$0xff]  ;;  %vm19863_vm3 = vnez %v19862_v1  ;;  %v19888_v12 = vld [vmem:[#allocation50_spill] sm:$0xff] }
 0x3d7   :  { %10611 = vmatprep.mubr.msk.bf16.mxu1 %vm9363_vm6, %v9364_v23  ;;  %vm9369_vm6 = vmpackc.low %vm19860_vm0, %vm19859_vm2  ;;  %vm19865_vm2 = vcmp.le.s32.totalorder %v19864_v7, 14  ;;  %v19886_v26 = vld [vmem:[#allocation76_spill] sm:$0xff]  ;;  %v9382_v23 = vpack.c.bf16 %v6484_v18, %v6483_v48  ;;  %v19894_v1 = vld [vmem:[#allocation53_spill] sm:$0xff] }
 0x3d8   :  { %vm9055_vm10 = vmpackc.low %vm19815_vm9, %vm19863_vm3  ;;  %v6491_v48 = vld [vmem:[#allocation2 + $0x161] sm:$0xff]  ;;  %v6492_v18 = vld [vmem:[#allocation2 + $0x169] sm:$0xff] }
 0x3d9   :  { %vm9058_vm3 = vmpackc.low %vm19815_vm9, %vm19875_vm13  ;;  %vm19889_vm13 = vnez %v19888_v12  ;;  %v19912_v12 = vld [vmem:[#allocation97_spill] sm:$0xff]  ;;  %v9394_v2 = vpack.c.bf16 %v6492_v18, %v6491_v48  ;;  %v19927_v48 = vld [vmem:[#allocation155_spill] sm:$0xff] }
 0x3dd   :  { %10292 = vmatmul.mubr.msk.bf16.gmra.mrb[84].mxu0 %vm9046_vm5, %v15183_v29  ;;  %v19866_v29 = vld [vmem:[#allocation63_spill] sm:$0xff] }
 0x3de   :  { %10295 = vmatprep.mubr.msk.bf16.mxu0 %vm9049_vm4, %v15224_v52  ;;  %10612 = vmatmul.mubr.msk.bf16.gmra.mrb[20].mxu1 %vm9366_vm12, %v9367_v59  ;;  %vm19867_vm5 = vcmp.le.s32.totalorder %v19866_v29, 14  ;;  %v9373_v52 = vpack.c.bf16 %v6478_v9, %v6477_v46  ;;  %vm19869_vm4 = vcmp.le.s32.totalorder %v19868_v54, 14  ;;  %vm19871_vm12 = vcmp.le.s32.totalorder %v19870_v13, 14  ;;  %v19890_v59 = vld [vmem:[#allocation52_spill] sm:$0xff]  ;;  %v6488_v46 = vld [vmem:[#allocation2 + $0x149] sm:$0xff] }
 0x3df   :  { %10615 = vmatprep.mubr.msk.bf16.mxu1 %vm9369_vm6, %v9370_v3  ;;  %vm9372_vm0 = vmpackc.low %vm19867_vm5, %vm19865_vm2  ;;  %vm19877_vm2 = vnez %v19876_v40  ;;  %v6487_v3 = vld [vmem:[#allocation2 + $0x141] sm:$0xff]  ;;  %v19892_v9 = vld [vmem:[#allocation70_spill] sm:$0xff] }
 0x3e0   :  { %vm9375_vm6 = vmpackc.low %vm19871_vm12, %vm19869_vm4  ;;  %vm19879_vm4 = vcmp.le.s32.totalorder %v19878_v49, 14  ;;  %v19904_v40 = vld [vmem:[#allocation90_spill] sm:$0xff] }
 0x3e1   :  { %vm9061_vm5 = vmpackc.low %vm19815_vm9, %vm19877_vm2 }
 0x3e2   :  { %vm9064_vm2 = vmpackc.low %vm19815_vm9, %vm19889_vm13  ;;  %vm19903_vm13 = vnez %v19902_v24  ;;  %v19920_v24 = vld [vmem:[#allocation100_spill] sm:$0xff] }
 0x3e5   :  { %10296 = vmatmul.mubr.msk.bf16.gmra.mrb[88].mxu0 %vm9052_vm1, %v19872_v36  ;;  %vm19881_vm1 = vcmp.le.s32.totalorder %v19880_v25, 14  ;;  %v19900_v36 = vld [vmem:[#allocation151_spill] sm:$0xff] }
 0x3e6   :  { %10299 = vmatprep.mubr.msk.bf16.mxu0 %vm9055_vm10, %v19873_v38  ;;  %10616 = vmatmul.mubr.msk.bf16.gmra.mrb[24].mxu1 %vm9372_vm0, %v9373_v52  ;;  %vm9378_vm12 = vmpackc.low %vm19881_vm1, %vm19879_vm4  ;;  %vm19883_vm10 = vcmp.le.s32.totalorder %v19882_v34, 14  ;;  %vm19885_vm0 = vcmp.le.s32.totalorder %v19884_v63, 14  ;;  %vm19891_vm4 = vnez %v19890_v59  ;;  %v19898_v52 = vld [vmem:[#allocation89_spill] sm:$0xff]  ;;  %v19901_v38 = vld [vmem:[#allocation152_spill] sm:$0xff] }
 0x3e7   :  { %10619 = vmatprep.mubr.msk.bf16.mxu1 %vm9375_vm6, %v9376_v57  ;;  %vm9381_vm6 = vmpackc.low %vm19885_vm0, %vm19883_vm10  ;;  %vm19893_vm10 = vcmp.le.s32.totalorder %v19892_v9, 14  ;;  %v9388_v57 = vpack.c.bf16 %v6488_v46, %v6487_v3  ;;  %v19915_v59 = vld [vmem:[#allocation154_spill] sm:$0xff] }
 0x3e8   :  { %vm9067_vm1 = vmpackc.low %vm19815_vm9, %vm19891_vm4  ;;  %v19916_v3 = vld [vmem:[#allocation94_spill] sm:$0xff] }
 0x3e9   :  { %vm9070_vm4 = vmpackc.low %vm19815_vm9, %vm19903_vm13  ;;  %vm19917_vm13 = vnez %v19916_v3  ;;  %v6493_v46 = vld [vmem:[#allocation2 + $0x171] sm:$0xff]  ;;  %v6500_v3 = vld [vmem:[#allocation2 + $0x1a9] sm:$0xff] }
 0x3ed   :  { %10300 = vmatmul.mubr.msk.bf16.gmra.mrb[92].mxu0 %vm9058_vm3, %v19886_v26  ;;  %vm19895_vm3 = vcmp.le.s32.totalorder %v19894_v1, 14  ;;  %v19908_v26 = vld [vmem:[#allocation93_spill] sm:$0xff] }
 0x3ee   :  { %10303 = vmatprep.mubr.msk.bf16.mxu0 %vm9061_vm5, %v19887_v44  ;;  %10620 = vmatmul.mubr.msk.bf16.gmra.mrb[28].mxu1 %vm9378_vm12, %v9379_v5  ;;  %vm9384_vm0 = vmpackc.low %vm19895_vm3, %vm19893_vm10  ;;  %vm19897_vm5 = vcmp.le.s32.totalorder %v19896_v33, 14  ;;  %vm19899_vm12 = vcmp.le.s32.totalorder %v19898_v52, 14  ;;  %vm19905_vm10 = vnez %v19904_v40  ;;  %v19906_v5 = vld [vmem:[#allocation92_spill] sm:$0xff] }
 0x3ef   :  { %10623 = vmatprep.mubr.msk.bf16.mxu1 %vm9381_vm6, %v9382_v23  ;;  %vm9387_vm6 = vmpackc.low %vm19899_vm12, %vm19897_vm5  ;;  %vm19907_vm5 = vcmp.le.s32.totalorder %v19906_v5, 14  ;;  %v9391_v23 = vpack.c.bf16 %v6490_v4, %v6489_v62  ;;  %v19910_v44 = vld [vmem:[#allocation96_spill] sm:$0xff]  ;;  %v19922_v62 = vld [vmem:[#allocation101_spill] sm:$0xff] }
 0x3f0   :  { %vm9073_vm3 = vmpackc.low %vm19815_vm9, %vm19905_vm10  ;;  %v19924_v40 = vld [vmem:[#allocation104_spill] sm:$0xff] }
 0x3f1   :  { %vm9076_vm10 = vmpackc.low %vm19815_vm9, %vm19917_vm13 }
 0x3f5   :  { %10304 = vmatmul.mubr.msk.bf16.gmra.mrb[96].mxu0 %vm9064_vm2, %v19900_v36  ;;  %vm19909_vm2 = vcmp.le.s32.totalorder %v19908_v26, 14  ;;  %v19918_v36 = vld [vmem:[#allocation98_spill] sm:$0xff] }
 0x3f6   :  { %10307 = vmatprep.mubr.msk.bf16.mxu0 %vm9067_vm1, %v19901_v38  ;;  %10624 = vmatmul.mubr.msk.bf16.gmra.mrb[32].mxu1 %vm9384_vm0, %v9385_v53  ;;  %vm9390_vm12 = vmpackc.low %vm19909_vm2, %vm19907_vm5  ;;  %vm19911_vm1 = vcmp.le.s32.totalorder %v19910_v44, 14  ;;  %vm19913_vm0 = vcmp.le.s32.totalorder %v19912_v12, 14  ;;  %v6494_v53 = vld [vmem:[#allocation2 + $0x179] sm:$0xff]  ;;  %vm19919_vm5 = vnez %v19918_v36  ;;  %v6496_v38 = vld [vmem:[#allocation2 + $0x189] sm:$0xff] }
 0x3f7   :  { %10627 = vmatprep.mubr.msk.bf16.mxu1 %vm9387_vm6, %v9388_v57  ;;  %vm9393_vm6 = vmpackc.low %vm19913_vm0, %vm19911_vm1  ;;  %v6495_v57 = vld [vmem:[#allocation2 + $0x181] sm:$0xff]  ;;  %vm19921_vm1 = vcmp.le.s32.totalorder %v19920_v24, 14  ;;  %v9397_v4 = vpack.c.bf16 %v6494_v53, %v6493_v46 }
 0x3f8   :  { %vm9079_vm2 = vmpackc.low %vm19815_vm9, %vm19919_vm5  ;;  %v9400_v18 = vpack.c.bf16 %v6496_v38, %v6495_v57  ;;  %v19931_v46 = vld [vmem:[#allocation108_spill] sm:$0xff]  ;;  %v19933_v53 = vld [vmem:[#allocation109_spill] sm:$0xff] }
 0x3f9   :  { %v19935_v36 = vld [vmem:[#allocation112_spill] sm:$0xff]  ;;  %v19938_v57 = vld [vmem:[#allocation105_spill] sm:$0xff] }
 0x3fd   :  { %10308 = vmatmul.mubr.msk.bf16.gmra.mrb[100].mxu0 %vm9070_vm4, %v19914_v37  ;;  %vm19923_vm4 = vcmp.le.s32.totalorder %v19922_v62, 14  ;;  %v6497_v37 = vld [vmem:[#allocation2 + $0x191] sm:$0xff] }
 0x3fe   :  { %10311 = vmatprep.mubr.msk.bf16.mxu0 %vm9073_vm3, %v19915_v59  ;;  %10628 = vmatmul.mubr.msk.bf16.gmra.mrb[36].mxu1 %vm9390_vm12, %v9391_v23  ;;  %vm9396_vm0 = vmpackc.low %vm19923_vm4, %vm19921_vm1  ;;  %vm19925_vm3 = vcmp.le.s32.totalorder %v19924_v40, 14  ;;  %vm19926_vm12 = vcmp.le.s32.totalorder %v19717_v20, 14  ;;  %v19928_v23 = vld [vmem:[#allocation102_spill] sm:$0xff]  ;;  %vm19930_vm1 = vnez %v19748_v56  ;;  %v6499_v59 = vld [vmem:[#allocation2 + $0x1a1] sm:$0xff] }
 0x3ff   :  { %10631 = vmatprep.mubr.msk.bf16.mxu1 %vm9393_vm6, %v9394_v2  ;;  %vm9399_vm6 = vmpackc.low %vm19926_vm12, %vm19925_vm3  ;;  %vm19929_vm13 = vnez %v19928_v23  ;;  %v6498_v2 = vld [vmem:[#allocation2 + $0x199] sm:$0xff]  ;;  %vm19932_vm3 = vcmp.le.s32.totalorder %v19931_v46, 14  ;;  %v9406_v38 = vpack.c.bf16 %v6500_v3, %v6499_v59  ;;  %v19939_v23 = vld [vmem:[#allocation110_spill] sm:$0xff] }
 0x400   :  { %vm9082_vm5 = vmpackc.low %vm19815_vm9, %vm19929_vm13  ;;  %v3809_v56 = vld [vmem:[#allocation2 + $0x1a0] sm:$0xff]  ;;  %vm19940_vm13 = vnez %v19939_v23  ;;  %v6504_v59 = vld [vmem:[#allocation2 + $0x1c9] sm:$0xff] }
 0x401   :  { %vm9085_vm4 = vmpackc.low %vm19815_vm9, %vm19930_vm1  ;;  %v19949_v23 = vld [vmem:[#allocation121_spill] sm:$0xff] }
 0x402   :  { %vm9088_vm1 = vmpackc.low %vm19815_vm9, %vm19940_vm13  ;;  %v3814_v40 = vld [vmem:[#allocation2 + $0x1c8] sm:$0xff] }
 0x405   :  { %10312 = vmatmul.mubr.msk.bf16.gmra.mrb[104].mxu0 %vm9076_vm10, %v19927_v48  ;;  %vm19934_vm10 = vcmp.le.s32.totalorder %v19933_v53, 14  ;;  %v3811_v48 = vld [vmem:[#allocation2 + $0x1b0] sm:$0xff] }
 0x406   :  { %10315 = vmatprep.mubr.msk.bf16.mxu0 %vm9079_vm2, %v15454_v14  ;;  %10632 = vmatmul.mubr.msk.bf16.gmra.mrb[40].mxu1 %vm9396_vm0, %v9397_v4  ;;  %vm9402_vm12 = vmpackc.low %vm19934_vm10, %vm19932_vm3  ;;  %v9403_v14 = vpack.c.bf16 %v6498_v2, %v6497_v37  ;;  %vm19936_vm2 = vcmp.le.s32.totalorder %v19935_v36, 14  ;;  %vm19937_vm0 = vcmp.le.s32.totalorder %v19739_v31, 14  ;;  %v3810_v4 = vld [vmem:[#allocation2 + $0x1a8] sm:$0xff]  ;;  %v6501_v37 = vld [vmem:[#allocation2 + $0x1b1] sm:$0xff] }
 0x407   :  { %10635 = vmatprep.mubr.msk.bf16.mxu1 %vm9399_vm6, %v9400_v18  ;;  %vm9405_vm6 = vmpackc.low %vm19937_vm0, %vm19936_vm2  ;;  %v3812_v18 = vld [vmem:[#allocation2 + $0x1b8] sm:$0xff]  ;;  %v19941_v36 = vld [vmem:[#allocation114_spill] sm:$0xff]  ;;  %v9089_v3 = vpack.c.bf16 %v3810_v4, %v3809_v56  ;;  %vm19950_vm0 = vcmp.le.s32.totalorder %v19949_v23, 14 }
 0x408   :  { %v6502_v2 = vld [vmem:[#allocation2 + $0x1b9] sm:$0xff]  ;;  %vm19942_vm3 = vnez %v19941_v36  ;;  %v3815_v56 = vld [vmem:[#allocation2 + $0x1d0] sm:$0xff] }
 0x409   :  { %vm9091_vm10 = vmpackc.low %vm19815_vm9, %vm19942_vm3  ;;  %v9409_v46 = vpack.c.bf16 %v6502_v2, %v6501_v37  ;;  %v19947_v31 = vld [vmem:[#allocation120_spill] sm:$0xff]  ;;  %v3816_v4 = vld [vmem:[#allocation2 + $0x1d8] sm:$0xff] }
 0x40a   :  { %vm19948_vm2 = vcmp.le.s32.totalorder %v19947_v31, 14  ;;  %v3813_v36 = vld [vmem:[#allocation2 + $0x1c0] sm:$0xff] }
 0x40b   :  { %v6507_v2 = vld [vmem:[#allocation2 + $0x1e1] sm:$0xff] }
 0x40c   :  { %v19958_v31 = vld [vmem:[#allocation128_spill] sm:$0xff] }
 0x40d   :  { %10316 = vmatmul.mubr.msk.bf16.gmra.mrb[108].mxu0 %vm9082_vm5, %v19938_v57  ;;  %v6503_v57 = vld [vmem:[#allocation2 + $0x1c1] sm:$0xff] }
 0x40e   :  { %10319 = vmatprep.mubr.msk.bf16.mxu0 %vm9085_vm4, %v15496_v19  ;;  %10636 = vmatmul.mubr.msk.bf16.gmra.mrb[44].mxu1 %vm9402_vm12, %v9403_v14  ;;  %v19943_v19 = vld [vmem:[#allocation116_spill] sm:$0xff]  ;;  %v19945_v14 = vld [vmem:[#allocation117_spill] sm:$0xff]  ;;  %v9412_v53 = vpack.c.bf16 %v6504_v59, %v6503_v57  ;;  %v9095_v57 = vpack.c.bf16 %v3814_v40, %v3813_v36  ;;  %v3819_v40 = vld [vmem:[#allocation2 + $0x1f0] sm:$0xff] }
 0x40f   :  { %10639 = vmatprep.mubr.msk.bf16.mxu1 %vm9405_vm6, %v9406_v38  ;;  %vm19944_vm5 = vcmp.le.s32.totalorder %v19943_v19, 14  ;;  %vm19946_vm4 = vcmp.le.s32.totalorder %v19945_v14, 14  ;;  %v9092_v38 = vpack.c.bf16 %v3812_v18, %v3811_v48  ;;  %vm9411_vm6 = vmpackc.low %vm19950_vm0, %vm19948_vm2  ;;  %v19951_v19 = vld [vmem:[#allocation118_spill] sm:$0xff]  ;;  %v6506_v18 = vld [vmem:[#allocation2 + $0x1d9] sm:$0xff] }
 0x410   :  { %vm9408_vm12 = vmpackc.low %vm19946_vm4, %vm19944_vm5  ;;  %vm19952_vm13 = vnez %v19951_v19  ;;  %v6505_v48 = vld [vmem:[#allocation2 + $0x1d1] sm:$0xff]  ;;  %v19954_v59 = vld [vmem:[#allocation124_spill] sm:$0xff] }
 0x411   :  { %vm9094_vm3 = vmpackc.low %vm19815_vm9, %vm19952_vm13  ;;  %v19960_v19 = vld [vmem:[#allocation129_spill] sm:$0xff]  ;;  %v3817_v37 = vld [vmem:[#allocation2 + $0x1e0] sm:$0xff] }
 0x412   :  { %vm9097_vm5 = vmpackc.low %vm19815_vm9, %vm19786_vm15  ;;  %vm19961_vm2 = vcmp.le.s32.totalorder %v19960_v19, 14  ;;  %v3818_v14 = vld [vmem:[#allocation2 + $0x1e8] sm:$0xff]  ;;  %v3820_v36 = vld [vmem:[#allocation2 + $0x1f8] sm:$0xff] }
 0x413   :  { %vm9100_vm15 = vmpackc.low %vm19815_vm9, %vm19803_vm14 }
 0x415   :  { %10320 = vmatmul.mubr.msk.bf16.gmra.mrb[112].mxu0 %vm9088_vm1, %v9089_v3  ;;  %v6508_v3 = vld [vmem:[#allocation2 + $0x1e9] sm:$0xff]  ;;  %vm19955_vm1 = vcmp.le.s32.totalorder %v19954_v59, 14 }
 0x416   :  { %10323 = vmatprep.mubr.msk.bf16.mxu0 %vm9091_vm10, %v9092_v38  ;;  %10640 = vmatmul.mubr.msk.bf16.gmra.mrb[48].mxu1 %vm9408_vm12, %v9409_v46  ;;  %v19956_v46 = vld [vmem:[#allocation125_spill] sm:$0xff]  ;;  %v9415_v38 = vpack.c.bf16 %v6506_v18, %v6505_v48  ;;  %vm19959_vm12 = vcmp.le.s32.totalorder %v19958_v31, 14  ;;  %v9418_v23 = vpack.c.bf16 %v6508_v3, %v6507_v2  ;;  %v9101_v2 = vpack.c.bf16 %v3818_v14, %v3817_v37  ;;  %v19964_v3 = vld [vmem:[#allocation132_spill] sm:$0xff] }
 0x417   :  { %10643 = vmatprep.mubr.msk.bf16.mxu1 %vm9411_vm6, %v9412_v53  ;;  %vm19957_vm10 = vcmp.le.s32.totalorder %v19956_v46, 14  ;;  %v9098_v53 = vpack.c.bf16 %v3816_v4, %v3815_v56  ;;  %vm9417_vm0 = vmpackc.low %vm19961_vm2, %vm19959_vm12  ;;  %v6509_v56 = vld [vmem:[#allocation2 + $0x1f1] sm:$0xff]  ;;  %v6510_v4 = vld [vmem:[#allocation2 + $0x1f9] sm:$0xff]  ;;  %vm19965_vm13 = vcmp.le.s32.totalorder %v19964_v3, 14 }
 0x418   :  { %vm9414_vm4 = vmpackc.low %vm19957_vm10, %vm19955_vm1  ;;  %v6511_v18 = vld [vmem:[#allocation2 + $0x201] sm:$0xff] }
 0x419   :  { %vm9103_vm6 = vmpackc.low %vm19815_vm9, %vm19805_vm11  ;;  %v19968_v31 = vld [vmem:[#allocation136_spill] sm:$0xff]  ;;  %v19970_v59 = vld [vmem:[#allocation137_spill] sm:$0xff] }
 0x41a   :  { %vm19969_vm1 = vcmp.le.s32.totalorder %v19968_v31, 14  ;;  %vm19971_vm14 = vcmp.le.s32.totalorder %v19970_v59, 14  ;;  %v19972_v48 = vld [vmem:[#allocation72_spill] sm:$0xff]  ;;  %vm9106_vm2 = vmpackc.low %vm19815_vm9, %vm19812_vm8  ;;  %vm19982_vm8 = vcmp.le.s32.totalorder %v19824_v28, 14  ;;  %v19988_v28 = vld [vmem:[#allocation78_spill] sm:$0xff] }
 0x41b   :  { %vm9423_vm10 = vmpackc.low %vm19971_vm14, %vm19969_vm1  ;;  %vm19973_vm11 = vnez %v19972_v48  ;;  %v11343_v37 = vld [vmem:[#allocation2] sm:$0xff]  ;;  %vm19985_vm1 = vcmp.le.s32.totalorder %v19512_v55, 14 }
 0x41c   :  { %v7163_v55 = vld [vmem:[#allocation2 + $0x5a] sm:$0xff] }
 0x41d   :  { %10324 = vmatmul.mubr.msk.bf16.gmra.mrb[116].mxu0 %vm9094_vm3, %v9095_v57  ;;  %v6512_v57 = vld [vmem:[#allocation2 + $0x209] sm:$0xff] }
 0x41e   :  { %10327 = vmatprep.mubr.msk.bf16.mxu0 %vm9097_vm5, %v9098_v53  ;;  %10644 = vmatmul.mubr.msk.bf16.gmra.mrb[52].mxu1 %vm9414_vm4, %v9415_v38  ;;  %v9104_v53 = vpack.c.bf16 %v3820_v36, %v3819_v40  ;;  %v9421_v38 = vpack.c.bf16 %v6510_v4, %v6509_v56  ;;  %v9424_v19 = vpack.c.bf16 %v6512_v57, %v6511_v18  ;;  %vm19974_vm4 = vcmp.le.s32.totalorder %v19494_v0, 14  ;;  %v7156_v36 = vld [vmem:[#allocation2 + $0x22] sm:$0xff]  ;;  %v7157_v56 = vld [vmem:[#allocation2 + $0x2a] sm:$0xff]  ;;  %v7158_v57 = vld [vmem:[#allocation2 + $0x32] sm:$0xff] }
 0x41f   :  { %10647 = vmatprep.mubr.msk.bf16.mxu1 %vm9417_vm0, %v9418_v23  ;;  %v19966_v23 = vld [vmem:[#allocation133_spill] sm:$0xff]  ;;  %vm7221_vm12 = vmand %vm19974_vm4, %vm19973_vm11  ;;  %v9427_v40 = vpack.c.bf16 %v11343_v37, %v11343_v37  ;;  %v19976_v4 = vld [vmem:[#allocation138_spill] sm:$0xff]  ;;  %v9438_v0 = vpack.c.bf16 %v7157_v56, %v7156_v36  ;;  %vm19987_vm4 = vcmp.le.s32.totalorder %v19826_v32, 14 }
 0x420   :  { %vm19967_vm3 = vcmp.le.s32.totalorder %v19966_v23, 14  ;;  %vm19977_vm0 = vcmp.le.s32.totalorder %v19976_v4, 14  ;;  %v19980_v18 = vld [vmem:[#allocation73_spill] sm:$0xff]  ;;  %v7162_v37 = vld [vmem:[#allocation2 + $0x52] sm:$0xff] }
 0x421   :  { %vm9420_vm5 = vmpackc.low %vm19967_vm3, %vm19965_vm13  ;;  %vm19981_vm3 = vnez %v19980_v18  ;;  %v7165_v36 = vld [vmem:[#allocation2 + $0x6a] sm:$0xff]  ;;  %v9447_v32 = vpack.c.bf16 %v7163_v55, %v7162_v37  ;;  %v7178_v55 = vld [vmem:[#allocation2 + $0xd2] sm:$0xff] }
 0x422   :  { %vm7223_vm9 = vmand %vm19982_vm8, %vm19981_vm3  ;;  %vm19994_vm8 = vcmp.le.s32.totalorder %v19006_v15, 14  ;;  %v7168_v15 = vld [vmem:[#allocation2 + $0x82] sm:$0xff]  ;;  %v7169_v18 = vld [vmem:[#allocation2 + $0x8a] sm:$0xff] }
 0x425   :  { %10328 = vmatmul.mubr.msk.bf16.gmra.mrb[120].mxu0 %vm9100_vm15, %v9101_v2  ;;  %vm9426_vm15 = vmpackc.low %vm1515_vm7, %vm19977_vm0  ;;  %v7159_v2 = vld [vmem:[#allocation2 + $0x3a] sm:$0xff]  ;;  %vm19990_vm0 = vcmp.le.s32.totalorder %v19832_v60, 14 }
 0x426   :  { %10331 = vmatprep.mubr.msk.bf16.mxu0 %vm9103_vm6, %v9104_v53  ;;  %10648 = vmatmul.mubr.msk.bf16.gmra.mrb[56].mxu1 %vm9420_vm5, %v9421_v38  ;;  %vm19978_vm6 = vcmp.le.s32.totalorder %v19816_v51, 14  ;;  %v19983_v53 = vld [vmem:[#allocation75_spill] sm:$0xff]  ;;  %v7160_v38 = vld [vmem:[#allocation2 + $0x42] sm:$0xff]  ;;  %v7161_v51 = vld [vmem:[#allocation2 + $0x4a] sm:$0xff]  ;;  %v9441_v48 = vpack.c.bf16 %v7159_v2, %v7158_v57  ;;  %v9456_v57 = vpack.c.bf16 %v7169_v18, %v7168_v15 }
 0x427   :  { %10651 = vmatprep.mubr.msk.bf16.mxu1 %vm9423_vm10, %v9424_v19  ;;  %vm9437_vm13 = vmpackc.low %vm7221_vm12, %vm19978_vm6  ;;  %v19979_v19 = vld [vmem:[#allocation106_spill] sm:$0xff]  ;;  %vm19984_vm5 = vnez %v19983_v53  ;;  %vm19986_vm10 = vcmp.le.s32.totalorder %v19822_v16, 14  ;;  %v9444_v14 = vpack.c.bf16 %v7161_v51, %v7160_v38  ;;  %v7164_v16 = vld [vmem:[#allocation2 + $0x62] sm:$0xff] }
 0x428   :  { %vm7225_vm14 = vmand %vm19985_vm1, %vm19984_vm5  ;;  %vm19995_vm5 = vcmp.le.s32.totalorder %v19834_v35, 14  ;;  %v9450_v56 = vpack.c.bf16 %v7165_v36, %v7164_v16  ;;  %v19996_v60 = vld [vmem:[#allocation79_spill] sm:$0xff]  ;;  %v7173_v38 = vld [vmem:[#allocation2 + $0xaa] sm:$0xff] }
 0x429   :  { %vm9440_vm11 = vmpackc.low %vm7223_vm9, %vm19986_vm10  ;;  %vm19998_vm10 = vcmp.le.s32.totalorder %v13552_v50, 14  ;;  %v20004_v50 = vld [vmem:[#allocation142_spill] sm:$0xff]  ;;  %v20007_v53 = vld [vmem:[#allocation143_spill] sm:$0xff] }
 0x42a   :  { %vm9443_vm12 = vmpackc.low %vm7225_vm14, %vm19987_vm4  ;;  %vm19997_vm14 = vnez %v19996_v60  ;;  %v7170_v2 = vld [vmem:[#allocation2 + $0x92] sm:$0xff]  ;;  %v7181_v16 = vld [vmem:[#allocation2 + $0xea] sm:$0xff] }
 0x42b   :  { %v7185_v60 = vld [vmem:[#allocation2 + $0x10a] sm:$0xff] }
 0x42c   :  { %v7189_v15 = vld [vmem:[#allocation2 + $0x12a] sm:$0xff] }
 0x42d   :  { %10332 = vmatmul.mubr.msk.bf16.gmra.mrb[124].mxu0 %vm9106_vm2, %v19979_v19  ;;  %vm19989_vm2 = vnez %v19988_v28  ;;  %v7166_v19 = vld [vmem:[#allocation2 + $0x72] sm:$0xff]  ;;  %v7177_v28 = vld [vmem:[#allocation2 + $0xca] sm:$0xff] }
 0x42e   :  { %10652 = vmatmul.mubr.msk.bf16.gmra.mrb[60].mxu1 %vm9426_vm15, %v9427_v40  ;;  %vm7227_vm15 = vmand %vm19990_vm0, %vm19989_vm2  ;;  %v19991_v40 = vld [vmem:[#allocation77_spill] sm:$0xff]  ;;  %vm20002_vm0 = vcmp.le.s32.totalorder %v13550_v39, 14 }
 0x42f   :  { %10671 = vmatprep.mubr.msk.bf16.mxu1 %vm9437_vm13, %v9438_v0  ;;  %vm19992_vm6 = vnez %v19991_v40  ;;  %vm19993_vm13 = vcmp.le.s32.totalorder %v19023_v30, 14  ;;  %vm9446_vm9 = vmpackc.low %vm7227_vm15, %vm19994_vm8  ;;  %v7167_v30 = vld [vmem:[#allocation2 + $0x7a] sm:$0xff]  ;;  %v19999_v0 = vld [vmem:[#allocation141_spill] sm:$0xff]  ;;  %vm20006_vm8 = vcmp.le.s32.totalorder %v13595_v21, 14 }
 0x430   :  { %vm7229_vm3 = vmand %vm19993_vm13, %vm19992_vm6  ;;  %vm20000_vm4 = vnez %v19999_v0  ;;  %v9453_v35 = vpack.c.bf16 %v7167_v30, %v7166_v19  ;;  %vm20003_vm6 = vcmp.le.s32.totalorder %v13557_v8, 14  ;;  %v7172_v39 = vld [vmem:[#allocation2 + $0xa2] sm:$0xff]  ;;  %v20023_v40 = vld [vmem:[#allocation59_spill] sm:$0xff] }
 0x431   :  { %vm9449_vm1 = vmpackc.low %vm7229_vm3, %vm19995_vm5  ;;  %vm20005_vm3 = vnez %v20004_v50  ;;  %vm20008_vm5 = vnez %v20007_v53  ;;  %v9462_v51 = vpack.c.bf16 %v7173_v38, %v7172_v39  ;;  %v20012_v21 = vld [vmem:[#allocation144_spill] sm:$0xff]  ;;  %v7186_v30 = vld [vmem:[#allocation2 + $0x112] sm:$0xff] }
 0x432   :  { %v20039_v0 = vld [vmem:[#allocation49_spill] sm:$0xff]  ;;  %v20055_v53 = vld [vmem:[#allocation91_spill] sm:$0xff] }
 0x433   :  { %v7193_v50 = vld [vmem:[#allocation2 + $0x14a] sm:$0xff] }
 0x434   :  { %v7197_v39 = vld [vmem:[#allocation2 + $0x16a] sm:$0xff] }
 0x436   :  { %10672 = vmatmul.mubr.msk.bf16.vlgmr.msra.gmra.mrb[0].mxu1 %vm9440_vm11, %v9441_v48  ;;  %vm7231_vm11 = vmand %vm19998_vm10, %vm19997_vm14  ;;  %vm20010_vm10 = vcmp.le.s32.totalorder %v13593_v47, 14  ;;  %v7174_v48 = vld [vmem:[#allocation2 + $0xb2] sm:$0xff]  ;;  %v7176_v47 = vld [vmem:[#allocation2 + $0xc2] sm:$0xff] }
 0x437   :  { %10675 = vmatprep.mubr.msk.bf16.mxu1 %vm9443_vm12, %v9444_v14  ;;  %vm20001_vm12 = vcmp.le.s32.totalorder %v13559_v58, 14  ;;  %vm9452_vm15 = vmpackc.low %vm7231_vm11, %vm20002_vm0  ;;  %v7171_v58 = vld [vmem:[#allocation2 + $0x9a] sm:$0xff]  ;;  %vm20014_vm0 = vcmp.le.s32.totalorder %v13663_v43, 14  ;;  %v20015_v14 = vld [vmem:[#allocation145_spill] sm:$0xff]  ;;  %v9468_v37 = vpack.c.bf16 %v7177_v28, %v7176_v47 }
 0x438   :  { %vm7233_vm2 = vmand %vm20001_vm12, %vm20000_vm4  ;;  %v9459_v8 = vpack.c.bf16 %v7171_v58, %v7170_v2  ;;  %vm20011_vm4 = vcmp.le.s32.totalorder %v13605_v10, 14  ;;  %v20020_v43 = vld [vmem:[#allocation55_spill] sm:$0xff]  ;;  %v20071_v47 = vld [vmem:[#allocation109_spill] sm:$0xff] }
 0x439   :  { %vm9455_vm13 = vmpackc.low %vm7233_vm2, %vm20003_vm6  ;;  %vm20013_vm2 = vnez %v20012_v21  ;;  %vm20016_vm6 = vnez %v20015_v14  ;;  %v7194_v58 = vld [vmem:[#allocation2 + $0x152] sm:$0xff]  ;;  %v7201_v21 = vld [vmem:[#allocation2 + $0x18a] sm:$0xff] }
 0x43a   :  { %v20069_v14 = vld [vmem:[#allocation103_spill] sm:$0xff] }
 0x43b   :  { %v7202_v28 = vld [vmem:[#allocation2 + $0x192] sm:$0xff] }
 0x43e   :  { %10676 = vmatmul.mubr.msk.bf16.gmra.mrb[4].mxu1 %vm9446_vm9, %v9447_v32  ;;  %vm7235_vm9 = vmand %vm20006_vm8, %vm20005_vm3  ;;  %vm20018_vm8 = vcmp.le.s32.totalorder %v13661_v41, 14  ;;  %v7180_v41 = vld [vmem:[#allocation2 + $0xe2] sm:$0xff]  ;;  %v7182_v32 = vld [vmem:[#allocation2 + $0xf2] sm:$0xff] }
 0x43f   :  { %10679 = vmatprep.mubr.msk.bf16.mxu1 %vm9449_vm1, %v9450_v56  ;;  %vm20009_vm1 = vcmp.le.s32.totalorder %v13619_v17, 14  ;;  %vm9458_vm11 = vmpackc.low %vm7235_vm9, %vm20010_vm10  ;;  %v7175_v17 = vld [vmem:[#allocation2 + $0xba] sm:$0xff]  ;;  %vm20022_vm10 = vcmp.le.s32.totalorder %v19257_v45, 14  ;;  %v9474_v36 = vpack.c.bf16 %v7181_v16, %v7180_v41 }
 0x440   :  { %vm7237_vm14 = vmand %vm20009_vm1, %vm20008_vm5  ;;  %v9465_v10 = vpack.c.bf16 %v7175_v17, %v7174_v48  ;;  %vm20019_vm5 = vcmp.le.s32.totalorder %v13671_v6, 14  ;;  %v20028_v45 = vld [vmem:[#allocation67_spill] sm:$0xff]  ;;  %v20031_v56 = vld [vmem:[#allocation64_spill] sm:$0xff] }
 0x441   :  { %vm9461_vm12 = vmpackc.low %vm7237_vm14, %vm20011_vm4  ;;  %vm20021_vm14 = vnez %v20020_v43  ;;  %vm20024_vm4 = vnez %v20023_v40  ;;  %v20067_v48 = vld [vmem:[#allocation104_spill] sm:$0xff] }
 0x442   :  { %v20077_v41 = vld [vmem:[#allocation108_spill] sm:$0xff] }
 0x446   :  { %10680 = vmatmul.mubr.msk.bf16.gmra.mrb[8].mxu1 %vm9452_vm15, %v9453_v35  ;;  %vm7239_vm15 = vmand %vm20014_vm0, %vm20013_vm2  ;;  %vm20026_vm0 = vcmp.le.s32.totalorder %v13705_v61, 14  ;;  %v7184_v61 = vld [vmem:[#allocation2 + $0x102] sm:$0xff]  ;;  %v7190_v35 = vld [vmem:[#allocation2 + $0x132] sm:$0xff] }
 0x447   :  { %10683 = vmatprep.mubr.msk.bf16.mxu1 %vm9455_vm13, %v9456_v57  ;;  %vm20017_vm13 = vcmp.le.s32.totalorder %v13673_v11, 14  ;;  %vm9464_vm9 = vmpackc.low %vm7239_vm15, %vm20018_vm8  ;;  %v7179_v11 = vld [vmem:[#allocation2 + $0xda] sm:$0xff]  ;;  %vm20030_vm8 = vcmp.le.s32.totalorder %v19866_v29, 14  ;;  %v9480_v19 = vpack.c.bf16 %v7185_v60, %v7184_v61  ;;  %v20047_v57 = vld [vmem:[#allocation65_spill] sm:$0xff] }
 0x448   :  { %vm7241_vm3 = vmand %vm20017_vm13, %vm20016_vm6  ;;  %v9471_v6 = vpack.c.bf16 %v7179_v11, %v7178_v55  ;;  %vm20027_vm6 = vcmp.le.s32.totalorder %v13715_v27, 14  ;;  %v20036_v29 = vld [vmem:[#allocation68_spill] sm:$0xff]  ;;  %v7205_v11 = vld [vmem:[#allocation2 + $0x1aa] sm:$0xff] }
 0x449   :  { %vm9467_vm1 = vmpackc.low %vm7241_vm3, %vm20019_vm5  ;;  %vm20029_vm3 = vnez %v20028_v45  ;;  %vm20032_vm5 = vnez %v20031_v56  ;;  %v7204_v55 = vld [vmem:[#allocation2 + $0x1a2] sm:$0xff]  ;;  %v7206_v61 = vld [vmem:[#allocation2 + $0x1b2] sm:$0xff] }
 0x44a   :  { %v7207_v60 = vld [vmem:[#allocation2 + $0x1ba] sm:$0xff] }
 0x44e   :  { %10684 = vmatmul.mubr.msk.bf16.gmra.mrb[12].mxu1 %vm9458_vm11, %v9459_v8  ;;  %vm7243_vm11 = vmand %vm20022_vm10, %vm20021_vm14  ;;  %vm20034_vm10 = vcmp.le.s32.totalorder %v19864_v7, 14  ;;  %v7188_v7 = vld [vmem:[#allocation2 + $0x122] sm:$0xff]  ;;  %v7198_v8 = vld [vmem:[#allocation2 + $0x172] sm:$0xff] }
 0x44f   :  { %10687 = vmatprep.mubr.msk.bf16.mxu1 %vm9461_vm12, %v9462_v51  ;;  %vm20025_vm12 = vcmp.le.s32.totalorder %v19262_v42, 14  ;;  %vm9470_vm15 = vmpackc.low %vm7243_vm11, %vm20026_vm0  ;;  %v7183_v42 = vld [vmem:[#allocation2 + $0xfa] sm:$0xff]  ;;  %vm20038_vm0 = vcmp.le.s32.totalorder %v19880_v25, 14  ;;  %v9486_v18 = vpack.c.bf16 %v7189_v15, %v7188_v7  ;;  %v9513_v15 = vpack.c.bf16 %v7207_v60, %v7206_v61 }
 0x450   :  { %vm7245_vm2 = vmand %vm20025_vm12, %vm20024_vm4  ;;  %v9477_v27 = vpack.c.bf16 %v7183_v42, %v7182_v32  ;;  %vm20035_vm4 = vcmp.le.s32.totalorder %v19868_v54, 14  ;;  %v20044_v25 = vld [vmem:[#allocation56_spill] sm:$0xff]  ;;  %v20063_v51 = vld [vmem:[#allocation99_spill] sm:$0xff] }
 0x451   :  { %vm9473_vm13 = vmpackc.low %vm7245_vm2, %vm20027_vm6  ;;  %vm20037_vm2 = vnez %v20036_v29  ;;  %vm20040_vm6 = vnez %v20039_v0  ;;  %v20081_v32 = vld [vmem:[#allocation111_spill] sm:$0xff]  ;;  %v20083_v42 = vld [vmem:[#allocation117_spill] sm:$0xff] }
 0x452   :  { %v20089_v7 = vld [vmem:[#allocation116_spill] sm:$0xff] }
 0x456   :  { %10688 = vmatmul.mubr.msk.bf16.gmra.mrb[16].mxu1 %vm9464_vm9, %v9465_v10  ;;  %vm7247_vm9 = vmand %vm20030_vm8, %vm20029_vm3  ;;  %vm20042_vm8 = vcmp.le.s32.totalorder %v19878_v49, 14  ;;  %v7192_v49 = vld [vmem:[#allocation2 + $0x142] sm:$0xff]  ;;  %v7203_v10 = vld [vmem:[#allocation2 + $0x19a] sm:$0xff] }
 0x457   :  { %10691 = vmatprep.mubr.msk.bf16.mxu1 %vm9467_vm1, %v9468_v37  ;;  %vm20033_vm1 = vcmp.le.s32.totalorder %v19870_v13, 14  ;;  %vm9476_vm11 = vmpackc.low %vm7247_vm9, %vm20034_vm10  ;;  %v7187_v13 = vld [vmem:[#allocation2 + $0x11a] sm:$0xff]  ;;  %vm20046_vm10 = vcmp.le.s32.totalorder %v19894_v1, 14  ;;  %v9492_v2 = vpack.c.bf16 %v7193_v50, %v7192_v49  ;;  %v20075_v37 = vld [vmem:[#allocation113_spill] sm:$0xff]  ;;  %v9507_v16 = vpack.c.bf16 %v7203_v10, %v7202_v28 }
 0x458   :  { %vm7249_vm14 = vmand %vm20033_vm1, %vm20032_vm5  ;;  %v9483_v54 = vpack.c.bf16 %v7187_v13, %v7186_v30  ;;  %vm20043_vm5 = vcmp.le.s32.totalorder %v19882_v34, 14  ;;  %v20052_v1 = vld [vmem:[#allocation87_spill] sm:$0xff]  ;;  %v7208_v30 = vld [vmem:[#allocation2 + $0x1c2] sm:$0xff] }
 0x459   :  { %vm9479_vm12 = vmpackc.low %vm7249_vm14, %vm20035_vm4  ;;  %vm20045_vm14 = vnez %v20044_v25  ;;  %vm20048_vm4 = vnez %v20047_v57  ;;  %v7209_v13 = vld [vmem:[#allocation2 + $0x1ca] sm:$0xff]  ;;  %v7210_v57 = vld [vmem:[#allocation2 + $0x1d2] sm:$0xff] }
 0x45a   :  { %v7211_v49 = vld [vmem:[#allocation2 + $0x1da] sm:$0xff]  ;;  %v20112_v28 = vld [vmem:[#allocation58_spill] sm:$0xff] }
 0x45b   :  { %v20096_v50 = vld [vmem:[#allocation123_spill] sm:$0xff] }
 0x45e   :  { %10692 = vmatmul.mubr.msk.bf16.gmra.mrb[20].mxu1 %vm9470_vm15, %v9471_v6  ;;  %vm7251_vm15 = vmand %vm20038_vm0, %vm20037_vm2  ;;  %vm20050_vm0 = vcmp.le.s32.totalorder %v19892_v9, 14  ;;  %v7196_v9 = vld [vmem:[#allocation2 + $0x162] sm:$0xff] }
 0x45f   :  { %10695 = vmatprep.mubr.msk.bf16.mxu1 %vm9473_vm13, %v9474_v36  ;;  %vm20041_vm13 = vcmp.le.s32.totalorder %v19884_v63, 14  ;;  %vm9482_vm9 = vmpackc.low %vm7251_vm15, %vm20042_vm8  ;;  %v7191_v63 = vld [vmem:[#allocation2 + $0x13a] sm:$0xff]  ;;  %vm20054_vm8 = vcmp.le.s32.totalorder %v19908_v26, 14  ;;  %v9498_v38 = vpack.c.bf16 %v7197_v39, %v7196_v9  ;;  %v9510_v36 = vpack.c.bf16 %v7205_v11, %v7204_v55 }
 0x460   :  { %vm7253_vm3 = vmand %vm20041_vm13, %vm20040_vm6  ;;  %v9489_v34 = vpack.c.bf16 %v7191_v63, %v7190_v35  ;;  %vm20051_vm6 = vcmp.le.s32.totalorder %v19896_v33, 14  ;;  %v20060_v26 = vld [vmem:[#allocation95_spill] sm:$0xff]  ;;  %v20079_v6 = vld [vmem:[#allocation112_spill] sm:$0xff] }
 0x461   :  { %vm9485_vm1 = vmpackc.low %vm7253_vm3, %vm20043_vm5  ;;  %vm20053_vm3 = vnez %v20052_v1  ;;  %vm20056_vm5 = vnez %v20055_v53  ;;  %v20093_v35 = vld [vmem:[#allocation119_spill] sm:$0xff]  ;;  %v7212_v1 = vld [vmem:[#allocation2 + $0x1e2] sm:$0xff] }
 0x462   :  { %v20100_v53 = vld [vmem:[#allocation124_spill] sm:$0xff] }
 0x463   :  { %v20102_v9 = vld [vmem:[#allocation128_spill] sm:$0xff] }
 0x466   :  { %10696 = vmatmul.mubr.msk.bf16.gmra.mrb[24].mxu1 %vm9476_vm11, %v9477_v27  ;;  %vm7255_vm11 = vmand %vm20046_vm10, %vm20045_vm14  ;;  %vm20058_vm10 = vcmp.le.s32.totalorder %v19906_v5, 14  ;;  %v7200_v5 = vld [vmem:[#allocation2 + $0x182] sm:$0xff]  ;;  %v20085_v27 = vld [vmem:[#allocation115_spill] sm:$0xff] }
 0x467   :  { %10699 = vmatprep.mubr.msk.bf16.mxu1 %vm9479_vm12, %v9480_v19  ;;  %vm20049_vm12 = vcmp.le.s32.totalorder %v19898_v52, 14  ;;  %vm9488_vm15 = vmpackc.low %vm7255_vm11, %vm20050_vm0  ;;  %v7195_v52 = vld [vmem:[#allocation2 + $0x15a] sm:$0xff]  ;;  %vm20062_vm0 = vcmp.le.s32.totalorder %v19922_v62, 14  ;;  %v9504_v17 = vpack.c.bf16 %v7201_v21, %v7200_v5  ;;  %v20087_v19 = vld [vmem:[#allocation121_spill] sm:$0xff] }
 0x468   :  { %vm7257_vm2 = vmand %vm20049_vm12, %vm20048_vm4  ;;  %v9495_v33 = vpack.c.bf16 %v7195_v52, %v7194_v58  ;;  %vm20059_vm4 = vcmp.le.s32.totalorder %v19910_v44, 14  ;;  %v7213_v58 = vld [vmem:[#allocation2 + $0x1ea] sm:$0xff]  ;;  %v7216_v21 = vld [vmem:[#allocation2 + $0x202] sm:$0xff] }
 0x469   :  { %vm9491_vm13 = vmpackc.low %vm7257_vm2, %vm20051_vm6  ;;  %vm20061_vm2 = vnez %v20060_v26  ;;  %vm20064_vm6 = vnez %v20063_v51  ;;  %v9522_v39 = vpack.c.bf16 %v7213_v58, %v7212_v1  ;;  %v20107_v51 = vld [vmem:[#allocation134_spill] sm:$0xff] }
 0x46e   :  { %10700 = vmatmul.mubr.msk.bf16.gmra.mrb[28].mxu1 %vm9482_vm9, %v9483_v54  ;;  %vm7259_vm9 = vmand %vm20054_vm8, %vm20053_vm3  ;;  %vm20066_vm8 = vcmp.le.s32.totalorder %v19920_v24, 14  ;;  %v20073_v24 = vld [vmem:[#allocation107_spill] sm:$0xff]  ;;  %v20091_v54 = vld [vmem:[#allocation120_spill] sm:$0xff] }
 0x46f   :  { %10703 = vmatprep.mubr.msk.bf16.mxu1 %vm9485_vm1, %v9486_v18  ;;  %vm20057_vm1 = vcmp.le.s32.totalorder %v19912_v12, 14  ;;  %vm9494_vm11 = vmpackc.low %vm7259_vm9, %vm20058_vm10  ;;  %v7199_v12 = vld [vmem:[#allocation2 + $0x17a] sm:$0xff]  ;;  %vm20072_vm10 = vcmp.le.s32.totalorder %v20071_v47, 14  ;;  %v9516_v18 = vpack.c.bf16 %v7209_v13, %v7208_v30 }
 0x470   :  { %vm7261_vm14 = vmand %vm20057_vm1, %vm20056_vm5  ;;  %v9501_v44 = vpack.c.bf16 %v7199_v12, %v7198_v8  ;;  %vm20068_vm5 = vcmp.le.s32.totalorder %v20067_v48, 14  ;;  %v7214_v8 = vld [vmem:[#allocation2 + $0x1f2] sm:$0xff]  ;;  %v7215_v12 = vld [vmem:[#allocation2 + $0x1fa] sm:$0xff] }
 0x471   :  { %vm9497_vm12 = vmpackc.low %vm7261_vm14, %vm20059_vm4  ;;  %vm20070_vm14 = vnez %v20069_v14  ;;  %vm20074_vm4 = vnez %v20073_v24  ;;  %v7218_v14 = vld [vmem:[#allocation2 + $0x212] sm:$0xff]  ;;  %v7219_v47 = vld [vmem:[#allocation2 + $0x21a] sm:$0xff] }
 0x472   :  { %v9531_v24 = vpack.c.bf16 %v7219_v47, %v7218_v14 }
 0x476   :  { %10704 = vmatmul.mubr.msk.bf16.gmra.mrb[32].mxu1 %vm9488_vm15, %v9489_v34  ;;  %vm7263_vm15 = vmand %vm20062_vm0, %vm20061_vm2  ;;  %vm20078_vm0 = vcmp.le.s32.totalorder %v20077_v41, 14  ;;  %v20098_v34 = vld [vmem:[#allocation129_spill] sm:$0xff] }
 0x477   :  { %10707 = vmatprep.mubr.msk.bf16.mxu1 %vm9491_vm13, %v9492_v2  ;;  %vm20065_vm13 = vcmp.le.s32.totalorder %v19717_v20, 14  ;;  %vm9500_vm9 = vmpackc.low %vm7263_vm15, %vm20066_vm8  ;;  %vm20084_vm8 = vcmp.le.s32.totalorder %v20083_v42, 14 }
 0x478   :  { %vm7265_vm3 = vmand %vm20065_vm13, %vm20064_vm6  ;;  %vm20080_vm6 = vcmp.le.s32.totalorder %v20079_v6, 14 }
 0x479   :  { %vm9503_vm1 = vmpackc.low %vm7265_vm3, %vm20068_vm5  ;;  %vm20082_vm3 = vnez %v20081_v32  ;;  %vm20086_vm5 = vnez %v20085_v27 }
 0x47e   :  { %10708 = vmatmul.mubr.msk.bf16.gmra.mrb[36].mxu1 %vm9494_vm11, %v9495_v33  ;;  %vm7267_vm11 = vmand %vm20072_vm10, %vm20070_vm14  ;;  %vm20090_vm10 = vcmp.le.s32.totalorder %v20089_v7, 14 }
 0x47f   :  { %10711 = vmatprep.mubr.msk.bf16.mxu1 %vm9497_vm12, %v9498_v38  ;;  %vm20076_vm12 = vcmp.le.s32.totalorder %v20075_v37, 14  ;;  %vm9506_vm15 = vmpackc.low %vm7267_vm11, %vm20078_vm0  ;;  %vm20095_vm0 = vcmp.le.s32.totalorder %v19956_v46, 14  ;;  %v9519_v46 = vpack.c.bf16 %v7211_v49, %v7210_v57  ;;  %v20104_v38 = vld [vmem:[#allocation131_spill] sm:$0xff] }
 0x480   :  { %vm7269_vm2 = vmand %vm20076_vm12, %vm20074_vm4  ;;  %vm20092_vm4 = vcmp.le.s32.totalorder %v20091_v54, 14 }
 0x481   :  { %vm9509_vm13 = vmpackc.low %vm7269_vm2, %vm20080_vm6  ;;  %vm20094_vm2 = vnez %v20093_v35  ;;  %vm20097_vm6 = vnez %v20096_v50 }
 0x486   :  { %10712 = vmatmul.mubr.msk.bf16.gmra.mrb[40].mxu1 %vm9500_vm9, %v9501_v44  ;;  %vm7271_vm9 = vmand %vm20084_vm8, %vm20082_vm3  ;;  %vm20101_vm8 = vcmp.le.s32.totalorder %v20100_v53, 14  ;;  %v7217_v44 = vld [vmem:[#allocation2 + $0x20a] sm:$0xff] }
 0x487   :  { %10715 = vmatprep.mubr.msk.bf16.mxu1 %vm9503_vm1, %v9504_v17  ;;  %vm20088_vm1 = vcmp.le.s32.totalorder %v20087_v19, 14  ;;  %vm9512_vm11 = vmpackc.low %vm7271_vm9, %vm20090_vm10  ;;  %vm20106_vm10 = vcmp.le.s32.totalorder %v19966_v23, 14  ;;  %v9525_v23 = vpack.c.bf16 %v7215_v12, %v7214_v8  ;;  %v9528_v17 = vpack.c.bf16 %v7217_v44, %v7216_v21 }
 0x488   :  { %v16008_v62 = vpop.f32.mrb[64].mxu0  ;;  %vm7273_vm14 = vmand %vm20088_vm1, %vm20086_vm5  ;;  %vm20103_vm5 = vcmp.le.s32.totalorder %v20102_v9, 14 }
 0x489   :  { %v16014_v20 = vpop.f32.mrb[65].mxu0  ;;  %vm9515_vm12 = vmpackc.low %vm7273_vm14, %vm20092_vm4  ;;  %vm20105_vm14 = vnez %v20104_v38  ;;  %vm20108_vm4 = vnez %v20107_v51 }
 0x48a   :  { %v16020_v43 = vpop.f32.mrb[66].mxu0 }
 0x48b   :  { %v16022_v40 = vpop.f32.mrb[67].mxu0 }
 0x48e   :  { %10716 = vmatmul.mubr.msk.bf16.gmra.mrb[44].mxu1 %vm9506_vm15, %v9507_v16  ;;  %vm7275_vm15 = vmand %vm20095_vm0, %vm20094_vm2  ;;  %vm20110_vm0 = vcmp.le.s32.totalorder %v19964_v3, 14 }
 0x48f   :  { %10719 = vmatprep.mubr.msk.bf16.mxu1 %vm9509_vm13, %v9510_v36  ;;  %vm20099_vm13 = vcmp.le.s32.totalorder %v20098_v34, 14  ;;  %vm9518_vm9 = vmpackc.low %vm7275_vm15, %vm20101_vm8 }
 0x490   :  { %v16028_v45 = vpop.f32.mrb[68].mxu0  ;;  %vm7277_vm3 = vmand %vm20099_vm13, %vm20097_vm6  ;;  %vm20111_vm6 = vcmp.le.s32.totalorder %v19968_v31, 14 }
 0x491   :  { %v16034_v56 = vpop.f32.mrb[69].mxu0  ;;  %vm9521_vm1 = vmpackc.low %vm7277_vm3, %vm20103_vm5  ;;  %vm20113_vm3 = vnez %v20112_v28 }
 0x492   :  { %v16040_v29 = vpop.f32.mrb[70].mxu0  ;;  %vm7283_vm8 = vmand %vm1515_vm7, %vm20113_vm3 }
 0x493   :  { %v16042_v0 = vpop.f32.mrb[71].mxu0 }
 0x496   :  { %10720 = vmatmul.mubr.msk.bf16.gmra.mrb[48].mxu1 %vm9512_vm11, %v9513_v15  ;;  %vm7279_vm11 = vmand %vm20106_vm10, %vm20105_vm14 }
 0x497   :  { %10723 = vmatprep.mubr.msk.bf16.mxu1 %vm9515_vm12, %v9516_v18  ;;  %vm20109_vm12 = vcmp.le.s32.totalorder %v19970_v59, 14  ;;  %vm9524_vm15 = vmpackc.low %vm7279_vm11, %vm20110_vm0 }
 0x498   :  { %v16048_v25 = vpop.f32.mrb[72].mxu0  ;;  %vm7281_vm2 = vmand %vm20109_vm12, %vm20108_vm4 }
 0x499   :  { %v16054_v63 = vpop.f32.mrb[73].mxu0  ;;  %vm9527_vm13 = vmpackc.low %vm7281_vm2, %vm20111_vm6 }
 0x49a   :  { %v16060_v2 = vpop.f32.mrb[74].mxu0 }
 0x49b   :  { %v16062_v52 = vpop.f32.mrb[75].mxu0 }
 0x49e   :  { %10724 = vmatmul.mubr.msk.bf16.gmra.mrb[52].mxu1 %vm9518_vm9, %v9519_v46  ;;  %vm20114_vm9 = vcmp.le.s32.totalorder %v19976_v4, 14 }
 0x49f   :  { %10727 = vmatprep.mubr.msk.bf16.mxu1 %vm9521_vm1, %v9522_v39  ;;  %vm9530_vm5 = vmpackc.low %vm7283_vm8, %vm20114_vm9 }
 0x4a0   :  { %v16068_v33 = vpop.f32.mrb[76].mxu0 }
 0x4a1   :  { %v16074_v26 = vpop.f32.mrb[77].mxu0 }
 0x4a2   :  { %v16080_v5 = vpop.f32.mrb[78].mxu0 }
 0x4a3   :  { %v16082_v48 = vpop.f32.mrb[79].mxu0 }
 0x4a6   :  { %10728 = vmatmul.mubr.msk.bf16.gmra.mrb[56].mxu1 %vm9524_vm15, %v9525_v23 }
 0x4a7   :  { %10731 = vmatprep.mubr.msk.bf16.mxu1 %vm9527_vm13, %v9528_v17 }
 0x4a8   :  { %v16088_v59 = vpop.f32.mrb[80].mxu0 }
 0x4a9   :  { %v16094_v10 = vpop.f32.mrb[81].mxu0 }
 0x4aa   :  { %v16096_v3 = vpop.f32.mrb[82].mxu0 }
 0x4ab   :  { %v16098_v37 = vpop.f32.mrb[83].mxu0 }
 0x4ae   :  { %10732 = vmatmul.mubr.msk.bf16.gmra.mrb[60].mxu1 %vm9530_vm5, %v9531_v24 }
 0x4b0   :  { %v16102_v31 = vpop.f32.mrb[84].mxu0 }
 0x4b1   :  { %v16104_v55 = vpop.f32.mrb[85].mxu0 }
 0x4b2   :  { %v16106_v11 = vpop.f32.mrb[86].mxu0 }
 0x4b3   :  { %v16108_v41 = vpop.f32.mrb[87].mxu0 }
 0x4b8   :  { %v16110_v22 = vpop.f32.mrb[88].mxu0 }
 0x4b9   :  { %v16112_v16 = vpop.f32.mrb[89].mxu0 }
 0x4ba   :  { %v16114_v6 = vpop.f32.mrb[90].mxu0 }
 0x4bb   :  { %v16116_v36 = vpop.f32.mrb[91].mxu0 }
 0x4c0   :  { %v16118_v32 = vpop.f32.mrb[92].mxu0 }
 0x4c1   :  { %v16120_v4 = vpop.f32.mrb[93].mxu0 }
 0x4c2   :  { %v16122_v42 = vpop.f32.mrb[94].mxu0 }
 0x4c3   :  { %v16124_v61 = vpop.f32.mrb[95].mxu0 }
 0x4c8   :  { %v16126_v60 = vpop.f32.mrb[96].mxu0 }
 0x4c9   :  { %v16128_v27 = vpop.f32.mrb[97].mxu0 }
 0x4ca   :  { %v16130_v19 = vpop.f32.mrb[98].mxu0 }
 0x4cb   :  { %v16132_v30 = vpop.f32.mrb[99].mxu0 }
 0x4d0   :  { %v16134_v13 = vpop.f32.mrb[100].mxu0 }
 0x4d1   :  { %v16136_v7 = vpop.f32.mrb[101].mxu0 }
 0x4d2   :  { %v16138_v15 = vpop.f32.mrb[102].mxu0 }
 0x4d3   :  { %v16140_v54 = vpop.f32.mrb[103].mxu0 }
 0x4d8   :  { %v16142_v18 = vpop.f32.mrb[104].mxu0 }
 0x4d9   :  { %v16144_v35 = vpop.f32.mrb[105].mxu0 }
 0x4da   :  { %v16146_v57 = vpop.f32.mrb[106].mxu0 }
 0x4db   :  { %v16148_v49 = vpop.f32.mrb[107].mxu0 }
 0x4e0   :  { %v16150_v50 = vpop.f32.mrb[108].mxu0 }
 0x4e1   :  { %v16152_v34 = vpop.f32.mrb[109].mxu0 }
 0x4e2   :  { %v16154_v1 = vpop.f32.mrb[110].mxu0 }
 0x4e3   :  { %v16156_v58 = vpop.f32.mrb[111].mxu0 }
 0x4e8   :  { %v16158_v53 = vpop.f32.mrb[112].mxu0 }
 0x4e9   :  { %v16160_v46 = vpop.f32.mrb[113].mxu0 }
 0x4ea   :  { %v16162_v9 = vpop.f32.mrb[114].mxu0 }
 0x4eb   :  { %v16164_v39 = vpop.f32.mrb[115].mxu0 }
 0x4ec   :  { %20115 = vst [vmem:[#allocation122_spill] sm:$0xff] %v16164_v39 }
 0x4f0   :  { %v16166_v38 = vpop.f32.mrb[116].mxu0 }
 0x4f1   :  { %20116 = vst [vmem:[#allocation130_spill] sm:$0xff] %v16166_v38  ;;  %v16168_v8 = vpop.f32.mrb[117].mxu0 }
 0x4f2   :  { %20117 = vst [vmem:[#allocation127_spill] sm:$0xff] %v16168_v8  ;;  %v16170_v12 = vpop.f32.mrb[118].mxu0 }
 0x4f3   :  { %20118 = vst [vmem:[#allocation150_spill] sm:$0xff] %v16170_v12  ;;  %v16172_v51 = vpop.f32.mrb[119].mxu0 }
 0x4f4   :  { %20119 = vst [vmem:[#allocation135_spill] sm:$0xff] %v16172_v51 }
 0x4f8   :  { %v16174_v21 = vpop.f32.mrb[120].mxu0 }
 0x4f9   :  { %20120 = vst [vmem:[#allocation139_spill] sm:$0xff] %v16174_v21  ;;  %v16176_v44 = vpop.f32.mrb[121].mxu0 }
 0x4fa   :  { %20121 = vst [vmem:[#allocation54_spill] sm:$0xff] %v16176_v44  ;;  %v16178_v23 = vpop.f32.mrb[122].mxu0 }
 0x4fb   :  { %20122 = vst [vmem:[#allocation57_spill] sm:$0xff] %v16178_v23  ;;  %v16180_v17 = vpop.f32.mrb[123].mxu0 }
 0x4fc   :  { %20123 = vst [vmem:[#allocation74_spill] sm:$0xff] %v16180_v17 }
 0x500   :  { %v16182_v14 = vpop.f32.mrb[124].mxu0 }
 0x501   :  { %20124 = vst [vmem:[#allocation80_spill] sm:$0xff] %v16182_v14  ;;  %v16184_v47 = vpop.f32.mrb[125].mxu0 }
 0x502   :  { %20125 = vst [vmem:[#allocation81_spill] sm:$0xff] %v16184_v47  ;;  %v16186_v28 = vpop.f32.mrb[126].mxu0 }
 0x503   :  { %20126 = vst [vmem:[#allocation82_spill] sm:$0xff] %v16186_v28  ;;  %v16188_v24 = vpop.f32.mrb[127].mxu0 }
 0x504   :  { %20127 = vst [vmem:[#allocation85_spill] sm:$0xff] %v16188_v24 }
 0x509   :  { %v10673_v8 = vpop.f32.mrb[0].mxu1 }
 0x50a   :  { %v16191_v12 = vadd.f32 %v10673_v8, %v16008_v62  ;;  %v7606_v51 = vpop.f32.mrb[1].mxu1 }
 0x50b   :  { %v16194_v21 = vadd.f32 %v7606_v51, %v16014_v20  ;;  %v10674_v44 = vpop.f32.mrb[2].mxu1 }
 0x50c   :  { %v16197_v23 = vadd.f32 %v10674_v44, %v16020_v43  ;;  %v7609_v17 = vpop.f32.mrb[3].mxu1  ;;  %v7997_v20 = vmul.f32 %v16191_v12, %v16191_v12 }
 0x50d   :  { %20128 = vst [vmem:[#allocation48_spill] sm:$0xff] %v16194_v21  ;;  %v16200_v14 = vadd.f32 %v7609_v17, %v16022_v40  ;;  %v7995_v28 = vmul.f32 %v16194_v21, %v16194_v21 }
 0x50e   :  { %v7998_v17 = vmul.f32 %v16197_v23, %v16197_v23 }
 0x50f   :  { %20129 = vst [vmem:[#allocation146_spill] sm:$0xff] %v16200_v14  ;;  %v7925_v24 = vadd.f32 %v16200_v14, %v16194_v21  ;;  %v7996_v62 = vmul.f32 %v16200_v14, %v16200_v14 }
 0x511   :  { %v7926_v8 = vadd.f32 %v16191_v12, %v7925_v24  ;;  %v8059_v43 = vadd.f32 %v7996_v62, %v7995_v28  ;;  %v10677_v51 = vpop.f32.mrb[4].mxu1 }
 0x512   :  { %v16212_v44 = vadd.f32 %v10677_v51, %v16028_v45  ;;  %v7622_v40 = vpop.f32.mrb[5].mxu1 }
 0x513   :  { %v8060_v47 = vadd.f32 %v8059_v43, %v7997_v20  ;;  %v16217_v21 = vadd.f32 %v7622_v40, %v16034_v56  ;;  %v7927_v14 = vadd.f32 %v16197_v23, %v7926_v8  ;;  %v10678_v38 = vpop.f32.mrb[6].mxu1 }
 0x514   :  { %v16221_v39 = vadd.f32 %v10678_v38, %v16040_v29  ;;  %v7625_v24 = vpop.f32.mrb[7].mxu1  ;;  %v8001_v29 = vmul.f32 %v16212_v44, %v16212_v44 }
 0x515   :  { %v7928_v28 = vadd.f32 %v16217_v21, %v7927_v14  ;;  %v7999_v45 = vmul.f32 %v16217_v21, %v16217_v21  ;;  %v8061_v62 = vadd.f32 %v8060_v47, %v7998_v17  ;;  %v16227_v51 = vadd.f32 %v7625_v24, %v16042_v0 }
 0x516   :  { %v8002_v0 = vmul.f32 %v16221_v39, %v16221_v39 }
 0x517   :  { %v8062_v20 = vadd.f32 %v8061_v62, %v7999_v45  ;;  %v7929_v56 = vadd.f32 %v16227_v51, %v7928_v28  ;;  %v8000_v8 = vmul.f32 %v16227_v51, %v16227_v51 }
 0x519   :  { %v7930_v38 = vadd.f32 %v16212_v44, %v7929_v56  ;;  %v8063_v43 = vadd.f32 %v8062_v20, %v8000_v8  ;;  %v10681_v14 = vpop.f32.mrb[8].mxu1 }
 0x51a   :  { %v16236_v40 = vadd.f32 %v10681_v14, %v16048_v25  ;;  %v7638_v47 = vpop.f32.mrb[9].mxu1 }
 0x51b   :  { %v8064_v17 = vadd.f32 %v8063_v43, %v8001_v29  ;;  %v16241_v24 = vadd.f32 %v7638_v47, %v16054_v63  ;;  %v7931_v28 = vadd.f32 %v16221_v39, %v7930_v38  ;;  %v10682_v45 = vpop.f32.mrb[10].mxu1 }
 0x51c   :  { %v16245_v62 = vadd.f32 %v10682_v45, %v16060_v2  ;;  %v7641_v56 = vpop.f32.mrb[11].mxu1  ;;  %v8005_v2 = vmul.f32 %v16236_v40, %v16236_v40 }
 0x51d   :  { %v7932_v20 = vadd.f32 %v16241_v24, %v7931_v28  ;;  %v8003_v25 = vmul.f32 %v16241_v24, %v16241_v24  ;;  %v8065_v8 = vadd.f32 %v8064_v17, %v8002_v0  ;;  %v16251_v14 = vadd.f32 %v7641_v56, %v16062_v52 }
 0x51e   :  { %v8006_v52 = vmul.f32 %v16245_v62, %v16245_v62 }
 0x51f   :  { %v8066_v29 = vadd.f32 %v8065_v8, %v8003_v25  ;;  %v7933_v63 = vadd.f32 %v16251_v14, %v7932_v20  ;;  %v8004_v38 = vmul.f32 %v16251_v14, %v16251_v14 }
 0x521   :  { %v7934_v43 = vadd.f32 %v16236_v40, %v7933_v63  ;;  %v8067_v47 = vadd.f32 %v8066_v29, %v8004_v38  ;;  %v10685_v28 = vpop.f32.mrb[12].mxu1 }
 0x522   :  { %v16260_v45 = vadd.f32 %v10685_v28, %v16068_v33  ;;  %v7654_v0 = vpop.f32.mrb[13].mxu1 }
 0x523   :  { %v8068_v17 = vadd.f32 %v8067_v47, %v8005_v2  ;;  %v16265_v56 = vadd.f32 %v7654_v0, %v16074_v26  ;;  %v7935_v20 = vadd.f32 %v16245_v62, %v7934_v43  ;;  %v10686_v25 = vpop.f32.mrb[14].mxu1 }
 0x524   :  { %v16269_v8 = vadd.f32 %v10686_v25, %v16080_v5  ;;  %v7657_v63 = vpop.f32.mrb[15].mxu1  ;;  %v8009_v5 = vmul.f32 %v16260_v45, %v16260_v45 }
 0x525   :  { %v7936_v29 = vadd.f32 %v16265_v56, %v7935_v20  ;;  %v8007_v33 = vmul.f32 %v16265_v56, %v16265_v56  ;;  %v8069_v38 = vadd.f32 %v8068_v17, %v8006_v52  ;;  %v16275_v28 = vadd.f32 %v7657_v63, %v16082_v48 }
 0x526   :  { %v8010_v48 = vmul.f32 %v16269_v8, %v16269_v8 }
 0x527   :  { %v8070_v2 = vadd.f32 %v8069_v38, %v8007_v33  ;;  %v7937_v26 = vadd.f32 %v16275_v28, %v7936_v29  ;;  %v8008_v43 = vmul.f32 %v16275_v28, %v16275_v28 }
 0x529   :  { %v7938_v47 = vadd.f32 %v16260_v45, %v7937_v26  ;;  %v8071_v0 = vadd.f32 %v8070_v2, %v8008_v43  ;;  %v10689_v20 = vpop.f32.mrb[16].mxu1 }
 0x52a   :  { %v16284_v25 = vadd.f32 %v10689_v20, %v16088_v59  ;;  %v7670_v52 = vpop.f32.mrb[17].mxu1 }
 0x52b   :  { %v8072_v17 = vadd.f32 %v8071_v0, %v8009_v5  ;;  %v16289_v63 = vadd.f32 %v7670_v52, %v16094_v10  ;;  %v7939_v29 = vadd.f32 %v16269_v8, %v7938_v47  ;;  %v10690_v33 = vpop.f32.mrb[18].mxu1 }
 0x52c   :  { %v16293_v38 = vadd.f32 %v10690_v33, %v16096_v3  ;;  %v7673_v26 = vpop.f32.mrb[19].mxu1  ;;  %v8013_v3 = vmul.f32 %v16284_v25, %v16284_v25 }
 0x52d   :  { %v7940_v2 = vadd.f32 %v16289_v63, %v7939_v29  ;;  %v8011_v59 = vmul.f32 %v16289_v63, %v16289_v63  ;;  %v8073_v43 = vadd.f32 %v8072_v17, %v8010_v48  ;;  %v16299_v20 = vadd.f32 %v7673_v26, %v16098_v37 }
 0x52e   :  { %v8014_v37 = vmul.f32 %v16293_v38, %v16293_v38 }
 0x52f   :  { %v8074_v5 = vadd.f32 %v8073_v43, %v8011_v59  ;;  %v7941_v10 = vadd.f32 %v16299_v20, %v7940_v2  ;;  %v8012_v47 = vmul.f32 %v16299_v20, %v16299_v20 }
 0x531   :  { %v7942_v0 = vadd.f32 %v16284_v25, %v7941_v10  ;;  %v8075_v52 = vadd.f32 %v8074_v5, %v8012_v47  ;;  %v10693_v29 = vpop.f32.mrb[20].mxu1 }
 0x532   :  { %v16308_v33 = vadd.f32 %v10693_v29, %v16102_v31  ;;  %v7686_v48 = vpop.f32.mrb[21].mxu1 }
 0x533   :  { %v8076_v17 = vadd.f32 %v8075_v52, %v8013_v3  ;;  %v16313_v26 = vadd.f32 %v7686_v48, %v16104_v55  ;;  %v7943_v2 = vadd.f32 %v16293_v38, %v7942_v0  ;;  %v10694_v59 = vpop.f32.mrb[22].mxu1 }
 0x534   :  { %v16317_v43 = vadd.f32 %v10694_v59, %v16106_v11  ;;  %v7689_v10 = vpop.f32.mrb[23].mxu1  ;;  %v8017_v11 = vmul.f32 %v16308_v33, %v16308_v33 }
 0x535   :  { %v7944_v5 = vadd.f32 %v16313_v26, %v7943_v2  ;;  %v8015_v31 = vmul.f32 %v16313_v26, %v16313_v26  ;;  %v8077_v47 = vadd.f32 %v8076_v17, %v8014_v37  ;;  %v16323_v29 = vadd.f32 %v7689_v10, %v16108_v41 }
 0x536   :  { %v8018_v41 = vmul.f32 %v16317_v43, %v16317_v43 }
 0x537   :  { %v8078_v3 = vadd.f32 %v8077_v47, %v8015_v31  ;;  %v7945_v55 = vadd.f32 %v16323_v29, %v7944_v5  ;;  %v8016_v0 = vmul.f32 %v16323_v29, %v16323_v29 }
 0x539   :  { %v7946_v52 = vadd.f32 %v16308_v33, %v7945_v55  ;;  %v8079_v48 = vadd.f32 %v8078_v3, %v8016_v0  ;;  %v10697_v2 = vpop.f32.mrb[24].mxu1 }
 0x53a   :  { %v16332_v59 = vadd.f32 %v10697_v2, %v16110_v22  ;;  %v7702_v37 = vpop.f32.mrb[25].mxu1 }
 0x53b   :  { %v8080_v17 = vadd.f32 %v8079_v48, %v8017_v11  ;;  %v16337_v10 = vadd.f32 %v7702_v37, %v16112_v16  ;;  %v7947_v5 = vadd.f32 %v16317_v43, %v7946_v52  ;;  %v10698_v31 = vpop.f32.mrb[26].mxu1 }
 0x53c   :  { %v16341_v47 = vadd.f32 %v10698_v31, %v16114_v6  ;;  %v7705_v55 = vpop.f32.mrb[27].mxu1  ;;  %v8021_v6 = vmul.f32 %v16332_v59, %v16332_v59 }
 0x53d   :  { %v7948_v3 = vadd.f32 %v16337_v10, %v7947_v5  ;;  %v8019_v22 = vmul.f32 %v16337_v10, %v16337_v10  ;;  %v8081_v0 = vadd.f32 %v8080_v17, %v8018_v41  ;;  %v16347_v2 = vadd.f32 %v7705_v55, %v16116_v36 }
 0x53e   :  { %v8022_v36 = vmul.f32 %v16341_v47, %v16341_v47 }
 0x53f   :  { %v8082_v11 = vadd.f32 %v8081_v0, %v8019_v22  ;;  %v7949_v16 = vadd.f32 %v16347_v2, %v7948_v3  ;;  %v8020_v52 = vmul.f32 %v16347_v2, %v16347_v2 }
 0x541   :  { %v7950_v48 = vadd.f32 %v16332_v59, %v7949_v16  ;;  %v8083_v37 = vadd.f32 %v8082_v11, %v8020_v52  ;;  %v10701_v5 = vpop.f32.mrb[28].mxu1 }
 0x542   :  { %v16356_v31 = vadd.f32 %v10701_v5, %v16118_v32  ;;  %v7718_v41 = vpop.f32.mrb[29].mxu1 }
 0x543   :  { %v8084_v17 = vadd.f32 %v8083_v37, %v8021_v6  ;;  %v16361_v55 = vadd.f32 %v7718_v41, %v16120_v4  ;;  %v7951_v3 = vadd.f32 %v16341_v47, %v7950_v48  ;;  %v10702_v22 = vpop.f32.mrb[30].mxu1 }
 0x544   :  { %v16365_v0 = vadd.f32 %v10702_v22, %v16122_v42  ;;  %v7721_v16 = vpop.f32.mrb[31].mxu1  ;;  %v8025_v42 = vmul.f32 %v16356_v31, %v16356_v31 }
 0x545   :  { %v7952_v11 = vadd.f32 %v16361_v55, %v7951_v3  ;;  %v8023_v32 = vmul.f32 %v16361_v55, %v16361_v55  ;;  %v8085_v52 = vadd.f32 %v8084_v17, %v8022_v36  ;;  %v16371_v5 = vadd.f32 %v7721_v16, %v16124_v61 }
 0x546   :  { %v8026_v61 = vmul.f32 %v16365_v0, %v16365_v0 }
 0x547   :  { %v8086_v6 = vadd.f32 %v8085_v52, %v8023_v32  ;;  %v7953_v4 = vadd.f32 %v16371_v5, %v7952_v11  ;;  %v8024_v48 = vmul.f32 %v16371_v5, %v16371_v5 }
 0x549   :  { %v7954_v37 = vadd.f32 %v16356_v31, %v7953_v4  ;;  %v8087_v41 = vadd.f32 %v8086_v6, %v8024_v48  ;;  %v10705_v3 = vpop.f32.mrb[32].mxu1 }
 0x54a   :  { %v16380_v22 = vadd.f32 %v10705_v3, %v16126_v60  ;;  %v7734_v36 = vpop.f32.mrb[33].mxu1 }
 0x54b   :  { %v8088_v17 = vadd.f32 %v8087_v41, %v8025_v42  ;;  %v16385_v16 = vadd.f32 %v7734_v36, %v16128_v27  ;;  %v7955_v11 = vadd.f32 %v16365_v0, %v7954_v37  ;;  %v10706_v32 = vpop.f32.mrb[34].mxu1 }
 0x54c   :  { %v16389_v52 = vadd.f32 %v10706_v32, %v16130_v19  ;;  %v7737_v4 = vpop.f32.mrb[35].mxu1  ;;  %v8029_v19 = vmul.f32 %v16380_v22, %v16380_v22 }
 0x54d   :  { %v7956_v6 = vadd.f32 %v16385_v16, %v7955_v11  ;;  %v8027_v60 = vmul.f32 %v16385_v16, %v16385_v16  ;;  %v8089_v48 = vadd.f32 %v8088_v17, %v8026_v61  ;;  %v16395_v3 = vadd.f32 %v7737_v4, %v16132_v30 }
 0x54e   :  { %v8030_v30 = vmul.f32 %v16389_v52, %v16389_v52 }
 0x54f   :  { %v8090_v42 = vadd.f32 %v8089_v48, %v8027_v60  ;;  %v7957_v27 = vadd.f32 %v16395_v3, %v7956_v6  ;;  %v8028_v37 = vmul.f32 %v16395_v3, %v16395_v3 }
 0x551   :  { %v7958_v41 = vadd.f32 %v16380_v22, %v7957_v27  ;;  %v8091_v36 = vadd.f32 %v8090_v42, %v8028_v37  ;;  %v10709_v11 = vpop.f32.mrb[36].mxu1 }
 0x552   :  { %v16404_v32 = vadd.f32 %v10709_v11, %v16134_v13  ;;  %v7750_v61 = vpop.f32.mrb[37].mxu1 }
 0x553   :  { %v8092_v17 = vadd.f32 %v8091_v36, %v8029_v19  ;;  %v16409_v4 = vadd.f32 %v7750_v61, %v16136_v7  ;;  %v7959_v6 = vadd.f32 %v16389_v52, %v7958_v41  ;;  %v10710_v60 = vpop.f32.mrb[38].mxu1 }
 0x554   :  { %v16413_v48 = vadd.f32 %v10710_v60, %v16138_v15  ;;  %v7753_v27 = vpop.f32.mrb[39].mxu1  ;;  %v8033_v15 = vmul.f32 %v16404_v32, %v16404_v32 }
 0x555   :  { %v7960_v42 = vadd.f32 %v16409_v4, %v7959_v6  ;;  %v8031_v13 = vmul.f32 %v16409_v4, %v16409_v4  ;;  %v8093_v37 = vadd.f32 %v8092_v17, %v8030_v30  ;;  %v16419_v11 = vadd.f32 %v7753_v27, %v16140_v54 }
 0x556   :  { %v8034_v54 = vmul.f32 %v16413_v48, %v16413_v48 }
 0x557   :  { %v8094_v19 = vadd.f32 %v8093_v37, %v8031_v13  ;;  %v7961_v7 = vadd.f32 %v16419_v11, %v7960_v42  ;;  %v8032_v41 = vmul.f32 %v16419_v11, %v16419_v11 }
 0x559   :  { %v7962_v36 = vadd.f32 %v16404_v32, %v7961_v7  ;;  %v8095_v61 = vadd.f32 %v8094_v19, %v8032_v41  ;;  %v10713_v6 = vpop.f32.mrb[40].mxu1 }
 0x55a   :  { %v16428_v60 = vadd.f32 %v10713_v6, %v16142_v18  ;;  %v7766_v30 = vpop.f32.mrb[41].mxu1 }
 0x55b   :  { %v8096_v17 = vadd.f32 %v8095_v61, %v8033_v15  ;;  %v16433_v27 = vadd.f32 %v7766_v30, %v16144_v35  ;;  %v7963_v42 = vadd.f32 %v16413_v48, %v7962_v36  ;;  %v10714_v13 = vpop.f32.mrb[42].mxu1 }
 0x55c   :  { %20130 = vst [vmem:[#allocation61_spill] sm:$0xff] %v16428_v60  ;;  %v16437_v37 = vadd.f32 %v10714_v13, %v16146_v57  ;;  %v7769_v7 = vpop.f32.mrb[43].mxu1  ;;  %v8037_v57 = vmul.f32 %v16428_v60, %v16428_v60 }
 0x55d   :  { %v7964_v19 = vadd.f32 %v16433_v27, %v7963_v42  ;;  %v8035_v18 = vmul.f32 %v16433_v27, %v16433_v27  ;;  %v8097_v41 = vadd.f32 %v8096_v17, %v8034_v54  ;;  %v16443_v6 = vadd.f32 %v7769_v7, %v16148_v49 }
 0x55e   :  { %20131 = vst [vmem:[#allocation63_spill] sm:$0xff] %v16437_v37  ;;  %v8038_v49 = vmul.f32 %v16437_v37, %v16437_v37 }
 0x55f   :  { %v8098_v15 = vadd.f32 %v8097_v41, %v8035_v18  ;;  %v7965_v35 = vadd.f32 %v16443_v6, %v7964_v19  ;;  %v8036_v36 = vmul.f32 %v16443_v6, %v16443_v6 }
 0x561   :  { %v7966_v61 = vadd.f32 %v16428_v60, %v7965_v35  ;;  %v8099_v30 = vadd.f32 %v8098_v15, %v8036_v36  ;;  %v10717_v42 = vpop.f32.mrb[44].mxu1 }
 0x562   :  { %v16452_v13 = vadd.f32 %v10717_v42, %v16150_v50  ;;  %v7782_v54 = vpop.f32.mrb[45].mxu1 }
 0x563   :  { %v8100_v17 = vadd.f32 %v8099_v30, %v8037_v57  ;;  %v16457_v7 = vadd.f32 %v7782_v54, %v16152_v34  ;;  %v7967_v19 = vadd.f32 %v16437_v37, %v7966_v61  ;;  %v10718_v18 = vpop.f32.mrb[46].mxu1 }
 0x564   :  { %20132 = vst [vmem:[#allocation69_spill] sm:$0xff] %v16452_v13  ;;  %v16461_v41 = vadd.f32 %v10718_v18, %v16154_v1  ;;  %v7785_v35 = vpop.f32.mrb[47].mxu1  ;;  %v8041_v1 = vmul.f32 %v16452_v13, %v16452_v13 }
 0x565   :  { %20133 = vst [vmem:[#allocation71_spill] sm:$0xff] %v16457_v7  ;;  %v7968_v15 = vadd.f32 %v16457_v7, %v7967_v19  ;;  %v8039_v50 = vmul.f32 %v16457_v7, %v16457_v7  ;;  %v8101_v36 = vadd.f32 %v8100_v17, %v8038_v49  ;;  %v16467_v42 = vadd.f32 %v7785_v35, %v16156_v58 }
 0x566   :  { %20134 = vst [vmem:[#allocation83_spill] sm:$0xff] %v16461_v41  ;;  %v8042_v58 = vmul.f32 %v16461_v41, %v16461_v41 }
 0x567   :  { %20135 = vst [vmem:[#allocation140_spill] sm:$0xff] %v16467_v42  ;;  %v8102_v57 = vadd.f32 %v8101_v36, %v8039_v50  ;;  %v7969_v34 = vadd.f32 %v16467_v42, %v7968_v15  ;;  %v8040_v61 = vmul.f32 %v16467_v42, %v16467_v42  ;;  %v20143_v42 = vld [vmem:[#allocation150_spill] sm:$0xff] }
 0x569   :  { %v7970_v30 = vadd.f32 %v16452_v13, %v7969_v34  ;;  %v8103_v54 = vadd.f32 %v8102_v57, %v8040_v61  ;;  %v10721_v19 = vpop.f32.mrb[48].mxu1 }
 0x56a   :  { %v16476_v18 = vadd.f32 %v10721_v19, %v16158_v53  ;;  %v7798_v49 = vpop.f32.mrb[49].mxu1  ;;  %v20138_v19 = vld [vmem:[#allocation122_spill] sm:$0xff] }
 0x56b   :  { %v8104_v17 = vadd.f32 %v8103_v54, %v8041_v1  ;;  %v16481_v35 = vadd.f32 %v7798_v49, %v16160_v46  ;;  %v7971_v15 = vadd.f32 %v16461_v41, %v7970_v30  ;;  %v10722_v50 = vpop.f32.mrb[50].mxu1 }
 0x56c   :  { %20136 = vst [vmem:[#allocation66_spill] sm:$0xff] %v16476_v18  ;;  %v16485_v36 = vadd.f32 %v10722_v50, %v16162_v9  ;;  %v7801_v34 = vpop.f32.mrb[51].mxu1  ;;  %v8045_v9 = vmul.f32 %v16476_v18, %v16476_v18  ;;  %v20139_v50 = vld [vmem:[#allocation130_spill] sm:$0xff] }
 0x56d   :  { %v7972_v57 = vadd.f32 %v16481_v35, %v7971_v15  ;;  %v8043_v53 = vmul.f32 %v16481_v35, %v16481_v35  ;;  %v8105_v61 = vadd.f32 %v8104_v17, %v8042_v58  ;;  %v16491_v13 = vadd.f32 %v7801_v34, %v20138_v19 }
 0x56e   :  { %20137 = vst [vmem:[#allocation84_spill] sm:$0xff] %v16485_v36  ;;  %v8046_v17 = vmul.f32 %v16485_v36, %v16485_v36 }
 0x56f   :  { %v8106_v1 = vadd.f32 %v8105_v61, %v8043_v53  ;;  %v7973_v46 = vadd.f32 %v16491_v13, %v7972_v57  ;;  %v8044_v30 = vmul.f32 %v16491_v13, %v16491_v13  ;;  %v20141_v53 = vld [vmem:[#allocation127_spill] sm:$0xff] }
 0x571   :  { %v7974_v54 = vadd.f32 %v16476_v18, %v7973_v46  ;;  %v8107_v49 = vadd.f32 %v8106_v1, %v8044_v30  ;;  %v10725_v15 = vpop.f32.mrb[52].mxu1  ;;  %v11345_v18 = vld [vmem:[#allocation3 + $0x8] sm:$0xff] }
 0x572   :  { %v16500_v41 = vadd.f32 %v10725_v15, %v20139_v50  ;;  %v7814_v58 = vpop.f32.mrb[53].mxu1  ;;  %v20145_v50 = vld [vmem:[#allocation135_spill] sm:$0xff] }
 0x573   :  { %v8108_v34 = vadd.f32 %v8107_v49, %v8045_v9  ;;  %v16505_v57 = vadd.f32 %v7814_v58, %v20141_v53  ;;  %v7975_v61 = vadd.f32 %v16485_v36, %v7974_v54  ;;  %v10726_v19 = vpop.f32.mrb[54].mxu1 }
 0x574   :  { %20140 = vst [vmem:[#allocation51_spill] sm:$0xff] %v16500_v41  ;;  %v16509_v7 = vadd.f32 %v10726_v19, %v20143_v42  ;;  %v7817_v46 = vpop.f32.mrb[55].mxu1  ;;  %v8049_v42 = vmul.f32 %v16500_v41, %v16500_v41  ;;  %v20147_v19 = vld [vmem:[#allocation139_spill] sm:$0xff] }
 0x575   :  { %20142 = vst [vmem:[#allocation47_spill] sm:$0xff] %v16505_v57  ;;  %v7976_v1 = vadd.f32 %v16505_v57, %v7975_v61  ;;  %v8047_v30 = vmul.f32 %v16505_v57, %v16505_v57  ;;  %v8109_v15 = vadd.f32 %v8108_v34, %v8046_v17  ;;  %v16515_v37 = vadd.f32 %v7817_v46, %v20145_v50 }
 0x576   :  { %20144 = vst [vmem:[#allocation60_spill] sm:$0xff] %v16509_v7  ;;  %v8050_v34 = vmul.f32 %v16509_v7, %v16509_v7 }
 0x577   :  { %20146 = vst [vmem:[#allocation46_spill] sm:$0xff] %v16515_v37  ;;  %v8110_v9 = vadd.f32 %v8109_v15, %v8047_v30  ;;  %v7977_v49 = vadd.f32 %v16515_v37, %v7976_v1  ;;  %v8048_v54 = vmul.f32 %v16515_v37, %v16515_v37  ;;  %v20149_v30 = vld [vmem:[#allocation54_spill] sm:$0xff]  ;;  %v20151_v37 = vld [vmem:[#allocation57_spill] sm:$0xff] }
 0x579   :  { %v7978_v58 = vadd.f32 %v16500_v41, %v7977_v49  ;;  %v8111_v53 = vadd.f32 %v8110_v9, %v8048_v54  ;;  %v10729_v61 = vpop.f32.mrb[56].mxu1 }
 0x57a   :  { %v16524_v60 = vadd.f32 %v10729_v61, %v20147_v19  ;;  %v7830_v17 = vpop.f32.mrb[57].mxu1  ;;  %v20153_v19 = vld [vmem:[#allocation74_spill] sm:$0xff] }
 0x57b   :  { %v8112_v46 = vadd.f32 %v8111_v53, %v8049_v42  ;;  %v16529_v1 = vadd.f32 %v7830_v17, %v20149_v30  ;;  %v7979_v15 = vadd.f32 %v16509_v7, %v7978_v58  ;;  %v10730_v50 = vpop.f32.mrb[58].mxu1 }
 0x57c   :  { %20148 = vst [vmem:[#allocation76_spill] sm:$0xff] %v16524_v60  ;;  %v16533_v57 = vadd.f32 %v10730_v50, %v20151_v37  ;;  %v7833_v49 = vpop.f32.mrb[59].mxu1  ;;  %v8053_v37 = vmul.f32 %v16524_v60, %v16524_v60  ;;  %v20155_v50 = vld [vmem:[#allocation80_spill] sm:$0xff] }
 0x57d   :  { %20150 = vst [vmem:[#allocation62_spill] sm:$0xff] %v16529_v1  ;;  %v7980_v9 = vadd.f32 %v16529_v1, %v7979_v15  ;;  %v8051_v54 = vmul.f32 %v16529_v1, %v16529_v1  ;;  %v8113_v61 = vadd.f32 %v8112_v46, %v8050_v34  ;;  %v16539_v41 = vadd.f32 %v7833_v49, %v20153_v19 }
 0x57e   :  { %20152 = vst [vmem:[#allocation50_spill] sm:$0xff] %v16533_v57  ;;  %v8054_v46 = vmul.f32 %v16533_v57, %v16533_v57 }
 0x57f   :  { %20154 = vst [vmem:[#allocation52_spill] sm:$0xff] %v16539_v41  ;;  %v8114_v42 = vadd.f32 %v8113_v61, %v8051_v54  ;;  %v7981_v53 = vadd.f32 %v16539_v41, %v7980_v9  ;;  %v8052_v58 = vmul.f32 %v16539_v41, %v16539_v41  ;;  %v20157_v54 = vld [vmem:[#allocation81_spill] sm:$0xff]  ;;  %v20159_v41 = vld [vmem:[#allocation82_spill] sm:$0xff] }
 0x581   :  { %v7982_v17 = vadd.f32 %v16524_v60, %v7981_v53  ;;  %v8115_v30 = vadd.f32 %v8114_v42, %v8052_v58  ;;  %v10733_v15 = vpop.f32.mrb[60].mxu1 }
 0x582   :  { %v16548_v7 = vadd.f32 %v10733_v15, %v20155_v50  ;;  %v7846_v34 = vpop.f32.mrb[61].mxu1  ;;  %v20161_v50 = vld [vmem:[#allocation85_spill] sm:$0xff] }
 0x583   :  { %v8116_v49 = vadd.f32 %v8115_v30, %v8053_v37  ;;  %v16553_v9 = vadd.f32 %v7846_v34, %v20157_v54  ;;  %v7983_v61 = vadd.f32 %v16533_v57, %v7982_v17  ;;  %v10734_v19 = vpop.f32.mrb[62].mxu1  ;;  %v20162_v57 = vld [vmem:[#allocation13_spill] sm:$0xff] }
 0x584   :  { %20156 = vst [vmem:[#allocation70_spill] sm:$0xff] %v16548_v7  ;;  %v16557_v1 = vadd.f32 %v10734_v19, %v20159_v41  ;;  %v7849_v53 = vpop.f32.mrb[63].mxu1  ;;  %v8057_v41 = vmul.f32 %v16548_v7, %v16548_v7  ;;  %vm20163_vm7 = vcmp.lt.s32.totalorder %v20162_v57, 4 }
 0x585   :  { %20158 = vst [vmem:[#allocation53_spill] sm:$0xff] %v16553_v9  ;;  %v7984_v42 = vadd.f32 %v16553_v9, %v7983_v61  ;;  %v8055_v58 = vmul.f32 %v16553_v9, %v16553_v9  ;;  %v8117_v15 = vadd.f32 %v8116_v49, %v8054_v46  ;;  %v16563_v60 = vadd.f32 %v7849_v53, %v20161_v50  ;;  %v11344_v9 = vld [vmem:[#allocation3] sm:$0xff]  ;;  %vm20165_vm1 = vmmov %vm20163_vm7 }
 0x586   :  { %20160 = vst [vmem:[#allocation88_spill] sm:$0xff] %v16557_v1  ;;  %v8058_v61 = vmul.f32 %v16557_v1, %v16557_v1  ;;  %v16576_v36 = vsel %vm20163_vm7, %v11344_v9, 0.0  ;;  %vm20167_vm14 = vmmov %vm20165_vm1 }
 0x587   :  { %v8118_v37 = vadd.f32 %v8117_v15, %v8055_v58  ;;  %v7985_v30 = vadd.f32 %v16563_v60, %v7984_v42  ;;  %v8056_v17 = vmul.f32 %v16563_v60, %v16563_v60  ;;  %20164 = vst [vmem:[#allocation89_spill] sm:$0xff] %v16576_v36  ;;  %vm20169_vm10 = vmmov %vm20165_vm1 }
 0x588   :  { %vm20171_vm11 = vmmov %vm20165_vm1 }
 0x589   :  { %v7986_v34 = vadd.f32 %v16548_v7, %v7985_v30  ;;  %v8119_v54 = vadd.f32 %v8118_v37, %v8056_v17  ;;  %v16580_v37 = vsel %vm20165_vm1, %v11345_v18, 0.0  ;;  %v11346_v30 = vld [vmem:[#allocation3 + $0x10] sm:$0xff]  ;;  %vm20173_vm4 = vmmov %vm20165_vm1 }
 0x58a   :  { %20166 = vst [vmem:[#allocation151_spill] sm:$0xff] %v16580_v37  ;;  %v16584_v17 = vsel %vm20167_vm14, %v11346_v30, 0.0  ;;  %vm20175_vm12 = vmmov %vm20165_vm1  ;;  %v20243_v37 = vld [vmem:[#allocation83_spill] sm:$0xff] }
 0x58b   :  { %v7987_v46 = vadd.f32 %v16557_v1, %v7986_v34  ;;  %v8120_v49 = vadd.f32 %v8119_v54, %v8057_v41  ;;  %20168 = vst [vmem:[#allocation152_spill] sm:$0xff] %v16584_v17  ;;  %v11347_v41 = vld [vmem:[#allocation3 + $0x18] sm:$0xff]  ;;  %vm20177_vm2 = vmmov %vm20165_vm1  ;;  %v20239_v17 = vld [vmem:[#allocation63_spill] sm:$0xff] }
 0x58c   :  { %v16588_v34 = vsel %vm20169_vm10, %v11347_v41, 0.0  ;;  %vm20179_vm0 = vmmov %vm20165_vm1  ;;  %v11353_v41 = vld [vmem:[#allocation3 + $0x48] sm:$0xff] }
 0x58d   :  { %v7988_v19 = vrot.slane %v7987_v46, 4  ;;  %v8121_v53 = vadd.f32 %v8120_v49, %v8058_v61  ;;  %20170 = vst [vmem:[#allocation86_spill] sm:$0xff] %v16588_v34  ;;  %v11349_v49 = vld [vmem:[#allocation3 + $0x28] sm:$0xff]  ;;  %vm20181_vm15 = vmmov %vm20179_vm0  ;;  %v20238_v34 = vld [vmem:[#allocation61_spill] sm:$0xff] }
 0x58e   :  { %v16596_v18 = vsel %vm20173_vm4, %v11349_v49, 0.0  ;;  %vm20183_vm6 = vmmov %vm20179_vm0 }
 0x58f   :  { %v7989_v58 = vadd.f32 %v7988_v19, %v7987_v46  ;;  %v8122_v15 = vrot.slane %v8121_v53, 4  ;;  %v11348_v46 = vld [vmem:[#allocation3 + $0x20] sm:$0xff]  ;;  %20174 = vst [vmem:[#allocation92_spill] sm:$0xff] %v16596_v18  ;;  %v11350_v19 = vld [vmem:[#allocation3 + $0x30] sm:$0xff]  ;;  %vm20185_vm13 = vmmov %vm20179_vm0 }
 0x590   :  { %v16592_v9 = vsel %vm20171_vm11, %v11348_v46, 0.0  ;;  %v16612_v46 = vsel %vm20181_vm15, %v11353_v41, 0.0  ;;  %vm20187_vm3 = vmmov %vm20179_vm0 }
 0x591   :  { %v7990_v42 = vrot.slane %v7989_v58, 2  ;;  %v8123_v50 = vadd.f32 %v8122_v15, %v8121_v53  ;;  %20172 = vst [vmem:[#allocation90_spill] sm:$0xff] %v16592_v9  ;;  %v16600_v53 = vsel %vm20175_vm12, %v11350_v19, 0.0  ;;  %v11351_v15 = vld [vmem:[#allocation3 + $0x38] sm:$0xff]  ;;  %20182 = vst [vmem:[#allocation153_spill] sm:$0xff] %v16612_v46  ;;  %v11354_v9 = vld [vmem:[#allocation3 + $0x50] sm:$0xff] }
 0x592   :  { %20176 = vst [vmem:[#allocation93_spill] sm:$0xff] %v16600_v53  ;;  %v16616_v19 = vsel %vm20183_vm6, %v11354_v9, 0.0  ;;  %v11355_v53 = vld [vmem:[#allocation3 + $0x58] sm:$0xff]  ;;  %vm20189_vm8 = vmmov %vm20179_vm0  ;;  %v11360_v46 = vld [vmem:[#allocation3 + $0x80] sm:$0xff] }
 0x593   :  { %v7991_v54 = vadd.f32 %v7990_v42, %v7989_v58  ;;  %v8124_v61 = vrot.slane %v8123_v50, 2  ;;  %v16604_v58 = vsel %vm20177_vm2, %v11351_v15, 0.0  ;;  %v11352_v42 = vld [vmem:[#allocation3 + $0x40] sm:$0xff]  ;;  %20184 = vst [vmem:[#allocation154_spill] sm:$0xff] %v16616_v19  ;;  %v16620_v15 = vsel %vm20185_vm13, %v11355_v53, 0.0  ;;  %vm20191_vm9 = vmmov %vm20179_vm0  ;;  %v11359_v9 = vld [vmem:[#allocation3 + $0x78] sm:$0xff] }
 0x594   :  { %20178 = vst [vmem:[#allocation96_spill] sm:$0xff] %v16604_v58  ;;  %v16608_v30 = vsel %vm20179_vm0, %v11352_v42, 0.0  ;;  %20186 = vst [vmem:[#allocation94_spill] sm:$0xff] %v16620_v15  ;;  %v11356_v58 = vld [vmem:[#allocation3 + $0x60] sm:$0xff] }
 0x595   :  { %20180 = vst [vmem:[#allocation97_spill] sm:$0xff] %v16608_v30  ;;  %v7992_v49 = vrot.slane %v7991_v54, 1  ;;  %v8125_v18 = vadd.f32 %v8124_v61, %v8123_v50  ;;  %v16624_v42 = vsel %vm20187_vm3, %v11356_v58, 0.0  ;;  %v11357_v30 = vld [vmem:[#allocation3 + $0x68] sm:$0xff]  ;;  %v11358_v50 = vld [vmem:[#allocation3 + $0x70] sm:$0xff]  ;;  %vm20193_vm5 = vmmov %vm20179_vm0 }
 0x596   :  { %20188 = vst [vmem:[#allocation98_spill] sm:$0xff] %v16624_v42  ;;  %v16628_v41 = vsel %vm20189_vm8, %v11357_v30, 0.0  ;;  %v16632_v61 = vsel %vm20191_vm9, %v11358_v50, 0.0  ;;  %v16636_v53 = vsel %vm20193_vm5, %v11359_v9, 0.0  ;;  %vm20195_vm7 = vmmov %vm20179_vm0  ;;  %v11361_v42 = vld [vmem:[#allocation3 + $0x88] sm:$0xff] }
 0x597   :  { %20190 = vst [vmem:[#allocation100_spill] sm:$0xff] %v16628_v41  ;;  %20192 = vst [vmem:[#allocation101_spill] sm:$0xff] %v16632_v61  ;;  %v7993_v15 = vadd.f32 %v7992_v49, %v7991_v54  ;;  %v8126_v19 = vrot.slane %v8125_v18, 1  ;;  %v16640_v58 = vsel %vm20195_vm7, %v11360_v46, 0.0  ;;  %v11362_v41 = vld [vmem:[#allocation3 + $0x90] sm:$0xff]  ;;  %v11363_v61 = vld [vmem:[#allocation3 + $0x98] sm:$0xff] }
 0x598   :  { %20194 = vst [vmem:[#allocation155_spill] sm:$0xff] %v16636_v53  ;;  %20196 = vst [vmem:[#allocation102_spill] sm:$0xff] %v16640_v58  ;;  %v11364_v49 = vld [vmem:[#allocation3 + $0xa0] sm:$0xff]  ;;  %v11365_v9 = vld [vmem:[#allocation3 + $0xa8] sm:$0xff] }
 0x599   :  { %vm20197_vm1 = vmmov %vm20179_vm0  ;;  %v8127_v58 = vadd.f32 %v8126_v19, %v8125_v18  ;;  %v11370_v18 = vld [vmem:[#allocation3 + $0xd0] sm:$0xff] }
 0x59a   :  { %v16644_v30 = vsel %vm20197_vm1, %v11361_v42, 0.0  ;;  %vm20199_vm14 = vmmov %vm20179_vm0 }
 0x59b   :  { %20198 = vst [vmem:[#allocation105_spill] sm:$0xff] %v16644_v30  ;;  %v16648_v50 = vsel %vm20199_vm14, %v11362_v41, 0.0  ;;  %vm20201_vm10 = vmmov %vm20179_vm0  ;;  %v16662_v30 = vmul.f32 0.001953125, %v7993_v15  ;;  %v11366_v41 = vld [vmem:[#allocation3 + $0xb0] sm:$0xff] }
 0x59c   :  { %20200 = vst [vmem:[#allocation110_spill] sm:$0xff] %v16648_v50  ;;  %v16652_v54 = vsel %vm20201_vm10, %v11363_v61, 0.0  ;;  %vm20203_vm11 = vmmov %vm20179_vm0  ;;  %v11367_v61 = vld [vmem:[#allocation3 + $0xb8] sm:$0xff] }
 0x59d   :  { %20202 = vst [vmem:[#allocation114_spill] sm:$0xff] %v16652_v54  ;;  %v16656_v46 = vsel %vm20203_vm11, %v11364_v49, 0.0  ;;  %vm20205_vm4 = vmmov %vm20179_vm0  ;;  %v11368_v49 = vld [vmem:[#allocation3 + $0xc0] sm:$0xff]  ;;  %v8179_v7 = vsub.f32 %v20243_v37, %v16662_v30  ;;  %v20244_v36 = vsub.f32 %v16563_v60, %v16662_v30  ;;  %v20247_v37 = vsub.f32 %v16191_v12, %v16662_v30  ;;  %v16866_v60 = vld [vmem:[%s18053_s6] ss:$0 sm:$0xff]  ;;  %s11479_s6 = smov [#allocation9]  }
 0x59e   :  { %20204 = vst [vmem:[#allocation118_spill] sm:$0xff] %v16656_v46  ;;  %v16660_v42 = vsel %vm20205_vm4, %v11365_v9, 0.0  ;;  %vm20207_vm12 = vmmov %vm20179_vm0  ;;  %v16674_v46 = vsel %vm20179_vm0, %v11368_v49, 0.0  ;;  %v11369_v9 = vld [vmem:[#allocation3 + $0xc8] sm:$0xff]  ;;  %v20251_v12 = vsub.f32 %v16227_v51, %v16662_v30  ;;  %v20254_v51 = vsub.f32 %v16241_v24, %v16662_v30  ;;  %s8670_s20 = sshll.u32 %s11479_s6, 4  ;;  %s8671_s20 = int_to_ptr.vmem [resolvable:$true] %s8670_s20 }
 0x59f   :  { %20206 = vst [vmem:[#allocation147_spill] sm:$0xff] %v16660_v42  ;;  %v16666_v50 = vsel %vm20207_vm12, %v11366_v41, 0.0  ;;  %vm20209_vm2 = vmmov %vm20179_vm0  ;;  %v8128_v41 = vmul.f32 0.001953125, %v8127_v58  ;;  %v20225_v42 = vld [vmem:[#allocation48_spill] sm:$0xff]  ;;  %s11442_s21 = scalar_lea.vmem %s8671_s20, 8192  ;;  %p11447_p11 = scmp.lt.s32.totalorder %s8671_s20, %s8671_s20 }
 0x5a0   :  { %20208 = vst [vmem:[#allocation125_spill] sm:$0xff] %v16666_v50  ;;  %v16670_v54 = vsel %vm20209_vm2, %v11367_v61, 0.0  ;;  %20211 = vst [vmem:[#allocation148_spill] sm:$0xff] %v16674_v46  ;;  %v8129_v61 = vmul.f32 %v16662_v30, %v16662_v30  ;;  %v11371_v50 = vld [vmem:[#allocation3 + $0xd8] sm:$0xff]  ;;  %v11372_v46 = vld [vmem:[#allocation3 + $0xe0] sm:$0xff]  ;;  %p11443_p10 = scmp.ne.s32.totalorder %s8671_s20, %s11442_s21  ;;  %p11448_p12 = scmp.lt.s32.totalorder %s11442_s21, %s11442_s21 }
 0x5a1   :  { %20210 = vst [vmem:[#allocation126_spill] sm:$0xff] %v16670_v54  ;;  %vm20212_vm15 = vmmov %vm20179_vm0  ;;  %v11375_v54 = vld [vmem:[#allocation3 + $0x1e8] sm:$0xff] }
 0x5a2   :  { %v16678_v15 = vsel %vm20212_vm15, %v11369_v9, 0.0  ;;  %vm20214_vm6 = vmmov %vm20179_vm0  ;;  %20248 = vst [vmem:[#allocation138_spill] sm:$0xff] %v16866_v60  ;;  %p11449_p13 = por %p11448_p12, %p11447_p11 }
 0x5a3   :  { %20213 = vst [vmem:[#allocation132_spill] sm:$0xff] %v16678_v15  ;;  %v16682_v19 = vsel %vm20214_vm6, %v11370_v18, 0.0  ;;  %vm20216_vm13 = vmmov %vm20179_vm0  ;;  %v11373_v15 = vld [vmem:[#allocation3 + $0xe8] sm:$0xff]  ;;  %v11374_v18 = vld [vmem:[#allocation3 + $0xf0] sm:$0xff] }
 0x5a4   :  { %20215 = vst [vmem:[#allocation133_spill] sm:$0xff] %v16682_v19  ;;  %v16690_v49 = vsel %vm20216_vm13, %v11371_v50, 0.0  ;;  %vm20218_vm3 = vmmov %vm20179_vm0  ;;  %p11450_p0 = pnand %p11449_p13, %p11443_p10 }
 0x5a5   :  { %20217 = vst [vmem:[#allocation136_spill] sm:$0xff] %v16690_v49  ;;  %v16694_v9 = vsel %vm20218_vm3, %v11372_v46, 0.0  ;;  %vm20220_vm8 = vmmov %vm20179_vm0  ;;  %v8130_v49 = vsub.f32 %v8128_v41, %v8129_v61  ;;  %v8174_v41 = vsub.f32 %v20238_v34, %v16662_v30  ;;  %v8175_v61 = vsub.f32 %v20239_v17, %v16662_v30  ;;  %v20241_v34 = vld [vmem:[#allocation140_spill] sm:$0xff]  ;;  %v20242_v17 = vld [vmem:[#allocation69_spill] sm:$0xff] }
 0x5a6   :  { %20219 = vst [vmem:[#allocation137_spill] sm:$0xff] %v16694_v9  ;;  %v16698_v58 = vsel %vm20220_vm8, %v11373_v15, 0.0  ;;  %vm20222_vm9 = vmmov %vm20179_vm0  ;;  %v20226_v9 = vld [vmem:[#allocation146_spill] sm:$0xff]  ;;  %v8178_v46 = vsub.f32 %v20242_v17, %v16662_v30 }
 0x5a7   :  { %20221 = vst [vmem:[#allocation72_spill] sm:$0xff] %v16698_v58  ;;  %v16702_v19 = vsel %vm20222_vm9, %v11374_v18, 0.0  ;;  %vm20224_vm5 = vmmov %vm20179_vm0  ;;  %v20227_v15 = vld [vmem:[#allocation66_spill] sm:$0xff]  ;;  %v16831_v18 = vld [vmem:[%s18052_s5] ss:$0 sm:$0xff] }
 0x5a8   :  { %20223 = vst [vmem:[#allocation149_spill] sm:$0xff] %v16702_v19  ;;  %v16706_v50 = vsel %vm20224_vm5, %v11375_v54, 0.0  ;;  %v8131_v54 = vmax.f32 %v8130_v49, 0.0  ;;  %v8177_v19 = vsub.f32 %v20241_v34, %v16662_v30  ;;  %v20245_v49 = vsub.f32 %v20225_v42, %v16662_v30 }
 0x5aa   :  { %v8196_v57 = vadd.f32 1e-05, %v8131_v54 }
 0x5ac   :  { %11339 = vrsqrt.f32 %v8196_v57  ;;  %v20240_v57 = vld [vmem:[#allocation71_spill] sm:$0xff] }
 0x5ad   :  { %v8176_v58 = vsub.f32 %v20240_v57, %v16662_v30  ;;  %v20246_v57 = vsub.f32 %v20226_v9, %v16662_v30  ;;  %v20250_v9 = vsub.f32 %v16217_v21, %v16662_v30  ;;  %v20253_v21 = vsub.f32 %v16221_v39, %v16662_v30 }
 0x5b6   :  { %v16826_v54 = vpop.eup %11339 }
 0x5b7   :  { %v8259_v1 = vmul.f32 %v16826_v54, %v20244_v36  ;;  %v16849_v53 = vmul.f32 %v16826_v54, %v20245_v49  ;;  %v16855_v34 = vmul.f32 %v16826_v54, %v20246_v57  ;;  %v16861_v17 = vmul.f32 %v16826_v54, %v20247_v37 }
 0x5b8   :  { %v20249_v36 = vsub.f32 %v16197_v23, %v16662_v30  ;;  %v16878_v49 = vmul.f32 %v16826_v54, %v20250_v9  ;;  %v16884_v57 = vmul.f32 %v16826_v54, %v20251_v12  ;;  %v20252_v37 = vsub.f32 %v16212_v44, %v16662_v30 }
 0x5b9   :  { %v16897_v9 = vmul.f32 %v16826_v54, %v20253_v21  ;;  %v16903_v12 = vmul.f32 %v16826_v54, %v20254_v51  ;;  %v20255_v44 = vsub.f32 %v16251_v14, %v16662_v30  ;;  %v20257_v21 = vsub.f32 %v16245_v62, %v16662_v30 }
 0x5ba   :  { %v16872_v42 = vmul.f32 %v16826_v54, %v20249_v36  ;;  %v16890_v23 = vmul.f32 %v16826_v54, %v20252_v37  ;;  %v8330_v36 = vmul.f32 %v16831_v18, %v8259_v1  ;;  %v20256_v1 = vsub.f32 %v16236_v40, %v16662_v30 }
 0x5bb   :  { %v16909_v37 = vmul.f32 %v16826_v54, %v20255_v44  ;;  %v16921_v24 = vmul.f32 %v16826_v54, %v20257_v21  ;;  %v20258_v51 = vsub.f32 %v16265_v56, %v16662_v30  ;;  %v20259_v44 = vsub.f32 %v16275_v28, %v16662_v30 }
 0x5bc   :  { %v16915_v39 = vmul.f32 %v16826_v54, %v20256_v1  ;;  %v8401_v1 = vadd.f32 %v16866_v60, %v8330_v36  ;;  %v20260_v62 = vsub.f32 %v16260_v45, %v16662_v30  ;;  %v20261_v56 = vsub.f32 %v16269_v8, %v16662_v30 }
 0x5bd   :  { %v16927_v14 = vmul.f32 %v16826_v54, %v20258_v51  ;;  %v16933_v40 = vmul.f32 %v16826_v54, %v20259_v44  ;;  %v20262_v28 = vsub.f32 %v16289_v63, %v16662_v30  ;;  %v20263_v36 = vsub.f32 %v16299_v20, %v16662_v30 }
 0x5be   :  { %v16940_v21 = vmul.f32 %v16826_v54, %v20260_v62  ;;  %v16946_v51 = vmul.f32 %v16826_v54, %v20261_v56  ;;  %v20264_v62 = vsub.f32 %v16284_v25, %v16662_v30  ;;  %v20265_v56 = vsub.f32 %v16293_v38, %v16662_v30 }
 0x5bf   :  { %v16952_v44 = vmul.f32 %v16826_v54, %v20262_v28  ;;  %v16958_v45 = vmul.f32 %v16826_v54, %v20263_v36  ;;  %v20266_v28 = vsub.f32 %v16313_v26, %v16662_v30  ;;  %v8534_v36 = vadd.f32 %v16706_v50, %v8401_v1 }
 0x5c0   :  { %v16964_v8 = vmul.f32 %v16826_v54, %v20264_v62  ;;  %v16970_v63 = vmul.f32 %v16826_v54, %v20265_v56  ;;  %v20267_v25 = vsub.f32 %v16323_v29, %v16662_v30  ;;  %v20268_v38 = vsub.f32 %v16308_v33, %v16662_v30 }
 0x5c1   :  { %v16976_v20 = vmul.f32 %v16826_v54, %v20266_v28  ;;  %v20269_v26 = vsub.f32 %v16317_v43, %v16662_v30  ;;  %v20270_v50 = vsub.f32 %v16337_v10, %v16662_v30  ;;  %v20271_v1 = vsub.f32 %v16347_v2, %v16662_v30 }
 0x5c2   :  { %v16983_v62 = vmul.f32 %v16826_v54, %v20267_v25  ;;  %v16989_v56 = vmul.f32 %v16826_v54, %v20268_v38  ;;  %v20272_v25 = vsub.f32 %v16332_v59, %v16662_v30  ;;  %v20273_v38 = vsub.f32 %v16341_v47, %v16662_v30 }
 0x5c3   :  { %v16995_v28 = vmul.f32 %v16826_v54, %v20269_v26  ;;  %v17001_v29 = vmul.f32 %v16826_v54, %v20270_v50  ;;  %v17007_v33 = vmul.f32 %v16826_v54, %v20271_v1  ;;  %v8598_v26 = vmax.f32 %v8534_v36, 0.0 }
 0x5c4   :  { %v17013_v43 = vmul.f32 %v16826_v54, %v20272_v25  ;;  %v17019_v10 = vmul.f32 %v16826_v54, %v20273_v38  ;;  %v20274_v50 = vsub.f32 %v16361_v55, %v16662_v30  ;;  %v20275_v1 = vsub.f32 %v16371_v5, %v16662_v30 }
 0x5c5   :  { %v20276_v25 = vsub.f32 %v16356_v31, %v16662_v30  ;;  %v20277_v36 = vsub.f32 %v16365_v0, %v16662_v30  ;;  %v20278_v38 = vsub.f32 %v16385_v16, %v16662_v30  ;;  %8662 = vst [vmem:[#allocation9 + $0x1e8] sm:$0xff] %v8598_v26  ;;  %v20284_v26 = vsub.f32 %v16404_v32, %v16662_v30 }
 0x5c6   :  { %v17025_v2 = vmul.f32 %v16826_v54, %v20274_v50  ;;  %v17031_v59 = vmul.f32 %v16826_v54, %v20275_v1  ;;  %v20279_v50 = vsub.f32 %v16395_v3, %v16662_v30  ;;  %v20280_v1 = vsub.f32 %v16380_v22, %v16662_v30 }
 0x5c7   :  { %v17037_v47 = vmul.f32 %v16826_v54, %v20276_v25  ;;  %v17043_v55 = vmul.f32 %v16826_v54, %v20277_v36  ;;  %v17049_v5 = vmul.f32 %v16826_v54, %v20278_v38  ;;  %v20281_v25 = vsub.f32 %v16389_v52, %v16662_v30 }
 0x5c8   :  { %v17055_v31 = vmul.f32 %v16826_v54, %v20279_v50  ;;  %v17061_v0 = vmul.f32 %v16826_v54, %v20280_v1  ;;  %v20282_v36 = vsub.f32 %v16409_v4, %v16662_v30  ;;  %v20283_v38 = vsub.f32 %v16419_v11, %v16662_v30 }
 0x5c9   :  { %v17067_v16 = vmul.f32 %v16826_v54, %v20281_v25  ;;  %v17085_v52 = vmul.f32 %v16826_v54, %v20284_v26  ;;  %v20285_v50 = vsub.f32 %v16413_v48, %v16662_v30  ;;  %v20286_v1 = vsub.f32 %v16433_v27, %v16662_v30 }
 0x5ca   :  { %v17073_v3 = vmul.f32 %v16826_v54, %v20282_v36  ;;  %v17079_v22 = vmul.f32 %v16826_v54, %v20283_v38  ;;  %v20287_v25 = vsub.f32 %v16443_v6, %v16662_v30  ;;  %v17106_v36 = vmul.f32 %v16826_v54, %v8174_v41 }
 0x5cb   :  { %v17091_v4 = vmul.f32 %v16826_v54, %v20285_v50  ;;  %v17097_v11 = vmul.f32 %v16826_v54, %v20286_v1  ;;  %v17109_v48 = vmul.f32 %v16826_v54, %v8175_v61  ;;  %v17112_v38 = vmul.f32 %v16826_v54, %v8176_v58 }
 0x5cc   :  { %v17103_v32 = vmul.f32 %v16826_v54, %v20287_v25  ;;  %v17115_v27 = vmul.f32 %v16826_v54, %v8177_v19  ;;  %v17118_v26 = vmul.f32 %v16826_v54, %v8178_v46  ;;  %v17121_v6 = vmul.f32 %v16826_v54, %v8179_v7  ;;  %v20292_v7 = vld [vmem:[#allocation84_spill] sm:$0xff]  ;;  %v20295_v25 = vld [vmem:[#allocation47_spill] sm:$0xff] }
 0x5cd   :  { %v20288_v50 = vsub.f32 %v16481_v35, %v16662_v30  ;;  %v20289_v61 = vsub.f32 %v16491_v13, %v16662_v30  ;;  %v20290_v19 = vsub.f32 %v20227_v15, %v16662_v30  ;;  %v20293_v1 = vsub.f32 %v20292_v7, %v16662_v30 }
 0x5cf   :  { %v17127_v41 = vmul.f32 %v16826_v54, %v20288_v50  ;;  %v17133_v58 = vmul.f32 %v16826_v54, %v20289_v61  ;;  %v17139_v46 = vmul.f32 %v16826_v54, %v20290_v19  ;;  %v17145_v35 = vmul.f32 %v16826_v54, %v20293_v1  ;;  %v20298_v61 = vld [vmem:[#allocation46_spill] sm:$0xff]  ;;  %v20301_v19 = vld [vmem:[#allocation51_spill] sm:$0xff]  ;;  %v20304_v1 = vld [vmem:[#allocation60_spill] sm:$0xff] }
 0x5d0   :  { %v20296_v50 = vsub.f32 %v20295_v25, %v16662_v30  ;;  %v20299_v60 = vsub.f32 %v20298_v61, %v16662_v30 }
 0x5d1   :  { %20291 = vst [vmem:[#allocation106_spill] sm:$0xff] %v17139_v46  ;;  %20294 = vst [vmem:[#allocation73_spill] sm:$0xff] %v17145_v35  ;;  %v20302_v46 = vsub.f32 %v20301_v19, %v16662_v30  ;;  %v20305_v35 = vsub.f32 %v20304_v1, %v16662_v30 }
 0x5d2   :  { %v17151_v13 = vmul.f32 %v16826_v54, %v20296_v50  ;;  %v17157_v15 = vmul.f32 %v16826_v54, %v20299_v60  ;;  %v20307_v50 = vld [vmem:[#allocation62_spill] sm:$0xff]  ;;  %v20310_v60 = vld [vmem:[#allocation52_spill] sm:$0xff] }
 0x5d3   :  { %v17163_v7 = vmul.f32 %v16826_v54, %v20302_v46  ;;  %v17169_v25 = vmul.f32 %v16826_v54, %v20305_v35  ;;  %v20313_v46 = vld [vmem:[#allocation76_spill] sm:$0xff]  ;;  %v20316_v35 = vld [vmem:[#allocation50_spill] sm:$0xff] }
 0x5d4   :  { %20297 = vst [vmem:[#allocation75_spill] sm:$0xff] %v17151_v13  ;;  %20300 = vst [vmem:[#allocation78_spill] sm:$0xff] %v17157_v15  ;;  %v20308_v13 = vsub.f32 %v20307_v50, %v16662_v30  ;;  %v20311_v15 = vsub.f32 %v20310_v60, %v16662_v30 }
 0x5d5   :  { %20303 = vst [vmem:[#allocation77_spill] sm:$0xff] %v17163_v7  ;;  %20306 = vst [vmem:[#allocation79_spill] sm:$0xff] %v17169_v25  ;;  %v20314_v7 = vsub.f32 %v20313_v46, %v16662_v30  ;;  %v20317_v25 = vsub.f32 %v20316_v35, %v16662_v30 }
 0x5d6   :  { %v17175_v61 = vmul.f32 %v16826_v54, %v20308_v13  ;;  %v17181_v19 = vmul.f32 %v16826_v54, %v20311_v15  ;;  %v20318_v13 = vld [vmem:[#allocation53_spill] sm:$0xff]  ;;  %v20320_v15 = vld [vmem:[#allocation70_spill] sm:$0xff] }
 0x5d7   :  { %v17187_v1 = vmul.f32 %v16826_v54, %v20314_v7  ;;  %v17193_v50 = vmul.f32 %v16826_v54, %v20317_v25  ;;  %v20322_v7 = vld [vmem:[#allocation88_spill] sm:$0xff]  ;;  %v17215_v25 = vmul.f32 %v16831_v18, %v16849_v53  ;;  %v17235_v53 = vmul.f32 %v16831_v18, %v16884_v57 }
 0x5d8   :  { %20309 = vst [vmem:[#allocation141_spill] sm:$0xff] %v17175_v61  ;;  %20312 = vst [vmem:[#allocation142_spill] sm:$0xff] %v17181_v19  ;;  %v20319_v61 = vsub.f32 %v20318_v13, %v16662_v30  ;;  %v20321_v19 = vsub.f32 %v20320_v15, %v16662_v30  ;;  %v17223_v13 = vmul.f32 %v16831_v18, %v16861_v17 }
 0x5d9   :  { %20315 = vst [vmem:[#allocation143_spill] sm:$0xff] %v17187_v1  ;;  %v20323_v1 = vsub.f32 %v20322_v7, %v16662_v30  ;;  %v17231_v30 = vmul.f32 %v16831_v18, %v16878_v49  ;;  %v17247_v17 = vmul.f32 %v16831_v18, %v16903_v12  ;;  %v17255_v49 = vmul.f32 %v16831_v18, %v16915_v39 }
 0x5da   :  { %v17199_v60 = vmul.f32 %v16826_v54, %v20319_v61  ;;  %v17205_v46 = vmul.f32 %v16826_v54, %v20321_v19  ;;  %v17219_v61 = vmul.f32 %v16831_v18, %v16855_v34  ;;  %v17227_v19 = vmul.f32 %v16831_v18, %v16872_v42 }
 0x5db   :  { %v17211_v35 = vmul.f32 %v16826_v54, %v20323_v1  ;;  %v17239_v54 = vmul.f32 %v16831_v18, %v16890_v23  ;;  %v17243_v34 = vmul.f32 %v16831_v18, %v16897_v9  ;;  %v17251_v42 = vmul.f32 %v16831_v18, %v16909_v37  ;;  %v20328_v1 = vld [vmem:[#allocation73_spill] sm:$0xff]  ;;  %v20330_v15 = vld [vmem:[#allocation75_spill] sm:$0xff]  ;;  %v20332_v7 = vld [vmem:[#allocation78_spill] sm:$0xff] }
 0x5dc   :  { %v17259_v57 = vmul.f32 %v16831_v18, %v16921_v24  ;;  %v17263_v23 = vmul.f32 %v16831_v18, %v16927_v14  ;;  %v17267_v9 = vmul.f32 %v16831_v18, %v16933_v40  ;;  %v17271_v12 = vmul.f32 %v16831_v18, %v16940_v21 }
 0x5dd   :  { %v17275_v37 = vmul.f32 %v16831_v18, %v16946_v51  ;;  %v17279_v39 = vmul.f32 %v16831_v18, %v16952_v44  ;;  %v17283_v24 = vmul.f32 %v16831_v18, %v16958_v45  ;;  %v17287_v14 = vmul.f32 %v16831_v18, %v16964_v8 }
 0x5de   :  { %v17291_v40 = vmul.f32 %v16831_v18, %v16970_v63  ;;  %v17295_v21 = vmul.f32 %v16831_v18, %v16976_v20  ;;  %v17299_v51 = vmul.f32 %v16831_v18, %v16983_v62  ;;  %v17303_v44 = vmul.f32 %v16831_v18, %v16989_v56 }
 0x5df   :  { %v17307_v45 = vmul.f32 %v16831_v18, %v16995_v28  ;;  %v17311_v8 = vmul.f32 %v16831_v18, %v17001_v29  ;;  %v17315_v63 = vmul.f32 %v16831_v18, %v17007_v33  ;;  %v17319_v20 = vmul.f32 %v16831_v18, %v17013_v43 }
 0x5e0   :  { %v17323_v62 = vmul.f32 %v16831_v18, %v17019_v10  ;;  %v17327_v56 = vmul.f32 %v16831_v18, %v17025_v2  ;;  %v17331_v28 = vmul.f32 %v16831_v18, %v17031_v59  ;;  %v17335_v29 = vmul.f32 %v16831_v18, %v17037_v47 }
 0x5e1   :  { %v17339_v33 = vmul.f32 %v16831_v18, %v17043_v55  ;;  %v17343_v43 = vmul.f32 %v16831_v18, %v17049_v5  ;;  %v17347_v10 = vmul.f32 %v16831_v18, %v17055_v31  ;;  %v17351_v2 = vmul.f32 %v16831_v18, %v17061_v0 }
 0x5e2   :  { %v17355_v59 = vmul.f32 %v16831_v18, %v17067_v16  ;;  %v17359_v47 = vmul.f32 %v16831_v18, %v17073_v3  ;;  %v17363_v55 = vmul.f32 %v16831_v18, %v17079_v22  ;;  %v17367_v5 = vmul.f32 %v16831_v18, %v17085_v52 }
 0x5e3   :  { %v17371_v31 = vmul.f32 %v16831_v18, %v17091_v4  ;;  %v17375_v0 = vmul.f32 %v16831_v18, %v17097_v11  ;;  %v17379_v16 = vmul.f32 %v16831_v18, %v17103_v32  ;;  %v17383_v3 = vmul.f32 %v16831_v18, %v17106_v36 }
 0x5e4   :  { %v17387_v22 = vmul.f32 %v16831_v18, %v17109_v48  ;;  %v17391_v52 = vmul.f32 %v16831_v18, %v17112_v38  ;;  %v17395_v4 = vmul.f32 %v16831_v18, %v17115_v27  ;;  %v17399_v11 = vmul.f32 %v16831_v18, %v17118_v26  ;;  %v20326_v38 = vld [vmem:[#allocation106_spill] sm:$0xff] }
 0x5e5   :  { %v17403_v32 = vmul.f32 %v16831_v18, %v17121_v6  ;;  %v17407_v36 = vmul.f32 %v16831_v18, %v17127_v41  ;;  %v17411_v48 = vmul.f32 %v16831_v18, %v17133_v58  ;;  %v17415_v27 = vmul.f32 %v16831_v18, %v20326_v38 }
 0x5e6   :  { %v17419_v26 = vmul.f32 %v16831_v18, %v20328_v1  ;;  %v17423_v6 = vmul.f32 %v16831_v18, %v20330_v15  ;;  %v17427_v41 = vmul.f32 %v16831_v18, %v20332_v7 }
 0x5e7   :  { %20324 = vst [vmem:[#allocation144_spill] sm:$0xff] %v17407_v36  ;;  %20325 = vst [vmem:[#allocation145_spill] sm:$0xff] %v17411_v48  ;;  %v20333_v36 = vld [vmem:[#allocation77_spill] sm:$0xff]  ;;  %v20334_v48 = vld [vmem:[#allocation79_spill] sm:$0xff] }
 0x5e8   :  { %20327 = vst [vmem:[#allocation55_spill] sm:$0xff] %v17415_v27  ;;  %20329 = vst [vmem:[#allocation59_spill] sm:$0xff] %v17419_v26  ;;  %v17431_v58 = vmul.f32 %v16831_v18, %v20333_v36  ;;  %v17435_v38 = vmul.f32 %v16831_v18, %v20334_v48  ;;  %v20335_v27 = vld [vmem:[#allocation141_spill] sm:$0xff]  ;;  %v20336_v26 = vld [vmem:[#allocation142_spill] sm:$0xff]  ;;  %v17451_v36 = vmul.f32 %v16831_v18, %v17193_v50 }
 0x5e9   :  { %20331 = vst [vmem:[#allocation67_spill] sm:$0xff] %v17423_v6  ;;  %v17439_v1 = vmul.f32 %v16831_v18, %v20335_v27  ;;  %v17443_v15 = vmul.f32 %v16831_v18, %v20336_v26  ;;  %v20338_v6 = vld [vmem:[#allocation143_spill] sm:$0xff]  ;;  %v17455_v48 = vmul.f32 %v16831_v18, %v17199_v60  ;;  %v17459_v27 = vmul.f32 %v16831_v18, %v17205_v46 }
 0x5ea   :  { %v17447_v7 = vmul.f32 %v16831_v18, %v20338_v6  ;;  %v17463_v26 = vmul.f32 %v16831_v18, %v17211_v35 }
 0x5eb   :  { %20337 = vst [vmem:[#allocation64_spill] sm:$0xff] %v17443_v15  ;;  %v20339_v15 = vld [vmem:[#allocation138_spill] sm:$0xff] }
 0x5ec   :  { %v17467_v6 = vadd.f32 %v20339_v15, %v17215_v25  ;;  %v17471_v50 = vadd.f32 %v20339_v15, %v17219_v61  ;;  %v17475_v60 = vadd.f32 %v20339_v15, %v17223_v13  ;;  %v17479_v46 = vadd.f32 %v20339_v15, %v17227_v19 }
 0x5ed   :  { %v17483_v18 = vadd.f32 %v20339_v15, %v17231_v30  ;;  %v17487_v35 = vadd.f32 %v20339_v15, %v17235_v53  ;;  %v17491_v25 = vadd.f32 %v20339_v15, %v17239_v54  ;;  %v17495_v61 = vadd.f32 %v20339_v15, %v17243_v34 }
 0x5ee   :  { %v17499_v13 = vadd.f32 %v20339_v15, %v17247_v17  ;;  %v17503_v19 = vadd.f32 %v20339_v15, %v17251_v42  ;;  %v17507_v30 = vadd.f32 %v20339_v15, %v17255_v49  ;;  %v17511_v53 = vadd.f32 %v20339_v15, %v17259_v57 }
 0x5ef   :  { %v17515_v54 = vadd.f32 %v20339_v15, %v17263_v23  ;;  %v17519_v34 = vadd.f32 %v20339_v15, %v17267_v9  ;;  %v17523_v17 = vadd.f32 %v20339_v15, %v17271_v12  ;;  %v17527_v42 = vadd.f32 %v20339_v15, %v17275_v37 }
 0x5f0   :  { %v17531_v49 = vadd.f32 %v20339_v15, %v17279_v39  ;;  %v17535_v57 = vadd.f32 %v20339_v15, %v17283_v24  ;;  %v17539_v23 = vadd.f32 %v20339_v15, %v17287_v14  ;;  %v17543_v9 = vadd.f32 %v20339_v15, %v17291_v40 }
 0x5f1   :  { %v17547_v12 = vadd.f32 %v20339_v15, %v17295_v21  ;;  %v17551_v37 = vadd.f32 %v20339_v15, %v17299_v51  ;;  %v17555_v39 = vadd.f32 %v20339_v15, %v17303_v44  ;;  %v17559_v24 = vadd.f32 %v20339_v15, %v17307_v45 }
 0x5f2   :  { %v17563_v14 = vadd.f32 %v20339_v15, %v17311_v8  ;;  %v17567_v40 = vadd.f32 %v20339_v15, %v17315_v63  ;;  %v17571_v21 = vadd.f32 %v20339_v15, %v17319_v20  ;;  %v17575_v51 = vadd.f32 %v20339_v15, %v17323_v62 }
 0x5f3   :  { %v17579_v44 = vadd.f32 %v20339_v15, %v17327_v56  ;;  %v17583_v45 = vadd.f32 %v20339_v15, %v17331_v28  ;;  %v17587_v8 = vadd.f32 %v20339_v15, %v17335_v29  ;;  %v17591_v63 = vadd.f32 %v20339_v15, %v17339_v33 }
 0x5f4   :  { %v17595_v20 = vadd.f32 %v20339_v15, %v17343_v43  ;;  %v17599_v62 = vadd.f32 %v20339_v15, %v17347_v10  ;;  %v17603_v56 = vadd.f32 %v20339_v15, %v17351_v2  ;;  %v17607_v28 = vadd.f32 %v20339_v15, %v17355_v59 }
 0x5f5   :  { %v17611_v29 = vadd.f32 %v20339_v15, %v17359_v47  ;;  %v17615_v33 = vadd.f32 %v20339_v15, %v17363_v55  ;;  %v17619_v43 = vadd.f32 %v20339_v15, %v17367_v5  ;;  %v17623_v10 = vadd.f32 %v20339_v15, %v17371_v31 }
 0x5f6   :  { %v17627_v2 = vadd.f32 %v20339_v15, %v17375_v0  ;;  %v17631_v59 = vadd.f32 %v20339_v15, %v17379_v16  ;;  %v17635_v47 = vadd.f32 %v20339_v15, %v17383_v3  ;;  %v17639_v55 = vadd.f32 %v20339_v15, %v17387_v22  ;;  %v20344_v3 = vld [vmem:[#allocation144_spill] sm:$0xff] }
 0x5f7   :  { %v17643_v5 = vadd.f32 %v20339_v15, %v17391_v52  ;;  %v17647_v31 = vadd.f32 %v20339_v15, %v17395_v4  ;;  %v17651_v0 = vadd.f32 %v20339_v15, %v17399_v11  ;;  %v17655_v16 = vadd.f32 %v20339_v15, %v17403_v32 }
 0x5f8   :  { %20340 = vst [vmem:[#allocation68_spill] sm:$0xff] %v17639_v55  ;;  %v17659_v22 = vadd.f32 %v20339_v15, %v20344_v3  ;;  %v20345_v55 = vld [vmem:[#allocation145_spill] sm:$0xff]  ;;  %v17679_v3 = vadd.f32 %v20339_v15, %v17427_v41  ;;  %v17699_v41 = vadd.f32 %v20339_v15, %v17447_v7 }
 0x5f9   :  { %20341 = vst [vmem:[#allocation49_spill] sm:$0xff] %v17643_v5  ;;  %20342 = vst [vmem:[#allocation56_spill] sm:$0xff] %v17647_v31  ;;  %v17663_v52 = vadd.f32 %v20339_v15, %v20345_v55  ;;  %v20346_v5 = vld [vmem:[#allocation55_spill] sm:$0xff]  ;;  %v17683_v55 = vadd.f32 %v20339_v15, %v17431_v58  ;;  %v17703_v58 = vadd.f32 %v20339_v15, %v17451_v36 }
 0x5fa   :  { %20343 = vst [vmem:[#allocation65_spill] sm:$0xff] %v17651_v0  ;;  %v17667_v4 = vadd.f32 %v20339_v15, %v20346_v5  ;;  %v20347_v31 = vld [vmem:[#allocation59_spill] sm:$0xff]  ;;  %v17687_v5 = vadd.f32 %v20339_v15, %v17435_v38  ;;  %20352 = vst [vmem:[#allocation95_spill] sm:$0xff] %v17699_v41  ;;  %v17707_v38 = vadd.f32 %v20339_v15, %v17455_v48 }
 0x5fb   :  { %v17671_v11 = vadd.f32 %v20339_v15, %v20347_v31  ;;  %v20349_v0 = vld [vmem:[#allocation67_spill] sm:$0xff]  ;;  %v17691_v31 = vadd.f32 %v20339_v15, %v17439_v1  ;;  %20353 = vst [vmem:[#allocation99_spill] sm:$0xff] %v17703_v58  ;;  %v17711_v1 = vadd.f32 %v20339_v15, %v17459_v27  ;;  %v20358_v58 = vld [vmem:[#allocation152_spill] sm:$0xff] }
 0x5fc   :  { %v17675_v32 = vadd.f32 %v20339_v15, %v20349_v0  ;;  %20354 = vst [vmem:[#allocation104_spill] sm:$0xff] %v17707_v38  ;;  %v20357_v41 = vld [vmem:[#allocation151_spill] sm:$0xff]  ;;  %v17727_v48 = vadd.f32 %v20358_v58, %v17475_v60  ;;  %v20359_v38 = vld [vmem:[#allocation86_spill] sm:$0xff]  ;;  %v20364_v58 = vld [vmem:[#allocation97_spill] sm:$0xff] }
 0x5fd   :  { %20348 = vst [vmem:[#allocation87_spill] sm:$0xff] %v17671_v11  ;;  %v20350_v11 = vld [vmem:[#allocation64_spill] sm:$0xff]  ;;  %20355 = vst [vmem:[#allocation103_spill] sm:$0xff] %v17711_v1  ;;  %v17723_v36 = vadd.f32 %v20357_v41, %v17471_v50  ;;  %v17731_v27 = vadd.f32 %v20359_v38, %v17479_v46  ;;  %v20360_v1 = vld [vmem:[#allocation90_spill] sm:$0xff]  ;;  %v17751_v46 = vadd.f32 %v20364_v58, %v17499_v13 }
 0x5fe   :  { %v17695_v0 = vadd.f32 %v20339_v15, %v20350_v11  ;;  %v17715_v11 = vadd.f32 %v20339_v15, %v17463_v26  ;;  %v17735_v15 = vadd.f32 %v20360_v1, %v17483_v18  ;;  %v20361_v26 = vld [vmem:[#allocation92_spill] sm:$0xff]  ;;  %v20365_v38 = vld [vmem:[#allocation153_spill] sm:$0xff]  ;;  %v20366_v1 = vld [vmem:[#allocation154_spill] sm:$0xff] }
 0x5ff   :  { %v20363_v41 = vld [vmem:[#allocation96_spill] sm:$0xff]  ;;  %v17755_v18 = vadd.f32 %v20365_v38, %v17503_v19  ;;  %v20370_v58 = vld [vmem:[#allocation101_spill] sm:$0xff]  ;;  %v20371_v38 = vld [vmem:[#allocation155_spill] sm:$0xff] }
 0x600   :  { %20351 = vst [vmem:[#allocation91_spill] sm:$0xff] %v17695_v0  ;;  %v20356_v0 = vld [vmem:[#allocation89_spill] sm:$0xff]  ;;  %v17747_v60 = vadd.f32 %v20363_v41, %v17495_v61  ;;  %v20369_v41 = vld [vmem:[#allocation100_spill] sm:$0xff]  ;;  %v17775_v19 = vadd.f32 %v20370_v58, %v17523_v17  ;;  %v20376_v58 = vld [vmem:[#allocation118_spill] sm:$0xff] }
 0x601   :  { %v17719_v7 = vadd.f32 %v20356_v0, %v17467_v6  ;;  %v17739_v6 = vadd.f32 %v20361_v26, %v17487_v35  ;;  %v20362_v0 = vld [vmem:[#allocation93_spill] sm:$0xff]  ;;  %v17759_v35 = vadd.f32 %v20366_v1, %v17507_v30  ;;  %v20367_v26 = vld [vmem:[#allocation94_spill] sm:$0xff]  ;;  %v17771_v13 = vadd.f32 %v20369_v41, %v17519_v34 }
 0x602   :  { %v17743_v50 = vadd.f32 %v20362_v0, %v17491_v25  ;;  %v17763_v25 = vadd.f32 %v20367_v26, %v17511_v53  ;;  %v20368_v0 = vld [vmem:[#allocation98_spill] sm:$0xff]  ;;  %v17779_v30 = vadd.f32 %v20371_v38, %v17527_v42  ;;  %v20373_v26 = vld [vmem:[#allocation105_spill] sm:$0xff]  ;;  %v17799_v42 = vadd.f32 %v20376_v58, %v17547_v12  ;;  %v20377_v38 = vld [vmem:[#allocation147_spill] sm:$0xff] }
 0x603   :  { %v17767_v61 = vadd.f32 %v20368_v0, %v17515_v54  ;;  %v20372_v1 = vld [vmem:[#allocation102_spill] sm:$0xff]  ;;  %v17787_v54 = vadd.f32 %v20373_v26, %v17535_v57  ;;  %v20382_v58 = vld [vmem:[#allocation133_spill] sm:$0xff] }
 0x604   :  { %v17783_v53 = vadd.f32 %v20372_v1, %v17531_v49  ;;  %v20374_v0 = vld [vmem:[#allocation110_spill] sm:$0xff]  ;;  %v17803_v49 = vadd.f32 %v20377_v38, %v17551_v37  ;;  %v20378_v1 = vld [vmem:[#allocation125_spill] sm:$0xff]  ;;  %v17823_v37 = vadd.f32 %v20382_v58, %v17571_v21  ;;  %v20383_v38 = vld [vmem:[#allocation136_spill] sm:$0xff] }
 0x605   :  { %v17791_v34 = vadd.f32 %v20374_v0, %v17539_v23  ;;  %v20375_v41 = vld [vmem:[#allocation114_spill] sm:$0xff]  ;;  %v17807_v57 = vadd.f32 %v20378_v1, %v17555_v39  ;;  %v20380_v0 = vld [vmem:[#allocation148_spill] sm:$0xff]  ;;  %v17827_v39 = vadd.f32 %v20383_v38, %v17575_v51  ;;  %v20384_v1 = vld [vmem:[#allocation137_spill] sm:$0xff] }
 0x606   :  { %v17795_v17 = vadd.f32 %v20375_v41, %v17543_v9  ;;  %v20379_v26 = vld [vmem:[#allocation126_spill] sm:$0xff]  ;;  %v17815_v9 = vadd.f32 %v20380_v0, %v17563_v14  ;;  %v20381_v41 = vld [vmem:[#allocation132_spill] sm:$0xff]  ;;  %v20386_v0 = vld [vmem:[#allocation149_spill] sm:$0xff] }
 0x607   :  { %v17811_v23 = vadd.f32 %v20379_v26, %v17559_v24  ;;  %v17819_v12 = vadd.f32 %v20381_v41, %v17567_v40  ;;  %v17831_v24 = vadd.f32 %v20384_v1, %v17579_v44  ;;  %v20385_v26 = vld [vmem:[#allocation72_spill] sm:$0xff]  ;;  %v17839_v40 = vadd.f32 %v20386_v0, %v17587_v8  ;;  %v20387_v41 = vld [vmem:[#allocation14_spill] sm:$0xff]  ;;  %v20388_v58 = vld [vmem:[#allocation15_spill] sm:$0xff] }
 0x608   :  { %v17835_v14 = vadd.f32 %v20385_v26, %v17583_v45  ;;  %v17843_v21 = vadd.f32 %v20387_v41, %v17591_v63  ;;  %v17847_v51 = vadd.f32 %v20388_v58, %v17595_v20  ;;  %v20389_v38 = vld [vmem:[#allocation16_spill] sm:$0xff]  ;;  %v20390_v1 = vld [vmem:[#allocation17_spill] sm:$0xff]  ;;  %v20391_v26 = vld [vmem:[#allocation18_spill] sm:$0xff] }
 0x609   :  { %v17851_v44 = vadd.f32 %v20389_v38, %v17599_v62  ;;  %v17855_v45 = vadd.f32 %v20390_v1, %v17603_v56  ;;  %v17859_v8 = vadd.f32 %v20391_v26, %v17607_v28  ;;  %v20392_v0 = vld [vmem:[#allocation19_spill] sm:$0xff]  ;;  %v20393_v41 = vld [vmem:[#allocation20_spill] sm:$0xff]  ;;  %v20395_v58 = vld [vmem:[#allocation21_spill] sm:$0xff] }
 0x60a   :  { %v17863_v63 = vadd.f32 %v20392_v0, %v17611_v29  ;;  %v17867_v20 = vadd.f32 %v20393_v41, %v17615_v33  ;;  %v17871_v62 = vadd.f32 %v20395_v58, %v17619_v43  ;;  %v20397_v38 = vld [vmem:[#allocation22_spill] sm:$0xff]  ;;  %v20399_v1 = vld [vmem:[#allocation23_spill] sm:$0xff]  ;;  %v20401_v26 = vld [vmem:[#allocation24_spill] sm:$0xff] }
 0x60b   :  { %v17875_v56 = vadd.f32 %v20397_v38, %v17623_v10  ;;  %v17879_v28 = vadd.f32 %v20399_v1, %v17627_v2  ;;  %v17883_v29 = vadd.f32 %v20401_v26, %v17631_v59  ;;  %v20402_v0 = vld [vmem:[#allocation25_spill] sm:$0xff]  ;;  %v20403_v41 = vld [vmem:[#allocation68_spill] sm:$0xff]  ;;  %v20412_v26 = vld [vmem:[#allocation30_spill] sm:$0xff] }
 0x60c   :  { %20394 = vst [vmem:[#allocation109_spill] sm:$0xff] %v17867_v20  ;;  %20396 = vst [vmem:[#allocation107_spill] sm:$0xff] %v17871_v62  ;;  %v17887_v33 = vadd.f32 %v20402_v0, %v17635_v47  ;;  %v20404_v20 = vld [vmem:[#allocation26_spill] sm:$0xff]  ;;  %v20405_v58 = vld [vmem:[#allocation49_spill] sm:$0xff]  ;;  %v17907_v47 = vadd.f32 %v20412_v26, %v17655_v16 }
 0x60d   :  { %20398 = vst [vmem:[#allocation113_spill] sm:$0xff] %v17875_v56  ;;  %20400 = vst [vmem:[#allocation108_spill] sm:$0xff] %v17879_v28  ;;  %v17891_v43 = vadd.f32 %v20404_v20, %v20403_v41  ;;  %v20406_v62 = vld [vmem:[#allocation27_spill] sm:$0xff]  ;;  %v20407_v38 = vld [vmem:[#allocation56_spill] sm:$0xff] }
 0x60e   :  { %v17895_v10 = vadd.f32 %v20406_v62, %v20405_v58  ;;  %v20408_v56 = vld [vmem:[#allocation28_spill] sm:$0xff]  ;;  %v20410_v1 = vld [vmem:[#allocation65_spill] sm:$0xff]  ;;  %v20413_v0 = vld [vmem:[#allocation31_spill] sm:$0xff] }
 0x60f   :  { %v17899_v2 = vadd.f32 %v20408_v56, %v20407_v38  ;;  %v20411_v28 = vld [vmem:[#allocation29_spill] sm:$0xff]  ;;  %v17911_v20 = vadd.f32 %v20413_v0, %v17659_v22  ;;  %v20414_v41 = vld [vmem:[#allocation32_spill] sm:$0xff]  ;;  %v20416_v38 = vld [vmem:[#allocation87_spill] sm:$0xff] }
 0x610   :  { %v17903_v59 = vadd.f32 %v20411_v28, %v20410_v1  ;;  %v17915_v62 = vadd.f32 %v20414_v41, %v17663_v52  ;;  %v20415_v58 = vld [vmem:[#allocation33_spill] sm:$0xff]  ;;  %v20419_v1 = vld [vmem:[#allocation35_spill] sm:$0xff]  ;;  %v20421_v26 = vld [vmem:[#allocation36_spill] sm:$0xff] }
 0x611   :  { %20409 = vst [vmem:[#allocation112_spill] sm:$0xff] %v17899_v2  ;;  %v17919_v56 = vadd.f32 %v20415_v58, %v17667_v4  ;;  %v20417_v2 = vld [vmem:[#allocation34_spill] sm:$0xff]  ;;  %v17927_v16 = vadd.f32 %v20419_v1, %v17675_v32  ;;  %v17931_v22 = vadd.f32 %v20421_v26, %v17679_v3  ;;  %v20423_v0 = vld [vmem:[#allocation37_spill] sm:$0xff]  ;;  %v20427_v58 = vld [vmem:[#allocation39_spill] sm:$0xff] }
 0x612   :  { %v17923_v28 = vadd.f32 %v20417_v2, %v20416_v38  ;;  %v17935_v52 = vadd.f32 %v20423_v0, %v17683_v55  ;;  %v20425_v41 = vld [vmem:[#allocation38_spill] sm:$0xff]  ;;  %v17943_v2 = vadd.f32 %v20427_v58, %v17691_v31  ;;  %v20428_v38 = vld [vmem:[#allocation91_spill] sm:$0xff]  ;;  %v20434_v0 = vld [vmem:[#allocation104_spill] sm:$0xff] }
 0x613   :  { %20420 = vst [vmem:[#allocation117_spill] sm:$0xff] %v17927_v16  ;;  %20422 = vst [vmem:[#allocation115_spill] sm:$0xff] %v17931_v22  ;;  %v17939_v4 = vadd.f32 %v20425_v41, %v17687_v5  ;;  %v20430_v1 = vld [vmem:[#allocation95_spill] sm:$0xff]  ;;  %v20431_v16 = vld [vmem:[#allocation41_spill] sm:$0xff] }
 0x614   :  { %20418 = vst [vmem:[#allocation111_spill] sm:$0xff] %v17923_v28  ;;  %20424 = vst [vmem:[#allocation121_spill] sm:$0xff] %v17935_v52  ;;  %v20429_v28 = vld [vmem:[#allocation40_spill] sm:$0xff]  ;;  %v17951_v3 = vadd.f32 %v20431_v16, %v20430_v1  ;;  %v20432_v26 = vld [vmem:[#allocation99_spill] sm:$0xff]  ;;  %v8538_v16 = vmax.f32 %v17723_v36, 0.0  ;;  %v8539_v1 = vmax.f32 %v17727_v48, 0.0 }
 0x615   :  { %20426 = vst [vmem:[#allocation116_spill] sm:$0xff] %v17939_v4  ;;  %v17947_v32 = vadd.f32 %v20429_v28, %v20428_v38  ;;  %v20433_v22 = vld [vmem:[#allocation42_spill] sm:$0xff]  ;;  %v20435_v52 = vld [vmem:[#allocation43_spill] sm:$0xff]  ;;  %v20437_v4 = vld [vmem:[#allocation44_spill] sm:$0xff]  ;;  %v8537_v38 = vmax.f32 %v17719_v7, 0.0  ;;  %v8547_v7 = vmax.f32 %v17759_v35, 0.0 }
 0x616   :  { %v17955_v55 = vadd.f32 %v20433_v22, %v20432_v26  ;;  %v17959_v5 = vadd.f32 %v20435_v52, %v20434_v0  ;;  %v20436_v41 = vld [vmem:[#allocation103_spill] sm:$0xff]  ;;  %v20438_v58 = vld [vmem:[#allocation45_spill] sm:$0xff]  ;;  %v8540_v22 = vmax.f32 %v17731_v27, 0.0  ;;  %v8541_v26 = vmax.f32 %v17735_v15, 0.0  ;;  %8602 = vst [vmem:[#allocation9 + $0x8] sm:$0xff] %v8538_v16  ;;  %8603 = vst [vmem:[#allocation9 + $0x10] sm:$0xff] %v8539_v1 }
 0x617   :  { %v17963_v31 = vadd.f32 %v20437_v4, %v20436_v41  ;;  %v17967_v28 = vadd.f32 %v20438_v58, %v17715_v11  ;;  %v8542_v52 = vmax.f32 %v17739_v6, 0.0  ;;  %v8543_v0 = vmax.f32 %v17743_v50, 0.0  ;;  %8601 = vst [vmem:[#allocation9] sm:$0xff] %v8537_v38  ;;  %8611 = vst [vmem:[#allocation9 + $0x50] sm:$0xff] %v8547_v7 }
 0x618   :  { %v8544_v4 = vmax.f32 %v17747_v60, 0.0  ;;  %v8545_v41 = vmax.f32 %v17751_v46, 0.0  ;;  %v8546_v11 = vmax.f32 %v17755_v18, 0.0  ;;  %v8548_v36 = vmax.f32 %v17763_v25, 0.0  ;;  %8604 = vst [vmem:[#allocation9 + $0x18] sm:$0xff] %v8540_v22  ;;  %8605 = vst [vmem:[#allocation9 + $0x20] sm:$0xff] %v8541_v26 }
 0x619   :  { %v8549_v48 = vmax.f32 %v17767_v61, 0.0  ;;  %v8550_v27 = vmax.f32 %v17771_v13, 0.0  ;;  %v8551_v15 = vmax.f32 %v17775_v19, 0.0  ;;  %8606 = vst [vmem:[#allocation9 + $0x28] sm:$0xff] %v8542_v52  ;;  %8607 = vst [vmem:[#allocation9 + $0x30] sm:$0xff] %v8543_v0  ;;  %v8552_v6 = vmax.f32 %v17779_v30, 0.0 }
 0x61a   :  { %v8553_v50 = vmax.f32 %v17783_v53, 0.0  ;;  %v8554_v60 = vmax.f32 %v17787_v54, 0.0  ;;  %v8555_v46 = vmax.f32 %v17791_v34, 0.0  ;;  %8608 = vst [vmem:[#allocation9 + $0x38] sm:$0xff] %v8544_v4  ;;  %8609 = vst [vmem:[#allocation9 + $0x40] sm:$0xff] %v8545_v41  ;;  %v8556_v18 = vmax.f32 %v17795_v17, 0.0 }
 0x61b   :  { %8610 = vst [vmem:[#allocation9 + $0x48] sm:$0xff] %v8546_v11  ;;  %v8557_v35 = vmax.f32 %v17799_v42, 0.0  ;;  %v8558_v25 = vmax.f32 %v17803_v49, 0.0  ;;  %v8559_v61 = vmax.f32 %v17807_v57, 0.0  ;;  %8612 = vst [vmem:[#allocation9 + $0x58] sm:$0xff] %v8548_v36  ;;  %v8560_v13 = vmax.f32 %v17811_v23, 0.0 }
 0x61c   :  { %8613 = vst [vmem:[#allocation9 + $0x60] sm:$0xff] %v8549_v48  ;;  %8614 = vst [vmem:[#allocation9 + $0x68] sm:$0xff] %v8550_v27  ;;  %v8561_v19 = vmax.f32 %v17815_v9, 0.0  ;;  %v8562_v30 = vmax.f32 %v17819_v12, 0.0  ;;  %v8563_v53 = vmax.f32 %v17823_v37, 0.0  ;;  %v8564_v54 = vmax.f32 %v17827_v39, 0.0 }
 0x61d   :  { %8615 = vst [vmem:[#allocation9 + $0x70] sm:$0xff] %v8551_v15  ;;  %8616 = vst [vmem:[#allocation9 + $0x78] sm:$0xff] %v8552_v6  ;;  %v8565_v34 = vmax.f32 %v17831_v24, 0.0  ;;  %v8566_v17 = vmax.f32 %v17835_v14, 0.0  ;;  %v8567_v42 = vmax.f32 %v17839_v40, 0.0  ;;  %v8568_v49 = vmax.f32 %v17843_v21, 0.0 }
 0x61e   :  { %8617 = vst [vmem:[#allocation9 + $0x80] sm:$0xff] %v8553_v50  ;;  %8618 = vst [vmem:[#allocation9 + $0x88] sm:$0xff] %v8554_v60  ;;  %v8569_v57 = vmax.f32 %v17847_v51, 0.0  ;;  %v8570_v23 = vmax.f32 %v17851_v44, 0.0  ;;  %v8571_v9 = vmax.f32 %v17855_v45, 0.0  ;;  %v8572_v12 = vmax.f32 %v17859_v8, 0.0 }
 0x61f   :  { %8619 = vst [vmem:[#allocation9 + $0x90] sm:$0xff] %v8555_v46  ;;  %8620 = vst [vmem:[#allocation9 + $0x98] sm:$0xff] %v8556_v18  ;;  %v8573_v37 = vmax.f32 %v17863_v63, 0.0  ;;  %v20439_v39 = vld [vmem:[#allocation109_spill] sm:$0xff]  ;;  %v20440_v14 = vld [vmem:[#allocation107_spill] sm:$0xff]  ;;  %v8578_v58 = vmax.f32 %v17883_v29, 0.0 }
 0x620   :  { %8621 = vst [vmem:[#allocation9 + $0xa0] sm:$0xff] %v8557_v35  ;;  %8622 = vst [vmem:[#allocation9 + $0xa8] sm:$0xff] %v8558_v25  ;;  %v8574_v24 = vmax.f32 %v20439_v39, 0.0  ;;  %v8575_v40 = vmax.f32 %v20440_v14, 0.0  ;;  %v20441_v21 = vld [vmem:[#allocation113_spill] sm:$0xff]  ;;  %v20442_v44 = vld [vmem:[#allocation108_spill] sm:$0xff] }
 0x621   :  { %8623 = vst [vmem:[#allocation9 + $0xb0] sm:$0xff] %v8559_v61  ;;  %8624 = vst [vmem:[#allocation9 + $0xb8] sm:$0xff] %v8560_v13  ;;  %v8576_v51 = vmax.f32 %v20441_v21, 0.0  ;;  %v8577_v45 = vmax.f32 %v20442_v44, 0.0  ;;  %v8579_v38 = vmax.f32 %v17887_v33, 0.0  ;;  %v8580_v8 = vmax.f32 %v17891_v43, 0.0 }
 0x622   :  { %8625 = vst [vmem:[#allocation9 + $0xc0] sm:$0xff] %v8561_v19  ;;  %8626 = vst [vmem:[#allocation9 + $0xc8] sm:$0xff] %v8562_v30  ;;  %v8581_v63 = vmax.f32 %v17895_v10, 0.0  ;;  %v20443_v16 = vld [vmem:[#allocation112_spill] sm:$0xff]  ;;  %v8583_v22 = vmax.f32 %v17903_v59, 0.0  ;;  %v8584_v29 = vmax.f32 %v17907_v47, 0.0 }
 0x623   :  { %8627 = vst [vmem:[#allocation9 + $0xd0] sm:$0xff] %v8563_v53  ;;  %8628 = vst [vmem:[#allocation9 + $0xd8] sm:$0xff] %v8564_v54  ;;  %v8582_v1 = vmax.f32 %v20443_v16, 0.0  ;;  %v8585_v33 = vmax.f32 %v17911_v20, 0.0  ;;  %v8586_v26 = vmax.f32 %v17915_v62, 0.0  ;;  %v8587_v52 = vmax.f32 %v17919_v56, 0.0 }
 0x624   :  { %8629 = vst [vmem:[#allocation9 + $0xe0] sm:$0xff] %v8565_v34  ;;  %8630 = vst [vmem:[#allocation9 + $0xe8] sm:$0xff] %v8566_v17  ;;  %v20444_v43 = vld [vmem:[#allocation111_spill] sm:$0xff]  ;;  %v20445_v59 = vld [vmem:[#allocation117_spill] sm:$0xff]  ;;  %v8593_v56 = vmax.f32 %v17943_v2, 0.0  ;;  %v8594_v7 = vmax.f32 %v17947_v32, 0.0 }
 0x625   :  { %8631 = vst [vmem:[#allocation9 + $0xf0] sm:$0xff] %v8567_v42  ;;  %8632 = vst [vmem:[#allocation9 + $0xf8] sm:$0xff] %v8568_v49  ;;  %v8588_v10 = vmax.f32 %v20444_v43, 0.0  ;;  %v8589_v0 = vmax.f32 %v20445_v59, 0.0  ;;  %v20446_v4 = vld [vmem:[#allocation115_spill] sm:$0xff]  ;;  %v20447_v11 = vld [vmem:[#allocation121_spill] sm:$0xff] }
 0x626   :  { %8633 = vst [vmem:[#allocation9 + $0x100] sm:$0xff] %v8569_v57  ;;  %8634 = vst [vmem:[#allocation9 + $0x108] sm:$0xff] %v8570_v23  ;;  %v8590_v41 = vmax.f32 %v20446_v4, 0.0  ;;  %v8591_v47 = vmax.f32 %v20447_v11, 0.0  ;;  %v20448_v20 = vld [vmem:[#allocation116_spill] sm:$0xff]  ;;  %v8595_v36 = vmax.f32 %v17951_v3, 0.0 }
 0x627   :  { %8635 = vst [vmem:[#allocation9 + $0x110] sm:$0xff] %v8571_v9  ;;  %8636 = vst [vmem:[#allocation9 + $0x118] sm:$0xff] %v8572_v12  ;;  %v8592_v62 = vmax.f32 %v20448_v20, 0.0  ;;  %v8596_v48 = vmax.f32 %v17955_v55, 0.0  ;;  %v8597_v27 = vmax.f32 %v17959_v5, 0.0  ;;  %v8599_v15 = vmax.f32 %v17963_v31, 0.0 }
 0x628   :  { %8637 = vst [vmem:[#allocation9 + $0x120] sm:$0xff] %v8573_v37  ;;  %8638 = vst [vmem:[#allocation9 + $0x128] sm:$0xff] %v8574_v24  ;;  %v8600_v6 = vmax.f32 %v17967_v28, 0.0 }
 0x629   :  { %8639 = vst [vmem:[#allocation9 + $0x130] sm:$0xff] %v8575_v40  ;;  %8640 = vst [vmem:[#allocation9 + $0x138] sm:$0xff] %v8576_v51 }
 0x62a   :  { %8641 = vst [vmem:[#allocation9 + $0x140] sm:$0xff] %v8577_v45  ;;  %8642 = vst [vmem:[#allocation9 + $0x148] sm:$0xff] %v8578_v58 }
 0x62b   :  { %8643 = vst [vmem:[#allocation9 + $0x150] sm:$0xff] %v8579_v38  ;;  %8644 = vst [vmem:[#allocation9 + $0x158] sm:$0xff] %v8580_v8 }
 0x62c   :  { %8645 = vst [vmem:[#allocation9 + $0x160] sm:$0xff] %v8581_v63  ;;  %8646 = vst [vmem:[#allocation9 + $0x168] sm:$0xff] %v8582_v1 }
 0x62d   :  { %8647 = vst [vmem:[#allocation9 + $0x170] sm:$0xff] %v8583_v22  ;;  %8648 = vst [vmem:[#allocation9 + $0x178] sm:$0xff] %v8584_v29 }
 0x62e   :  { %8649 = vst [vmem:[#allocation9 + $0x180] sm:$0xff] %v8585_v33  ;;  %8650 = vst [vmem:[#allocation9 + $0x188] sm:$0xff] %v8586_v26 }
 0x62f   :  { %8651 = vst [vmem:[#allocation9 + $0x190] sm:$0xff] %v8587_v52  ;;  %8652 = vst [vmem:[#allocation9 + $0x198] sm:$0xff] %v8588_v10 }
 0x630   :  { %8653 = vst [vmem:[#allocation9 + $0x1a0] sm:$0xff] %v8589_v0  ;;  %8654 = vst [vmem:[#allocation9 + $0x1a8] sm:$0xff] %v8590_v41 }
 0x631   :  { %8655 = vst [vmem:[#allocation9 + $0x1b0] sm:$0xff] %v8591_v47  ;;  %8656 = vst [vmem:[#allocation9 + $0x1b8] sm:$0xff] %v8592_v62 }
 0x632   :  { %8657 = vst [vmem:[#allocation9 + $0x1c0] sm:$0xff] %v8593_v56  ;;  %8658 = vst [vmem:[#allocation9 + $0x1c8] sm:$0xff] %v8594_v7 }
 0x633   :  { %8659 = vst [vmem:[#allocation9 + $0x1d0] sm:$0xff] %v8595_v36  ;;  %8660 = vst [vmem:[#allocation9 + $0x1d8] sm:$0xff] %v8596_v48 }
 0x634   :  { %8661 = vst [vmem:[#allocation9 + $0x1e0] sm:$0xff] %v8597_v27  ;;  %8663 = vst [vmem:[#allocation9 + $0x1f0] sm:$0xff] %v8599_v15 }
 0x635   :  { %8664 = vst [vmem:[#allocation9 + $0x1f8] sm:$0xff] %v8600_v6 }
 0x636   :  { %11453 = shalt.err (!%p11450_p0)
}
 0x637   :  { %s11454_s24 = scalar_lea.hbm %s18054_s7, 8192 }
 0x638   :  { %p11455_p1 = scmp.ne.s32.totalorder %s18054_s7, %s11454_s24  ;;  %p11458_p2 = scmp.lt.u32.totalorder %s11454_s24, %s18054_s7 }
 0x63a   :  { %p11460_p3 = pnand %p11458_p2, %p11455_p1 }
 0x63c   :  { %11463 = shalt.err (!%p11460_p3)
}
 0x63d   :  { %8676 = dma.vmem_to_hbm [thread:$0]  %s8671_s20, 8192, %s18054_s7, [#allocation5], %s11474_s1, %s11474_s1, %s11475_s25  }
 0x63e   :  { %11468 = dma.done.wait [#allocation5], 8192  }
 0x63f   :  { %11469 = vsyncadd [#allocation5], 4294959104 }
 0x640   :  { %8680 = vsyncpa [#allocation4], 1 }
 0x641   :  { %8681 = vsyncpa [#allocation7], 1 }
 0x642   :  { %8682 = vsyncpa [#allocation5], 1 }

</bundles_post_ra>
